<compile_context>
chip_gen: v5e
topology: v5e:2x2
jax: 0.10.0
libtpu: 0.0.40
codegen_flags: <defaults>
</compile_context>

<pallas_src>
import jax
import jax.numpy as jnp
from jax import lax
from jax.experimental import pallas as pl
from jax.experimental.pallas import tpu as pltpu


def _ir_basicblock_kernel(x_ref, halo_ref, w1_ref, b1_ref, w2_ref, b2_ref,
                          sew1_ref, sew2_ref, alpha_ref, o_ref):
    B, H, W, C = x_ref.shape
    Hp, Wp = H + 2, W + 2
    P = b1_ref.shape[-1]

    x = x_ref[...]                                           # (B, H, W, C) f32

    # ---- In-kernel halo pad: interior = x exactly, border = v with BN1(v) == 0 ----
    halo = halo_ref[...].reshape(1, 1, 1, C)                 # per-channel border value
    xz = jnp.pad(x, ((0, 0), (1, 1), (1, 1), (0, 0)))        # zero border
    row = lax.broadcasted_iota(jnp.int32, (1, Hp, Wp, 1), 1)
    col = lax.broadcasted_iota(jnp.int32, (1, Hp, Wp, 1), 2)
    border = (row == 0) | (row == Hp - 1) | (col == 0) | (col == Wp - 1)
    # Cast to bf16 ONCE, before the 9 overlapping tap slices.
    xp = jnp.where(border, halo, xz).astype(jnp.bfloat16)    # (B, Hp, Wp, C)

    # ---- Conv 3x3 #1 (BN1 and BN2 folded): im2col -> single MXU matmul, K = 9*C ----
    taps1 = [xp[:, dy:dy + H, dx:dx + W, :] for dy in range(3) for dx in range(3)]
    col1 = jnp.concatenate(taps1, axis=-1).reshape(B * H * W, 9 * C)
    y1 = jnp.dot(col1, w1_ref[...], preferred_element_type=jnp.float32)
    y1 = y1 + b1_ref[...]                                    # folded BN1/BN2 bias
    a1 = alpha_ref[0]                                        # PReLU (shared scalar alpha)
    y1 = jnp.where(y1 >= 0, y1, a1 * y1)

    # ---- Conv 3x3 #2 (BN3 folded): bf16 zero pad + im2col -> one matmul, K = 9*P ----
    y1p = jnp.pad(y1.astype(jnp.bfloat16).reshape(B, H, W, P),
                  ((0, 0), (1, 1), (1, 1), (0, 0)))          # zeros correct post-PReLU
    taps2 = [y1p[:, dy:dy + H, dx:dx + W, :] for dy in range(3) for dx in range(3)]
    col2 = jnp.concatenate(taps2, axis=-1).reshape(B * H * W, 9 * P)
    y2 = jnp.dot(col2, w2_ref[...], preferred_element_type=jnp.float32)
    y2 = y2 + b2_ref[...]                                    # folded BN3 shift

    # ---- SE block: global avg pool -> 1x1 -> PReLU -> 1x1 -> sigmoid -> scale ----
    y2b = y2.reshape(B, H * W, P)
    pooled = jnp.mean(y2b, axis=1)                           # (B, P)
    s = jnp.dot(pooled, sew1_ref[...], preferred_element_type=jnp.float32)   # (B, 128)
    a2 = alpha_ref[1]
    s = jnp.where(s >= 0, s, a2 * s)
    s = jnp.dot(s, sew2_ref[...], preferred_element_type=jnp.float32)        # (B, P)
    s = jax.nn.sigmoid(s)
    y3 = y2b * s[:, None, :]

    # ---- Residual add (raw x; IR_BasicBlock.forward has no final activation) ----
    o_ref[...] = (y3.reshape(B, H, W, P) + x).astype(o_ref.dtype)


def ir_basicblock_pallas(x, raw_params, images_per_step=2):
    """x: (N, H, W, C) NHWC float32; raw_params as produced by make_params."""
    N, H, W, C = x.shape
    (bn1, w1, bn2, w2, bn3, sew1, sew2, alphas) = raw_params
    P = w1.shape[-1]
    assert C == P, "residual add needs inplanes == planes (stride=1, no downsample)"
    R = sew1.shape[1]
    B = images_per_step
    assert N % B == 0

    s1, t1 = bn1[0], bn1[1]
    s2, t2 = bn2[0], bn2[1]
    s3, t3 = bn3[0], bn3[1]

    # Fold BNs into conv weights / biases (inference, frozen running stats).
    w1_eff = (w1 * s1[None, None, :, None] * s2[None, None, None, :]).reshape(9 * C, P)
    b1_eff = (s2 * jnp.einsum("hwio,i->o", w1, t1) + t2).reshape(1, P)
    w2_eff = (w2 * s3[None, None, None, :]).reshape(9 * P, P)
    b2_eff = t3.reshape(1, P)
    w1_bf = w1_eff.astype(jnp.bfloat16)
    w2_bf = w2_eff.astype(jnp.bfloat16)

    # Per-channel border value v with BN1(v) == 0 (kernel writes it into the halo).
    halo = (-(t1 / s1)).reshape(1, C)

    # Lane-dense SE weights: zero-pad the reduced dim R up to 128 lanes.
    # PReLU(0) = 0 and the zero rows of sew2 contribute nothing -> identical math.
    Rp = 128
    sew1_p = jnp.zeros((P, Rp), jnp.float32).at[:, :R].set(sew1)
    sew2_p = jnp.zeros((Rp, P), jnp.float32).at[:R, :].set(sew2)

    flops = int(N * H * W * 2 * (9 * C * P + 9 * P * P) + N * 2 * (P * Rp + Rp * P))
    bytes_accessed = int(x.size * 4 + N * H * W * P * 4 + w1_bf.size * 2
                         + w2_bf.size * 2 + (sew1_p.size + sew2_p.size + 3 * P + 2) * 4)

    grid_spec = pltpu.PrefetchScalarGridSpec(
        num_scalar_prefetch=0,
        grid=(N // B,),
        in_specs=[
            pl.BlockSpec((B, H, W, C), lambda n: (n, 0, 0, 0)),     # unpadded x
            pl.BlockSpec((1, C), lambda n: (0, 0)),                 # halo value
            pl.BlockSpec((9 * C, P), lambda n: (0, 0)),             # conv1 (folded, bf16)
            pl.BlockSpec((1, P), lambda n: (0, 0)),                 # bias1 (f32)
            pl.BlockSpec((9 * P, P), lambda n: (0, 0)),             # conv2 (folded, bf16)
            pl.BlockSpec((1, P), lambda n: (0, 0)),                 # bias2 (f32)
            pl.BlockSpec((P, Rp), lambda n: (0, 0)),                # SE fc1 (padded)
            pl.BlockSpec((Rp, P), lambda n: (0, 0)),                # SE fc2 (padded)
            pl.BlockSpec(memory_space=pltpu.MemorySpace.SMEM),      # PReLU alphas
        ],
        out_specs=pl.BlockSpec((B, H, W, P), lambda n: (n, 0, 0, 0)),
    )

    return pl.pallas_call(
        _ir_basicblock_kernel,
        out_shape=jax.ShapeDtypeStruct((N, H, W, P), jnp.float32),
        grid_spec=grid_spec,
        compiler_params=pltpu.CompilerParams(
            dimension_semantics=("parallel",)),
        cost_estimate=pl.CostEstimate(flops=flops, transcendentals=int(N * P),
                                      bytes_accessed=bytes_accessed),
    )(x, halo, w1_bf, b1_eff, w2_bf, b2_eff, sew1_p, sew2_p, alphas)


def _conv3x3(y, w):
    return lax.conv_general_dilated(
        y, w, window_strides=(1, 1), padding=((1, 1), (1, 1)),
        dimension_numbers=("NHWC", "HWIO", "NHWC"))


def ir_basicblock_reference(x, raw_params):
    """Pure-JAX (f32) reference with the PyTorch module's exact forward semantics."""
    (bn1, w1, bn2, w2, bn3, sew1, sew2, alphas) = raw_params
    y = x * bn1[0] + bn1[1]
    y = _conv3x3(y, w1)
    y = y * bn2[0] + bn2[1]
    y = jnp.where(y >= 0, y, alphas[0] * y)
    y = _conv3x3(y, w2)
    y = y * bn3[0] + bn3[1]
    pooled = jnp.mean(y, axis=(1, 2))                        # (N, P)
    s = pooled @ sew1                                        # 1x1 conv, bias=False
    s = jnp.where(s >= 0, s, alphas[1] * s)
    s = jax.nn.sigmoid(s @ sew2)                             # 1x1 conv, bias=False
    y = y * s[:, None, None, :]
    return y + x


def make_params(key, planes, reduction=16):
    C = planes
    R = max(C // reduction, 1)
    eps = 2e-5

    def bn_params(k, c):
        kg, kb, km, kv = jax.random.split(k, 4)
        gamma = jax.random.uniform(kg, (c,), jnp.float32, 0.5, 1.5)
        beta = 0.1 * jax.random.normal(kb, (c,), jnp.float32)
        mean = 0.1 * jax.random.normal(km, (c,), jnp.float32)
        var = jax.random.uniform(kv, (c,), jnp.float32, 0.5, 1.5)
        scale = gamma / jnp.sqrt(var + eps)
        shift = beta - mean * scale
        return jnp.stack([scale, shift], axis=0)             # (2, c)

    keys = jax.random.split(key, 7)
    bn1 = bn_params(keys[0], C)
    w1 = 0.05 * jax.random.normal(keys[1], (3, 3, C, C), jnp.float32)   # HWIO
    bn2 = bn_params(keys[2], C)
    w2 = 0.05 * jax.random.normal(keys[3], (3, 3, C, C), jnp.float32)   # HWIO
    bn3 = bn_params(keys[4], C)
    sew1 = 0.1 * jax.random.normal(keys[5], (C, R), jnp.float32)
    sew2 = 0.1 * jax.random.normal(keys[6], (R, C), jnp.float32)
    alphas = jnp.array([0.25, 0.25], jnp.float32)            # nn.PReLU() default init
    return (bn1, w1, bn2, w2, bn3, sew1, sew2, alphas)


if __name__ == "__main__":
    # inplanes == planes, stride=1, downsample=None (required for the residual add);
    # C=128 keeps channels lane-dense; N=4 with 2 images/step -> grid=(2,) "parallel".
    N, H, W = 4, 16, 16
    planes = 128

    key = jax.random.PRNGKey(0)
    kx, kp = jax.random.split(key)
    x = jax.random.normal(kx, (N, H, W, planes), jnp.float32)
    params = make_params(kp, planes)

    out = jax.block_until_ready(ir_basicblock_pallas(x, params))
    ref = jax.block_until_ready(ir_basicblock_reference(x, params))

    assert out.shape == ref.shape == (N, H, W, planes)
    max_err = float(jnp.max(jnp.abs(out - ref)))
    # bf16 matmul inputs (K=1152, two cascaded convs) with f32 accumulation.
    tol = 1.5e-2 * (float(jnp.max(jnp.abs(ref))) + 1.0)
    assert max_err <= tol, (max_err, tol)
    print("KERNEL_OK")
</pallas_src>

<mosaic_0001>
module attributes {stable_mosaic.version = 11 : i64} {
  func.func @_ir_basicblock_kernel(%arg0: i32, %arg1: memref<2x16x16x128xf32, #tpu.memory_space<vmem>>, %arg2: memref<1x128xf32, #tpu.memory_space<vmem>>, %arg3: memref<1152x128xbf16, #tpu.memory_space<vmem>>, %arg4: memref<1x128xf32, #tpu.memory_space<vmem>>, %arg5: memref<1152x128xbf16, #tpu.memory_space<vmem>>, %arg6: memref<1x128xf32, #tpu.memory_space<vmem>>, %arg7: memref<128x128xf32, #tpu.memory_space<vmem>>, %arg8: memref<128x128xf32, #tpu.memory_space<vmem>>, %arg9: memref<2xf32, #tpu.memory_space<smem>>, %arg10: memref<2x16x16x128xf32, #tpu.memory_space<vmem>>) attributes {dimension_semantics = [#tpu.dimension_semantics<parallel>], iteration_bounds = array<i64: 2>, scalar_prefetch = 0 : i64, scratch_operands = 0 : i64, tpu.core_type = #tpu.core_type<tc>, window_params = [{transform_indices = @transform_0, window_bounds = array<i64: 2, 16, 16, 128>}, {pipeline_mode = #tpu.pipeline_mode<synchronous>, transform_indices = @transform_1, window_bounds = array<i64: 1, 128>}, {pipeline_mode = #tpu.pipeline_mode<synchronous>, transform_indices = @transform_2, window_bounds = array<i64: 1152, 128>}, {pipeline_mode = #tpu.pipeline_mode<synchronous>, transform_indices = @transform_3, window_bounds = array<i64: 1, 128>}, {pipeline_mode = #tpu.pipeline_mode<synchronous>, transform_indices = @transform_4, window_bounds = array<i64: 1152, 128>}, {pipeline_mode = #tpu.pipeline_mode<synchronous>, transform_indices = @transform_5, window_bounds = array<i64: 1, 128>}, {pipeline_mode = #tpu.pipeline_mode<synchronous>, transform_indices = @transform_6, window_bounds = array<i64: 128, 128>}, {pipeline_mode = #tpu.pipeline_mode<synchronous>, transform_indices = @transform_7, window_bounds = array<i64: 128, 128>}, {transform_indices = @transform_8, window_bounds = array<i64: 2>}, {transform_indices = @transform_9, window_bounds = array<i64: 2, 16, 16, 128>}]} {
    %c0 = arith.constant 0 : index
    %c0_0 = arith.constant 0 : index
    %c0_1 = arith.constant 0 : index
    %c0_2 = arith.constant 0 : index
    %0 = vector.load %arg1[%c0, %c0_0, %c0_1, %c0_2] : memref<2x16x16x128xf32, #tpu.memory_space<vmem>>, vector<2x16x16x128xf32>
    %c0_3 = arith.constant 0 : index
    %c0_4 = arith.constant 0 : index
    %1 = vector.load %arg2[%c0_3, %c0_4] : memref<1x128xf32, #tpu.memory_space<vmem>>, vector<1x128xf32>
    %2 = vector.shape_cast %1 : vector<1x128xf32> to vector<1x1x1x128xf32>
    %c0_i32 = arith.constant 0 : i32
    %3 = arith.sitofp %c0_i32 : i32 to f32
    %4 = vector.broadcast %3 : f32 to vector<2x1x16x128xf32>
    %5 = tpu.concatenate %4, %0 in 1 : vector<2x1x16x128xf32>, vector<2x16x16x128xf32> -> vector<2x17x16x128xf32>
    %6 = vector.broadcast %3 : f32 to vector<2x1x16x128xf32>
    %7 = tpu.concatenate %5, %6 in 1 : vector<2x17x16x128xf32>, vector<2x1x16x128xf32> -> vector<2x18x16x128xf32>
    %8 = vector.broadcast %3 : f32 to vector<2x18x1x128xf32>
    %9 = tpu.concatenate %8, %7 in 2 : vector<2x18x1x128xf32>, vector<2x18x16x128xf32> -> vector<2x18x17x128xf32>
    %10 = vector.broadcast %3 : f32 to vector<2x18x1x128xf32>
    %11 = tpu.concatenate %9, %10 in 2 : vector<2x18x17x128xf32>, vector<2x18x1x128xf32> -> vector<2x18x18x128xf32>
    %12 = tpu.iota {dimensions = array<i32: 1>} : vector<1x18x18x1xi32>
    %13 = tpu.iota {dimensions = array<i32: 2>} : vector<1x18x18x1xi32>
    %c0_i32_5 = arith.constant 0 : i32
    %14 = vector.broadcast %c0_i32_5 : i32 to vector<1x18x18x1xi32>
    %15 = arith.cmpi eq, %12, %14 : vector<1x18x18x1xi32>
    %c17_i32 = arith.constant 17 : i32
    %16 = vector.broadcast %c17_i32 : i32 to vector<1x18x18x1xi32>
    %17 = arith.cmpi eq, %12, %16 : vector<1x18x18x1xi32>
    %18 = arith.ori %15, %17 : vector<1x18x18x1xi1>
    %c0_i32_6 = arith.constant 0 : i32
    %19 = vector.broadcast %c0_i32_6 : i32 to vector<1x18x18x1xi32>
    %20 = arith.cmpi eq, %13, %19 : vector<1x18x18x1xi32>
    %21 = arith.ori %18, %20 : vector<1x18x18x1xi1>
    %c17_i32_7 = arith.constant 17 : i32
    %22 = vector.broadcast %c17_i32_7 : i32 to vector<1x18x18x1xi32>
    %23 = arith.cmpi eq, %13, %22 : vector<1x18x18x1xi32>
    %24 = arith.ori %21, %23 : vector<1x18x18x1xi1>
    %25 = vector.shape_cast %24 : vector<1x18x18x1xi1> to vector<1x18x18x1xi1>
    %26 = vector.broadcast %25 : vector<1x18x18x1xi1> to vector<2x18x18x128xi1>
    %27 = vector.shape_cast %2 : vector<1x1x1x128xf32> to vector<1x1x1x128xf32>
    %28 = vector.broadcast %27 : vector<1x1x1x128xf32> to vector<2x18x18x128xf32>
    %29 = arith.select %26, %28, %11 : vector<2x18x18x128xi1>, vector<2x18x18x128xf32>
    %30 = arith.truncf %29 : vector<2x18x18x128xf32> to vector<2x18x18x128xbf16>
    %31 = vector.extract_strided_slice %30 {offsets = [0, 0, 0, 0], sizes = [2, 16, 16, 128], strides = [1, 1, 1, 1]} : vector<2x18x18x128xbf16> to vector<2x16x16x128xbf16>
    %32 = vector.extract_strided_slice %30 {offsets = [0, 0, 1, 0], sizes = [2, 16, 16, 128], strides = [1, 1, 1, 1]} : vector<2x18x18x128xbf16> to vector<2x16x16x128xbf16>
    %33 = vector.extract_strided_slice %30 {offsets = [0, 0, 2, 0], sizes = [2, 16, 16, 128], strides = [1, 1, 1, 1]} : vector<2x18x18x128xbf16> to vector<2x16x16x128xbf16>
    %34 = vector.extract_strided_slice %30 {offsets = [0, 1, 0, 0], sizes = [2, 16, 16, 128], strides = [1, 1, 1, 1]} : vector<2x18x18x128xbf16> to vector<2x16x16x128xbf16>
    %35 = vector.extract_strided_slice %30 {offsets = [0, 1, 1, 0], sizes = [2, 16, 16, 128], strides = [1, 1, 1, 1]} : vector<2x18x18x128xbf16> to vector<2x16x16x128xbf16>
    %36 = vector.extract_strided_slice %30 {offsets = [0, 1, 2, 0], sizes = [2, 16, 16, 128], strides = [1, 1, 1, 1]} : vector<2x18x18x128xbf16> to vector<2x16x16x128xbf16>
    %37 = vector.extract_strided_slice %30 {offsets = [0, 2, 0, 0], sizes = [2, 16, 16, 128], strides = [1, 1, 1, 1]} : vector<2x18x18x128xbf16> to vector<2x16x16x128xbf16>
    %38 = vector.extract_strided_slice %30 {offsets = [0, 2, 1, 0], sizes = [2, 16, 16, 128], strides = [1, 1, 1, 1]} : vector<2x18x18x128xbf16> to vector<2x16x16x128xbf16>
    %39 = vector.extract_strided_slice %30 {offsets = [0, 2, 2, 0], sizes = [2, 16, 16, 128], strides = [1, 1, 1, 1]} : vector<2x18x18x128xbf16> to vector<2x16x16x128xbf16>
    %40 = tpu.concatenate %31, %32, %33, %34, %35, %36, %37, %38, %39 in 3 : vector<2x16x16x128xbf16>, vector<2x16x16x128xbf16>, vector<2x16x16x128xbf16>, vector<2x16x16x128xbf16>, vector<2x16x16x128xbf16>, vector<2x16x16x128xbf16>, vector<2x16x16x128xbf16>, vector<2x16x16x128xbf16>, vector<2x16x16x128xbf16> -> vector<2x16x16x1152xbf16>
    %41 = vector.shape_cast %40 : vector<2x16x16x1152xbf16> to vector<512x1152xbf16>
    %c0_8 = arith.constant 0 : index
    %c0_9 = arith.constant 0 : index
    %42 = vector.load %arg3[%c0_8, %c0_9] : memref<1152x128xbf16, #tpu.memory_space<vmem>>, vector<1152x128xbf16>
    %cst = arith.constant dense<0.000000e+00> : vector<512x128xf32>
    %43 = tpu.matmul %41, %42, %cst {dimension_numbers = #tpu.dot_dimension_numbers<[1], [0], [0], [1], [0, 0, 1, 1], [], []>} : vector<512x1152xbf16>, vector<1152x128xbf16>, vector<512x128xf32> -> vector<512x128xf32>
    %c0_10 = arith.constant 0 : index
    %c0_11 = arith.constant 0 : index
    %44 = vector.load %arg4[%c0_10, %c0_11] : memref<1x128xf32, #tpu.memory_space<vmem>>, vector<1x128xf32>
    %45 = vector.broadcast %44 : vector<1x128xf32> to vector<512x128xf32>
    %46 = arith.addf %43, %45 : vector<512x128xf32>
    %c0_12 = arith.constant 0 : index
    %47 = memref.load %arg9[%c0_12] : memref<2xf32, #tpu.memory_space<smem>>
    %cst_13 = arith.constant 0.000000e+00 : f32
    %48 = vector.broadcast %cst_13 : f32 to vector<512x128xf32>
    %49 = arith.cmpf oge, %46, %48 : vector<512x128xf32>
    %50 = vector.broadcast %47 : f32 to vector<512x128xf32>
    %51 = arith.mulf %50, %46 : vector<512x128xf32>
    %52 = arith.select %49, %46, %51 : vector<512x128xi1>, vector<512x128xf32>
    %53 = arith.truncf %52 : vector<512x128xf32> to vector<512x128xbf16>
    %54 = vector.shape_cast %53 : vector<512x128xbf16> to vector<2x16x16x128xbf16>
    %c0_i32_14 = arith.constant 0 : i32
    %55 = arith.sitofp %c0_i32_14 : i32 to bf16
    %56 = vector.broadcast %55 : bf16 to vector<2x1x16x128xbf16>
    %57 = tpu.concatenate %56, %54 in 1 : vector<2x1x16x128xbf16>, vector<2x16x16x128xbf16> -> vector<2x17x16x128xbf16>
    %58 = vector.broadcast %55 : bf16 to vector<2x1x16x128xbf16>
    %59 = tpu.concatenate %57, %58 in 1 : vector<2x17x16x128xbf16>, vector<2x1x16x128xbf16> -> vector<2x18x16x128xbf16>
    %60 = vector.broadcast %55 : bf16 to vector<2x18x1x128xbf16>
    %61 = tpu.concatenate %60, %59 in 2 : vector<2x18x1x128xbf16>, vector<2x18x16x128xbf16> -> vector<2x18x17x128xbf16>
    %62 = vector.broadcast %55 : bf16 to vector<2x18x1x128xbf16>
    %63 = tpu.concatenate %61, %62 in 2 : vector<2x18x17x128xbf16>, vector<2x18x1x128xbf16> -> vector<2x18x18x128xbf16>
    %64 = vector.extract_strided_slice %63 {offsets = [0, 0, 0, 0], sizes = [2, 16, 16, 128], strides = [1, 1, 1, 1]} : vector<2x18x18x128xbf16> to vector<2x16x16x128xbf16>
    %65 = vector.extract_strided_slice %63 {offsets = [0, 0, 1, 0], sizes = [2, 16, 16, 128], strides = [1, 1, 1, 1]} : vector<2x18x18x128xbf16> to vector<2x16x16x128xbf16>
    %66 = vector.extract_strided_slice %63 {offsets = [0, 0, 2, 0], sizes = [2, 16, 16, 128], strides = [1, 1, 1, 1]} : vector<2x18x18x128xbf16> to vector<2x16x16x128xbf16>
    %67 = vector.extract_strided_slice %63 {offsets = [0, 1, 0, 0], sizes = [2, 16, 16, 128], strides = [1, 1, 1, 1]} : vector<2x18x18x128xbf16> to vector<2x16x16x128xbf16>
    %68 = vector.extract_strided_slice %63 {offsets = [0, 1, 1, 0], sizes = [2, 16, 16, 128], strides = [1, 1, 1, 1]} : vector<2x18x18x128xbf16> to vector<2x16x16x128xbf16>
    %69 = vector.extract_strided_slice %63 {offsets = [0, 1, 2, 0], sizes = [2, 16, 16, 128], strides = [1, 1, 1, 1]} : vector<2x18x18x128xbf16> to vector<2x16x16x128xbf16>
    %70 = vector.extract_strided_slice %63 {offsets = [0, 2, 0, 0], sizes = [2, 16, 16, 128], strides = [1, 1, 1, 1]} : vector<2x18x18x128xbf16> to vector<2x16x16x128xbf16>
    %71 = vector.extract_strided_slice %63 {offsets = [0, 2, 1, 0], sizes = [2, 16, 16, 128], strides = [1, 1, 1, 1]} : vector<2x18x18x128xbf16> to vector<2x16x16x128xbf16>
    %72 = vector.extract_strided_slice %63 {offsets = [0, 2, 2, 0], sizes = [2, 16, 16, 128], strides = [1, 1, 1, 1]} : vector<2x18x18x128xbf16> to vector<2x16x16x128xbf16>
    %73 = tpu.concatenate %64, %65, %66, %67, %68, %69, %70, %71, %72 in 3 : vector<2x16x16x128xbf16>, vector<2x16x16x128xbf16>, vector<2x16x16x128xbf16>, vector<2x16x16x128xbf16>, vector<2x16x16x128xbf16>, vector<2x16x16x128xbf16>, vector<2x16x16x128xbf16>, vector<2x16x16x128xbf16>, vector<2x16x16x128xbf16> -> vector<2x16x16x1152xbf16>
    %74 = vector.shape_cast %73 : vector<2x16x16x1152xbf16> to vector<512x1152xbf16>
    %c0_15 = arith.constant 0 : index
    %c0_16 = arith.constant 0 : index
    %75 = vector.load %arg5[%c0_15, %c0_16] : memref<1152x128xbf16, #tpu.memory_space<vmem>>, vector<1152x128xbf16>
    %cst_17 = arith.constant dense<0.000000e+00> : vector<512x128xf32>
    %76 = tpu.matmul %74, %75, %cst_17 {dimension_numbers = #tpu.dot_dimension_numbers<[1], [0], [0], [1], [0, 0, 1, 1], [], []>} : vector<512x1152xbf16>, vector<1152x128xbf16>, vector<512x128xf32> -> vector<512x128xf32>
    %c0_18 = arith.constant 0 : index
    %c0_19 = arith.constant 0 : index
    %77 = vector.load %arg6[%c0_18, %c0_19] : memref<1x128xf32, #tpu.memory_space<vmem>>, vector<1x128xf32>
    %78 = vector.broadcast %77 : vector<1x128xf32> to vector<512x128xf32>
    %79 = arith.addf %76, %78 : vector<512x128xf32>
    %80 = vector.shape_cast %79 : vector<512x128xf32> to vector<2x256x128xf32>
    %cst_20 = arith.constant dense<0.000000e+00> : vector<2x128xf32>
    %81 = vector.multi_reduction <add>, %80, %cst_20 [1] : vector<2x256x128xf32> to vector<2x128xf32>
    %cst_21 = arith.constant 2.560000e+02 : f32
    %82 = vector.broadcast %cst_21 : f32 to vector<2x128xf32>
    %83 = arith.divf %81, %82 : vector<2x128xf32>
    %c0_22 = arith.constant 0 : index
    %c0_23 = arith.constant 0 : index
    %84 = vector.load %arg7[%c0_22, %c0_23] : memref<128x128xf32, #tpu.memory_space<vmem>>, vector<128x128xf32>
    %cst_24 = arith.constant dense<0.000000e+00> : vector<2x128xf32>
    %85 = tpu.matmul %83, %84, %cst_24 {dimension_numbers = #tpu.dot_dimension_numbers<[1], [0], [0], [1], [0, 0, 1, 1], [], []>} : vector<2x128xf32>, vector<128x128xf32>, vector<2x128xf32> -> vector<2x128xf32>
    %c1 = arith.constant 1 : index
    %86 = memref.load %arg9[%c1] : memref<2xf32, #tpu.memory_space<smem>>
    %cst_25 = arith.constant 0.000000e+00 : f32
    %87 = vector.broadcast %cst_25 : f32 to vector<2x128xf32>
    %88 = arith.cmpf oge, %85, %87 : vector<2x128xf32>
    %89 = vector.broadcast %86 : f32 to vector<2x128xf32>
    %90 = arith.mulf %89, %85 : vector<2x128xf32>
    %91 = arith.select %88, %85, %90 : vector<2x128xi1>, vector<2x128xf32>
    %c0_26 = arith.constant 0 : index
    %c0_27 = arith.constant 0 : index
    %92 = vector.load %arg8[%c0_26, %c0_27] : memref<128x128xf32, #tpu.memory_space<vmem>>, vector<128x128xf32>
    %cst_28 = arith.constant dense<0.000000e+00> : vector<2x128xf32>
    %93 = tpu.matmul %91, %92, %cst_28 {dimension_numbers = #tpu.dot_dimension_numbers<[1], [0], [0], [1], [0, 0, 1, 1], [], []>} : vector<2x128xf32>, vector<128x128xf32>, vector<2x128xf32> -> vector<2x128xf32>
    %94 = arith.negf %93 : vector<2x128xf32>
    %95 = math.exp %94 : vector<2x128xf32>
    %cst_29 = arith.constant 1.000000e+00 : f32
    %96 = vector.broadcast %cst_29 : f32 to vector<2x128xf32>
    %97 = arith.addf %96, %95 : vector<2x128xf32>
    %98 = arith.divf %96, %97 : vector<2x128xf32>
    %99 = vector.shape_cast %98 : vector<2x128xf32> to vector<2x1x128xf32>
    %100 = vector.broadcast %99 : vector<2x1x128xf32> to vector<2x256x128xf32>
    %101 = arith.mulf %80, %100 : vector<2x256x128xf32>
    %102 = vector.shape_cast %101 : vector<2x256x128xf32> to vector<2x16x16x128xf32>
    %103 = arith.addf %102, %0 : vector<2x16x16x128xf32>
    %c0_30 = arith.constant 0 : index
    %c0_31 = arith.constant 0 : index
    %c0_32 = arith.constant 0 : index
    %c0_33 = arith.constant 0 : index
    %104 = vector.load %arg10[%c0_30, %c0_31, %c0_32, %c0_33] : memref<2x16x16x128xf32, #tpu.memory_space<vmem>>, vector<2x16x16x128xf32>
    tpu.vector_store %arg10[%c0_30, %c0_31, %c0_32, %c0_33], %103 {strides = array<i32>} : memref<2x16x16x128xf32, #tpu.memory_space<vmem>>, vector<2x16x16x128xf32>,
    return
  }
  func.func @transform_0(%arg0: i32) -> (i32, i32, i32, i32) {
    %c0_i32 = arith.constant 0 : i32
    %c0_i32_0 = arith.constant 0 : i32
    %c0_i32_1 = arith.constant 0 : i32
    %c0_i32_2 = arith.constant 0 : i32
    return %arg0, %c0_i32, %c0_i32_0, %c0_i32_1 : i32, i32, i32, i32
  }
  func.func @transform_1(%arg0: i32) -> (i32, i32) {
    %c0_i32 = arith.constant 0 : i32
    %c0_i32_0 = arith.constant 0 : i32
    %c0_i32_1 = arith.constant 0 : i32
    return %c0_i32, %c0_i32_0 : i32, i32
  }
  func.func @transform_2(%arg0: i32) -> (i32, i32) {
    %c0_i32 = arith.constant 0 : i32
    %c0_i32_0 = arith.constant 0 : i32
    %c0_i32_1 = arith.constant 0 : i32
    return %c0_i32, %c0_i32_0 : i32, i32
  }
  func.func @transform_3(%arg0: i32) -> (i32, i32) {
    %c0_i32 = arith.constant 0 : i32
    %c0_i32_0 = arith.constant 0 : i32
    %c0_i32_1 = arith.constant 0 : i32
    return %c0_i32, %c0_i32_0 : i32, i32
  }
  func.func @transform_4(%arg0: i32) -> (i32, i32) {
    %c0_i32 = arith.constant 0 : i32
    %c0_i32_0 = arith.constant 0 : i32
    %c0_i32_1 = arith.constant 0 : i32
    return %c0_i32, %c0_i32_0 : i32, i32
  }
  func.func @transform_5(%arg0: i32) -> (i32, i32) {
    %c0_i32 = arith.constant 0 : i32
    %c0_i32_0 = arith.constant 0 : i32
    %c0_i32_1 = arith.constant 0 : i32
    return %c0_i32, %c0_i32_0 : i32, i32
  }
  func.func @transform_6(%arg0: i32) -> (i32, i32) {
    %c0_i32 = arith.constant 0 : i32
    %c0_i32_0 = arith.constant 0 : i32
    %c0_i32_1 = arith.constant 0 : i32
    return %c0_i32, %c0_i32_0 : i32, i32
  }
  func.func @transform_7(%arg0: i32) -> (i32, i32) {
    %c0_i32 = arith.constant 0 : i32
    %c0_i32_0 = arith.constant 0 : i32
    %c0_i32_1 = arith.constant 0 : i32
    return %c0_i32, %c0_i32_0 : i32, i32
  }
  func.func @transform_8(%arg0: i32) -> i32 {
    %c0_i32 = arith.constant 0 : i32
    %c0_i32_0 = arith.constant 0 : i32
    return %c0_i32 : i32
  }
  func.func @transform_9(%arg0: i32) -> (i32, i32, i32, i32) {
    %c0_i32 = arith.constant 0 : i32
    %c0_i32_0 = arith.constant 0 : i32
    %c0_i32_1 = arith.constant 0 : i32
    %c0_i32_2 = arith.constant 0 : i32
    return %arg0, %c0_i32, %c0_i32_0, %c0_i32_1 : i32, i32, i32, i32
  }
}

</mosaic_0001>

<bundles_post_ra>
// kernel: tpu_custom_call.1
= control target key start
LH: loop header
LB: loop body
LE: loop exit
PB: predicated region body
PF: predicated region fallthrough
CT: control target
= control target key end

     0   :  { %s13662_s0 = inlined_call_operand.hbm [shape: f32[4,16,16,128], index: 0, kind: input, shape index: {}]   ;;  %s13663_s1 = inlined_call_operand.hbm [shape: f32[1,128], index: 1, kind: input, shape index: {}]   ;;  %s13664_s2 = inlined_call_operand.hbm [shape: bf16[1152,128], index: 2, kind: input, shape index: {}]   ;;  %s13665_s3 = inlined_call_operand.vmem [shape: f32[1,128], index: 3, kind: input, shape index: {}]   ;;  %s13666_s4 = inlined_call_operand.hbm [shape: bf16[1152,128], index: 4, kind: input, shape index: {}]   ;;  %s13667_s5 = inlined_call_operand.vmem [shape: f32[1,128], index: 5, kind: input, shape index: {}]   ;;  %s13668_s6 = inlined_call_operand.hbm [shape: f32[128,128], index: 6, kind: input, shape index: {}]   ;;  %s13669_s7 = inlined_call_operand.hbm [shape: f32[128,128], index: 7, kind: input, shape index: {}]   ;;  %s13670_s8 = inlined_call_operand.vmem [shape: f32[2], index: 8, kind: input, shape index: {}]   ;;  %s13671_s9 = inlined_call_operand.hbm [shape: f32[4,16,16,128], index: 9, kind: output, shape index: {}]  }
   0x1   :  { %14031 = sst [smem:[#allocation147_spill]] %s13663_s1 }
   0x2   :  { %14032 = sst [smem:[#allocation148_spill]] %s13664_s2 }
   0x3   :  { %14033 = sst [smem:[#allocation149_spill]] %s13666_s4 }
   0x4   :  { %14034 = sst [smem:[#allocation150_spill]] %s13668_s6 }
   0x5   :  { %14 = vsyncpa [#allocation3], 0 }
   0x6   :  { %16 = vsyncpa [#allocation3 + $0x1], 0 }
   0x7   :  { %17 = vsyncpa [#allocation7], 0 }
   0x8   :  { %18 = vsyncpa [#allocation10], 0 }
   0x9   :  { %19 = vsyncpa [#allocation13], 0 }
   0xa   :  { %20 = vsyncpa [#allocation5], 0 }
   0xb   :  { %21 = vsyncpa [#allocation4], 0 }
   0xc   :  { %23 = vsyncpa [#allocation4 + $0x1], 0  ;;  %s9391_s30 = smov 0   ;;  %s9393_s10 = smov 0  }
   0xd   :  { %s9395_s11 = smov 0   ;;  %s9397_s12 = smov 0  }
   0xe LB: > { %s14035_s1 = sld [smem:[#allocation147_spill]]  ;;  %s9415_s16 = sadd.s32 4294967295, %s9325_s12   ;;  %s9325_s12 = sphi %s9397_s12, %s15018_s12   ;;  %s9321_s11 = sphi %s9395_s11, %s15017_s11   ;;  %s9317_s10 = sphi %s9393_s10, %s15016_s10   ;;  %s9313_s30 = sphi %s9391_s30, %s15015_s30  }
   0xf   : > { %p8086_p0 = scmp.ge.s32.totalorder %s9325_s12, 1  ;;  %p50_p1 = scmp.eq.s32.totalorder %s9415_s16, 0 }
  0x10   : > { %p254_p2 = scmp.lt.s32.totalorder %s9325_s12, 3  ;;  %s9327_s18 = smov [#allocation6]  }
  0x11   : > { %s268_s19 = sshll.u32 %s9327_s18, 4  ;;  %s14037_s4 = sld [smem:[#allocation149_spill]]  ;;  %s269_s19 = int_to_ptr.vmem [resolvable:$true] %s268_s19 }
  0x12   : > { %p9420_p3 = pnand %p8086_p0, %p254_p2  ;;  %s14039_s2 = sld [smem:[#allocation148_spill]] }
  0x13   : > { %s9328_s27 = smov [#allocation9]   ;;  %s9329_s29 = smov 64  }
  0x14   : > { %s266_s15 = sshll.u32 %s14035_s1, 4  ;;  %p8883_p5 = pneg %p9420_p3  ;;  %s267_s15 = int_to_ptr.hbm [resolvable:$true] %s266_s15 }
  0x15   : > { %s296_s28 = sshll.u32 %s9328_s27, 4  ;;  %s9330_s13 = smov 4   ;;  %s297_s28 = int_to_ptr.vmem [resolvable:$true] %s296_s28 }
  0x16   : > { %p9432_p6 = pnand %p8883_p5, %p50_p1  ;;  %s14040_s6 = sld [smem:[#allocation150_spill]] }
  0x17   : > { %s294_s22 = sshll.u32 %s14037_s4, 4  ;;  %s9331_s21 = smov [#allocation8]   ;;  %s295_s22 = int_to_ptr.hbm [resolvable:$true] %s294_s22 }
  0x18   : > { %s277_s26 = sshll.u32 %s14039_s2, 4  ;;  %s279_s1 = sshll.u32 %s9331_s21, 4  ;;  %s278_s26 = int_to_ptr.hbm [resolvable:$true] %s277_s26  ;;  %s280_s1 = int_to_ptr.vmem [resolvable:$true] %s279_s1 }
  0x19   : > { %8886 = dma.hbm_to_vmem [thread:$0]  (!%p9432_p6), %s267_s15, 16, %s269_s19, [#allocation7]  }
  0x1a   : > { %8892 = dma.hbm_to_vmem [thread:$0]  (!%p9432_p6), %s295_s22, 9216, %s297_s28, [#allocation10], %s9329_s29, %s9329_s29, %s9330_s13  }
  0x1b   : > { %8889 = dma.hbm_to_vmem [thread:$0]  (!%p9432_p6), %s278_s26, 9216, %s280_s1, [#allocation7], %s9329_s29, %s9329_s29, %s9330_s13  }
  0x1c   : > { %s311_s20 = sshll.u32 %s14040_s6, 4  ;;  %s9332_s15 = smov [#allocation11]   ;;  %s312_s20 = int_to_ptr.hbm [resolvable:$true] %s311_s20 }
  0x1d   : > { %s313_s19 = sshll.u32 %s9332_s15, 4  ;;  %s13672_s24 = smov 128   ;;  %s314_s19 = int_to_ptr.vmem [resolvable:$true] %s313_s19 }
  0x1e   : > { %s13673_s22 = smov 8   ;;  %s325_s1 = sshll.u32 %s13669_s7, 4  ;;  %s326_s1 = int_to_ptr.hbm [resolvable:$true] %s325_s1 }
  0x1f   : > { %8895 = dma.hbm_to_vmem [thread:$0]  (!%p9432_p6), %s312_s20, 2048, %s314_s19, [#allocation10], %s13672_s24, %s13672_s24, %s13673_s22  }
  0x20   : > { %s9335_s26 = smov [#allocation12]   ;;  %s340_s14 = sshll.u32 %s13670_s8, 4  ;;  %s341_s14 = int_to_ptr.vmem [resolvable:$true] %s340_s14 }
  0x21   : > { %s327_s28 = sshll.u32 %s9335_s26, 4  ;;  %s9336_s18 = smov [#allocation14]   ;;  %s328_s28 = int_to_ptr.vmem [resolvable:$true] %s327_s28 }
  0x22   : > { %8898 = dma.hbm_to_vmem [thread:$0]  (!%p9432_p6), %s326_s1, 2048, %s328_s28, [#allocation13], %s13672_s24, %s13672_s24, %s13673_s22  }
  0x23   : > { %8901 = dma.vmem_to_smem (!%p9432_p6), %s341_s14, 16, %s9336_s18, [#allocation5]  }
  0x24   : > { %s8085_s20 = sadd.s32 4294967294, %s9325_s12   ;;  %s9468_s21 = sadd.s32 1, %s9325_s12  }
  0x25   : > { %s33_s15 = ssub.s32 %s9325_s12, %s9468_s21  ;;  %s36_s19 = sadd.s32 1, %s9321_s11 }
  0x26   : > { %p34_p7 = scmp.eq.s32.totalorder %s33_s15, 0  ;;  %p43_p8 = scmp.ne.s32.totalorder %s9321_s11, %s9317_s10 }
  0x27   : > { %p44_p9 = scmp.eq.s32.totalorder %s9325_s12, 0  ;;  %p49_p10 = scmp.ne.s32.totalorder %s9317_s10, %s9313_s30 }
  0x28   : > { %s9479_s25 = scalar_select %p34_p7, %s9321_s11, %s36_s19  }
  0x29   : > { %p9481_p11 = por %p44_p9, %p43_p8  ;;  %p9487_p12 = por %p50_p1, %p49_p10 }
  0x2a   : > { %p241_p13 = scmp.eq.s32.totalorder %s9415_s16, 1  ;;  %p247_p0 = scmp.eq.s32.totalorder %s8085_s20, 1 }
  0x2b   : > { %p8916_p2 = scmp.lt.s32.totalorder %s9325_s12, 2  ;;  %s351_s1 = sand.u32 1, %s9321_s11  }
  0x2c   : > { %p9494_p5 = por %p241_p13, %p43_p8  ;;  %p9498_p6 = por %p247_p0, %p49_p10 }
  0x2d   : > { %s8094_s29 = sshll.u32 %s351_s1, 9  ;;  %s8692_s13 = sshll.u32 %s9325_s12, 9 }
  0x2e   : > { %s361_s15 = scalar_lea.hbm %s13662_s0, %s8692_s13  ;;  %s355_s19 = scalar_lea.vmem [#allocation2], %s8094_s29 }
  0x2f   : > { %s364_s24 = sshll.u32 %s355_s19, 4  ;;  %s362_s22 = sshll.u32 %s361_s15, 4  ;;  %s365_s24 = int_to_ptr.vmem [resolvable:$true] %s364_s24  ;;  %s363_s22 = int_to_ptr.hbm [resolvable:$true] %s362_s22 }
  0x30   : > { %p9508_p7 = pnand %p8916_p2, %p9481_p11  ;;  %s352_s2 = scalar_lea.sflag [#allocation3], %s351_s1 }
  0x31   : > { %s9213_s4 = sshra.s32 %s363_s22, 4  ;;  %s9220_s14 = scalar_lea.hbm %s13662_s0, 1024  ;;  %s9214_s4 = int_to_ptr.hbm [resolvable:$true] %s9213_s4 }
  0x32   : > { %s9215_s6 = scalar_lea.hbm %s9214_s4, 512  ;;  %p9217_p9 = pneg %p9508_p7 }
  0x33   : > { %p9216_p8 = scmp.ne.s32.totalorder %s9214_s4, %s9215_s6  ;;  %p9221_p11 = scmp.lt.s32.totalorder %s9214_s4, %s13662_s0 }
  0x34   : > { %p9222_p0 = scmp.lt.s32.totalorder %s9220_s14, %s9215_s6 }
  0x35   : > { %p9218_p10 = pnand %p9217_p9, %p9216_p8 }
  0x36   : > { %p9223_p2 = por %p9222_p0, %p9221_p11 }
  0x37   : > { %p9219_p13 = pneg %p9218_p10 }
  0x39   : > { %p9224_p4 = pnand %p9223_p2, %p9219_p13 }
  0x3b   : > { %9227 = shalt.err (!%p9224_p4)
}
  0x3c   : > { %s14046_s1 = smov 8   ;;  %s14047_s15 = smov 128  }
  0x3d   : > { %8905 = dma.hbm_to_vmem [thread:$0]  (!%p9508_p7), %s363_s22, 8192, %s365_s24, %s352_s2, %s14047_s15, %s14047_s15, %s14046_s1  }
  0x3e   : > { %376 = sbr.rel (%p9420_p3) target bundleno = 3075 (0xc03), region = 56 }
  0x43   : > { %s9528_s19 = sand.u32 1, %s9317_s10  }
  0x44   : > { %s8099_s4 = sshll.u32 %s9528_s19, 9  ;;  %s379_s6 = scalar_lea.sflag [#allocation3], %s9528_s19 }
  0x45   : > { %s9534_s29 = scalar_lea.vmem [#allocation2], %s8099_s4 }
  0x46   : > { %9288 = dma.done.wait (%p9487_p12), %s379_s6, 8192  }
  0x47   : > { %9290 = vsyncadd (%p9487_p12), %s379_s6, 4294959104 }
  0x48   : > { %9292 = dma.done.wait (%p50_p1), [#allocation7], 9232  }
  0x49   : > { %9294 = vsyncadd (%p50_p1), [#allocation7], 4294958064 }
  0x4a   : > { %9296 = dma.done.wait (%p50_p1), [#allocation10], 11264  }
  0x4b   : > { %9298 = vsyncadd (%p50_p1), [#allocation10], 4294956032 }
  0x4c   : > { %9300 = dma.done.wait (%p50_p1), [#allocation13], 2048  }
  0x4d   : > { %9302 = vsyncadd (%p50_p1), [#allocation13], 4294965248 }
  0x4e   : > { %9304 = dma.done.wait (%p50_p1), [#allocation5], 16  }
  0x4f   : > { %9306 = vsyncadd (%p50_p1), [#allocation5], 4294967280 }
  0x50   : > { %418 = sfence }
  0x51   : > { %v8700_v0 = vld [vmem:[#allocation8 + $0x38] sm:$0xff]  ;;  %v845_v2 = vlaneseq  ;;  %v8699_v3 = vld [vmem:[#allocation8 + $0x30] sm:$0xff]  ;;  %v8698_v8 = vld [vmem:[#allocation8 + $0x28] sm:$0xff]  ;;  %vm582_vm0 = vcmask 1040384   ;;  %vm1359_vm3 = vsmask.f32 7424 }
  0x52   : > { %v8708_v1 = vld [vmem:[#allocation8 + $0x78] sm:$0xff]  ;;  %2520 = vmatpush.bf16.msra.mxu0 %v8700_v0  ;;  %8839 = vmatpush.bf16.msra.mxu2 %v8700_v0  ;;  %v8707_v5 = vld [vmem:[#allocation8 + $0x70] sm:$0xff]  ;;  %v485_v10 = vld [vmem:[%s9534_s29 + $0x108] sm:$0xff]  ;;  %vm1763_vm4 = vcmask 1046528   ;;  %vm4757_vm5 = vsmask.f32 256 }
  0x53   : > { %v9556_v4 = vshrl.u32 %v845_v2, 7  ;;  %8847 = vmatpush.bf16.msra.mxu3 %v8708_v1  ;;  %2689 = vmatpush.bf16.msra.mxu1 %v8708_v1  ;;  %v9561_v7 = vld [vmem:[#allocation6] ss:$0 sm:$0xff]  ;;  %v8706_v11 = vld [vmem:[#allocation8 + $0x68] sm:$0xff]  ;;  %v634_v14 = vrot.slane %v485_v10, 7  ;;  %v8697_v20 = vld [vmem:[#allocation8 + $0x20] sm:$0xff] }
  0x54   : > { %v484_v9 = vld [vmem:[%s9534_s29 + $0x100] sm:$0xff]  ;;  %v981_v12 = vpack.c.bf16 %v9561_v7, %v9561_v7  ;;  %v486_v15 = vld [vmem:[%s9534_s29 + $0x110] sm:$0xff]  ;;  %v487_v28 = vld [vmem:[%s9534_s29 + $0x118] sm:$0xff]  ;;  %s4041_s23 = sld [smem:[#allocation14]]  ;;  %s13390_s6 = scalar_lea.vmem [#allocation15], %s8099_s4 }
  0x55   : > { %v9559_v6 = vadd.s32 16, %v9556_v4  ;;  %vm849_vm1 = vcmp.eq.s32.totalorder %v9556_v4, 0  ;;  %v633_v13 = vrot.slane %v484_v9, 7  ;;  %v829_v18 = vsel %vm582_vm0, %v634_v14, 0.0  ;;  %v452_v19 = vld [vmem:[%s9534_s29] sm:$0xff]  ;;  %v453_v31 = vld [vmem:[%s9534_s29 + $0x8] sm:$0xff]  ;;  %vm11020_vm6 = vmand %vm582_vm0, %vm4757_vm5 }
  0x56   : > { %2521 = vmatpush.bf16.msra.mxu0 %v8699_v3  ;;  %8840 = vmatpush.bf16.msra.mxu2 %v8699_v3  ;;  %v1142_v21 = vunpack.c.l.b16 %v981_v12  ;;  %v8705_v25 = vld [vmem:[#allocation8 + $0x60] sm:$0xff]  ;;  %v636_v29 = vrot.slane %v486_v15, 7  ;;  %v585_v32 = vrot.slane %v452_v19, 7  ;;  %v8696_v34 = vld [vmem:[#allocation8 + $0x18] sm:$0xff]  ;;  %v637_v36 = vrot.slane %v487_v28, 7  ;;  %v8695_v43 = vld [vmem:[#allocation8 + $0x10] sm:$0xff] }
  0x57   : > { %8848 = vmatpush.bf16.msra.mxu3 %v8707_v5  ;;  %2690 = vmatpush.bf16.msra.mxu1 %v8707_v5  ;;  %vm860_vm2 = vcmp.eq.s32.totalorder %v9559_v6, 17  ;;  %v635_v16 = vsel %vm582_vm0, %v633_v13, %v634_v14  ;;  %v796_v17 = vsel %vm582_vm0, 0.0, %v633_v13  ;;  %v8704_v37 = vld [vmem:[#allocation8 + $0x58] sm:$0xff]  ;;  %v586_v40 = vrot.slane %v453_v31, 7  ;;  %v8703_v47 = vld [vmem:[#allocation8 + $0x50] sm:$0xff]  ;;  %v8694_v56 = vld [vmem:[#allocation8 + $0x8] sm:$0xff] }
  0x58   : > { %v933_v22 = vsel %vm849_vm1, %v9561_v7, %v796_v17  ;;  %v1033_v23 = vpack.c.bf16 %v635_v16, %v635_v16  ;;  %v935_v24 = vsel %vm860_vm2, %v9561_v7, %v829_v18  ;;  %v9582_v35 = vpack.c.b16 %v1142_v21, %v1142_v21  ;;  %v8702_v61 = vld [vmem:[#allocation8 + $0x48] sm:$0xff]  ;;  %v488_v3 = vld [vmem:[%s9534_s29 + $0x120] sm:$0xff]  ;;  %s8683_s15 = sld [smem:[#allocation14 + $0x1]]  ;;  %s8838_s4 = sshll.u32 %s9415_s16, 9 }
  0x59   : > { %v1032_v26 = vpack.c.bf16 %v933_v22, %v933_v22  ;;  %v1034_v27 = vpack.c.bf16 %v935_v24, %v935_v24  ;;  %v797_v41 = vsel %vm582_vm0, 0.0, %v636_v29  ;;  %v780_v42 = vsel %vm582_vm0, 0.0, %v585_v32  ;;  %v454_v9 = vld [vmem:[%s9534_s29 + $0x10] sm:$0xff]  ;;  %v8693_v10 = vld [vmem:[#allocation8] sm:$0xff]  ;;  %v8732_v21 = vld [vmem:[#allocation8 + $0x138] sm:$0xff]  ;;  %s7948_s17 = scalar_lea.hbm %s13671_s9, %s8838_s4  ;;  %s7949_s24 = sshll.u32 %s13390_s6, 4  ;;  %s7950_s24 = int_to_ptr.vmem [resolvable:$true] %s7949_s24 }
  0x5a   : > { %2522 = vmatpush.bf16.msra.mxu0 %v8698_v8  ;;  %8841 = vmatpush.bf16.msra.mxu2 %v8698_v8  ;;  %v1175_v30 = vunpack.c.l.b16 %v1033_v23  ;;  %14048 = vst [vmem:[#allocation22_spill] sm:$0xff] %v9582_v35  ;;  %v1363_v44 = vshll.u32 %v9582_v35, 16  ;;  %v638_v45 = vsel %vm582_vm0, %v636_v29, %v637_v36  ;;  %v936_v46 = vsel %vm849_vm1, %v9561_v7, %v797_v41  ;;  %v8701_v15 = vld [vmem:[#allocation8 + $0x40] sm:$0xff]  ;;  %v8716_v22 = vld [vmem:[#allocation8 + $0xb8] sm:$0xff]  ;;  %s7951_s22 = sshll.u32 %s7948_s17, 4  ;;  %s7952_s22 = int_to_ptr.hbm [resolvable:$true] %s7951_s22 }
  0x5b   : > { %8849 = vmatpush.bf16.msra.mxu3 %v8706_v11  ;;  %2691 = vmatpush.bf16.msra.mxu1 %v8706_v11  ;;  %v1174_v33 = vunpack.c.l.b16 %v1032_v26  ;;  %v1313_v39 = vunpack.c.l.b16 %v1034_v27  ;;  %v587_v50 = vsel %vm582_vm0, %v585_v32, %v586_v40  ;;  %v885_v51 = vsel %vm849_vm1, %v9561_v7, %v780_v42  ;;  %v489_v19 = vld [vmem:[%s9534_s29 + $0x128] sm:$0xff]  ;;  %v455_v23 = vld [vmem:[%s9534_s29 + $0x18] sm:$0xff]  ;;  %s9257_s20 = sshra.s32 %s7952_s22, 4  ;;  %s9258_s20 = int_to_ptr.hbm [resolvable:$true] %s9257_s20 }
  0x5c   : > { %v830_v52 = vsel %vm582_vm0, %v637_v36, 0.0  ;;  %v1035_v53 = vpack.c.bf16 %v936_v46, %v936_v46  ;;  %v1036_v54 = vpack.c.bf16 %v638_v45, %v638_v45  ;;  %v813_v55 = vsel %vm582_vm0, %v586_v40, 0.0  ;;  %v8724_v32 = vld [vmem:[#allocation8 + $0xf8] sm:$0xff]  ;;  %v8731_v42 = vld [vmem:[#allocation8 + $0x130] sm:$0xff]  ;;  %s9259_s13 = scalar_lea.hbm %s9258_s20, 512  ;;  %p9264_p12 = scmp.lt.s32.totalorder %s9258_s20, %s13671_s9 }
  0x5d   : > { %v9584_v38 = vpack.c.b16 %v1175_v30, %v1174_v33  ;;  %v9593_v48 = vpack.c.b16 %v1313_v39, %v1313_v39  ;;  %v1361_v57 = vshrl.u32 %v9582_v35, 16  ;;  %v1365_v58 = vrot.slane %v1363_v44, 1  ;;  %p9260_p1 = scmp.ne.s32.totalorder %s9258_s20, %s9259_s13 }
  0x5e   : > { %2523 = vmatpush.bf16.msra.mxu0 %v8697_v20  ;;  %8842 = vmatpush.bf16.msra.mxu2 %v8697_v20  ;;  %v984_v59 = vpack.c.bf16 %v885_v51, %v885_v51  ;;  %v985_v60 = vpack.c.bf16 %v587_v50, %v587_v50  ;;  %v938_v1 = vsel %vm860_vm2, %v9561_v7, %v830_v52  ;;  %v1176_v5 = vunpack.c.l.b16 %v1035_v53 }
  0x5f   : > { %8850 = vmatpush.bf16.msra.mxu3 %v8705_v25  ;;  %2692 = vmatpush.bf16.msra.mxu1 %v8705_v25  ;;  %14049 = vst [vmem:[#allocation23_spill] sm:$0xff] %v9584_v38  ;;  %v1555_v49 = vshll.u32 %v9584_v38, 16  ;;  %v1553_v62 = vshrl.u32 %v9584_v38, 16  ;;  %v1560_v0 = vshll.u32 %v9593_v48, 16  ;;  %v887_v2 = vsel %vm860_vm2, %v9561_v7, %v813_v55  ;;  %p9261_p3 = pnand %p9260_p1, %p9494_p5 }
  0x60   : > { %14050 = vst [vmem:[#allocation24_spill] sm:$0xff] %v9593_v48  ;;  %v1177_v8 = vunpack.c.l.b16 %v1036_v54  ;;  %v1366_v11 = vor.u32 %v1365_v58, %v1361_v57  ;;  %v1144_v12 = vunpack.c.l.b16 %v984_v59  ;;  %v1145_v13 = vunpack.c.l.b16 %v985_v60  ;;  %v507_v48 = vld [vmem:[%s9534_s29 + $0x1b8] sm:$0xff] }
  0x61   : > { %v1557_v63 = vrot.slane %v1555_v49, 1  ;;  %v1037_v14 = vpack.c.bf16 %v938_v1, %v938_v1  ;;  %v1562_v17 = vrot.slane %v1560_v0, 1  ;;  %v986_v18 = vpack.c.bf16 %v887_v2, %v887_v2  ;;  %v456_v2 = vld [vmem:[%s9534_s29 + $0x20] sm:$0xff]  ;;  %p9262_p4 = pneg %p9261_p3 }
  0x62   : > { %2524 = vmatpush.bf16.msra.mxu0 %v8696_v34  ;;  %8843 = vmatpush.bf16.msra.mxu2 %v8696_v34  ;;  %v639_v20 = vrot.slane %v488_v3, 7  ;;  %v588_v24 = vrot.slane %v454_v9, 7  ;;  %v9615_v25 = vpack.c.b16 %v1177_v8, %v1176_v5  ;;  %v9618_v26 = vsel %vm1359_vm3, %v1366_v11, %v1365_v58 }
  0x63   : > { %8851 = vmatpush.bf16.msra.mxu3 %v8704_v37  ;;  %2693 = vmatpush.bf16.msra.mxu1 %v8704_v37  ;;  %v1558_v16 = vor.u32 %v1557_v63, %v1553_v62  ;;  %14052 = vst [vmem:[#allocation26_spill] sm:$0xff] %v9618_v26  ;;  %v9620_v27 = vpack.c.b16 %v1145_v13, %v1144_v12  ;;  %v1314_v28 = vunpack.c.l.b16 %v1037_v14  ;;  %v640_v29 = vrot.slane %v489_v19, 7  ;;  %v490_v62 = vld [vmem:[%s9534_s29 + $0x130] sm:$0xff]  ;;  %v491_v13 = vld [vmem:[%s9534_s29 + $0x138] sm:$0xff] }
  0x64   : > { %14051 = vst [vmem:[#allocation25_spill] sm:$0xff] %v9615_v25  ;;  %v1298_v31 = vunpack.c.l.b16 %v986_v18  ;;  %v589_v33 = vrot.slane %v455_v23, 7  ;;  %v798_v34 = vsel %vm582_vm0, 0.0, %v639_v20  ;;  %v781_v36 = vsel %vm582_vm0, 0.0, %v588_v24 }
  0x65   : > { %v9623_v30 = vsel %vm1359_vm3, %v1558_v16, %v1562_v17  ;;  %v1567_v37 = vshll.u32 %v9615_v25, 16  ;;  %v9632_v39 = vpack.c.b16 %v1314_v28, %v1314_v28  ;;  %v641_v40 = vsel %vm582_vm0, %v639_v20, %v640_v29 }
  0x66   : > { %2525 = vmatpush.bf16.msra.mxu0 %v8695_v43  ;;  %8844 = vmatpush.bf16.msra.mxu2 %v8695_v43  ;;  %14053 = vst [vmem:[#allocation27_spill] sm:$0xff] %v9623_v30  ;;  %v939_v41 = vsel %vm849_vm1, %v9561_v7, %v798_v34  ;;  %v9638_v43 = vpack.c.b16 %v1298_v31, %v1298_v31  ;;  %v1375_v44 = vshll.u32 %v9620_v27, 16  ;;  %v831_v49 = vsel %vm582_vm0, %v640_v29, 0.0 }
  0x67   : > { %8852 = vmatpush.bf16.msra.mxu3 %v8703_v47  ;;  %2694 = vmatpush.bf16.msra.mxu1 %v8703_v47  ;;  %14054 = vst [vmem:[#allocation28_spill] sm:$0xff] %v9632_v39  ;;  %v590_v45 = vsel %vm582_vm0, %v588_v24, %v589_v33  ;;  %v888_v46 = vsel %vm849_vm1, %v9561_v7, %v781_v36  ;;  %v1565_v47 = vshrl.u32 %v9615_v25, 16  ;;  %v1569_v50 = vrot.slane %v1567_v37, 1  ;;  %v8715_v36 = vld [vmem:[#allocation8 + $0xb0] sm:$0xff] }
  0x68   : > { %v1038_v51 = vpack.c.bf16 %v939_v41, %v939_v41  ;;  %v1039_v52 = vpack.c.bf16 %v641_v40, %v641_v40  ;;  %v814_v53 = vsel %vm582_vm0, %v589_v33, 0.0  ;;  %v1572_v54 = vshll.u32 %v9632_v39, 16  ;;  %v8723_v37 = vld [vmem:[#allocation8 + $0xf0] sm:$0xff] }
  0x69   : > { %v987_v55 = vpack.c.bf16 %v888_v46, %v888_v46  ;;  %v1373_v57 = vshrl.u32 %v9620_v27, 16  ;;  %v1377_v58 = vrot.slane %v1375_v44, 1  ;;  %v1380_v59 = vshll.u32 %v9638_v43, 16 }
  0x6a   : > { %2526 = vmatpush.bf16.msra.mxu0 %v8694_v56  ;;  %8845 = vmatpush.bf16.msra.mxu2 %v8694_v56  ;;  %v988_v56 = vpack.c.bf16 %v590_v45, %v590_v45  ;;  %v941_v60 = vsel %vm860_vm2, %v9561_v7, %v831_v49  ;;  %v1570_v63 = vor.u32 %v1569_v50, %v1565_v47  ;;  %v1178_v0 = vunpack.c.l.b16 %v1038_v51 }
  0x6b   : > { %8853 = vmatpush.bf16.msra.mxu3 %v8702_v61  ;;  %2695 = vmatpush.bf16.msra.mxu1 %v8702_v61  ;;  %v890_v61 = vsel %vm860_vm2, %v9561_v7, %v814_v53  ;;  %v1179_v1 = vunpack.c.l.b16 %v1039_v52  ;;  %v1574_v3 = vrot.slane %v1572_v54, 1  ;;  %v1146_v5 = vunpack.c.l.b16 %v987_v55 }
  0x6c   : > { %v1147_v8 = vunpack.c.l.b16 %v988_v56  ;;  %v1040_v9 = vpack.c.bf16 %v941_v60, %v941_v60  ;;  %v1382_v11 = vrot.slane %v1380_v59, 1  ;;  %v989_v12 = vpack.c.bf16 %v890_v61, %v890_v61  ;;  %v492_v60 = vld [vmem:[%s9534_s29 + $0x140] sm:$0xff] }
  0x6d   : > { %v642_v14 = vrot.slane %v490_v62, 7  ;;  %v591_v16 = vrot.slane %v456_v2, 7  ;;  %v9661_v17 = vpack.c.b16 %v1179_v1, %v1178_v0  ;;  %v9664_v18 = vsel %vm1359_vm3, %v1570_v63, %v1574_v3  ;;  %v458_v0 = vld [vmem:[%s9534_s29 + $0x30] sm:$0xff] }
  0x6e   : > { %2527 = vmatpush.bf16.msra.mxu0 %v8693_v10  ;;  %8846 = vmatpush.bf16.msra.mxu2 %v8693_v10  ;;  %v1378_v10 = vor.u32 %v1377_v58, %v1373_v57  ;;  %14056 = vst [vmem:[#allocation30_spill] sm:$0xff] %v9664_v18  ;;  %v9666_v19 = vpack.c.b16 %v1147_v8, %v1146_v5  ;;  %v1315_v20 = vunpack.c.l.b16 %v1040_v9  ;;  %v1299_v23 = vunpack.c.l.b16 %v989_v12 }
  0x6f   : > { %8854 = vmatpush.bf16.msra.mxu3 %v8701_v15  ;;  %2696 = vmatpush.bf16.msra.mxu1 %v8701_v15  ;;  %v457_v15 = vld [vmem:[%s9534_s29 + $0x28] sm:$0xff]  ;;  %14055 = vst [vmem:[#allocation29_spill] sm:$0xff] %v9661_v17  ;;  %v799_v28 = vsel %vm582_vm0, 0.0, %v642_v14  ;;  %v782_v29 = vsel %vm582_vm0, 0.0, %v591_v16  ;;  %v1579_v31 = vshll.u32 %v9661_v17, 16  ;;  %v1577_v45 = vshrl.u32 %v9661_v17, 16 }
  0x70   : > { %14057 = vst [vmem:[#allocation31_spill] sm:$0xff] %v9666_v19  ;;  %v592_v24 = vrot.slane %v457_v15, 7  ;;  %v942_v34 = vsel %vm849_vm1, %v9561_v7, %v799_v28  ;;  %v9684_v40 = vpack.c.b16 %v1299_v23, %v1299_v23  ;;  %v1387_v41 = vshll.u32 %v9666_v19, 16 }
  0x71   : > { %2528 = vmatmul.bf16.vlgmr.msra.gmra.mxu0 %v9582_v35  ;;  %2613 = vmatmul.bf16.vlgmr.msra.gmra.mxu2 %v9584_v38  ;;  %v891_v44 = vsel %vm849_vm1, %v9561_v7, %v782_v29  ;;  %v1581_v47 = vrot.slane %v1579_v31, 1  ;;  %v1041_v49 = vpack.c.bf16 %v942_v34, %v942_v34  ;;  %v1385_v55 = vshrl.u32 %v9666_v19, 16 }
  0x72   : > { %3196 = vmatpush.bf16.msrb.mxu0 %v8732_v21  ;;  %2858 = vmatpush.bf16.msrb.mxu2 %v8716_v22  ;;  %v643_v21 = vrot.slane %v491_v13, 7  ;;  %v9669_v22 = vsel %vm1359_vm3, %v1378_v10, %v1382_v11  ;;  %v815_v51 = vsel %vm582_vm0, %v592_v24, 0.0  ;;  %v990_v53 = vpack.c.bf16 %v891_v44, %v891_v44  ;;  %v493_v11 = vld [vmem:[%s9534_s29 + $0x148] sm:$0xff]  ;;  %v459_v13 = vld [vmem:[%s9534_s29 + $0x38] sm:$0xff] }
  0x73   : > { %2782 = vmatmul.bf16.vlgmr.msra.gmra.mxu3 %v9623_v30  ;;  %2697 = vmatmul.bf16.vlgmr.msra.gmra.mxu1 %v9618_v26  ;;  %v1389_v56 = vrot.slane %v1387_v41, 1  ;;  %v1392_v57 = vshll.u32 %v9684_v40, 16  ;;  %v893_v59 = vsel %vm860_vm2, %v9561_v7, %v815_v51  ;;  %v1582_v61 = vor.u32 %v1581_v47, %v1577_v45  ;;  %v8730_v44 = vld [vmem:[#allocation8 + $0x128] sm:$0xff] }
  0x74   : > { %3027 = vmatpush.bf16.msrb.mxu3 %v8724_v32  ;;  %v9678_v32 = vpack.c.b16 %v1315_v20, %v1315_v20  ;;  %v644_v33 = vsel %vm582_vm0, %v642_v14, %v643_v21  ;;  %v832_v46 = vsel %vm582_vm0, %v643_v21, 0.0  ;;  %v1180_v62 = vunpack.c.l.b16 %v1041_v49 }
  0x75   : > { %v1042_v50 = vpack.c.bf16 %v644_v33, %v644_v33  ;;  %v944_v58 = vsel %vm860_vm2, %v9561_v7, %v832_v46  ;;  %v1148_v2 = vunpack.c.l.b16 %v990_v53  ;;  %v1390_v8 = vor.u32 %v1389_v56, %v1385_v55 }
  0x76   : > { %3197 = vmatpush.bf16.msrb.mxu0 %v8731_v42  ;;  %14058 = vst [vmem:[#allocation32_spill] sm:$0xff] %v9678_v32  ;;  %v593_v42 = vsel %vm582_vm0, %v591_v16, %v592_v24  ;;  %2859 = vmatpush.bf16.msrb.mxu2 %v8715_v36  ;;  %v1584_v52 = vshll.u32 %v9678_v32, 16  ;;  %v1043_v5 = vpack.c.bf16 %v944_v58, %v944_v58  ;;  %v1394_v9 = vrot.slane %v1392_v57, 1 }
  0x77   : > { %v991_v54 = vpack.c.bf16 %v593_v42, %v593_v42  ;;  %v1181_v63 = vunpack.c.l.b16 %v1042_v50  ;;  %v992_v10 = vpack.c.bf16 %v893_v59, %v893_v59  ;;  %v645_v12 = vrot.slane %v492_v60, 7 }
  0x78   : > { %3028 = vmatpush.bf16.msrb.mxu3 %v8723_v37  ;;  %v1586_v1 = vrot.slane %v1584_v52, 1  ;;  %v594_v14 = vrot.slane %v458_v0, 7  ;;  %v1316_v21 = vunpack.c.l.b16 %v1043_v5  ;;  %v646_v23 = vrot.slane %v493_v11, 7 }
  0x79   : > { %v1149_v3 = vunpack.c.l.b16 %v991_v54  ;;  %v9707_v15 = vpack.c.b16 %v1181_v63, %v1180_v62  ;;  %v9715_v24 = vsel %vm1359_vm3, %v1390_v8, %v1394_v9  ;;  %v1300_v28 = vunpack.c.l.b16 %v992_v10  ;;  %v494_v63 = vld [vmem:[%s9534_s29 + $0x150] sm:$0xff]  ;;  %v460_v10 = vld [vmem:[%s9534_s29 + $0x40] sm:$0xff] }
  0x7a   : > { %v9710_v16 = vsel %vm1359_vm3, %v1582_v61, %v1586_v1  ;;  %14062 = vst [vmem:[#allocation36_spill] sm:$0xff] %v9715_v24  ;;  %v595_v29 = vrot.slane %v459_v13, 7  ;;  %v800_v31 = vsel %vm582_vm0, 0.0, %v645_v12  ;;  %v783_v33 = vsel %vm582_vm0, 0.0, %v594_v14  ;;  %3198 = vmatpush.bf16.msrb.mxu0 %v8730_v44 }
  0x7b   : > { %14059 = vst [vmem:[#allocation33_spill] sm:$0xff] %v9707_v15  ;;  %v9712_v20 = vpack.c.b16 %v1149_v3, %v1148_v2  ;;  %v1591_v34 = vshll.u32 %v9707_v15, 16  ;;  %v9724_v36 = vpack.c.b16 %v1316_v21, %v1316_v21  ;;  %v647_v41 = vsel %vm582_vm0, %v645_v12, %v646_v23 }
  0x7c   : > { %14060 = vst [vmem:[#allocation34_spill] sm:$0xff] %v9710_v16  ;;  %v945_v42 = vsel %vm849_vm1, %v9561_v7, %v800_v31  ;;  %v9731_v45 = vpack.c.b16 %v1300_v28, %v1300_v28  ;;  %v596_v46 = vsel %vm582_vm0, %v594_v14, %v595_v29  ;;  %v894_v47 = vsel %vm849_vm1, %v9561_v7, %v783_v33  ;;  %v495_v14 = vld [vmem:[%s9534_s29 + $0x158] sm:$0xff] }
  0x7d   : > { %14061 = vst [vmem:[#allocation35_spill] sm:$0xff] %v9712_v20  ;;  %v1399_v37 = vshll.u32 %v9712_v20, 16  ;;  %v833_v49 = vsel %vm582_vm0, %v646_v23, 0.0  ;;  %v816_v50 = vsel %vm582_vm0, %v595_v29, 0.0  ;;  %v1589_v51 = vshrl.u32 %v9707_v15, 16  ;;  %v461_v29 = vld [vmem:[%s9534_s29 + $0x48] sm:$0xff] }
  0x7e   : > { %14063 = vst [vmem:[#allocation37_spill] sm:$0xff] %v9724_v36  ;;  %v1397_v52 = vshrl.u32 %v9712_v20, 16  ;;  %v1044_v53 = vpack.c.bf16 %v945_v42, %v945_v42  ;;  %v1045_v54 = vpack.c.bf16 %v647_v41, %v647_v41  ;;  %v1593_v55 = vrot.slane %v1591_v34, 1 }
  0x7f   : > { %v993_v56 = vpack.c.bf16 %v894_v47, %v894_v47  ;;  %v994_v57 = vpack.c.bf16 %v596_v46, %v596_v46  ;;  %v947_v58 = vsel %vm860_vm2, %v9561_v7, %v833_v49  ;;  %v1596_v59 = vshll.u32 %v9724_v36, 16 }
  0x80   : > { %v1401_v60 = vrot.slane %v1399_v37, 1  ;;  %v1404_v61 = vshll.u32 %v9731_v45, 16  ;;  %v896_v62 = vsel %vm860_vm2, %v9561_v7, %v816_v50  ;;  %v1182_v0 = vunpack.c.l.b16 %v1044_v53 }
  0x81   : > { %2533 = vmatmul.bf16.gmra.mxu0 %v9620_v27  ;;  %2618 = vmatmul.bf16.gmra.mxu2 %v9615_v25  ;;  %v1183_v1 = vunpack.c.l.b16 %v1045_v54  ;;  %v1046_v2 = vpack.c.bf16 %v947_v58, %v947_v58  ;;  %v1594_v3 = vor.u32 %v1593_v55, %v1589_v51  ;;  %v1150_v5 = vunpack.c.l.b16 %v993_v56  ;;  %v8714_v55 = vld [vmem:[#allocation8 + $0xa8] sm:$0xff] }
  0x82   : > { %v1151_v8 = vunpack.c.l.b16 %v994_v57  ;;  %v995_v9 = vpack.c.bf16 %v896_v62, %v896_v62  ;;  %v1598_v11 = vrot.slane %v1596_v59, 1  ;;  %v1402_v12 = vor.u32 %v1401_v60, %v1397_v52  ;;  %v8722_v56 = vld [vmem:[#allocation8 + $0xe8] sm:$0xff]  ;;  %2860 = vmatpush.bf16.msrb.mxu2 %v8714_v55 }
  0x83   : > { %2787 = vmatmul.bf16.gmra.mxu3 %v9664_v18  ;;  %2702 = vmatmul.bf16.gmra.mxu1 %v9669_v22  ;;  %v1406_v13 = vrot.slane %v1404_v61, 1  ;;  %v648_v21 = vrot.slane %v494_v63, 7  ;;  %v9752_v23 = vpack.c.b16 %v1183_v1, %v1182_v0  ;;  %v1317_v28 = vunpack.c.l.b16 %v1046_v2  ;;  %v471_v18 = vld [vmem:[%s9534_s29 + $0x98] sm:$0xff] }
  0x84   : > { %v597_v31 = vrot.slane %v460_v10, 7  ;;  %v9755_v33 = vpack.c.b16 %v1151_v8, %v1150_v5  ;;  %v1301_v34 = vunpack.c.l.b16 %v995_v9  ;;  %v649_v37 = vrot.slane %v495_v14, 7  ;;  %3029 = vmatpush.bf16.msrb.mxu3 %v8722_v56 }
  0x85   : > { %14064 = vst [vmem:[#allocation38_spill] sm:$0xff] %v9752_v23  ;;  %v9758_v41 = vsel %vm1359_vm3, %v1594_v3, %v1598_v11  ;;  %v9761_v42 = vsel %vm1359_vm3, %v1402_v12, %v1406_v13  ;;  %v801_v44 = vsel %vm582_vm0, 0.0, %v648_v21  ;;  %v598_v46 = vrot.slane %v461_v29, 7  ;;  %v496_v12 = vld [vmem:[%s9534_s29 + $0x160] sm:$0xff] }
  0x86   : > { %14065 = vst [vmem:[#allocation39_spill] sm:$0xff] %v9755_v33  ;;  %v9766_v47 = vpack.c.b16 %v1317_v28, %v1317_v28  ;;  %v1603_v49 = vshll.u32 %v9752_v23, 16  ;;  %v784_v50 = vsel %vm582_vm0, 0.0, %v597_v31  ;;  %v9772_v51 = vpack.c.b16 %v1301_v34, %v1301_v34  ;;  %v462_v28 = vld [vmem:[%s9534_s29 + $0x50] sm:$0xff] }
  0x87   : > { %14066 = vst [vmem:[#allocation40_spill] sm:$0xff] %v9758_v41  ;;  %v1411_v52 = vshll.u32 %v9755_v33, 16  ;;  %v650_v53 = vsel %vm582_vm0, %v648_v21, %v649_v37  ;;  %v948_v54 = vsel %vm849_vm1, %v9561_v7, %v801_v44  ;;  %v1601_v57 = vshrl.u32 %v9752_v23, 16 }
  0x88   : > { %14067 = vst [vmem:[#allocation41_spill] sm:$0xff] %v9761_v42  ;;  %v599_v58 = vsel %vm582_vm0, %v597_v31, %v598_v46  ;;  %v897_v59 = vsel %vm849_vm1, %v9561_v7, %v784_v50  ;;  %v834_v60 = vsel %vm582_vm0, %v649_v37, 0.0  ;;  %v1605_v61 = vrot.slane %v1603_v49, 1  ;;  %v497_v50 = vld [vmem:[%s9534_s29 + $0x168] sm:$0xff] }
  0x89   : > { %14068 = vst [vmem:[#allocation42_spill] sm:$0xff] %v9766_v47  ;;  %v1047_v62 = vpack.c.bf16 %v948_v54, %v948_v54  ;;  %v1048_v63 = vpack.c.bf16 %v650_v53, %v650_v53  ;;  %v817_v0 = vsel %vm582_vm0, %v598_v46, 0.0  ;;  %v1608_v1 = vshll.u32 %v9766_v47, 16  ;;  %v463_v53 = vld [vmem:[%s9534_s29 + $0x58] sm:$0xff] }
  0x8a   : > { %v1409_v2 = vshrl.u32 %v9755_v33, 16  ;;  %v1413_v3 = vrot.slane %v1411_v52, 1  ;;  %v1416_v5 = vshll.u32 %v9772_v51, 16  ;;  %v996_v8 = vpack.c.bf16 %v897_v59, %v897_v59 }
  0x8b   : > { %v997_v9 = vpack.c.bf16 %v599_v58, %v599_v58  ;;  %v950_v10 = vsel %vm860_vm2, %v9561_v7, %v834_v60  ;;  %v899_v11 = vsel %vm860_vm2, %v9561_v7, %v817_v0  ;;  %v1606_v13 = vor.u32 %v1605_v61, %v1601_v57 }
  0x8c   : > { %v1184_v14 = vunpack.c.l.b16 %v1047_v62  ;;  %v1185_v21 = vunpack.c.l.b16 %v1048_v63  ;;  %v1610_v29 = vrot.slane %v1608_v1, 1  ;;  %v1414_v31 = vor.u32 %v1413_v3, %v1409_v2 }
  0x8d   : > { %v1418_v34 = vrot.slane %v1416_v5, 1  ;;  %v1049_v37 = vpack.c.bf16 %v950_v10, %v950_v10  ;;  %v1152_v44 = vunpack.c.l.b16 %v996_v8  ;;  %v1153_v46 = vunpack.c.l.b16 %v997_v9  ;;  %v8729_v8 = vld [vmem:[#allocation8 + $0x120] sm:$0xff] }
  0x8e   : > { %v998_v49 = vpack.c.bf16 %v899_v11, %v899_v11  ;;  %v651_v52 = vrot.slane %v496_v12, 7  ;;  %v600_v54 = vrot.slane %v462_v28, 7  ;;  %v9799_v55 = vpack.c.b16 %v1185_v21, %v1184_v14  ;;  %3199 = vmatpush.bf16.msrb.mxu0 %v8729_v8 }
  0x8f   : > { %v9802_v56 = vsel %vm1359_vm3, %v1606_v13, %v1610_v29  ;;  %v9805_v57 = vsel %vm1359_vm3, %v1414_v31, %v1418_v34  ;;  %v1318_v58 = vunpack.c.l.b16 %v1049_v37  ;;  %v652_v59 = vrot.slane %v497_v50, 7 }
  0x90   : > { %14069 = vst [vmem:[#allocation43_spill] sm:$0xff] %v9799_v55  ;;  %v9807_v60 = vpack.c.b16 %v1153_v46, %v1152_v44  ;;  %v1302_v61 = vunpack.c.l.b16 %v998_v49  ;;  %v601_v62 = vrot.slane %v463_v53, 7  ;;  %v802_v63 = vsel %vm582_vm0, 0.0, %v651_v52  ;;  %v498_v53 = vld [vmem:[%s9534_s29 + $0x170] sm:$0xff] }
  0x91   : > { %2538 = vmatmul.bf16.gmra.mxu0 %v9666_v19  ;;  %2623 = vmatmul.bf16.gmra.mxu2 %v9661_v17  ;;  %14070 = vst [vmem:[#allocation44_spill] sm:$0xff] %v9802_v56  ;;  %v785_v0 = vsel %vm582_vm0, 0.0, %v600_v54  ;;  %v1615_v1 = vshll.u32 %v9799_v55, 16  ;;  %v9816_v2 = vpack.c.b16 %v1318_v58, %v1318_v58  ;;  %v653_v3 = vsel %vm582_vm0, %v651_v52, %v652_v59 }
  0x92   : > { %14071 = vst [vmem:[#allocation45_spill] sm:$0xff] %v9805_v57  ;;  %v951_v5 = vsel %vm849_vm1, %v9561_v7, %v802_v63  ;;  %v9822_v9 = vpack.c.b16 %v1302_v61, %v1302_v61  ;;  %v1423_v10 = vshll.u32 %v9807_v60, 16  ;;  %v602_v11 = vsel %vm582_vm0, %v600_v54, %v601_v62 }
  0x93   : > { %2792 = vmatmul.bf16.gmra.mxu3 %v9710_v16  ;;  %2707 = vmatmul.bf16.gmra.mxu1 %v9715_v24  ;;  %14072 = vst [vmem:[#allocation46_spill] sm:$0xff] %v9807_v60  ;;  %v900_v12 = vsel %vm849_vm1, %v9561_v7, %v785_v0  ;;  %v1613_v13 = vshrl.u32 %v9799_v55, 16  ;;  %v835_v14 = vsel %vm582_vm0, %v652_v59, 0.0  ;;  %v1617_v21 = vrot.slane %v1615_v1, 1 }
  0x94   : > { %14073 = vst [vmem:[#allocation47_spill] sm:$0xff] %v9816_v2  ;;  %v1050_v28 = vpack.c.bf16 %v951_v5, %v951_v5  ;;  %v1051_v29 = vpack.c.bf16 %v653_v3, %v653_v3  ;;  %v818_v31 = vsel %vm582_vm0, %v601_v62, 0.0  ;;  %v1620_v34 = vshll.u32 %v9816_v2, 16  ;;  %v464_v62 = vld [vmem:[%s9534_s29 + $0x60] sm:$0xff]  ;;  %v499_v3 = vld [vmem:[%s9534_s29 + $0x178] sm:$0xff] }
  0x95   : > { %v999_v37 = vpack.c.bf16 %v900_v12, %v900_v12  ;;  %v1000_v44 = vpack.c.bf16 %v602_v11, %v602_v11  ;;  %v1421_v46 = vshrl.u32 %v9807_v60, 16  ;;  %v1425_v49 = vrot.slane %v1423_v10, 1 }
  0x96   : > { %v1428_v50 = vshll.u32 %v9822_v9, 16  ;;  %v953_v52 = vsel %vm860_vm2, %v9561_v7, %v835_v14  ;;  %v902_v54 = vsel %vm860_vm2, %v9561_v7, %v818_v31  ;;  %v1618_v58 = vor.u32 %v1617_v21, %v1613_v13  ;;  %v465_v14 = vld [vmem:[%s9534_s29 + $0x68] sm:$0xff] }
  0x97   : > { %v1186_v59 = vunpack.c.l.b16 %v1050_v28  ;;  %v1187_v61 = vunpack.c.l.b16 %v1051_v29  ;;  %v1154_v63 = vunpack.c.l.b16 %v999_v37  ;;  %v1155_v0 = vunpack.c.l.b16 %v1000_v44 }
  0x98   : > { %v1052_v1 = vpack.c.bf16 %v953_v52, %v953_v52  ;;  %v654_v5 = vrot.slane %v498_v53, 7  ;;  %v1622_v8 = vrot.slane %v1620_v34, 1  ;;  %v1426_v10 = vor.u32 %v1425_v49, %v1421_v46  ;;  %v8713_v53 = vld [vmem:[#allocation8 + $0xa0] sm:$0xff] }
  0x99   : > { %v1430_v11 = vrot.slane %v1428_v50, 1  ;;  %v1001_v12 = vpack.c.bf16 %v902_v54, %v902_v54  ;;  %v9845_v2 = vpack.c.b16 %v1187_v61, %v1186_v59  ;;  %v9847_v47 = vpack.c.b16 %v1155_v0, %v1154_v63  ;;  %v8721_v54 = vld [vmem:[#allocation8 + $0xe0] sm:$0xff]  ;;  %2861 = vmatpush.bf16.msrb.mxu2 %v8713_v53  ;;  %v466_v53 = vld [vmem:[%s9534_s29 + $0x70] sm:$0xff] }
  0x9a   : > { %v1319_v13 = vunpack.c.l.b16 %v1052_v1  ;;  %v803_v21 = vsel %vm582_vm0, 0.0, %v654_v5  ;;  %v9851_v28 = vsel %vm1359_vm3, %v1618_v58, %v1622_v8  ;;  %v604_v34 = vrot.slane %v465_v14, 7  ;;  %3030 = vmatpush.bf16.msrb.mxu3 %v8721_v54 }
  0x9b   : > { %14074 = vst [vmem:[#allocation48_spill] sm:$0xff] %v9845_v2  ;;  %v9854_v29 = vsel %vm1359_vm3, %v1426_v10, %v1430_v11  ;;  %v1303_v31 = vunpack.c.l.b16 %v1001_v12  ;;  %v1627_v44 = vshll.u32 %v9845_v2, 16  ;;  %v954_v49 = vsel %vm849_vm1, %v9561_v7, %v803_v21 }
  0x9c   : > { %14075 = vst [vmem:[#allocation49_spill] sm:$0xff] %v9847_v47  ;;  %v9866_v50 = vpack.c.b16 %v1319_v13, %v1319_v13  ;;  %v1435_v52 = vshll.u32 %v9847_v47, 16  ;;  %v1053_v63 = vpack.c.bf16 %v954_v49, %v954_v49  ;;  %v819_v1 = vsel %vm582_vm0, %v604_v34, 0.0 }
  0x9d   : > { %14076 = vst [vmem:[#allocation50_spill] sm:$0xff] %v9851_v28  ;;  %v9869_v58 = vpack.c.b16 %v1303_v31, %v1303_v31  ;;  %v905_v13 = vsel %vm860_vm2, %v9561_v7, %v819_v1  ;;  %v606_v1 = vrot.slane %v466_v53, 7 }
  0x9e   : > { %14077 = vst [vmem:[#allocation51_spill] sm:$0xff] %v9854_v29  ;;  %v1632_v8 = vshll.u32 %v9866_v50, 16  ;;  %v1437_v12 = vrot.slane %v1435_v52, 1  ;;  %v1188_v21 = vunpack.c.l.b16 %v1053_v63  ;;  %v1004_v49 = vpack.c.bf16 %v905_v13, %v905_v13  ;;  %v501_v52 = vld [vmem:[%s9534_s29 + $0x188] sm:$0xff] }
  0x9f   : > { %14078 = vst [vmem:[#allocation52_spill] sm:$0xff] %v9866_v50  ;;  %v1440_v14 = vshll.u32 %v9869_v58, 16 }
  0xa1   : > { %2543 = vmatmul.bf16.gmra.mxu0 %v9712_v20  ;;  %2628 = vmatmul.bf16.gmra.mxu2 %v9707_v15 }
  0xa3   : > { %2797 = vmatmul.bf16.gmra.mxu3 %v9758_v41  ;;  %2712 = vmatmul.bf16.gmra.mxu1 %v9761_v42  ;;  %v655_v41 = vrot.slane %v499_v3, 7  ;;  %v1625_v3 = vshrl.u32 %v9845_v2, 16 }
  0xa5   : > { %v656_v46 = vsel %vm582_vm0, %v654_v5, %v655_v41  ;;  %v1629_v5 = vrot.slane %v1627_v44, 1 }
  0xa6   : > { %v1054_v0 = vpack.c.bf16 %v656_v46, %v656_v46 }
  0xa7   : > { %v1630_v54 = vor.u32 %v1629_v5, %v1625_v3 }
  0xa8   : > { %v1189_v31 = vunpack.c.l.b16 %v1054_v0  ;;  %v1304_v0 = vunpack.c.l.b16 %v1004_v49 }
  0xb1   : > { %2548 = vmatmul.bf16.gmra.mxu0 %v9755_v33  ;;  %2633 = vmatmul.bf16.gmra.mxu2 %v9752_v23  ;;  %v467_v23 = vld [vmem:[%s9534_s29 + $0x78] sm:$0xff] }
  0xb2   : > { %v607_v5 = vrot.slane %v467_v23, 7 }
  0xb3   : > { %2802 = vmatmul.bf16.gmra.mxu3 %v9802_v56  ;;  %2717 = vmatmul.bf16.gmra.mxu1 %v9805_v57  ;;  %v603_v56 = vrot.slane %v464_v62, 7  ;;  %v836_v62 = vsel %vm582_vm0, %v655_v41, 0.0  ;;  %v1433_v41 = vshrl.u32 %v9847_v47, 16 }
  0xb4   : > { %v956_v11 = vsel %vm860_vm2, %v9561_v7, %v836_v62  ;;  %v1442_v62 = vrot.slane %v1440_v14, 1  ;;  %v9910_v14 = vpack.c.b16 %v1304_v0, %v1304_v0  ;;  %v820_v53 = vsel %vm582_vm0, %v607_v5, 0.0 }
  0xb5   : > { %v786_v37 = vsel %vm582_vm0, 0.0, %v603_v56  ;;  %v605_v59 = vsel %vm582_vm0, %v603_v56, %v604_v34  ;;  %v1055_v34 = vpack.c.bf16 %v956_v11, %v956_v11  ;;  %v658_v11 = vrot.slane %v501_v52, 7 }
  0xb6   : > { %v903_v61 = vsel %vm849_vm1, %v9561_v7, %v786_v37  ;;  %v1003_v10 = vpack.c.bf16 %v605_v59, %v605_v59  ;;  %v500_v37 = vld [vmem:[%s9534_s29 + $0x180] sm:$0xff]  ;;  %v1634_v59 = vrot.slane %v1632_v8, 1 }
  0xb7   : > { %v1002_v56 = vpack.c.bf16 %v903_v61, %v903_v61  ;;  %v1438_v61 = vor.u32 %v1437_v12, %v1433_v41  ;;  %v657_v50 = vrot.slane %v500_v37, 7  ;;  %v787_v12 = vsel %vm582_vm0, 0.0, %v606_v1 }
  0xb8   : > { %v1157_v46 = vunpack.c.l.b16 %v1003_v10  ;;  %v837_v23 = vsel %vm582_vm0, %v658_v11, 0.0  ;;  %v608_v37 = vsel %vm582_vm0, %v606_v1, %v607_v5  ;;  %v468_v5 = vld [vmem:[%s9534_s29 + $0x80] sm:$0xff] }
  0xb9   : > { %v1156_v44 = vunpack.c.l.b16 %v1002_v56  ;;  %v9896_v56 = vsel %vm1359_vm3, %v1630_v54, %v1634_v59  ;;  %v9899_v10 = vsel %vm1359_vm3, %v1438_v61, %v1442_v62  ;;  %v804_v8 = vsel %vm582_vm0, 0.0, %v657_v50 }
  0xba   : > { %14081 = vst [vmem:[#allocation55_spill] sm:$0xff] %v9896_v56  ;;  %v1452_v59 = vshll.u32 %v9910_v14, 16  ;;  %v1006_v1 = vpack.c.bf16 %v608_v37, %v608_v37  ;;  %v609_v36 = vrot.slane %v468_v5, 7 }
  0xbb   : > { %v9893_v63 = vpack.c.b16 %v1157_v46, %v1156_v44  ;;  %14082 = vst [vmem:[#allocation56_spill] sm:$0xff] %v9899_v10  ;;  %v906_v44 = vsel %vm849_vm1, %v9561_v7, %v787_v12 }
  0xbc   : > { %v1005_v52 = vpack.c.bf16 %v906_v44, %v906_v44  ;;  %v1159_v44 = vunpack.c.l.b16 %v1006_v1  ;;  %v788_v1 = vsel %vm582_vm0, 0.0, %v609_v36 }
  0xbd   : > { %14080 = vst [vmem:[#allocation54_spill] sm:$0xff] %v9893_v63  ;;  %v1447_v13 = vshll.u32 %v9893_v63, 16  ;;  %v1445_v49 = vshrl.u32 %v9893_v63, 16 }
  0xbf   : > { %v1449_v54 = vrot.slane %v1447_v13, 1 }
  0xc1   : > { %2553 = vmatmul.bf16.gmra.mxu0 %v9807_v60  ;;  %2638 = vmatmul.bf16.gmra.mxu2 %v9799_v55  ;;  %v1320_v55 = vunpack.c.l.b16 %v1055_v34  ;;  %v1450_v13 = vor.u32 %v1449_v54, %v1445_v49 }
  0xc3   : > { %2807 = vmatmul.bf16.gmra.mxu3 %v9851_v28  ;;  %2722 = vmatmul.bf16.gmra.mxu1 %v9854_v29  ;;  %v9890_v28 = vpack.c.b16 %v1189_v31, %v1188_v21  ;;  %v9905_v41 = vpack.c.b16 %v1320_v55, %v1320_v55  ;;  %v659_v21 = vsel %vm582_vm0, %v657_v50, %v658_v11 }
  0xc4   : > { %v957_v31 = vsel %vm849_vm1, %v9561_v7, %v804_v8  ;;  %v959_v50 = vsel %vm860_vm2, %v9561_v7, %v837_v23  ;;  %v1057_v62 = vpack.c.bf16 %v659_v21, %v659_v21  ;;  %v908_v11 = vsel %vm860_vm2, %v9561_v7, %v820_v53  ;;  %v8728_v23 = vld [vmem:[#allocation8 + $0x118] sm:$0xff]  ;;  %v469_v53 = vld [vmem:[%s9534_s29 + $0x88] sm:$0xff] }
  0xc5   : > { %14079 = vst [vmem:[#allocation53_spill] sm:$0xff] %v9890_v28  ;;  %v1639_v3 = vshll.u32 %v9890_v28, 16  ;;  %v1637_v55 = vshrl.u32 %v9890_v28, 16  ;;  %v1644_v46 = vshll.u32 %v9905_v41, 16  ;;  %v1056_v61 = vpack.c.bf16 %v957_v31, %v957_v31  ;;  %3200 = vmatpush.bf16.msrb.mxu0 %v8728_v23 }
  0xc6   : > { %14083 = vst [vmem:[#allocation57_spill] sm:$0xff] %v9905_v41  ;;  %v1058_v0 = vpack.c.bf16 %v959_v50, %v959_v50  ;;  %v1454_v41 = vrot.slane %v1452_v59, 1  ;;  %v1191_v31 = vunpack.c.l.b16 %v1057_v62  ;;  %v1158_v21 = vunpack.c.l.b16 %v1005_v52  ;;  %v503_v50 = vld [vmem:[%s9534_s29 + $0x198] sm:$0xff] }
  0xc7   : > { %v1641_v34 = vrot.slane %v1639_v3, 1  ;;  %v502_v3 = vld [vmem:[%s9534_s29 + $0x190] sm:$0xff]  ;;  %v1646_v12 = vrot.slane %v1644_v46, 1  ;;  %v1007_v37 = vpack.c.bf16 %v908_v11, %v908_v11  ;;  %v661_v49 = vrot.slane %v503_v50, 7 }
  0xc8   : > { %v660_v16 = vrot.slane %v502_v3, 7  ;;  %v1321_v7 = vunpack.c.l.b16 %v1058_v0  ;;  %v9945_v54 = vpack.c.b16 %v1159_v44, %v1158_v21  ;;  %v610_v62 = vrot.slane %v469_v53, 7  ;;  %v9957_v0 = vld [vmem:[#allocation6] ss:$0 sm:$0xff] }
  0xc9   : > { %v1642_v8 = vor.u32 %v1641_v34, %v1637_v55  ;;  %v9941_v34 = vsel %vm1359_vm3, %v1450_v13, %v1454_v41  ;;  %v1305_v59 = vunpack.c.l.b16 %v1007_v37  ;;  %v838_v3 = vsel %vm582_vm0, %v661_v49, 0.0 }
  0xca   : > { %14085 = vst [vmem:[#allocation59_spill] sm:$0xff] %v9941_v34  ;;  %v9948_v52 = vpack.c.b16 %v1321_v7, %v1321_v7  ;;  %v662_v41 = vsel %vm582_vm0, %v660_v16, %v661_v49  ;;  %v1459_v23 = vshll.u32 %v9945_v54, 16  ;;  %v611_v5 = vsel %vm582_vm0, %v609_v36, %v610_v62 }
  0xcb   : > { %v9938_v55 = vsel %vm1359_vm3, %v1642_v8, %v1646_v12  ;;  %14087 = vst [vmem:[#allocation61_spill] sm:$0xff] %v9945_v54  ;;  %v8720_v8 = vld [vmem:[#allocation8 + $0xd8] sm:$0xff]  ;;  %v9963_v12 = vpack.c.b16 %v1305_v59, %v1305_v59  ;;  %v1060_v21 = vpack.c.bf16 %v662_v41, %v662_v41  ;;  %v962_v44 = vsel %vm860_vm2, %v9957_v0, %v838_v3 }
  0xcc   : > { %14084 = vst [vmem:[#allocation58_spill] sm:$0xff] %v9938_v55  ;;  %v1656_v13 = vshll.u32 %v9948_v52, 16  ;;  %3031 = vmatpush.bf16.msrb.mxu3 %v8720_v8  ;;  %v821_v37 = vsel %vm582_vm0, %v610_v62, 0.0  ;;  %v1009_v53 = vpack.c.bf16 %v611_v5, %v611_v5  ;;  %v1457_v49 = vshrl.u32 %v9945_v54, 16  ;;  %v505_v5 = vld [vmem:[%s9534_s29 + $0x1a8] sm:$0xff] }
  0xcd   : > { %14088 = vst [vmem:[#allocation62_spill] sm:$0xff] %v9948_v52  ;;  %v1461_v59 = vrot.slane %v1459_v23, 1  ;;  %v911_v41 = vsel %vm860_vm2, %v9957_v0, %v821_v37  ;;  %v1193_v8 = vunpack.c.l.b16 %v1060_v21  ;;  %v9987_v23 = vld [vmem:[%s13665_s3] ss:$0 sm:$0xff] }
  0xce   : > { %v1658_v62 = vrot.slane %v1656_v13, 1  ;;  %v1010_v15 = vpack.c.bf16 %v911_v41, %v911_v41  ;;  %v664_v13 = vrot.slane %v505_v5, 7 }
  0xd1   : > { %2558 = vmatmul.bf16.gmra.mxu0 %v9847_v47  ;;  %2643 = vmatmul.bf16.gmra.mxu2 %v9845_v2  ;;  %v1190_v2 = vunpack.c.l.b16 %v1056_v61  ;;  %v8712_v61 = vld [vmem:[#allocation8 + $0x98] sm:$0xff] }
  0xd2   : > { %2862 = vmatpush.bf16.msrb.mxu2 %v8712_v61  ;;  %v1464_v61 = vshll.u32 %v9963_v12, 16 }
  0xd3   : > { %2812 = vmatmul.bf16.gmra.mxu3 %v9896_v56  ;;  %2727 = vmatmul.bf16.gmra.mxu1 %v9899_v10  ;;  %v8740_v56 = vld [vmem:[#allocation8 + $0x178] sm:$0xff]  ;;  %v9943_v46 = vpack.c.b16 %v1191_v31, %v1190_v2 }
  0xd4   : > { %3365 = vmatpush.bf16.msrb.mxu1 %v8740_v56  ;;  %v805_v56 = vsel %vm582_vm0, 0.0, %v660_v16  ;;  %v909_v16 = vsel %vm849_vm1, %v9957_v0, %v788_v1  ;;  %v1061_v1 = vpack.c.bf16 %v962_v44, %v962_v44  ;;  %v1466_v44 = vrot.slane %v1464_v61, 1 }
  0xd5   : > { %14086 = vst [vmem:[#allocation60_spill] sm:$0xff] %v9943_v46  ;;  %v1651_v2 = vshll.u32 %v9943_v46, 16  ;;  %v960_v11 = vsel %vm849_vm1, %v9957_v0, %v805_v56  ;;  %v1649_v50 = vshrl.u32 %v9943_v46, 16  ;;  %v1008_v36 = vpack.c.bf16 %v909_v16, %v909_v16  ;;  %v504_v56 = vld [vmem:[%s9534_s29 + $0x1a0] sm:$0xff] }
  0xd6   : > { %v1059_v31 = vpack.c.bf16 %v960_v11, %v960_v11  ;;  %v470_v11 = vld [vmem:[%s9534_s29 + $0x90] sm:$0xff]  ;;  %v1161_v16 = vunpack.c.l.b16 %v1009_v53  ;;  %v663_v52 = vrot.slane %v504_v56, 7  ;;  %v1322_v37 = vunpack.c.l.b16 %v1061_v1 }
  0xd7   : > { %v1653_v7 = vrot.slane %v1651_v2, 1  ;;  %v612_v32 = vrot.slane %v470_v11, 7  ;;  %v1306_v61 = vunpack.c.l.b16 %v1010_v15 }
  0xd8   : > { %v1192_v3 = vunpack.c.l.b16 %v1059_v31  ;;  %v10003_v1 = vpack.c.b16 %v1322_v37, %v1322_v37 }
  0xd9   : > { %v1654_v2 = vor.u32 %v1653_v7, %v1649_v50  ;;  %v613_v7 = vrot.slane %v471_v18, 7  ;;  %v789_v56 = vsel %vm582_vm0, 0.0, %v612_v32 }
  0xda   : > { %v9990_v17 = vpack.c.b16 %v1193_v8, %v1192_v3  ;;  %14093 = vst [vmem:[#allocation67_spill] sm:$0xff] %v10003_v1  ;;  %v839_v3 = vsel %vm582_vm0, %v664_v13, 0.0  ;;  %v10022_v8 = vpack.c.b16 %v1306_v61, %v1306_v61  ;;  %v1668_v61 = vshll.u32 %v10003_v1, 16  ;;  %v472_v1 = vld [vmem:[%s9534_s29 + $0xa0] sm:$0xff] }
  0xdb   : > { %v9993_v21 = vsel %vm1359_vm3, %v1654_v2, %v1658_v62  ;;  %v614_v11 = vsel %vm582_vm0, %v612_v32, %v613_v7  ;;  %v912_v62 = vsel %vm849_vm1, %v9957_v0, %v789_v56 }
  0xdc   : > { %14089 = vst [vmem:[#allocation63_spill] sm:$0xff] %v9990_v17  ;;  %v1663_v18 = vshll.u32 %v9990_v17, 16  ;;  %v1661_v2 = vshrl.u32 %v9990_v17, 16  ;;  %v1011_v32 = vpack.c.bf16 %v912_v62, %v912_v62  ;;  %v1670_v39 = vrot.slane %v1668_v61, 1 }
  0xdd   : > { %14090 = vst [vmem:[#allocation64_spill] sm:$0xff] %v9993_v21 }
  0xde   : > { %14095 = vst [vmem:[#allocation69_spill] sm:$0xff] %v10022_v8 }
  0xe1   : > { %2563 = vmatmul.bf16.gmra.mxu0 %v9893_v63  ;;  %2648 = vmatmul.bf16.gmra.mxu2 %v9890_v28  ;;  %v1462_v28 = vor.u32 %v1461_v59, %v1457_v49 }
  0xe3   : > { %2817 = vmatmul.bf16.gmra.mxu3 %v9938_v55  ;;  %2732 = vmatmul.bf16.gmra.mxu1 %v9941_v34  ;;  %v1160_v55 = vunpack.c.l.b16 %v1008_v36  ;;  %v806_v36 = vsel %vm582_vm0, 0.0, %v663_v52  ;;  %v10000_v59 = vsel %vm1359_vm3, %v1462_v28, %v1466_v44  ;;  %v822_v44 = vsel %vm582_vm0, %v613_v7, 0.0 }
  0xe4   : > { %14092 = vst [vmem:[#allocation66_spill] sm:$0xff] %v10000_v59  ;;  %v963_v28 = vsel %vm849_vm1, %v9957_v0, %v806_v36  ;;  %v1012_v36 = vpack.c.bf16 %v614_v11, %v614_v11  ;;  %v1476_v11 = vshll.u32 %v10022_v8, 16  ;;  %v914_v62 = vsel %vm860_vm2, %v9957_v0, %v822_v44 }
  0xe5   : > { %v9995_v50 = vpack.c.b16 %v1161_v16, %v1160_v55  ;;  %v665_v55 = vsel %vm582_vm0, %v663_v52, %v664_v13  ;;  %v1062_v16 = vpack.c.bf16 %v963_v28, %v963_v28  ;;  %v965_v13 = vsel %vm860_vm2, %v9957_v0, %v839_v3  ;;  %v506_v3 = vld [vmem:[%s9534_s29 + $0x1b0] sm:$0xff] }
  0xe6   : > { %v1063_v5 = vpack.c.bf16 %v665_v55, %v665_v55  ;;  %v1013_v25 = vpack.c.bf16 %v914_v62, %v914_v62  ;;  %v666_v38 = vrot.slane %v506_v3, 7  ;;  %v1478_v8 = vrot.slane %v1476_v11, 1  ;;  %v8711_v3 = vld [vmem:[#allocation8 + $0x90] sm:$0xff] }
  0xe7   : > { %14091 = vst [vmem:[#allocation65_spill] sm:$0xff] %v9995_v50  ;;  %v1471_v15 = vshll.u32 %v9995_v50, 16  ;;  %v1469_v56 = vshrl.u32 %v9995_v50, 16  ;;  %2863 = vmatpush.bf16.msrb.mxu2 %v8711_v3  ;;  %v508_v3 = vld [vmem:[%s9534_s29 + $0x1c0] sm:$0xff] }
  0xe8   : > { %v807_v11 = vsel %vm582_vm0, 0.0, %v666_v38 }
  0xe9   : > { %v1473_v55 = vrot.slane %v1471_v15, 1  ;;  %v1162_v15 = vunpack.c.l.b16 %v1011_v32 }
  0xee   : > { %v2529_v31 = vpop.f32.mrf.mxu0 }
  0xef   : > { %v2530_v53 = vadd.f32 %v9987_v23, %v2529_v31 }
  0xf0   : > { %v2698_v49 = vpop.f32.mrf.mxu1 }
  0xf1   : > { %v10005_v41 = vadd.f32 %v2698_v49, %v2530_v53  ;;  %2568 = vmatmul.bf16.gmra.mxu0 %v9945_v54  ;;  %2653 = vmatmul.bf16.gmra.mxu2 %v9943_v46  ;;  %v1665_v49 = vrot.slane %v1663_v18, 1  ;;  %v1195_v18 = vunpack.c.l.b16 %v1063_v5  ;;  %v1064_v46 = vpack.c.bf16 %v965_v13, %v965_v13 }
  0xf2   : > { %v615_v5 = vrot.slane %v472_v1, 7 }
  0xf3   : > { %14094 = vst [vmem:[#allocation68_spill] sm:$0xff] %v10005_v41  ;;  %2822 = vmatmul.bf16.gmra.mxu3 %v9993_v21  ;;  %2737 = vmatmul.bf16.gmra.mxu1 %v10000_v59  ;;  %v1194_v21 = vunpack.c.l.b16 %v1062_v16  ;;  %v1474_v59 = vor.u32 %v1473_v55, %v1469_v56  ;;  %v473_v16 = vld [vmem:[%s9534_s29 + $0xa8] sm:$0xff]  ;;  %v1307_v56 = vunpack.c.l.b16 %v1013_v25 }
  0xf4   : > { %v2614_v52 = vpop.f32.mrf.mxu2  ;;  %v616_v55 = vrot.slane %v473_v16, 7 }
  0xf5   : > { %v2615_v37 = vadd.f32 %v9987_v23, %v2614_v52  ;;  %v10045_v13 = vpack.c.b16 %v1195_v18, %v1194_v21  ;;  %v8719_v18 = vld [vmem:[#allocation8 + $0xd0] sm:$0xff] }
  0xf6   : > { %v2783_v31 = vpop.f32.mrf.mxu3  ;;  %v2531_v53 = vpop.f32.mrf.mxu0  ;;  %3032 = vmatpush.bf16.msrb.mxu3 %v8719_v18 }
  0xf7   : > { %v10032_v28 = vadd.f32 %v2783_v31, %v2615_v37  ;;  %v2532_v7 = vadd.f32 %v9987_v23, %v2531_v53  ;;  %v1163_v37 = vunpack.c.l.b16 %v1012_v36  ;;  %v8727_v31 = vld [vmem:[#allocation8 + $0x110] sm:$0xff]  ;;  %14098 = vst [vmem:[#allocation72_spill] sm:$0xff] %v10045_v13 }
  0xf8   : > { %v2700_v52 = vpop.f32.mrf.mxu1  ;;  %v8739_v53 = vld [vmem:[#allocation8 + $0x170] sm:$0xff]  ;;  %3201 = vmatpush.bf16.msrb.mxu0 %v8727_v31  ;;  %v617_v31 = vsel %vm582_vm0, %v615_v5, %v616_v55 }
  0xf9   : > { %14096 = vst [vmem:[#allocation70_spill] sm:$0xff] %v10032_v28  ;;  %v10041_v30 = vadd.f32 %v2700_v52, %v2532_v7  ;;  %v1666_v28 = vor.u32 %v1665_v49, %v1661_v2  ;;  %3366 = vmatpush.bf16.msrb.mxu1 %v8739_v53  ;;  %v1323_v7 = vunpack.c.l.b16 %v1064_v46  ;;  %v10048_v52 = vpack.c.b16 %v1163_v37, %v1162_v15 }
  0xfa   : > { %v667_v2 = vrot.slane %v507_v48, 7  ;;  %v10058_v46 = vsel %vm1359_vm3, %v1474_v59, %v1478_v8  ;;  %v790_v48 = vsel %vm582_vm0, 0.0, %v615_v5  ;;  %v966_v59 = vsel %vm849_vm1, %v9957_v0, %v807_v11 }
  0xfb   : > { %14097 = vst [vmem:[#allocation71_spill] sm:$0xff] %v10041_v30  ;;  %v10051_v61 = vsel %vm1359_vm3, %v1666_v28, %v1670_v39  ;;  %v10061_v15 = vpack.c.b16 %v1323_v7, %v1323_v7  ;;  %v1675_v39 = vshll.u32 %v10045_v13, 16  ;;  %v1483_v28 = vshll.u32 %v10048_v52, 16 }
  0xfc   : > { %v2616_v44 = vpop.f32.mrf.mxu2  ;;  %14099 = vst [vmem:[#allocation73_spill] sm:$0xff] %v10048_v52  ;;  %v668_v37 = vsel %vm582_vm0, %v666_v38, %v667_v2  ;;  %v10075_v8 = vpack.c.b16 %v1307_v56, %v1307_v56  ;;  %v915_v53 = vsel %vm849_vm1, %v9957_v0, %v790_v48  ;;  %v840_v16 = vsel %vm582_vm0, %v667_v2, 0.0 }
  0xfd   : > { %v2617_v32 = vadd.f32 %v9987_v23, %v2616_v44  ;;  %14100 = vst [vmem:[#allocation74_spill] sm:$0xff] %v10051_v61  ;;  %v1673_v38 = vshrl.u32 %v10045_v13, 16  ;;  %v823_v44 = vsel %vm582_vm0, %v616_v55, 0.0  ;;  %v1066_v56 = vpack.c.bf16 %v668_v37, %v668_v37 }
  0xfe   : > { %v2785_v36 = vpop.f32.mrf.mxu3  ;;  %v2534_v49 = vpop.f32.mrf.mxu0  ;;  %14102 = vst [vmem:[#allocation76_spill] sm:$0xff] %v10058_v46  ;;  %v968_v2 = vsel %vm860_vm2, %v9957_v0, %v840_v16  ;;  %v1481_v55 = vshrl.u32 %v10048_v52, 16  ;;  %v1485_v48 = vrot.slane %v1483_v28, 1  ;;  %v917_v37 = vsel %vm860_vm2, %v9957_v0, %v823_v44 }
  0xff   : > { %v10054_v62 = vadd.f32 %v2785_v36, %v2617_v32  ;;  %v2535_v21 = vadd.f32 %v9987_v23, %v2534_v49  ;;  %14103 = vst [vmem:[#allocation77_spill] sm:$0xff] %v10061_v15  ;;  %v1677_v32 = vrot.slane %v1675_v39, 1  ;;  %v1680_v36 = vshll.u32 %v10061_v15, 16  ;;  %v474_v15 = vld [vmem:[%s9534_s29 + $0xb0] sm:$0xff] }
 0x100   : > { %v2703_v1 = vpop.f32.mrf.mxu1  ;;  %14105 = vst [vmem:[#allocation79_spill] sm:$0xff] %v10075_v8  ;;  %v1065_v49 = vpack.c.bf16 %v966_v59, %v966_v59  ;;  %v1488_v39 = vshll.u32 %v10075_v8, 16  ;;  %v1197_v16 = vunpack.c.l.b16 %v1066_v56  ;;  %v1016_v8 = vpack.c.bf16 %v917_v37, %v917_v37 }
 0x101   : > { %14101 = vst [vmem:[#allocation75_spill] sm:$0xff] %v10054_v62  ;;  %v10064_v25 = vadd.f32 %v2703_v1, %v2535_v21  ;;  %2573 = vmatmul.bf16.gmra.mxu0 %v9995_v50  ;;  %2658 = vmatmul.bf16.gmra.mxu2 %v9990_v17  ;;  %v1014_v21 = vpack.c.bf16 %v915_v53, %v915_v53  ;;  %v669_v62 = vrot.slane %v508_v3, 7  ;;  %v1682_v41 = vrot.slane %v1680_v36, 1 }
 0x102   : > { %v1015_v1 = vpack.c.bf16 %v617_v31, %v617_v31  ;;  %v1678_v30 = vor.u32 %v1677_v32, %v1673_v38  ;;  %v1486_v44 = vor.u32 %v1485_v48, %v1481_v55 }
 0x103   : > { %14104 = vst [vmem:[#allocation78_spill] sm:$0xff] %v10064_v25  ;;  %2827 = vmatmul.bf16.gmra.mxu3 %v10051_v61  ;;  %2742 = vmatmul.bf16.gmra.mxu1 %v10058_v46  ;;  %v1067_v61 = vpack.c.bf16 %v968_v2, %v968_v2  ;;  %v1164_v28 = vunpack.c.l.b16 %v1014_v21  ;;  %v509_v25 = vld [vmem:[%s9534_s29 + $0x1c8] sm:$0xff]  ;;  %v808_v2 = vsel %vm582_vm0, 0.0, %v669_v62 }
 0x104   : > { %v2619_v7 = vpop.f32.mrf.mxu2  ;;  %v1165_v46 = vunpack.c.l.b16 %v1015_v1  ;;  %v670_v56 = vrot.slane %v509_v25, 7  ;;  %v1308_v1 = vunpack.c.l.b16 %v1016_v8  ;;  %v10110_v38 = vsel %vm1359_vm3, %v1678_v30, %v1682_v41 }
 0x105   : > { %v2620_v5 = vadd.f32 %v9987_v23, %v2619_v7  ;;  %v1196_v7 = vunpack.c.l.b16 %v1065_v49  ;;  %v1324_v49 = vunpack.c.l.b16 %v1067_v61  ;;  %14110 = vst [vmem:[#allocation84_spill] sm:$0xff] %v10110_v38 }
 0x106   : > { %v2788_v11 = vpop.f32.mrf.mxu3  ;;  %v2536_v18 = vpop.f32.mrf.mxu0  ;;  %v10107_v21 = vpack.c.b16 %v1165_v46, %v1164_v28  ;;  %v969_v46 = vsel %vm849_vm1, %v9957_v0, %v808_v2  ;;  %v671_v41 = vsel %vm582_vm0, %v669_v62, %v670_v56  ;;  %v841_v28 = vsel %vm582_vm0, %v670_v56, 0.0 }
 0x107   : > { %v10095_v59 = vadd.f32 %v2788_v11, %v2620_v5  ;;  %v2537_v31 = vadd.f32 %v9987_v23, %v2536_v18  ;;  %v1490_v5 = vrot.slane %v1488_v39, 1  ;;  %v475_v11 = vld [vmem:[%s9534_s29 + $0xb8] sm:$0xff]  ;;  %v10103_v50 = vpack.c.b16 %v1197_v16, %v1196_v7 }
 0x108   : > { %v2705_v53 = vpop.f32.mrf.mxu1  ;;  %14109 = vst [vmem:[#allocation83_spill] sm:$0xff] %v10107_v21  ;;  %v10122_v8 = vpack.c.b16 %v1324_v49, %v1324_v49  ;;  %v10130_v39 = vpack.c.b16 %v1308_v1, %v1308_v1  ;;  %v1068_v16 = vpack.c.bf16 %v969_v46, %v969_v46 }
 0x109   : > { %14106 = vst [vmem:[#allocation80_spill] sm:$0xff] %v10095_v59  ;;  %v10099_v17 = vadd.f32 %v2705_v53, %v2537_v31  ;;  %v618_v59 = vrot.slane %v474_v15, 7  ;;  %v10113_v32 = vsel %vm1359_vm3, %v1486_v44, %v1490_v5  ;;  %v619_v15 = vrot.slane %v475_v11, 7 }
 0x10a   : > { %14108 = vst [vmem:[#allocation82_spill] sm:$0xff] %v10103_v50  ;;  %v1687_v30 = vshll.u32 %v10103_v50, 16  ;;  %v1495_v53 = vshll.u32 %v10107_v21, 16  ;;  %v1069_v44 = vpack.c.bf16 %v671_v41, %v671_v41  ;;  %v1685_v11 = vshrl.u32 %v10103_v50, 16 }
 0x10b   : > { %14107 = vst [vmem:[#allocation81_spill] sm:$0xff] %v10099_v17  ;;  %v791_v55 = vsel %vm582_vm0, 0.0, %v618_v59  ;;  %v620_v7 = vsel %vm582_vm0, %v618_v59, %v619_v15  ;;  %v1692_v49 = vshll.u32 %v10122_v8, 16  ;;  %v824_v2 = vsel %vm582_vm0, %v619_v15, 0.0 }
 0x10c   : > { %v2621_v18 = vpop.f32.mrf.mxu2  ;;  %14111 = vst [vmem:[#allocation85_spill] sm:$0xff] %v10113_v32  ;;  %v918_v62 = vsel %vm849_vm1, %v9957_v0, %v791_v55  ;;  %v1018_v1 = vpack.c.bf16 %v620_v7, %v620_v7  ;;  %v1500_v55 = vshll.u32 %v10130_v39, 16  ;;  %v1198_v46 = vunpack.c.l.b16 %v1068_v16 }
 0x10d   : > { %v2622_v3 = vadd.f32 %v9987_v23, %v2621_v18  ;;  %14113 = vst [vmem:[#allocation87_spill] sm:$0xff] %v10122_v8  ;;  %v1689_v18 = vrot.slane %v1687_v30, 1  ;;  %v920_v7 = vsel %vm860_vm2, %v9957_v0, %v824_v2  ;;  %v1694_v8 = vrot.slane %v1692_v49, 1 }
 0x10e   : > { %v2790_v31 = vpop.f32.mrf.mxu3  ;;  %v2539_v37 = vpop.f32.mrf.mxu0  ;;  %14115 = vst [vmem:[#allocation89_spill] sm:$0xff] %v10130_v39  ;;  %v1167_v16 = vunpack.c.l.b16 %v1018_v1 }
 0x10f   : > { %v10115_v36 = vadd.f32 %v2790_v31, %v2622_v3  ;;  %v2540_v61 = vadd.f32 %v9987_v23, %v2539_v37  ;;  %v1017_v31 = vpack.c.bf16 %v918_v62, %v918_v62  ;;  %v971_v37 = vsel %vm860_vm2, %v9957_v0, %v841_v28  ;;  %v510_v28 = vld [vmem:[%s9534_s29 + $0x1d0] sm:$0xff] }
 0x110   : > { %v2708_v25 = vpop.f32.mrf.mxu1  ;;  %v1199_v62 = vunpack.c.l.b16 %v1069_v44  ;;  %v672_v44 = vrot.slane %v510_v28, 7  ;;  %v8726_v28 = vld [vmem:[#allocation8 + $0x108] sm:$0xff] }
 0x111   : > { %14112 = vst [vmem:[#allocation86_spill] sm:$0xff] %v10115_v36  ;;  %v10126_v48 = vadd.f32 %v2708_v25, %v2540_v61  ;;  %2578 = vmatmul.bf16.gmra.mxu0 %v10048_v52  ;;  %2663 = vmatmul.bf16.gmra.mxu2 %v10045_v13  ;;  %v1493_v61 = vshrl.u32 %v10107_v21, 16  ;;  %v1497_v25 = vrot.slane %v1495_v53, 1  ;;  %v1166_v36 = vunpack.c.l.b16 %v1017_v31 }
 0x112   : > { %v1019_v13 = vpack.c.bf16 %v920_v7, %v920_v7  ;;  %v10160_v39 = vpack.c.b16 %v1199_v62, %v1198_v46  ;;  %v809_v46 = vsel %vm582_vm0, 0.0, %v672_v44  ;;  %3202 = vmatpush.bf16.msrb.mxu0 %v8726_v28 }
 0x113   : > { %14114 = vst [vmem:[#allocation88_spill] sm:$0xff] %v10126_v48  ;;  %2832 = vmatmul.bf16.gmra.mxu3 %v10110_v38  ;;  %2747 = vmatmul.bf16.gmra.mxu1 %v10113_v32  ;;  %v1070_v38 = vpack.c.bf16 %v971_v37, %v971_v37  ;;  %v511_v32 = vld [vmem:[%s9534_s29 + $0x1d8] sm:$0xff]  ;;  %v10164_v49 = vpack.c.b16 %v1167_v16, %v1166_v36  ;;  %v8718_v36 = vld [vmem:[#allocation8 + $0xc8] sm:$0xff] }
 0x114   : > { %v2624_v5 = vpop.f32.mrf.mxu2  ;;  %14118 = vst [vmem:[#allocation92_spill] sm:$0xff] %v10160_v39  ;;  %v673_v31 = vrot.slane %v511_v32, 7  ;;  %v1699_v7 = vshll.u32 %v10160_v39, 16  ;;  %3033 = vmatpush.bf16.msrb.mxu3 %v8718_v36 }
 0x115   : > { %v2625_v3 = vadd.f32 %v9987_v23, %v2624_v5  ;;  %v1690_v5 = vor.u32 %v1689_v18, %v1685_v11  ;;  %v1325_v48 = vunpack.c.l.b16 %v1070_v38  ;;  %v477_v11 = vld [vmem:[%s9534_s29 + $0xc8] sm:$0xff]  ;;  %14119 = vst [vmem:[#allocation93_spill] sm:$0xff] %v10164_v49 }
 0x116   : > { %v2793_v59 = vpop.f32.mrf.mxu3  ;;  %v2541_v56 = vpop.f32.mrf.mxu0  ;;  %v622_v32 = vrot.slane %v477_v11, 7  ;;  %v1701_v11 = vrot.slane %v1699_v7, 1  ;;  %v1505_v7 = vshrl.u32 %v10164_v49, 16 }
 0x117   : > { %v10149_v30 = vadd.f32 %v2793_v59, %v2625_v3  ;;  %v2542_v15 = vadd.f32 %v9987_v23, %v2541_v56  ;;  %v8710_v3 = vld [vmem:[#allocation8 + $0x88] sm:$0xff]  ;;  %v476_v59 = vld [vmem:[%s9534_s29 + $0xc0] sm:$0xff]  ;;  %v1502_v56 = vrot.slane %v1500_v55, 1  ;;  %v1309_v55 = vunpack.c.l.b16 %v1019_v13 }
 0x118   : > { %v2710_v41 = vpop.f32.mrf.mxu1  ;;  %2864 = vmatpush.bf16.msrb.mxu2 %v8710_v3  ;;  %v621_v18 = vrot.slane %v476_v59, 7  ;;  %v10177_v16 = vpack.c.b16 %v1325_v48, %v1325_v48  ;;  %v1507_v13 = vshll.u32 %v10164_v49, 16  ;;  %v674_v3 = vsel %vm582_vm0, %v672_v44, %v673_v31 }
 0x119   : > { %14116 = vst [vmem:[#allocation90_spill] sm:$0xff] %v10149_v30  ;;  %v10156_v53 = vadd.f32 %v2710_v41, %v2542_v15  ;;  %v1498_v30 = vor.u32 %v1497_v25, %v1493_v61  ;;  %v10167_v61 = vsel %vm1359_vm3, %v1690_v5, %v1694_v8  ;;  %v8738_v8 = vld [vmem:[#allocation8 + $0x168] sm:$0xff]  ;;  %v972_v59 = vsel %vm849_vm1, %v9957_v0, %v809_v46 }
 0x11a   : > { %14120 = vst [vmem:[#allocation94_spill] sm:$0xff] %v10167_v61  ;;  %v792_v5 = vsel %vm582_vm0, 0.0, %v621_v18  ;;  %v10191_v48 = vpack.c.b16 %v1309_v55, %v1309_v55  ;;  %3367 = vmatpush.bf16.msrb.mxu1 %v8738_v8  ;;  %v1071_v46 = vpack.c.bf16 %v972_v59, %v972_v59  ;;  %v1072_v55 = vpack.c.bf16 %v674_v3, %v674_v3 }
 0x11b   : > { %14117 = vst [vmem:[#allocation91_spill] sm:$0xff] %v10156_v53  ;;  %v10170_v25 = vsel %vm1359_vm3, %v1498_v30, %v1502_v56  ;;  %v842_v56 = vsel %vm582_vm0, %v673_v31, 0.0  ;;  %v921_v44 = vsel %vm849_vm1, %v9957_v0, %v792_v5  ;;  %v1509_v36 = vrot.slane %v1507_v13, 1 }
 0x11c   : > { %v2626_v2 = vpop.f32.mrf.mxu2  ;;  %14121 = vst [vmem:[#allocation95_spill] sm:$0xff] %v10170_v25  ;;  %v1512_v5 = vshll.u32 %v10191_v48, 16  ;;  %v1020_v8 = vpack.c.bf16 %v921_v44, %v921_v44 }
 0x11d   : > { %v2627_v37 = vadd.f32 %v9987_v23, %v2626_v2  ;;  %14123 = vst [vmem:[#allocation97_spill] sm:$0xff] %v10177_v16  ;;  %v1697_v2 = vshrl.u32 %v10160_v39, 16 }
 0x11e   : > { %v2795_v15 = vpop.f32.mrf.mxu3  ;;  %v2544_v1 = vpop.f32.mrf.mxu0  ;;  %14125 = vst [vmem:[#allocation99_spill] sm:$0xff] %v10191_v48 }
 0x11f   : > { %v10173_v41 = vadd.f32 %v2795_v15, %v2627_v37  ;;  %v2545_v38 = vadd.f32 %v9987_v23, %v2544_v1  ;;  %v623_v37 = vsel %vm582_vm0, %v621_v18, %v622_v32  ;;  %v1704_v1 = vshll.u32 %v10177_v16, 16 }
 0x120   : > { %v2713_v62 = vpop.f32.mrf.mxu1  ;;  %v974_v18 = vsel %vm860_vm2, %v9957_v0, %v842_v56  ;;  %v1021_v59 = vpack.c.bf16 %v623_v37, %v623_v37  ;;  %v1201_v16 = vunpack.c.l.b16 %v1072_v55  ;;  %v512_v56 = vld [vmem:[%s9534_s29 + $0x1e0] sm:$0xff]  ;;  %v1510_v37 = vor.u32 %v1509_v36, %v1505_v7  ;;  %v479_v55 = vld [vmem:[%s9534_s29 + $0xd8] sm:$0xff] }
 0x121   : > { %14122 = vst [vmem:[#allocation96_spill] sm:$0xff] %v10173_v41  ;;  %v10180_v30 = vadd.f32 %v2713_v62, %v2545_v38  ;;  %2583 = vmatmul.bf16.gmra.mxu0 %v10107_v21  ;;  %2668 = vmatmul.bf16.gmra.mxu2 %v10103_v50  ;;  %v825_v38 = vsel %vm582_vm0, %v622_v32, 0.0  ;;  %v1073_v41 = vpack.c.bf16 %v974_v18, %v974_v18  ;;  %v1706_v44 = vrot.slane %v1704_v1, 1 }
 0x122   : > { %v923_v13 = vsel %vm860_vm2, %v9957_v0, %v825_v38  ;;  %v675_v53 = vrot.slane %v512_v56, 7 }
 0x123   : > { %14124 = vst [vmem:[#allocation98_spill] sm:$0xff] %v10180_v30  ;;  %2837 = vmatmul.bf16.gmra.mxu3 %v10167_v61  ;;  %2752 = vmatmul.bf16.gmra.mxu1 %v10170_v25  ;;  %v1200_v61 = vunpack.c.l.b16 %v1071_v46  ;;  %v1702_v25 = vor.u32 %v1701_v11, %v1697_v2  ;;  %v1022_v48 = vpack.c.bf16 %v923_v13, %v923_v13  ;;  %v513_v30 = vld [vmem:[%s9534_s29 + $0x1e8] sm:$0xff]  ;;  %v1326_v46 = vunpack.c.l.b16 %v1073_v41 }
 0x124   : > { %v2629_v15 = vpop.f32.mrf.mxu2 }
 0x125   : > { %v2630_v31 = vadd.f32 %v9987_v23, %v2629_v15  ;;  %v10218_v17 = vpack.c.b16 %v1201_v16, %v1200_v61  ;;  %v10223_v2 = vsel %vm1359_vm3, %v1702_v25, %v1706_v44  ;;  %v1310_v36 = vunpack.c.l.b16 %v1022_v48 }
 0x126   : > { %v2798_v62 = vpop.f32.mrf.mxu3  ;;  %v2546_v28 = vpop.f32.mrf.mxu0  ;;  %14128 = vst [vmem:[#allocation102_spill] sm:$0xff] %v10223_v2  ;;  %v625_v16 = vrot.slane %v479_v55, 7 }
 0x127   : > { %v10207_v3 = vadd.f32 %v2798_v62, %v2630_v31  ;;  %v2547_v32 = vadd.f32 %v9987_v23, %v2546_v28  ;;  %v478_v31 = vld [vmem:[%s9534_s29 + $0xd0] sm:$0xff]  ;;  %v1514_v62 = vrot.slane %v1512_v5, 1  ;;  %v1169_v28 = vunpack.c.l.b16 %v1021_v59  ;;  %14127 = vst [vmem:[#allocation101_spill] sm:$0xff] %v10218_v17 }
 0x128   : > { %v2715_v15 = vpop.f32.mrf.mxu1  ;;  %v624_v38 = vrot.slane %v478_v31, 7  ;;  %v676_v5 = vrot.slane %v513_v30, 7  ;;  %v10234_v59 = vpack.c.b16 %v1326_v46, %v1326_v46  ;;  %v1711_v25 = vshll.u32 %v10218_v17, 16 }
 0x129   : > { %14126 = vst [vmem:[#allocation100_spill] sm:$0xff] %v10207_v3  ;;  %v10214_v50 = vadd.f32 %v2715_v15, %v2547_v32  ;;  %v1168_v3 = vunpack.c.l.b16 %v1020_v8  ;;  %v10226_v1 = vsel %vm1359_vm3, %v1510_v37, %v1514_v62  ;;  %v10244_v30 = vpack.c.b16 %v1310_v36, %v1310_v36 }
 0x12a   : > { %14129 = vst [vmem:[#allocation103_spill] sm:$0xff] %v10226_v1  ;;  %v793_v15 = vsel %vm582_vm0, 0.0, %v624_v38  ;;  %v1709_v44 = vshrl.u32 %v10218_v17, 16  ;;  %v626_v37 = vsel %vm582_vm0, %v624_v38, %v625_v16  ;;  %v1716_v46 = vshll.u32 %v10234_v59, 16 }
 0x12b   : > { %v10228_v7 = vpack.c.b16 %v1169_v28, %v1168_v3  ;;  %14131 = vst [vmem:[#allocation105_spill] sm:$0xff] %v10234_v59  ;;  %v677_v3 = vsel %vm582_vm0, %v675_v53, %v676_v5  ;;  %v924_v31 = vsel %vm849_vm1, %v9957_v0, %v793_v15  ;;  %v1713_v28 = vrot.slane %v1711_v25, 1 }
 0x12c   : > { %v2631_v21 = vpop.f32.mrf.mxu2  ;;  %14133 = vst [vmem:[#allocation107_spill] sm:$0xff] %v10244_v30  ;;  %v843_v55 = vsel %vm582_vm0, %v676_v5, 0.0  ;;  %v1023_v15 = vpack.c.bf16 %v924_v31, %v924_v31  ;;  %v1024_v25 = vpack.c.bf16 %v626_v37, %v626_v37  ;;  %v8709_v31 = vld [vmem:[#allocation8 + $0x80] sm:$0xff] }
 0x12d   : > { %v2632_v18 = vadd.f32 %v9987_v23, %v2631_v21  ;;  %v810_v21 = vsel %vm582_vm0, 0.0, %v675_v53  ;;  %v1519_v48 = vshll.u32 %v10228_v7, 16  ;;  %v826_v53 = vsel %vm582_vm0, %v625_v16, 0.0  ;;  %2865 = vmatpush.bf16.msrb.mxu2 %v8709_v31 }
 0x12e   : > { %v2800_v32 = vpop.f32.mrf.mxu3  ;;  %v2549_v11 = vpop.f32.mrf.mxu0  ;;  %v975_v56 = vsel %vm849_vm1, %v9957_v0, %v810_v21  ;;  %v1524_v21 = vshll.u32 %v10244_v30, 16  ;;  %v977_v16 = vsel %vm860_vm2, %v9957_v0, %v843_v55  ;;  %v1170_v37 = vunpack.c.l.b16 %v1023_v15 }
 0x12f   : > { %v10230_v8 = vadd.f32 %v2800_v32, %v2632_v18  ;;  %v2550_v61 = vadd.f32 %v9987_v23, %v2549_v11  ;;  %v1517_v11 = vshrl.u32 %v10228_v7, 16  ;;  %v1074_v36 = vpack.c.bf16 %v975_v56, %v975_v56 }
 0x130   : > { %v2718_v41 = vpop.f32.mrf.mxu1  ;;  %v1526_v55 = vrot.slane %v1524_v21, 1 }
 0x131   : > { %14130 = vst [vmem:[#allocation104_spill] sm:$0xff] %v10230_v8  ;;  %v10238_v13 = vadd.f32 %v2718_v41, %v2550_v61  ;;  %2588 = vmatmul.bf16.gmra.mxu0 %v10164_v49  ;;  %2673 = vmatmul.bf16.gmra.mxu2 %v10160_v39  ;;  %v1075_v61 = vpack.c.bf16 %v677_v3, %v677_v3  ;;  %v1521_v41 = vrot.slane %v1519_v48, 1  ;;  %v1202_v48 = vunpack.c.l.b16 %v1074_v36  ;;  %v8717_v8 = vld [vmem:[#allocation8 + $0xc0] sm:$0xff] }
 0x132   : > { %v926_v3 = vsel %vm860_vm2, %v9957_v0, %v826_v53  ;;  %v1714_v39 = vor.u32 %v1713_v28, %v1709_v44  ;;  %3034 = vmatpush.bf16.msrb.mxu3 %v8717_v8 }
 0x133   : > { %14132 = vst [vmem:[#allocation106_spill] sm:$0xff] %v10238_v13  ;;  %2842 = vmatmul.bf16.gmra.mxu3 %v10223_v2  ;;  %2757 = vmatmul.bf16.gmra.mxu1 %v10226_v1  ;;  %v1718_v1 = vrot.slane %v1716_v46, 1  ;;  %v1522_v30 = vor.u32 %v1521_v41, %v1517_v11  ;;  %v8725_v46 = vld [vmem:[#allocation8 + $0x100] sm:$0xff] }
 0x134   : > { %v2634_v62 = vpop.f32.mrf.mxu2  ;;  %v8737_v11 = vld [vmem:[#allocation8 + $0x160] sm:$0xff]  ;;  %3203 = vmatpush.bf16.msrb.mxu0 %v8725_v46 }
 0x135   : > { %v2635_v18 = vadd.f32 %v9987_v23, %v2634_v62  ;;  %v1203_v62 = vunpack.c.l.b16 %v1075_v61  ;;  %v481_v61 = vld [vmem:[%s9534_s29 + $0xe8] sm:$0xff]  ;;  %v10284_v8 = vsel %vm1359_vm3, %v1714_v39, %v1718_v1  ;;  %3368 = vmatpush.bf16.msrb.mxu1 %v8737_v11 }
 0x136   : > { %v2803_v32 = vpop.f32.mrf.mxu3  ;;  %v2551_v38 = vpop.f32.mrf.mxu0  ;;  %14138 = vst [vmem:[#allocation112_spill] sm:$0xff] %v10284_v8  ;;  %v628_v41 = vrot.slane %v481_v61, 7 }
 0x137   : > { %v10262_v2 = vadd.f32 %v2803_v32, %v2635_v18  ;;  %v2552_v5 = vadd.f32 %v9987_v23, %v2551_v38  ;;  %v1171_v18 = vunpack.c.l.b16 %v1024_v25  ;;  %v1076_v32 = vpack.c.bf16 %v977_v16, %v977_v16 }
 0x138   : > { %v2720_v59 = vpop.f32.mrf.mxu1  ;;  %v1025_v38 = vpack.c.bf16 %v926_v3, %v926_v3  ;;  %v10275_v36 = vpack.c.b16 %v1203_v62, %v1202_v48 }
 0x139   : > { %14134 = vst [vmem:[#allocation108_spill] sm:$0xff] %v10262_v2  ;;  %v10271_v56 = vadd.f32 %v2720_v59, %v2552_v5  ;;  %v480_v2 = vld [vmem:[%s9534_s29 + $0xe0] sm:$0xff]  ;;  %v10278_v15 = vpack.c.b16 %v1171_v18, %v1170_v37  ;;  %v1327_v25 = vunpack.c.l.b16 %v1076_v32 }
 0x13a   : > { %v627_v5 = vrot.slane %v480_v2, 7  ;;  %v1311_v16 = vunpack.c.l.b16 %v1025_v38  ;;  %v1723_v21 = vshll.u32 %v10275_v36, 16  ;;  %v1721_v32 = vshrl.u32 %v10275_v36, 16 }
 0x13b   : > { %14135 = vst [vmem:[#allocation109_spill] sm:$0xff] %v10271_v56  ;;  %v10297_v39 = vpack.c.b16 %v1327_v25, %v1327_v25  ;;  %v1529_v61 = vshrl.u32 %v10278_v15, 16 }
 0x13c   : > { %v2636_v13 = vpop.f32.mrf.mxu2  ;;  %14136 = vst [vmem:[#allocation110_spill] sm:$0xff] %v10278_v15  ;;  %v10299_v1 = vpack.c.b16 %v1311_v16, %v1311_v16  ;;  %v629_v62 = vsel %vm582_vm0, %v627_v5, %v628_v41  ;;  %v1725_v38 = vrot.slane %v1723_v21, 1 }
 0x13d   : > { %v2637_v59 = vadd.f32 %v9987_v23, %v2636_v13  ;;  %v10287_v13 = vsel %vm1359_vm3, %v1522_v30, %v1526_v55  ;;  %14139 = vst [vmem:[#allocation113_spill] sm:$0xff] %v10297_v39  ;;  %v1531_v30 = vshll.u32 %v10278_v15, 16  ;;  %v827_v55 = vsel %vm582_vm0, %v628_v41, 0.0 }
 0x13e   : > { %v2805_v53 = vpop.f32.mrf.mxu3  ;;  %v2554_v56 = vpop.f32.mrf.mxu0  ;;  %v1027_v11 = vpack.c.bf16 %v629_v62, %v629_v62  ;;  %v929_v21 = vsel %vm860_vm2, %v9957_v0, %v827_v55 }
 0x13f   : > { %v10280_v3 = vadd.f32 %v2805_v53, %v2637_v59  ;;  %v2555_v44 = vadd.f32 %v9987_v23, %v2554_v56  ;;  %v794_v56 = vsel %vm582_vm0, 0.0, %v627_v5  ;;  %v1728_v53 = vshll.u32 %v10297_v39, 16 }
 0x140   : > { %v2723_v28 = vpop.f32.mrf.mxu1  ;;  %v927_v31 = vsel %vm849_vm1, %v9957_v0, %v794_v56  ;;  %v1533_v25 = vrot.slane %v1531_v30, 1  ;;  %v1536_v5 = vshll.u32 %v10299_v1, 16  ;;  %v1726_v56 = vor.u32 %v1725_v38, %v1721_v32 }
 0x141   : > { %14137 = vst [vmem:[#allocation111_spill] sm:$0xff] %v10280_v3  ;;  %v10289_v2 = vadd.f32 %v2723_v28, %v2555_v44  ;;  %2593 = vmatmul.bf16.gmra.mxu0 %v10228_v7  ;;  %2678 = vmatmul.bf16.gmra.mxu2 %v10218_v17  ;;  %v1026_v46 = vpack.c.bf16 %v927_v31, %v927_v31  ;;  %v1173_v3 = vunpack.c.l.b16 %v1027_v11 }
 0x142   : > { %v1538_v39 = vrot.slane %v1536_v5, 1  ;;  %v1028_v17 = vpack.c.bf16 %v929_v21, %v929_v21 }
 0x143   : > { %2847 = vmatmul.bf16.gmra.mxu3 %v10284_v8  ;;  %2762 = vmatmul.bf16.gmra.mxu1 %v10287_v13  ;;  %v1534_v8 = vor.u32 %v1533_v25, %v1529_v61  ;;  %v1172_v30 = vunpack.c.l.b16 %v1026_v46  ;;  %v8736_v25 = vld [vmem:[#allocation8 + $0x158] sm:$0xff] }
 0x144   : > { %v2639_v48 = vpop.f32.mrf.mxu2  ;;  %3369 = vmatpush.bf16.msrb.mxu1 %v8736_v25 }
 0x145   : > { %v2640_v37 = vadd.f32 %v9987_v23, %v2639_v48  ;;  %v1730_v48 = vrot.slane %v1728_v53, 1  ;;  %v10325_v31 = vsel %vm1359_vm3, %v1534_v8, %v1538_v39  ;;  %v10330_v55 = vpack.c.b16 %v1173_v3, %v1172_v30  ;;  %v8735_v30 = vld [vmem:[#allocation8 + $0x150] sm:$0xff] }
 0x146   : > { %v2808_v18 = vpop.f32.mrf.mxu3  ;;  %v2556_v59 = vpop.f32.mrf.mxu0  ;;  %v1312_v53 = vunpack.c.l.b16 %v1028_v17 }
 0x147   : > { %v10312_v16 = vadd.f32 %v2808_v18, %v2640_v37  ;;  %v2557_v44 = vadd.f32 %v9987_v23, %v2556_v59  ;;  %v10322_v62 = vsel %vm1359_vm3, %v1726_v56, %v1730_v48  ;;  %v1543_v39 = vshll.u32 %v10330_v55, 16  ;;  %v8748_v48 = vld [vmem:[#allocation8 + $0x1b8] sm:$0xff] }
 0x148   : > { %v2725_v28 = vpop.f32.mrf.mxu1  ;;  %14141 = vst [vmem:[#allocation115_spill] sm:$0xff] %v10322_v62  ;;  %v10338_v8 = vpack.c.b16 %v1312_v53, %v1312_v53  ;;  %3534 = vmatpush.bf16.msra.mxu2 %v8748_v48  ;;  %3370 = vmatpush.bf16.msrb.mxu1 %v8735_v30 }
 0x149   : > { %14140 = vst [vmem:[#allocation114_spill] sm:$0xff] %v10312_v16  ;;  %v10318_v41 = vadd.f32 %v2725_v28, %v2557_v44  ;;  %v1541_v44 = vshrl.u32 %v10330_v55, 16  ;;  %v1545_v21 = vrot.slane %v1543_v39, 1 }
 0x14a   : > { %v1548_v56 = vshll.u32 %v10338_v8, 16 }
 0x14c   : > { %v2641_v37 = vpop.f32.mrf.mxu2 }
 0x14d   : > { %v2642_v18 = vadd.f32 %v9987_v23, %v2641_v37 }
 0x14e   : > { %v2810_v59 = vpop.f32.mrf.mxu3  ;;  %v2559_v16 = vpop.f32.mrf.mxu0 }
 0x14f   : > { %v10327_v0 = vadd.f32 %v2810_v59, %v2642_v18  ;;  %v2560_v32 = vadd.f32 %v9987_v23, %v2559_v16  ;;  %v8756_v18 = vld [vmem:[#allocation8 + $0x1f8] sm:$0xff]  ;;  %v1546_v59 = vor.u32 %v1545_v21, %v1541_v44  ;;  %v8733_v44 = vld [vmem:[#allocation8 + $0x140] sm:$0xff] }
 0x150   : > { %v2728_v38 = vpop.f32.mrf.mxu1  ;;  %3703 = vmatpush.bf16.msra.mxu3 %v8756_v18 }
 0x151   : > { %v10332_v61 = vadd.f32 %v2728_v38, %v2560_v32  ;;  %2598 = vmatmul.bf16.gmra.mxu0 %v10278_v15  ;;  %2683 = vmatmul.bf16.gmra.mxu2 %v10275_v36  ;;  %v1550_v32 = vrot.slane %v1548_v56, 1  ;;  %v8734_v38 = vld [vmem:[#allocation8 + $0x148] sm:$0xff]  ;;  %v8764_v56 = vld [vmem:[#allocation8 + $0x238] sm:$0xff] }
 0x152   : > { %3371 = vmatpush.bf16.msrb.mxu1 %v8734_v38  ;;  %3872 = vmatpush.bf16.msra.mxu0 %v8764_v56 }
 0x153   : > { %2852 = vmatmul.bf16.gmra.mxu3 %v10322_v62  ;;  %2767 = vmatmul.bf16.gmra.mxu1 %v10325_v31 }
 0x154   : > { %v2644_v5 = vpop.f32.mrf.mxu2 }
 0x155   : > { %v2645_v3 = vadd.f32 %v9987_v23, %v2644_v5 }
 0x156   : > { %v2813_v16 = vpop.f32.mrf.mxu3  ;;  %v2561_v17 = vpop.f32.mrf.mxu0  ;;  %3372 = vmatpush.bf16.msrb.mxu1 %v8733_v44 }
 0x157   : > { %v10343_v28 = vadd.f32 %v2813_v16, %v2645_v3  ;;  %v2562_v46 = vadd.f32 %v9987_v23, %v2561_v17  ;;  %v10351_v3 = vrot.slane %v9582_v35, 1 }
 0x158   : > { %v2730_v11 = vpop.f32.mrf.mxu1 }
 0x159   : > { %v10347_v37 = vadd.f32 %v2730_v11, %v2562_v46  ;;  %14142 = vst [vmem:[#allocation116_spill] sm:$0xff] %v10351_v3  ;;  %v10357_v11 = vsel %vm1359_vm3, %v1546_v59, %v1550_v32 }
 0x15c   : > { %v2646_v53 = vpop.f32.mrf.mxu2 }
 0x15d   : > { %v2647_v25 = vadd.f32 %v9987_v23, %v2646_v53 }
 0x15e   : > { %v2815_v5 = vpop.f32.mrf.mxu3  ;;  %v2564_v39 = vpop.f32.mrf.mxu0 }
 0x15f   : > { %v10353_v16 = vadd.f32 %v2815_v5, %v2647_v25  ;;  %v2565_v17 = vadd.f32 %v9987_v23, %v2564_v39  ;;  %v1767_v5 = vrot.slane %v9620_v27, 1  ;;  %v1768_v39 = vrot.slane %v9638_v43, 1 }
 0x160   : > { %v2733_v46 = vpop.f32.mrf.mxu1 }
 0x161   : > { %14143 = vst [vmem:[#allocation117_spill] sm:$0xff] %v10353_v16  ;;  %v10359_v21 = vadd.f32 %v2733_v46, %v2565_v17  ;;  %2603 = vmatmul.bf16.gmra.mxu0 %v10330_v55  ;;  %2866 = vmatmul.bf16.vlgmr.msrb.gmra.mxu2 %v10351_v3 }
 0x163   : > { %3035 = vmatmul.bf16.vlgmr.msrb.gmra.mxu3 %v9620_v27  ;;  %2772 = vmatmul.bf16.gmra.mxu1 %v10357_v11 }
 0x164   : > { %v2649_v48 = vpop.f32.mrf.mxu2 }
 0x165   : > { %v2650_v30 = vadd.f32 %v9987_v23, %v2649_v48  ;;  %v1769_v48 = vsel %vm1763_vm4, %v1767_v5, %v1768_v39 }
 0x166   : > { %v2818_v18 = vpop.f32.mrf.mxu3  ;;  %v2566_v59 = vpop.f32.mrf.mxu0 }
 0x167   : > { %v10366_v32 = vadd.f32 %v2818_v18, %v2650_v30  ;;  %v2567_v38 = vadd.f32 %v9987_v23, %v2566_v59 }
 0x168   : > { %v2735_v53 = vpop.f32.mrf.mxu1 }
 0x169   : > { %14144 = vst [vmem:[#allocation118_spill] sm:$0xff] %v10366_v32  ;;  %v10369_v25 = vadd.f32 %v2735_v53, %v2567_v38 }
 0x16c   : > { %v2651_v17 = vpop.f32.mrf.mxu2 }
 0x16d   : > { %v2652_v46 = vadd.f32 %v9987_v23, %v2651_v17 }
 0x16e   : > { %v2820_v44 = vpop.f32.mrf.mxu3  ;;  %v2569_v56 = vpop.f32.mrf.mxu0 }
 0x16f   : > { %v10375_v62 = vadd.f32 %v2820_v44, %v2652_v46  ;;  %v2570_v30 = vadd.f32 %v9987_v23, %v2569_v56  ;;  %v1770_v44 = vrot.slane %v9666_v19, 1  ;;  %v1771_v56 = vrot.slane %v9684_v40, 1 }
 0x170   : > { %v2738_v18 = vpop.f32.mrf.mxu1 }
 0x171   : > { %14145 = vst [vmem:[#allocation119_spill] sm:$0xff] %v10375_v62  ;;  %v10378_v59 = vadd.f32 %v2738_v18, %v2570_v30  ;;  %2608 = vmatmul.bf16.gmra.mxu0 %v9582_v35  ;;  %2871 = vmatmul.bf16.gmra.mxu2 %v1769_v48 }
 0x173   : > { %3040 = vmatmul.bf16.gmra.mxu3 %v9666_v19  ;;  %2777 = vmatmul.bf16.gmra.mxu1 %v9618_v26 }
 0x174   : > { %v2654_v27 = vpop.f32.mrf.mxu2 }
 0x175   : > { %v2655_v43 = vadd.f32 %v9987_v23, %v2654_v27  ;;  %v10393_v27 = vsel %vm1763_vm4, %v1770_v44, %v1771_v56 }
 0x176   : > { %v2823_v38 = vpop.f32.mrf.mxu3  ;;  %v2571_v53 = vpop.f32.mrf.mxu0  ;;  %14147 = vst [vmem:[#allocation121_spill] sm:$0xff] %v10393_v27 }
 0x177   : > { %v10384_v5 = vadd.f32 %v2823_v38, %v2655_v43  ;;  %v2572_v39 = vadd.f32 %v9987_v23, %v2571_v53  ;;  %v10400_v43 = vld [vmem:[%s13665_s3] ss:$0 sm:$0xff] }
 0x178   : > { %v2740_v17 = vpop.f32.mrf.mxu1 }
 0x179   : > { %14146 = vst [vmem:[#allocation120_spill] sm:$0xff] %v10384_v5  ;;  %v10387_v46 = vadd.f32 %v2740_v17, %v2572_v39 }
 0x17c   : > { %v2656_v30 = vpop.f32.mrf.mxu2 }
 0x17d   : > { %v2657_v18 = vadd.f32 %v9987_v23, %v2656_v30 }
 0x17e   : > { %v2825_v26 = vpop.f32.mrf.mxu3  ;;  %v2574_v35 = vpop.f32.mrf.mxu0 }
 0x17f   : > { %v10395_v62 = vadd.f32 %v2825_v26, %v2657_v18  ;;  %v2575_v38 = vadd.f32 %v10400_v43, %v2574_v35  ;;  %v1773_v18 = vrot.slane %v9712_v20, 1 }
 0x180   : > { %v2743_v53 = vpop.f32.mrf.mxu1 }
 0x181   : > { %14148 = vst [vmem:[#allocation122_spill] sm:$0xff] %v10395_v62  ;;  %v10403_v39 = vadd.f32 %v2743_v53, %v2575_v38  ;;  %2876 = vmatmul.bf16.gmra.mxu2 %v10393_v27  ;;  %3204 = vmatmul.bf16.vlgmr.msrb.gmra.mxu0 %v9669_v22  ;;  %v1774_v38 = vrot.slane %v9731_v45, 1 }
 0x183   : > { %3045 = vmatmul.bf16.gmra.mxu3 %v9712_v20  ;;  %3373 = vmatmul.bf16.vlgmr.msrb.gmra.mxu1 %v1769_v48 }
 0x184   : > { %v2659_v40 = vpop.f32.mrf.mxu2 }
 0x185   : > { %v2660_v26 = vadd.f32 %v10400_v43, %v2659_v40  ;;  %v10418_v40 = vsel %vm1763_vm4, %v1773_v18, %v1774_v38 }
 0x186   : > { %v2828_v23 = vpop.f32.mrf.mxu3  ;;  %v2576_v17 = vpop.f32.mrf.mxu0  ;;  %14150 = vst [vmem:[#allocation124_spill] sm:$0xff] %v10418_v40 }
 0x187   : > { %v10409_v44 = vadd.f32 %v2828_v23, %v2660_v26  ;;  %v2577_v56 = vadd.f32 %v10400_v43, %v2576_v17 }
 0x188   : > { %v2745_v35 = vpop.f32.mrf.mxu1 }
 0x189   : > { %14149 = vst [vmem:[#allocation123_spill] sm:$0xff] %v10409_v44  ;;  %v10412_v30 = vadd.f32 %v2745_v35, %v2577_v56 }
 0x18c   : > { %v2661_v22 = vpop.f32.mrf.mxu2 }
 0x18d   : > { %v2662_v53 = vadd.f32 %v10400_v43, %v2661_v22 }
 0x18e   : > { %v2830_v48 = vpop.f32.mrf.mxu3  ;;  %v2579_v62 = vpop.f32.mrf.mxu0 }
 0x18f   : > { %v10420_v5 = vadd.f32 %v2830_v48, %v2662_v53  ;;  %v2580_v26 = vadd.f32 %v10400_v43, %v2579_v62  ;;  %v8747_v53 = vld [vmem:[#allocation8 + $0x1b0] sm:$0xff] }
 0x190   : > { %v2748_v23 = vpop.f32.mrf.mxu1  ;;  %3535 = vmatpush.bf16.msra.mxu2 %v8747_v53 }
 0x191   : > { %14151 = vst [vmem:[#allocation125_spill] sm:$0xff] %v10420_v5  ;;  %v10423_v17 = vadd.f32 %v2748_v23, %v2580_v26  ;;  %2881 = vmatmul.bf16.gmra.mxu2 %v10418_v40  ;;  %3209 = vmatmul.bf16.gmra.mxu0 %v9715_v24  ;;  %v8755_v26 = vld [vmem:[#allocation8 + $0x1f0] sm:$0xff]  ;;  %v1776_v23 = vrot.slane %v9755_v33, 1  ;;  %v1777_v5 = vrot.slane %v9772_v51, 1 }
 0x192   : > { %3704 = vmatpush.bf16.msra.mxu3 %v8755_v26  ;;  %v8763_v51 = vld [vmem:[#allocation8 + $0x230] sm:$0xff] }
 0x193   : > { %3050 = vmatmul.bf16.gmra.mxu3 %v9755_v33  ;;  %3378 = vmatmul.bf16.gmra.mxu1 %v10393_v27 }
 0x194   : > { %v2664_v45 = vpop.f32.mrf.mxu2  ;;  %3873 = vmatpush.bf16.msra.mxu0 %v8763_v51 }
 0x195   : > { %v2665_v56 = vadd.f32 %v10400_v43, %v2664_v45 }
 0x196   : > { %v2833_v35 = vpop.f32.mrf.mxu3  ;;  %v2581_v18 = vpop.f32.mrf.mxu0 }
 0x197   : > { %v10430_v38 = vadd.f32 %v2833_v35, %v2665_v56  ;;  %v2582_v62 = vadd.f32 %v10400_v43, %v2581_v18  ;;  %v10439_v56 = vsel %vm1763_vm4, %v1776_v23, %v1777_v5 }
 0x198   : > { %v2750_v22 = vpop.f32.mrf.mxu1  ;;  %14153 = vst [vmem:[#allocation127_spill] sm:$0xff] %v10439_v56 }
 0x199   : > { %14152 = vst [vmem:[#allocation126_spill] sm:$0xff] %v10430_v38  ;;  %v10433_v48 = vadd.f32 %v2750_v22, %v2582_v62 }
 0x19c   : > { %v2666_v44 = vpop.f32.mrf.mxu2 }
 0x19d   : > { %v2667_v45 = vadd.f32 %v10400_v43, %v2666_v44 }
 0x19e   : > { %v2835_v27 = vpop.f32.mrf.mxu3  ;;  %v2584_v20 = vpop.f32.mrf.mxu0 }
 0x19f   : > { %v10441_v35 = vadd.f32 %v2835_v27, %v2667_v45  ;;  %v2585_v18 = vadd.f32 %v10400_v43, %v2584_v20 }
 0x1a0   : > { %v2753_v62 = vpop.f32.mrf.mxu1 }
 0x1a1   : > { %14154 = vst [vmem:[#allocation128_spill] sm:$0xff] %v10441_v35  ;;  %v10444_v22 = vadd.f32 %v2753_v62, %v2585_v18  ;;  %2886 = vmatmul.bf16.gmra.mxu2 %v10439_v56  ;;  %3214 = vmatmul.bf16.gmra.mxu0 %v9761_v42  ;;  %v1779_v18 = vrot.slane %v9807_v60, 1  ;;  %v1780_v62 = vrot.slane %v9822_v9, 1 }
 0x1a3   : > { %3055 = vmatmul.bf16.gmra.mxu3 %v9807_v60  ;;  %3383 = vmatmul.bf16.gmra.mxu1 %v10418_v40 }
 0x1a4   : > { %v2669_v44 = vpop.f32.mrf.mxu2 }
 0x1a5   : > { %v2670_v5 = vadd.f32 %v10400_v43, %v2669_v44  ;;  %v10460_v44 = vsel %vm1763_vm4, %v1779_v18, %v1780_v62 }
 0x1a6   : > { %v2838_v27 = vpop.f32.mrf.mxu3  ;;  %v2586_v53 = vpop.f32.mrf.mxu0  ;;  %14156 = vst [vmem:[#allocation130_spill] sm:$0xff] %v10460_v44 }
 0x1a7   : > { %v10451_v26 = vadd.f32 %v2838_v27, %v2670_v5  ;;  %v2587_v20 = vadd.f32 %v10400_v43, %v2586_v53 }
 0x1a8   : > { %v2755_v23 = vpop.f32.mrf.mxu1 }
 0x1a9   : > { %14155 = vst [vmem:[#allocation129_spill] sm:$0xff] %v10451_v26  ;;  %v10454_v45 = vadd.f32 %v2755_v23, %v2587_v20 }
 0x1ac   : > { %v2671_v35 = vpop.f32.mrf.mxu2 }
 0x1ad   : > { %v2672_v38 = vadd.f32 %v10400_v43, %v2671_v35 }
 0x1ae   : > { %v2840_v40 = vpop.f32.mrf.mxu3  ;;  %v2589_v51 = vpop.f32.mrf.mxu0 }
 0x1af   : > { %v10462_v33 = vadd.f32 %v2840_v40, %v2672_v38  ;;  %v2590_v5 = vadd.f32 %v10400_v43, %v2589_v51  ;;  %v1782_v51 = vrot.slane %v9847_v47, 1 }
 0x1b0   : > { %v2758_v27 = vpop.f32.mrf.mxu1 }
 0x1b1   : > { %14157 = vst [vmem:[#allocation131_spill] sm:$0xff] %v10462_v33  ;;  %v10465_v53 = vadd.f32 %v2758_v27, %v2590_v5  ;;  %2891 = vmatmul.bf16.gmra.mxu2 %v10460_v44  ;;  %3219 = vmatmul.bf16.gmra.mxu0 %v9805_v57  ;;  %v1783_v5 = vrot.slane %v9869_v58, 1 }
 0x1b3   : > { %3060 = vmatmul.bf16.gmra.mxu3 %v9847_v47  ;;  %3388 = vmatmul.bf16.gmra.mxu1 %v10439_v56 }
 0x1b4   : > { %v2674_v9 = vpop.f32.mrf.mxu2 }
 0x1b5   : > { %v2675_v35 = vadd.f32 %v10400_v43, %v2674_v9  ;;  %v10481_v9 = vsel %vm1763_vm4, %v1782_v51, %v1783_v5 }
 0x1b6   : > { %v2843_v20 = vpop.f32.mrf.mxu3  ;;  %v2591_v23 = vpop.f32.mrf.mxu0  ;;  %14159 = vst [vmem:[#allocation133_spill] sm:$0xff] %v10481_v9 }
 0x1b7   : > { %v10472_v40 = vadd.f32 %v2843_v20, %v2675_v35  ;;  %v2592_v38 = vadd.f32 %v10400_v43, %v2591_v23 }
 0x1b8   : > { %v2760_v18 = vpop.f32.mrf.mxu1 }
 0x1b9   : > { %14158 = vst [vmem:[#allocation132_spill] sm:$0xff] %v10472_v40  ;;  %v10475_v62 = vadd.f32 %v2760_v18, %v2592_v38 }
 0x1bc   : > { %v2676_v27 = vpop.f32.mrf.mxu2 }
 0x1bd   : > { %v2677_v33 = vadd.f32 %v10400_v43, %v2676_v27  ;;  %v1785_v27 = vrot.slane %v9893_v63, 1 }
 0x1be   : > { %v2845_v26 = vpop.f32.mrf.mxu3  ;;  %v2594_v56 = vpop.f32.mrf.mxu0 }
 0x1bf   : > { %v10483_v60 = vadd.f32 %v2845_v26, %v2677_v33  ;;  %v2595_v35 = vadd.f32 %v10400_v43, %v2594_v56 }
 0x1c0   : > { %v2763_v20 = vpop.f32.mrf.mxu1 }
 0x1c1   : > { %14160 = vst [vmem:[#allocation134_spill] sm:$0xff] %v10483_v60  ;;  %v10486_v23 = vadd.f32 %v2763_v20, %v2595_v35  ;;  %2896 = vmatmul.bf16.gmra.mxu2 %v10481_v9  ;;  %3224 = vmatmul.bf16.gmra.mxu0 %v9854_v29  ;;  %v1786_v35 = vrot.slane %v9910_v14, 1 }
 0x1c3   : > { %3065 = vmatmul.bf16.gmra.mxu3 %v9893_v63  ;;  %3393 = vmatmul.bf16.gmra.mxu1 %v10460_v44 }
 0x1c4   : > { %v2679_v58 = vpop.f32.mrf.mxu2 }
 0x1c5   : > { %v2680_v38 = vadd.f32 %v10400_v43, %v2679_v58  ;;  %v10502_v58 = vsel %vm1763_vm4, %v1785_v27, %v1786_v35  ;;  %v8746_v35 = vld [vmem:[#allocation8 + $0x1a8] sm:$0xff] }
 0x1c6   : > { %v2848_v18 = vpop.f32.mrf.mxu3  ;;  %v2596_v51 = vpop.f32.mrf.mxu0  ;;  %14162 = vst [vmem:[#allocation136_spill] sm:$0xff] %v10502_v58  ;;  %3536 = vmatpush.bf16.msra.mxu2 %v8746_v35 }
 0x1c7   : > { %v10493_v33 = vadd.f32 %v2848_v18, %v2680_v38  ;;  %v2597_v56 = vadd.f32 %v10400_v43, %v2596_v51 }
 0x1c8   : > { %v2765_v26 = vpop.f32.mrf.mxu1 }
 0x1c9   : > { %14161 = vst [vmem:[#allocation135_spill] sm:$0xff] %v10493_v33  ;;  %v10496_v5 = vadd.f32 %v2765_v26, %v2597_v56 }
 0x1cc   : > { %v2681_v20 = vpop.f32.mrf.mxu2 }
 0x1cd   : > { %v2682_v60 = vadd.f32 %v10400_v43, %v2681_v20 }
 0x1ce   : > { %v2850_v40 = vpop.f32.mrf.mxu3  ;;  %v2599_v44 = vpop.f32.mrf.mxu0 }
 0x1cf   : > { %v10504_v47 = vadd.f32 %v2850_v40, %v2682_v60  ;;  %v2600_v38 = vadd.f32 %v10400_v43, %v2599_v44 }
 0x1d0   : > { %v2768_v18 = vpop.f32.mrf.mxu1 }
 0x1d1   : > { %14163 = vst [vmem:[#allocation137_spill] sm:$0xff] %v10504_v47  ;;  %v10507_v51 = vadd.f32 %v2768_v18, %v2600_v38  ;;  %2901 = vmatmul.bf16.gmra.mxu2 %v10502_v58  ;;  %3229 = vmatmul.bf16.gmra.mxu0 %v9899_v10  ;;  %v8754_v38 = vld [vmem:[#allocation8 + $0x1e8] sm:$0xff]  ;;  %v1788_v18 = vrot.slane %v9945_v54, 1  ;;  %v1789_v47 = vrot.slane %v9963_v12, 1  ;;  %v14167_v12 = vld [vmem:[#allocation65_spill] sm:$0xff] }
 0x1d2   : > { %3705 = vmatpush.bf16.msra.mxu3 %v8754_v38  ;;  %v14170_v10 = vld [vmem:[#allocation71_spill] sm:$0xff] }
 0x1d3   : > { %3070 = vmatmul.bf16.gmra.mxu3 %v9945_v54  ;;  %3398 = vmatmul.bf16.gmra.mxu1 %v10481_v9  ;;  %v14169_v54 = vld [vmem:[#allocation69_spill] sm:$0xff] }
 0x1d4   : > { %v2684_v14 = vpop.f32.mrf.mxu2 }
 0x1d5   : > { %v2685_v56 = vadd.f32 %v10400_v43, %v2684_v14 }
 0x1d6   : > { %v2853_v26 = vpop.f32.mrf.mxu3  ;;  %v2601_v27 = vpop.f32.mrf.mxu0 }
 0x1d7   : > { %v10514_v60 = vadd.f32 %v2853_v26, %v2685_v56  ;;  %v2602_v44 = vadd.f32 %v10400_v43, %v2601_v27  ;;  %v10523_v56 = vsel %vm1763_vm4, %v1788_v18, %v1789_v47  ;;  %v14168_v47 = vld [vmem:[#allocation68_spill] sm:$0xff] }
 0x1d8   : > { %v2770_v40 = vpop.f32.mrf.mxu1  ;;  %14165 = vst [vmem:[#allocation139_spill] sm:$0xff] %v10523_v56 }
 0x1d9   : > { %14164 = vst [vmem:[#allocation138_spill] sm:$0xff] %v10514_v60  ;;  %v10517_v20 = vadd.f32 %v2770_v40, %v2602_v44  ;;  %v1791_v60 = vrot.slane %v14167_v12, 1 }
 0x1dc   : > { %v2686_v33 = vpop.f32.mrf.mxu2 }
 0x1dd   : > { %v2687_v14 = vadd.f32 %v10400_v43, %v2686_v33  ;;  %v8762_v33 = vld [vmem:[#allocation8 + $0x228] sm:$0xff] }
 0x1de   : > { %v2855_v9 = vpop.f32.mrf.mxu3  ;;  %v2604_v63 = vpop.f32.mrf.mxu0  ;;  %3874 = vmatpush.bf16.msra.mxu0 %v8762_v33 }
 0x1df   : > { %v10525_v26 = vadd.f32 %v2855_v9, %v2687_v14  ;;  %v2605_v27 = vadd.f32 %v10400_v43, %v2604_v63 }
 0x1e0   : > { %v2773_v44 = vpop.f32.mrf.mxu1 }
 0x1e1   : > { %14166 = vst [vmem:[#allocation140_spill] sm:$0xff] %v10525_v26  ;;  %v10528_v40 = vadd.f32 %v2773_v44, %v2605_v27  ;;  %2906 = vmatmul.bf16.gmra.mxu2 %v10523_v56  ;;  %3234 = vmatmul.bf16.gmra.mxu0 %v9941_v34  ;;  %v8772_v26 = vld [vmem:[#allocation9 + $0x38] sm:$0xff]  ;;  %v1792_v34 = vrot.slane %v14169_v54, 1  ;;  %v14173_v54 = vld [vmem:[#allocation78_spill] sm:$0xff] }
 0x1e2   : > { %6032 = vmatpush.bf16.msra.mxu1 %v8772_v26 }
 0x1e3   : > { %3075 = vmatmul.bf16.gmra.mxu3 %v14167_v12  ;;  %3403 = vmatmul.bf16.gmra.mxu1 %v10502_v58 }
 0x1e4   : > { %v2867_v35 = vpop.f32.mrf.mxu2 }
 0x1e5   : > { %v2868_v38 = vadd.f32 %v2867_v35, %v14168_v47  ;;  %v10542_v35 = vsel %vm1763_vm4, %v1791_v60, %v1792_v34 }
 0x1e6   : > { %v3036_v9 = vpop.f32.mrf.mxu3  ;;  %v2606_v18 = vpop.f32.mrf.mxu0  ;;  %14171 = vst [vmem:[#allocation68_spill] sm:$0xff] %v10542_v35 }
 0x1e7   : > { %v3037_v14 = vadd.f32 %v3036_v9, %v2868_v38  ;;  %v2607_v63 = vadd.f32 %v10400_v43, %v2606_v18 }
 0x1e8   : > { %v2775_v27 = vpop.f32.mrf.mxu1 }
 0x1e9   : > { %v10536_v44 = vadd.f32 %v2775_v27, %v2607_v63  ;;  %v14172_v63 = vld [vmem:[#allocation66_spill] sm:$0xff] }
 0x1ec   : > { %v2869_v58 = vpop.f32.mrf.mxu2 }
 0x1ed   : > { %v2870_v29 = vadd.f32 %v2869_v58, %v14170_v10 }
 0x1ee   : > { %v3038_v33 = vpop.f32.mrf.mxu3  ;;  %v2609_v57 = vpop.f32.mrf.mxu0 }
 0x1ef   : > { %v3039_v47 = vadd.f32 %v3038_v33, %v2870_v29  ;;  %v2610_v38 = vadd.f32 %v10400_v43, %v2609_v57  ;;  %v1794_v33 = vrot.slane %v10048_v52, 1 }
 0x1f0   : > { %v2778_v9 = vpop.f32.mrf.mxu1 }
 0x1f1   : > { %v10545_v18 = vadd.f32 %v2778_v9, %v2610_v38  ;;  %2911 = vmatmul.bf16.gmra.mxu2 %v10542_v35  ;;  %3239 = vmatmul.bf16.gmra.mxu0 %v14172_v63  ;;  %v14174_v38 = vld [vmem:[#allocation79_spill] sm:$0xff]  ;;  %v14175_v63 = vld [vmem:[#allocation81_spill] sm:$0xff] }
 0x1f2   : > { %v1795_v9 = vrot.slane %v14174_v38, 1 }
 0x1f3   : > { %3080 = vmatmul.bf16.gmra.mxu3 %v10048_v52  ;;  %3408 = vmatmul.bf16.gmra.mxu1 %v10523_v56 }
 0x1f4   : > { %v2872_v10 = vpop.f32.mrf.mxu2  ;;  %v10559_v24 = vsel %vm1763_vm4, %v1794_v33, %v1795_v9 }
 0x1f5   : > { %v2873_v58 = vadd.f32 %v2872_v10, %v14173_v54  ;;  %14176 = vst [vmem:[#allocation69_spill] sm:$0xff] %v10559_v24 }
 0x1f6   : > { %v3041_v26 = vpop.f32.mrf.mxu3  ;;  %v2611_v34 = vpop.f32.mrf.mxu0 }
 0x1f7   : > { %v3042_v60 = vadd.f32 %v3041_v26, %v2873_v58  ;;  %v2612_v29 = vadd.f32 %v10400_v43, %v2611_v34  ;;  %v14178_v43 = vld [vmem:[#allocation76_spill] sm:$0xff]  ;;  %v14179_v34 = vld [vmem:[#allocation83_spill] sm:$0xff] }
 0x1f8   : > { %v2780_v57 = vpop.f32.mrf.mxu1 }
 0x1f9   : > { %v10553_v27 = vadd.f32 %v2780_v57, %v2612_v29 }
 0x1fc   : > { %v2874_v12 = vpop.f32.mrf.mxu2 }
 0x1fd   : > { %v2875_v42 = vadd.f32 %v2874_v12, %v14175_v63  ;;  %v14180_v12 = vld [vmem:[#allocation88_spill] sm:$0xff] }
 0x1fe   : > { %v3043_v32 = vpop.f32.mrf.mxu3  ;;  %v3205_v56 = vpop.f32.mrf.mxu0 }
 0x1ff   : > { %v3044_v10 = vadd.f32 %v3043_v32, %v2875_v42  ;;  %v3206_v54 = vadd.f32 %v3205_v56, %v3037_v14  ;;  %v1797_v56 = vrot.slane %v14179_v34, 1  ;;  %v14181_v14 = vld [vmem:[#allocation89_spill] sm:$0xff] }
 0x200   : > { %v3374_v58 = vpop.f32.mrf.mxu1 }
 0x201   : > { %v10561_v26 = vadd.f32 %v3374_v58, %v3206_v54  ;;  %2916 = vmatmul.bf16.gmra.mxu2 %v10559_v24  ;;  %3244 = vmatmul.bf16.gmra.mxu0 %v14178_v43  ;;  %v1798_v54 = vrot.slane %v14181_v14, 1 }
 0x203   : > { %14177 = vst [vmem:[#allocation71_spill] sm:$0xff] %v10561_v26  ;;  %3085 = vmatmul.bf16.gmra.mxu3 %v14179_v34  ;;  %3413 = vmatmul.bf16.gmra.mxu1 %v10542_v35  ;;  %v14182_v26 = vld [vmem:[#allocation91_spill] sm:$0xff]  ;;  %v10574_v35 = vsel %vm1763_vm4, %v1797_v56, %v1798_v54 }
 0x204   : > { %v2877_v29 = vpop.f32.mrf.mxu2  ;;  %14183 = vst [vmem:[#allocation78_spill] sm:$0xff] %v10574_v35  ;;  %v14188_v54 = vld [vmem:[#allocation99_spill] sm:$0xff] }
 0x205   : > { %v2878_v63 = vadd.f32 %v2877_v29, %v14180_v12 }
 0x206   : > { %v3046_v57 = vpop.f32.mrf.mxu3  ;;  %v3207_v38 = vpop.f32.mrf.mxu0 }
 0x207   : > { %v3047_v33 = vadd.f32 %v3046_v57, %v2878_v63  ;;  %v3208_v9 = vadd.f32 %v3207_v38, %v3039_v47  ;;  %v14185_v47 = vld [vmem:[#allocation85_spill] sm:$0xff] }
 0x208   : > { %v3376_v42 = vpop.f32.mrf.mxu1 }
 0x209   : > { %v10568_v32 = vadd.f32 %v3376_v42, %v3208_v9 }
 0x20c   : > { %v2879_v58 = vpop.f32.mrf.mxu2 }
 0x20d   : > { %v2880_v52 = vadd.f32 %v2879_v58, %v14182_v26  ;;  %v14186_v26 = vld [vmem:[#allocation98_spill] sm:$0xff]  ;;  %v1801_v58 = vrot.slane %v14188_v54, 1 }
 0x20e   : > { %v3048_v43 = vpop.f32.mrf.mxu3  ;;  %v3210_v19 = vpop.f32.mrf.mxu0 }
 0x20f   : > { %v3049_v29 = vadd.f32 %v3048_v43, %v2880_v52  ;;  %v3211_v12 = vadd.f32 %v3210_v19, %v3042_v60  ;;  %v8745_v19 = vld [vmem:[#allocation8 + $0x1a0] sm:$0xff]  ;;  %v1800_v43 = vrot.slane %v10164_v49, 1 }
 0x210   : > { %v3379_v16 = vpop.f32.mrf.mxu1  ;;  %3537 = vmatpush.bf16.msra.mxu2 %v8745_v19  ;;  %v14192_v19 = vld [vmem:[#allocation106_spill] sm:$0xff] }
 0x211   : > { %v10576_v63 = vadd.f32 %v3379_v16, %v3211_v12  ;;  %2921 = vmatmul.bf16.gmra.mxu2 %v10574_v35  ;;  %3249 = vmatmul.bf16.gmra.mxu0 %v14185_v47  ;;  %v8753_v16 = vld [vmem:[#allocation8 + $0x1e0] sm:$0xff] }
 0x212   : > { %3706 = vmatpush.bf16.msra.mxu3 %v8753_v16 }
 0x213   : > { %14184 = vst [vmem:[#allocation79_spill] sm:$0xff] %v10576_v63  ;;  %3090 = vmatmul.bf16.gmra.mxu3 %v10164_v49  ;;  %3418 = vmatmul.bf16.gmra.mxu1 %v10559_v24 }
 0x214   : > { %v2882_v57 = vpop.f32.mrf.mxu2 }
 0x215   : > { %v2883_v38 = vadd.f32 %v2882_v57, %v14186_v26  ;;  %v10589_v26 = vsel %vm1763_vm4, %v1800_v43, %v1801_v58 }
 0x216   : > { %v3051_v9 = vpop.f32.mrf.mxu3  ;;  %v3212_v42 = vpop.f32.mrf.mxu0  ;;  %14189 = vst [vmem:[#allocation83_spill] sm:$0xff] %v10589_v26 }
 0x217   : > { %v3052_v56 = vadd.f32 %v3051_v9, %v2883_v38  ;;  %v3213_v14 = vadd.f32 %v3212_v42, %v3044_v10 }
 0x218   : > { %v3381_v52 = vpop.f32.mrf.mxu1 }
 0x219   : > { %v10583_v60 = vadd.f32 %v3381_v52, %v3213_v14  ;;  %v14191_v14 = vld [vmem:[#allocation95_spill] sm:$0xff]  ;;  %v8761_v52 = vld [vmem:[#allocation8 + $0x220] sm:$0xff] }
 0x21a   : > { %3875 = vmatpush.bf16.msra.mxu0 %v8761_v52 }
 0x21b   : > { %14187 = vst [vmem:[#allocation81_spill] sm:$0xff] %v10583_v60 }
 0x21c   : > { %v2884_v12 = vpop.f32.mrf.mxu2 }
 0x21d   : > { %v2885_v63 = vadd.f32 %v2884_v12, %v10214_v50  ;;  %v8771_v12 = vld [vmem:[#allocation9 + $0x30] sm:$0xff] }
 0x21e   : > { %v3053_v24 = vpop.f32.mrf.mxu3  ;;  %v3215_v57 = vpop.f32.mrf.mxu0  ;;  %6033 = vmatpush.bf16.msra.mxu1 %v8771_v12 }
 0x21f   : > { %v3054_v10 = vadd.f32 %v3053_v24, %v2885_v63  ;;  %v3216_v38 = vadd.f32 %v3215_v57, %v3047_v33  ;;  %v1803_v57 = vrot.slane %v10228_v7, 1 }
 0x220   : > { %v3384_v9 = vpop.f32.mrf.mxu1 }
 0x221   : > { %v10591_v42 = vadd.f32 %v3384_v9, %v3216_v38  ;;  %2926 = vmatmul.bf16.gmra.mxu2 %v10589_v26  ;;  %3254 = vmatmul.bf16.gmra.mxu0 %v14191_v14  ;;  %v14194_v38 = vld [vmem:[#allocation107_spill] sm:$0xff] }
 0x222   : > { %v1804_v9 = vrot.slane %v14194_v38, 1  ;;  %v1806_v38 = vrot.slane %v10278_v15, 1 }
 0x223   : > { %14190 = vst [vmem:[#allocation88_spill] sm:$0xff] %v10591_v42  ;;  %3095 = vmatmul.bf16.gmra.mxu3 %v10228_v7  ;;  %3423 = vmatmul.bf16.gmra.mxu1 %v10574_v35  ;;  %v14195_v35 = vld [vmem:[#allocation109_spill] sm:$0xff] }
 0x224   : > { %v2887_v50 = vpop.f32.mrf.mxu2 }
 0x225   : > { %v2888_v16 = vadd.f32 %v2887_v50, %v14192_v19  ;;  %v10604_v50 = vsel %vm1763_vm4, %v1803_v57, %v1804_v9  ;;  %v482_v57 = vld [vmem:[%s9534_s29 + $0xf0] sm:$0xff]  ;;  %v1807_v9 = vrot.slane %v10299_v1, 1 }
 0x226   : > { %v3056_v43 = vpop.f32.mrf.mxu3  ;;  %v3217_v54 = vpop.f32.mrf.mxu0  ;;  %14196 = vst [vmem:[#allocation91_spill] sm:$0xff] %v10604_v50 }
 0x227   : > { %v3057_v24 = vadd.f32 %v3056_v43, %v2888_v16  ;;  %v3218_v33 = vadd.f32 %v3217_v54, %v3049_v29  ;;  %v14198_v54 = vld [vmem:[#allocation103_spill] sm:$0xff] }
 0x228   : > { %v3386_v63 = vpop.f32.mrf.mxu1 }
 0x229   : > { %v10598_v58 = vadd.f32 %v3386_v63, %v3218_v33 }
 0x22b   : > { %14193 = vst [vmem:[#allocation89_spill] sm:$0xff] %v10598_v58 }
 0x22c   : > { %v2889_v42 = vpop.f32.mrf.mxu2 }
 0x22d   : > { %v2890_v60 = vadd.f32 %v2889_v42, %v14195_v35 }
 0x22e   : > { %v3058_v49 = vpop.f32.mrf.mxu3  ;;  %v3220_v52 = vpop.f32.mrf.mxu0 }
 0x22f   : > { %v3059_v19 = vadd.f32 %v3058_v49, %v2890_v60  ;;  %v3221_v29 = vadd.f32 %v3220_v52, %v3052_v56 }
 0x230   : > { %v3389_v16 = vpop.f32.mrf.mxu1 }
 0x231   : > { %v10606_v43 = vadd.f32 %v3389_v16, %v3221_v29  ;;  %2931 = vmatmul.bf16.gmra.mxu2 %v10604_v50  ;;  %3259 = vmatmul.bf16.gmra.mxu0 %v14198_v54  ;;  %v483_v29 = vld [vmem:[%s9534_s29 + $0xf8] sm:$0xff]  ;;  %v630_v16 = vrot.slane %v482_v57, 7 }
 0x233   : > { %14197 = vst [vmem:[#allocation85_spill] sm:$0xff] %v10606_v43  ;;  %3100 = vmatmul.bf16.gmra.mxu3 %v10278_v15  ;;  %3428 = vmatmul.bf16.gmra.mxu1 %v10589_v26 }
 0x234   : > { %v2892_v35 = vpop.f32.mrf.mxu2 }
 0x235   : > { %v2893_v42 = vadd.f32 %v2892_v35, %v10289_v2  ;;  %v10621_v2 = vsel %vm1763_vm4, %v1806_v38, %v1807_v9 }
 0x236   : > { %v3061_v33 = vpop.f32.mrf.mxu3  ;;  %v3222_v63 = vpop.f32.mrf.mxu0 }
 0x237   : > { %v3062_v49 = vadd.f32 %v3061_v33, %v2893_v42  ;;  %v3223_v60 = vadd.f32 %v3222_v63, %v3054_v10  ;;  %v631_v33 = vrot.slane %v483_v29, 7  ;;  %v795_v63 = vsel %vm582_vm0, 0.0, %v630_v16 }
 0x238   : > { %v3391_v56 = vpop.f32.mrf.mxu1 }
 0x239   : > { %v10613_v12 = vadd.f32 %v3391_v56, %v3223_v60  ;;  %v632_v1 = vsel %vm582_vm0, %v630_v16, %v631_v33  ;;  %v1809_v16 = vrot.slane %v10330_v55, 1 }
 0x23a   : > { %v1030_v38 = vpack.c.bf16 %v632_v1, %v632_v1 }
 0x23b   : > { %14199 = vst [vmem:[#allocation98_spill] sm:$0xff] %v10613_v12 }
 0x23c   : > { %v2894_v52 = vpop.f32.mrf.mxu2 }
 0x23d   : > { %v2895_v43 = vadd.f32 %v2894_v52, %v10318_v41  ;;  %v10631_v41 = vld [vmem:[#allocation6] ss:$0 sm:$0xff] }
 0x23e   : > { %v3063_v26 = vpop.f32.mrf.mxu3  ;;  %v3225_v58 = vpop.f32.mrf.mxu0 }
 0x23f   : > { %v3064_v35 = vadd.f32 %v3063_v26, %v2895_v43  ;;  %v3226_v10 = vadd.f32 %v3225_v58, %v3057_v24  ;;  %v930_v26 = vsel %vm849_vm1, %v10631_v41, %v795_v63 }
 0x240   : > { %v3394_v42 = vpop.f32.mrf.mxu1  ;;  %v1029_v57 = vpack.c.bf16 %v930_v26, %v930_v26 }
 0x241   : > { %v10624_v60 = vadd.f32 %v3394_v42, %v3226_v10  ;;  %2936 = vmatmul.bf16.gmra.mxu2 %v10621_v2  ;;  %3264 = vmatmul.bf16.gmra.mxu0 %v10287_v13  ;;  %v1810_v42 = vrot.slane %v10338_v8, 1 }
 0x243   : > { %14200 = vst [vmem:[#allocation99_spill] sm:$0xff] %v10624_v60  ;;  %3105 = vmatmul.bf16.gmra.mxu3 %v10330_v55  ;;  %3433 = vmatmul.bf16.gmra.mxu1 %v10604_v50  ;;  %v1892_v60 = vunpack.c.l.b16 %v1029_v57  ;;  %v1893_v50 = vunpack.c.l.b16 %v1030_v38  ;;  %v8744_v38 = vld [vmem:[#allocation8 + $0x198] sm:$0xff] }
 0x244   : > { %v2897_v24 = vpop.f32.mrf.mxu2  ;;  %3538 = vmatpush.bf16.msra.mxu2 %v8744_v38 }
 0x245   : > { %v2898_v58 = vadd.f32 %v2897_v24, %v10332_v61  ;;  %v10643_v24 = vsel %vm1763_vm4, %v1809_v16, %v1810_v42  ;;  %v10645_v1 = vpack.c.b16 %v1893_v50, %v1892_v60 }
 0x246   : > { %v3066_v43 = vpop.f32.mrf.mxu3  ;;  %v3227_v56 = vpop.f32.mrf.mxu0  ;;  %14201 = vst [vmem:[#allocation95_spill] sm:$0xff] %v10643_v24 }
 0x247   : > { %v3067_v9 = vadd.f32 %v3066_v43, %v2898_v58  ;;  %v3228_v52 = vadd.f32 %v3227_v56, %v3059_v19 }
 0x248   : > { %v3396_v29 = vpop.f32.mrf.mxu1 }
 0x249   : > { %v10637_v10 = vadd.f32 %v3396_v29, %v3228_v52  ;;  %v8752_v29 = vld [vmem:[#allocation8 + $0x1d8] sm:$0xff] }
 0x24a   : > { %3707 = vmatpush.bf16.msra.mxu3 %v8752_v29 }
 0x24c   : > { %v2899_v12 = vpop.f32.mrf.mxu2 }
 0x24d   : > { %v2900_v63 = vadd.f32 %v2899_v12, %v10347_v37  ;;  %v828_v37 = vsel %vm582_vm0, %v631_v33, 0.0 }
 0x24e   : > { %v3068_v15 = vpop.f32.mrf.mxu3  ;;  %v3230_v61 = vpop.f32.mrf.mxu0  ;;  %v932_v57 = vsel %vm860_vm2, %v10631_v41, %v828_v37  ;;  %v14203_v37 = vld [vmem:[#allocation23_spill] sm:$0xff] }
 0x24f   : > { %v3069_v19 = vadd.f32 %v3068_v15, %v2900_v63  ;;  %v3231_v26 = vadd.f32 %v3230_v61, %v3062_v49  ;;  %v1031_v16 = vpack.c.bf16 %v932_v57, %v932_v57  ;;  %v1907_v57 = vshrl.u32 %v10645_v1, 16 }
 0x250   : > { %v3399_v58 = vpop.f32.mrf.mxu1 }
 0x251   : > { %v10647_v43 = vadd.f32 %v3399_v58, %v3231_v26  ;;  %2941 = vmatmul.bf16.gmra.mxu2 %v10643_v24  ;;  %3269 = vmatmul.bf16.gmra.mxu0 %v10325_v31  ;;  %v1902_v61 = vunpack.c.l.b16 %v1031_v16 }
 0x253   : > { %3110 = vmatmul.bf16.gmra.mxu3 %v10645_v1  ;;  %3438 = vmatmul.bf16.gmra.mxu1 %v10621_v2 }
 0x254   : > { %v2902_v8 = vpop.f32.mrf.mxu2 }
 0x255   : > { %v2903_v12 = vadd.f32 %v2902_v8, %v10359_v21 }
 0x256   : > { %v3071_v50 = vpop.f32.mrf.mxu3  ;;  %v3232_v60 = vpop.f32.mrf.mxu0 }
 0x257   : > { %v3072_v15 = vadd.f32 %v3071_v50, %v2903_v12  ;;  %v3233_v49 = vadd.f32 %v3232_v60, %v3064_v35  ;;  %v1904_v12 = vpack.c.b16 %v1902_v61, %v1902_v61  ;;  %v1909_v50 = vshll.u32 %v10645_v1, 16 }
 0x258   : > { %v3401_v56 = vpop.f32.mrf.mxu1  ;;  %v1812_v61 = vrot.slane %v14203_v37, 1 }
 0x259   : > { %v10658_v52 = vadd.f32 %v3401_v56, %v3233_v49  ;;  %v1911_v38 = vrot.slane %v1909_v50, 1  ;;  %v1914_v29 = vshll.u32 %v1904_v12, 16 }
 0x25c   : > { %v2904_v42 = vpop.f32.mrf.mxu2 }
 0x25d   : > { %v2905_v33 = vadd.f32 %v2904_v42, %v10369_v25  ;;  %v8760_v25 = vld [vmem:[#allocation8 + $0x218] sm:$0xff] }
 0x25e   : > { %v3073_v21 = vpop.f32.mrf.mxu3  ;;  %v3235_v63 = vpop.f32.mrf.mxu0  ;;  %3876 = vmatpush.bf16.msra.mxu0 %v8760_v25  ;;  %v1916_v25 = vrot.slane %v1914_v29, 1 }
 0x25f   : > { %v3074_v26 = vadd.f32 %v3073_v21, %v2905_v33  ;;  %v3236_v35 = vadd.f32 %v3235_v63, %v3067_v9  ;;  %v8770_v63 = vld [vmem:[#allocation9 + $0x28] sm:$0xff] }
 0x260   : > { %v3404_v58 = vpop.f32.mrf.mxu1  ;;  %6034 = vmatpush.bf16.msra.mxu1 %v8770_v63 }
 0x261   : > { %v10661_v8 = vadd.f32 %v3404_v58, %v3236_v35  ;;  %2946 = vmatmul.bf16.gmra.mxu2 %v10351_v3  ;;  %3274 = vmatmul.bf16.gmra.mxu0 %v10357_v11  ;;  %v14204_v35 = vld [vmem:[#allocation24_spill] sm:$0xff]  ;;  %v1912_v3 = vor.u32 %v1911_v38, %v1907_v57 }
 0x262   : > { %v1813_v58 = vrot.slane %v14204_v35, 1  ;;  %v14206_v35 = vld [vmem:[#allocation28_spill] sm:$0xff] }
 0x263   : > { %14202 = vst [vmem:[#allocation106_spill] sm:$0xff] %v10661_v8  ;;  %3115 = vmatmul.bf16.gmra.mxu3 %v14203_v37  ;;  %3443 = vmatmul.bf16.gmra.mxu1 %v10643_v24 }
 0x264   : > { %v2907_v60 = vpop.f32.mrf.mxu2 }
 0x265   : > { %v2908_v49 = vadd.f32 %v2907_v60, %v10378_v59  ;;  %v1932_v59 = vrot.slane %v10645_v1, 1  ;;  %v1933_v60 = vrot.slane %v1904_v12, 1  ;;  %v14205_v12 = vld [vmem:[#allocation25_spill] sm:$0xff] }
 0x266   : > { %v3076_v9 = vpop.f32.mrf.mxu3  ;;  %v3237_v56 = vpop.f32.mrf.mxu0 }
 0x267   : > { %v3077_v16 = vadd.f32 %v3076_v9, %v2908_v49  ;;  %v3238_v42 = vadd.f32 %v3237_v56, %v3069_v19  ;;  %v1814_v19 = vsel %vm1763_vm4, %v1812_v61, %v1813_v58  ;;  %v10678_v9 = vsel %vm1359_vm3, %v1912_v3, %v1916_v25 }
 0x268   : > { %v3406_v33 = vpop.f32.mrf.mxu1  ;;  %v10681_v57 = vsel %vm1763_vm4, %v1932_v59, %v1933_v60  ;;  %v1815_v61 = vrot.slane %v14205_v12, 1  ;;  %v1816_v58 = vrot.slane %v14206_v35, 1 }
 0x269   : > { %v10670_v21 = vadd.f32 %v3406_v33, %v3238_v42 }
 0x26c   : > { %v2909_v8 = vpop.f32.mrf.mxu2 }
 0x26d   : > { %v2910_v50 = vadd.f32 %v2909_v8, %v10387_v46 }
 0x26e   : > { %v3078_v24 = vpop.f32.mrf.mxu3  ;;  %v3240_v49 = vpop.f32.mrf.mxu0 }
 0x26f   : > { %v3079_v56 = vadd.f32 %v3078_v24, %v2910_v50  ;;  %v3241_v37 = vadd.f32 %v3240_v49, %v3072_v15  ;;  %v10695_v49 = vsel %vm1763_vm4, %v1815_v61, %v1816_v58 }
 0x270   : > { %v3409_v42 = vpop.f32.mrf.mxu1  ;;  %14207 = vst [vmem:[#allocation107_spill] sm:$0xff] %v10695_v49 }
 0x271   : > { %v10683_v38 = vadd.f32 %v3409_v42, %v3241_v37  ;;  %2951 = vmatmul.bf16.gmra.mxu2 %v1814_v19  ;;  %3279 = vmatmul.bf16.gmra.mxu0 %v10678_v9 }
 0x273   : > { %3120 = vmatmul.bf16.gmra.mxu3 %v14205_v12  ;;  %3448 = vmatmul.bf16.gmra.mxu1 %v10681_v57 }
 0x274   : > { %v2912_v46 = vpop.f32.mrf.mxu2 }
 0x275   : > { %v2913_v8 = vadd.f32 %v2912_v46, %v10403_v39 }
 0x276   : > { %v3081_v3 = vpop.f32.mrf.mxu3  ;;  %v3242_v29 = vpop.f32.mrf.mxu0 }
 0x277   : > { %v3082_v24 = vadd.f32 %v3081_v3, %v2913_v8  ;;  %v3243_v15 = vadd.f32 %v3242_v29, %v3074_v26  ;;  %v14208_v26 = vld [vmem:[#allocation27_spill] sm:$0xff]  ;;  %v14209_v8 = vld [vmem:[#allocation29_spill] sm:$0xff] }
 0x278   : > { %v3411_v33 = vpop.f32.mrf.mxu1 }
 0x279   : > { %v10689_v63 = vadd.f32 %v3411_v33, %v3243_v15 }
 0x27c   : > { %v2914_v25 = vpop.f32.mrf.mxu2 }
 0x27d   : > { %v2915_v59 = vadd.f32 %v2914_v25, %v10412_v30  ;;  %v14210_v25 = vld [vmem:[#allocation32_spill] sm:$0xff] }
 0x27e   : > { %v3083_v60 = vpop.f32.mrf.mxu3  ;;  %v3245_v50 = vpop.f32.mrf.mxu0 }
 0x27f   : > { %v3084_v39 = vadd.f32 %v3083_v60, %v2915_v59  ;;  %v3246_v37 = vadd.f32 %v3245_v50, %v3077_v16  ;;  %v1818_v16 = vrot.slane %v14209_v8, 1  ;;  %v1819_v59 = vrot.slane %v14210_v25, 1 }
 0x280   : > { %v3414_v42 = vpop.f32.mrf.mxu1 }
 0x281   : > { %v10697_v46 = vadd.f32 %v3414_v42, %v3246_v37  ;;  %2956 = vmatmul.bf16.gmra.mxu2 %v10695_v49  ;;  %3284 = vmatmul.bf16.gmra.mxu0 %v14208_v26 }
 0x283   : > { %3125 = vmatmul.bf16.gmra.mxu3 %v14209_v8  ;;  %3453 = vmatmul.bf16.gmra.mxu1 %v1814_v19  ;;  %v10709_v19 = vsel %vm1763_vm4, %v1818_v16, %v1819_v59 }
 0x284   : > { %v2917_v3 = vpop.f32.mrf.mxu2  ;;  %14211 = vst [vmem:[#allocation109_spill] sm:$0xff] %v10709_v19 }
 0x285   : > { %v2918_v30 = vadd.f32 %v2917_v3, %v10423_v17 }
 0x286   : > { %v3086_v29 = vpop.f32.mrf.mxu3  ;;  %v3247_v15 = vpop.f32.mrf.mxu0 }
 0x287   : > { %v3087_v33 = vadd.f32 %v3086_v29, %v2918_v30  ;;  %v3248_v61 = vadd.f32 %v3247_v15, %v3079_v56  ;;  %v14213_v56 = vld [vmem:[#allocation30_spill] sm:$0xff]  ;;  %v14214_v29 = vld [vmem:[#allocation33_spill] sm:$0xff] }
 0x288   : > { %v3416_v35 = vpop.f32.mrf.mxu1 }
 0x289   : > { %v10703_v58 = vadd.f32 %v3416_v35, %v3248_v61 }
 0x28c   : > { %v2919_v60 = vpop.f32.mrf.mxu2 }
 0x28d   : > { %v2920_v50 = vadd.f32 %v2919_v60, %v10433_v48 }
 0x28e   : > { %v3088_v37 = vpop.f32.mrf.mxu3  ;;  %v3250_v42 = vpop.f32.mrf.mxu0 }
 0x28f   : > { %v3089_v17 = vadd.f32 %v3088_v37, %v2920_v50  ;;  %v3251_v26 = vadd.f32 %v3250_v42, %v3082_v24  ;;  %v8743_v24 = vld [vmem:[#allocation8 + $0x190] sm:$0xff]  ;;  %v1821_v37 = vrot.slane %v14214_v29, 1  ;;  %v14216_v42 = vld [vmem:[#allocation37_spill] sm:$0xff] }
 0x290   : > { %v3419_v3 = vpop.f32.mrf.mxu1  ;;  %3539 = vmatpush.bf16.msra.mxu2 %v8743_v24  ;;  %v8751_v50 = vld [vmem:[#allocation8 + $0x1d0] sm:$0xff] }
 0x291   : > { %v10711_v30 = vadd.f32 %v3419_v3, %v3251_v26  ;;  %2961 = vmatmul.bf16.gmra.mxu2 %v10709_v19  ;;  %3289 = vmatmul.bf16.gmra.mxu0 %v14213_v56  ;;  %v1822_v26 = vrot.slane %v14216_v42, 1  ;;  %v8759_v24 = vld [vmem:[#allocation8 + $0x210] sm:$0xff] }
 0x292   : > { %3708 = vmatpush.bf16.msra.mxu3 %v8751_v50  ;;  %3877 = vmatpush.bf16.msra.mxu0 %v8759_v24 }
 0x293   : > { %14212 = vst [vmem:[#allocation103_spill] sm:$0xff] %v10711_v30  ;;  %3130 = vmatmul.bf16.gmra.mxu3 %v14214_v29  ;;  %3458 = vmatmul.bf16.gmra.mxu1 %v10695_v49 }
 0x294   : > { %v2922_v15 = vpop.f32.mrf.mxu2 }
 0x295   : > { %v2923_v48 = vadd.f32 %v2922_v15, %v10444_v22  ;;  %v10724_v15 = vsel %vm1763_vm4, %v1821_v37, %v1822_v26 }
 0x296   : > { %v3091_v61 = vpop.f32.mrf.mxu3  ;;  %v3252_v35 = vpop.f32.mrf.mxu0  ;;  %14217 = vst [vmem:[#allocation24_spill] sm:$0xff] %v10724_v15 }
 0x297   : > { %v3092_v16 = vadd.f32 %v3091_v61, %v2923_v48  ;;  %v3253_v25 = vadd.f32 %v3252_v35, %v3084_v39 }
 0x298   : > { %v3421_v59 = vpop.f32.mrf.mxu1 }
 0x299   : > { %v10718_v60 = vadd.f32 %v3421_v59, %v3253_v25  ;;  %v14219_v25 = vld [vmem:[#allocation34_spill] sm:$0xff] }
 0x29a   : > { %v14220_v59 = vld [vmem:[#allocation38_spill] sm:$0xff] }
 0x29b   : > { %14215 = vst [vmem:[#allocation23_spill] sm:$0xff] %v10718_v60 }
 0x29c   : > { %v2924_v3 = vpop.f32.mrf.mxu2 }
 0x29d   : > { %v2925_v30 = vadd.f32 %v2924_v3, %v10454_v45  ;;  %v8769_v3 = vld [vmem:[#allocation9 + $0x20] sm:$0xff] }
 0x29e   : > { %v3093_v49 = vpop.f32.mrf.mxu3  ;;  %v3255_v22 = vpop.f32.mrf.mxu0  ;;  %6035 = vmatpush.bf16.msra.mxu1 %v8769_v3 }
 0x29f   : > { %v3094_v39 = vadd.f32 %v3093_v49, %v2925_v30  ;;  %v3256_v48 = vadd.f32 %v3255_v22, %v3087_v33  ;;  %v1824_v22 = vrot.slane %v14220_v59, 1 }
 0x2a0   : > { %v3424_v61 = vpop.f32.mrf.mxu1 }
 0x2a1   : > { %v10726_v35 = vadd.f32 %v3424_v61, %v3256_v48  ;;  %2966 = vmatmul.bf16.gmra.mxu2 %v10724_v15  ;;  %3294 = vmatmul.bf16.gmra.mxu0 %v14219_v25  ;;  %v14222_v48 = vld [vmem:[#allocation42_spill] sm:$0xff] }
 0x2a2   : > { %v1825_v61 = vrot.slane %v14222_v48, 1 }
 0x2a3   : > { %14218 = vst [vmem:[#allocation25_spill] sm:$0xff] %v10726_v35  ;;  %3135 = vmatmul.bf16.gmra.mxu3 %v14220_v59  ;;  %3463 = vmatmul.bf16.gmra.mxu1 %v10709_v19 }
 0x2a4   : > { %v2927_v45 = vpop.f32.mrf.mxu2 }
 0x2a5   : > { %v2928_v50 = vadd.f32 %v2927_v45, %v10465_v53  ;;  %v10739_v53 = vsel %vm1763_vm4, %v1824_v22, %v1825_v61  ;;  %v14228_v61 = vld [vmem:[#allocation47_spill] sm:$0xff] }
 0x2a6   : > { %v3096_v37 = vpop.f32.mrf.mxu3  ;;  %v3257_v42 = vpop.f32.mrf.mxu0  ;;  %14223 = vst [vmem:[#allocation27_spill] sm:$0xff] %v10739_v53 }
 0x2a7   : > { %v3097_v49 = vadd.f32 %v3096_v37, %v2928_v50  ;;  %v3258_v33 = vadd.f32 %v3257_v42, %v3089_v17  ;;  %v14225_v42 = vld [vmem:[#allocation40_spill] sm:$0xff] }
 0x2a8   : > { %v3426_v30 = vpop.f32.mrf.mxu1 }
 0x2a9   : > { %v10733_v26 = vadd.f32 %v3426_v30, %v3258_v33  ;;  %v14226_v33 = vld [vmem:[#allocation43_spill] sm:$0xff] }
 0x2ab   : > { %14221 = vst [vmem:[#allocation28_spill] sm:$0xff] %v10733_v26 }
 0x2ac   : > { %v2929_v35 = vpop.f32.mrf.mxu2 }
 0x2ad   : > { %v2930_v19 = vadd.f32 %v2929_v35, %v10475_v62 }
 0x2ae   : > { %v3098_v60 = vpop.f32.mrf.mxu3  ;;  %v3260_v24 = vpop.f32.mrf.mxu0 }
 0x2af   : > { %v3099_v45 = vadd.f32 %v3098_v60, %v2930_v19  ;;  %v3261_v50 = vadd.f32 %v3260_v24, %v3092_v16  ;;  %v1827_v60 = vrot.slane %v14226_v33, 1  ;;  %v1828_v24 = vrot.slane %v14228_v61, 1 }
 0x2b0   : > { %v3429_v17 = vpop.f32.mrf.mxu1 }
 0x2b1   : > { %v10741_v37 = vadd.f32 %v3429_v17, %v3261_v50  ;;  %2971 = vmatmul.bf16.gmra.mxu2 %v10739_v53  ;;  %3299 = vmatmul.bf16.gmra.mxu0 %v14225_v42 }
 0x2b3   : > { %14224 = vst [vmem:[#allocation29_spill] sm:$0xff] %v10741_v37  ;;  %3140 = vmatmul.bf16.gmra.mxu3 %v14226_v33  ;;  %3468 = vmatmul.bf16.gmra.mxu1 %v10724_v15  ;;  %v10754_v15 = vsel %vm1763_vm4, %v1827_v60, %v1828_v24 }
 0x2b4   : > { %v2932_v30 = vpop.f32.mrf.mxu2  ;;  %14229 = vst [vmem:[#allocation30_spill] sm:$0xff] %v10754_v15 }
 0x2b5   : > { %v2933_v62 = vadd.f32 %v2932_v30, %v10486_v23 }
 0x2b6   : > { %v3101_v35 = vpop.f32.mrf.mxu3  ;;  %v3262_v3 = vpop.f32.mrf.mxu0 }
 0x2b7   : > { %v3102_v22 = vadd.f32 %v3101_v35, %v2933_v62  ;;  %v3263_v48 = vadd.f32 %v3262_v3, %v3094_v39  ;;  %v14231_v39 = vld [vmem:[#allocation44_spill] sm:$0xff] }
 0x2b8   : > { %v3431_v19 = vpop.f32.mrf.mxu1  ;;  %v14232_v35 = vld [vmem:[#allocation48_spill] sm:$0xff] }
 0x2b9   : > { %v10748_v16 = vadd.f32 %v3431_v19, %v3263_v48 }
 0x2bb   : > { %14227 = vst [vmem:[#allocation32_spill] sm:$0xff] %v10748_v16 }
 0x2bc   : > { %v2934_v50 = vpop.f32.mrf.mxu2 }
 0x2bd   : > { %v2935_v17 = vadd.f32 %v2934_v50, %v10496_v5 }
 0x2be   : > { %v3103_v37 = vpop.f32.mrf.mxu3  ;;  %v3265_v26 = vpop.f32.mrf.mxu0 }
 0x2bf   : > { %v3104_v23 = vadd.f32 %v3103_v37, %v2935_v17  ;;  %v3266_v30 = vadd.f32 %v3265_v26, %v3097_v49  ;;  %v14234_v26 = vld [vmem:[#allocation52_spill] sm:$0xff] }
 0x2c0   : > { %v3434_v59 = vpop.f32.mrf.mxu1  ;;  %v1831_v24 = vrot.slane %v14234_v26, 1 }
 0x2c1   : > { %v10756_v62 = vadd.f32 %v3434_v59, %v3266_v30  ;;  %2976 = vmatmul.bf16.gmra.mxu2 %v10754_v15  ;;  %3304 = vmatmul.bf16.gmra.mxu0 %v14231_v39  ;;  %v1830_v59 = vrot.slane %v14232_v35, 1 }
 0x2c3   : > { %14230 = vst [vmem:[#allocation33_spill] sm:$0xff] %v10756_v62  ;;  %3145 = vmatmul.bf16.gmra.mxu3 %v14232_v35  ;;  %3473 = vmatmul.bf16.gmra.mxu1 %v10739_v53  ;;  %v10769_v53 = vsel %vm1763_vm4, %v1830_v59, %v1831_v24 }
 0x2c4   : > { %v2937_v3 = vpop.f32.mrf.mxu2  ;;  %14235 = vst [vmem:[#allocation34_spill] sm:$0xff] %v10769_v53 }
 0x2c5   : > { %v2938_v5 = vadd.f32 %v2937_v3, %v10507_v51 }
 0x2c6   : > { %v3106_v48 = vpop.f32.mrf.mxu3  ;;  %v3267_v19 = vpop.f32.mrf.mxu0 }
 0x2c7   : > { %v3107_v60 = vadd.f32 %v3106_v48, %v2938_v5  ;;  %v3268_v61 = vadd.f32 %v3267_v19, %v3099_v45  ;;  %v14237_v45 = vld [vmem:[#allocation50_spill] sm:$0xff]  ;;  %v14238_v48 = vld [vmem:[#allocation53_spill] sm:$0xff] }
 0x2c8   : > { %v3436_v37 = vpop.f32.mrf.mxu1 }
 0x2c9   : > { %v10763_v49 = vadd.f32 %v3436_v37, %v3268_v61 }
 0x2cb   : > { %14233 = vst [vmem:[#allocation37_spill] sm:$0xff] %v10763_v49 }
 0x2cc   : > { %v2939_v50 = vpop.f32.mrf.mxu2 }
 0x2cd   : > { %v2940_v17 = vadd.f32 %v2939_v50, %v10517_v20  ;;  %v1833_v50 = vrot.slane %v14238_v48, 1 }
 0x2ce   : > { %v3108_v30 = vpop.f32.mrf.mxu3  ;;  %v3270_v62 = vpop.f32.mrf.mxu0 }
 0x2cf   : > { %v3109_v51 = vadd.f32 %v3108_v30, %v2940_v17  ;;  %v3271_v3 = vadd.f32 %v3270_v62, %v3102_v22  ;;  %v8742_v22 = vld [vmem:[#allocation8 + $0x188] sm:$0xff]  ;;  %v14240_v17 = vld [vmem:[#allocation57_spill] sm:$0xff] }
 0x2d0   : > { %v3439_v16 = vpop.f32.mrf.mxu1  ;;  %3540 = vmatpush.bf16.msra.mxu2 %v8742_v22  ;;  %v1834_v30 = vrot.slane %v14240_v17, 1  ;;  %v8758_v22 = vld [vmem:[#allocation8 + $0x208] sm:$0xff] }
 0x2d1   : > { %v10771_v5 = vadd.f32 %v3439_v16, %v3271_v3  ;;  %2981 = vmatmul.bf16.gmra.mxu2 %v10769_v53  ;;  %3309 = vmatmul.bf16.gmra.mxu0 %v14237_v45  ;;  %v8750_v16 = vld [vmem:[#allocation8 + $0x1c8] sm:$0xff] }
 0x2d2   : > { %3709 = vmatpush.bf16.msra.mxu3 %v8750_v16  ;;  %3878 = vmatpush.bf16.msra.mxu0 %v8758_v22 }
 0x2d3   : > { %14236 = vst [vmem:[#allocation42_spill] sm:$0xff] %v10771_v5  ;;  %3150 = vmatmul.bf16.gmra.mxu3 %v14238_v48  ;;  %3478 = vmatmul.bf16.gmra.mxu1 %v10754_v15 }
 0x2d4   : > { %v2942_v19 = vpop.f32.mrf.mxu2 }
 0x2d5   : > { %v2943_v20 = vadd.f32 %v2942_v19, %v10528_v40  ;;  %v10784_v19 = vsel %vm1763_vm4, %v1833_v50, %v1834_v30 }
 0x2d6   : > { %v3111_v61 = vpop.f32.mrf.mxu3  ;;  %v3272_v37 = vpop.f32.mrf.mxu0  ;;  %14241 = vst [vmem:[#allocation43_spill] sm:$0xff] %v10784_v19 }
 0x2d7   : > { %v3112_v59 = vadd.f32 %v3111_v61, %v2943_v20  ;;  %v3273_v26 = vadd.f32 %v3272_v37, %v3104_v23 }
 0x2d8   : > { %v3441_v24 = vpop.f32.mrf.mxu1 }
 0x2d9   : > { %v10778_v62 = vadd.f32 %v3441_v24, %v3273_v26  ;;  %v14243_v26 = vld [vmem:[#allocation55_spill] sm:$0xff]  ;;  %v14244_v24 = vld [vmem:[#allocation60_spill] sm:$0xff] }
 0x2db   : > { %14239 = vst [vmem:[#allocation40_spill] sm:$0xff] %v10778_v62 }
 0x2dc   : > { %v2944_v3 = vpop.f32.mrf.mxu2 }
 0x2dd   : > { %v2945_v5 = vadd.f32 %v2944_v3, %v10536_v44  ;;  %v8768_v3 = vld [vmem:[#allocation9 + $0x18] sm:$0xff] }
 0x2de   : > { %v3113_v15 = vpop.f32.mrf.mxu3  ;;  %v3275_v40 = vpop.f32.mrf.mxu0  ;;  %6036 = vmatpush.bf16.msra.mxu1 %v8768_v3 }
 0x2df   : > { %v3114_v23 = vadd.f32 %v3113_v15, %v2945_v5  ;;  %v3276_v20 = vadd.f32 %v3275_v40, %v3107_v60  ;;  %v1836_v40 = vrot.slane %v14244_v24, 1 }
 0x2e0   : > { %v3444_v61 = vpop.f32.mrf.mxu1 }
 0x2e1   : > { %v10786_v37 = vadd.f32 %v3444_v61, %v3276_v20  ;;  %2986 = vmatmul.bf16.gmra.mxu2 %v10784_v19  ;;  %3314 = vmatmul.bf16.gmra.mxu0 %v14243_v26  ;;  %v14246_v20 = vld [vmem:[#allocation62_spill] sm:$0xff] }
 0x2e2   : > { %v1837_v61 = vrot.slane %v14246_v20, 1 }
 0x2e3   : > { %14242 = vst [vmem:[#allocation47_spill] sm:$0xff] %v10786_v37  ;;  %3155 = vmatmul.bf16.gmra.mxu3 %v14244_v24  ;;  %3483 = vmatmul.bf16.gmra.mxu1 %v10769_v53 }
 0x2e4   : > { %v2947_v44 = vpop.f32.mrf.mxu2 }
 0x2e5   : > { %v2948_v16 = vadd.f32 %v2947_v44, %v10545_v18  ;;  %v10799_v18 = vsel %vm1763_vm4, %v1836_v40, %v1837_v61 }
 0x2e6   : > { %v3116_v50 = vpop.f32.mrf.mxu3  ;;  %v3277_v17 = vpop.f32.mrf.mxu0  ;;  %14247 = vst [vmem:[#allocation48_spill] sm:$0xff] %v10799_v18 }
 0x2e7   : > { %v3117_v15 = vadd.f32 %v3116_v50, %v2948_v16  ;;  %v3278_v60 = vadd.f32 %v3277_v17, %v3109_v51  ;;  %v14249_v17 = vld [vmem:[#allocation58_spill] sm:$0xff] }
 0x2e8   : > { %v3446_v5 = vpop.f32.mrf.mxu1 }
 0x2e9   : > { %v10793_v30 = vadd.f32 %v3446_v5, %v3278_v60  ;;  %v14250_v60 = vld [vmem:[#allocation63_spill] sm:$0xff] }
 0x2eb   : > { %14245 = vst [vmem:[#allocation44_spill] sm:$0xff] %v10793_v30  ;;  %v14254_v30 = vld [vmem:[#allocation75_spill] sm:$0xff] }
 0x2ec   : > { %v2949_v37 = vpop.f32.mrf.mxu2 }
 0x2ed   : > { %v2950_v53 = vadd.f32 %v2949_v37, %v10553_v27  ;;  %v14251_v27 = vld [vmem:[#allocation70_spill] sm:$0xff] }
 0x2ee   : > { %v3118_v62 = vpop.f32.mrf.mxu3  ;;  %v3280_v22 = vpop.f32.mrf.mxu0 }
 0x2ef   : > { %v3119_v44 = vadd.f32 %v3118_v62, %v2950_v53  ;;  %v3281_v16 = vadd.f32 %v3280_v22, %v3112_v59  ;;  %v1839_v62 = vrot.slane %v14250_v60, 1  ;;  %v14253_v22 = vld [vmem:[#allocation67_spill] sm:$0xff] }
 0x2f0   : > { %v3449_v51 = vpop.f32.mrf.mxu1 }
 0x2f1   : > { %v10801_v50 = vadd.f32 %v3449_v51, %v3281_v16  ;;  %2991 = vmatmul.bf16.gmra.mxu2 %v10799_v18  ;;  %3319 = vmatmul.bf16.gmra.mxu0 %v14249_v17  ;;  %v1840_v16 = vrot.slane %v14253_v22, 1 }
 0x2f3   : > { %14248 = vst [vmem:[#allocation52_spill] sm:$0xff] %v10801_v50  ;;  %3160 = vmatmul.bf16.gmra.mxu3 %v14250_v60  ;;  %3488 = vmatmul.bf16.gmra.mxu1 %v10784_v19  ;;  %v10814_v19 = vsel %vm1763_vm4, %v1839_v62, %v1840_v16 }
 0x2f4   : > { %v2952_v5 = vpop.f32.mrf.mxu2  ;;  %14255 = vst [vmem:[#allocation57_spill] sm:$0xff] %v10814_v19 }
 0x2f5   : > { %v2953_v37 = vadd.f32 %v2952_v5, %v14251_v27 }
 0x2f6   : > { %v3121_v3 = vpop.f32.mrf.mxu3  ;;  %v3282_v20 = vpop.f32.mrf.mxu0 }
 0x2f7   : > { %v3122_v40 = vadd.f32 %v3121_v3, %v2953_v37  ;;  %v3283_v61 = vadd.f32 %v3282_v20, %v3114_v23  ;;  %v14257_v23 = vld [vmem:[#allocation64_spill] sm:$0xff] }
 0x2f8   : > { %v3451_v53 = vpop.f32.mrf.mxu1  ;;  %v14258_v3 = vld [vmem:[#allocation72_spill] sm:$0xff] }
 0x2f9   : > { %v10808_v59 = vadd.f32 %v3451_v53, %v3283_v61 }
 0x2fb   : > { %14252 = vst [vmem:[#allocation50_spill] sm:$0xff] %v10808_v59 }
 0x2fc   : > { %v2954_v51 = vpop.f32.mrf.mxu2 }
 0x2fd   : > { %v2955_v50 = vadd.f32 %v2954_v51, %v14254_v30  ;;  %v14259_v30 = vld [vmem:[#allocation80_spill] sm:$0xff] }
 0x2fe   : > { %v3123_v24 = vpop.f32.mrf.mxu3  ;;  %v3285_v17 = vpop.f32.mrf.mxu0 }
 0x2ff   : > { %v3124_v5 = vadd.f32 %v3123_v24, %v2955_v50  ;;  %v3286_v27 = vadd.f32 %v3285_v17, %v3117_v15  ;;  %v14261_v50 = vld [vmem:[#allocation77_spill] sm:$0xff] }
 0x300   : > { %v3454_v48 = vpop.f32.mrf.mxu1  ;;  %v1843_v17 = vrot.slane %v14261_v50, 1 }
 0x301   : > { %v10816_v37 = vadd.f32 %v3454_v48, %v3286_v27  ;;  %2996 = vmatmul.bf16.gmra.mxu2 %v10814_v19  ;;  %3324 = vmatmul.bf16.gmra.mxu0 %v14257_v23  ;;  %v1842_v48 = vrot.slane %v14258_v3, 1  ;;  %v14262_v27 = vld [vmem:[#allocation86_spill] sm:$0xff] }
 0x303   : > { %14256 = vst [vmem:[#allocation55_spill] sm:$0xff] %v10816_v37  ;;  %3165 = vmatmul.bf16.gmra.mxu3 %v14258_v3  ;;  %3493 = vmatmul.bf16.gmra.mxu1 %v10799_v18  ;;  %v10829_v18 = vsel %vm1763_vm4, %v1842_v48, %v1843_v17 }
 0x304   : > { %v2957_v20 = vpop.f32.mrf.mxu2  ;;  %14263 = vst [vmem:[#allocation70_spill] sm:$0xff] %v10829_v18 }
 0x305   : > { %v2958_v61 = vadd.f32 %v2957_v20, %v14259_v30 }
 0x306   : > { %v3126_v53 = vpop.f32.mrf.mxu3  ;;  %v3287_v22 = vpop.f32.mrf.mxu0 }
 0x307   : > { %v3127_v62 = vadd.f32 %v3126_v53, %v2958_v61  ;;  %v3288_v16 = vadd.f32 %v3287_v22, %v3119_v44  ;;  %v14265_v44 = vld [vmem:[#allocation74_spill] sm:$0xff] }
 0x308   : > { %v3456_v24 = vpop.f32.mrf.mxu1  ;;  %v14266_v53 = vld [vmem:[#allocation82_spill] sm:$0xff] }
 0x309   : > { %v10823_v15 = vadd.f32 %v3456_v24, %v3288_v16  ;;  %v14267_v16 = vld [vmem:[#allocation90_spill] sm:$0xff] }
 0x30b   : > { %14260 = vst [vmem:[#allocation62_spill] sm:$0xff] %v10823_v15 }
 0x30c   : > { %v2959_v51 = vpop.f32.mrf.mxu2 }
 0x30d   : > { %v2960_v37 = vadd.f32 %v2959_v51, %v14262_v27  ;;  %v14269_v27 = vld [vmem:[#allocation87_spill] sm:$0xff] }
 0x30e   : > { %v3128_v60 = vpop.f32.mrf.mxu3  ;;  %v3290_v59 = vpop.f32.mrf.mxu0 }
 0x30f   : > { %v3129_v20 = vadd.f32 %v3128_v60, %v2960_v37  ;;  %v3291_v30 = vadd.f32 %v3290_v59, %v3122_v40  ;;  %v8741_v40 = vld [vmem:[#allocation8 + $0x180] sm:$0xff] }
 0x310   : > { %v3459_v23 = vpop.f32.mrf.mxu1  ;;  %3541 = vmatpush.bf16.msra.mxu2 %v8741_v40  ;;  %v8749_v37 = vld [vmem:[#allocation8 + $0x1c0] sm:$0xff] }
 0x311   : > { %v10831_v61 = vadd.f32 %v3459_v23, %v3291_v30  ;;  %3001 = vmatmul.bf16.gmra.mxu2 %v10829_v18  ;;  %3329 = vmatmul.bf16.gmra.mxu0 %v14265_v44  ;;  %v1845_v23 = vrot.slane %v14266_v53, 1  ;;  %v1846_v30 = vrot.slane %v14269_v27, 1  ;;  %v8757_v40 = vld [vmem:[#allocation8 + $0x200] sm:$0xff] }
 0x312   : > { %3710 = vmatpush.bf16.msra.mxu3 %v8749_v37  ;;  %3879 = vmatpush.bf16.msra.mxu0 %v8757_v40 }
 0x313   : > { %14264 = vst [vmem:[#allocation67_spill] sm:$0xff] %v10831_v61  ;;  %3170 = vmatmul.bf16.gmra.mxu3 %v14266_v53  ;;  %3498 = vmatmul.bf16.gmra.mxu1 %v10814_v19  ;;  %v14270_v19 = vld [vmem:[#allocation96_spill] sm:$0xff] }
 0x314   : > { %v2962_v22 = vpop.f32.mrf.mxu2 }
 0x315   : > { %v2963_v24 = vadd.f32 %v2962_v22, %v14267_v16  ;;  %v10844_v16 = vsel %vm1763_vm4, %v1845_v23, %v1846_v30 }
 0x316   : > { %v3131_v50 = vpop.f32.mrf.mxu3  ;;  %v3292_v51 = vpop.f32.mrf.mxu0  ;;  %14271 = vst [vmem:[#allocation80_spill] sm:$0xff] %v10844_v16 }
 0x317   : > { %v3132_v48 = vadd.f32 %v3131_v50, %v2963_v24  ;;  %v3293_v17 = vadd.f32 %v3292_v51, %v3124_v5 }
 0x318   : > { %v3461_v60 = vpop.f32.mrf.mxu1 }
 0x319   : > { %v10838_v59 = vadd.f32 %v3461_v60, %v3293_v17  ;;  %v14273_v17 = vld [vmem:[#allocation84_spill] sm:$0xff] }
 0x31a   : > { %v14274_v60 = vld [vmem:[#allocation92_spill] sm:$0xff] }
 0x31b   : > { %14268 = vst [vmem:[#allocation75_spill] sm:$0xff] %v10838_v59 }
 0x31c   : > { %v2964_v61 = vpop.f32.mrf.mxu2 }
 0x31d   : > { %v2965_v15 = vadd.f32 %v2964_v61, %v14270_v19  ;;  %v14275_v61 = vld [vmem:[#allocation100_spill] sm:$0xff] }
 0x31e   : > { %v3133_v3 = vpop.f32.mrf.mxu3  ;;  %v3295_v22 = vpop.f32.mrf.mxu0 }
 0x31f   : > { %v3134_v5 = vadd.f32 %v3133_v3, %v2965_v15  ;;  %v3296_v24 = vadd.f32 %v3295_v22, %v3127_v62  ;;  %v8767_v22 = vld [vmem:[#allocation9 + $0x10] sm:$0xff] }
 0x320   : > { %v3464_v50 = vpop.f32.mrf.mxu1  ;;  %6037 = vmatpush.bf16.msra.mxu1 %v8767_v22 }
 0x321   : > { %v10846_v51 = vadd.f32 %v3464_v50, %v3296_v24  ;;  %3006 = vmatmul.bf16.gmra.mxu2 %v10844_v16  ;;  %3334 = vmatmul.bf16.gmra.mxu0 %v14273_v17  ;;  %v1848_v24 = vrot.slane %v14274_v60, 1  ;;  %v14277_v50 = vld [vmem:[#allocation97_spill] sm:$0xff] }
 0x323   : > { %14272 = vst [vmem:[#allocation77_spill] sm:$0xff] %v10846_v51  ;;  %3175 = vmatmul.bf16.gmra.mxu3 %v14274_v60  ;;  %3503 = vmatmul.bf16.gmra.mxu1 %v10829_v18  ;;  %v1849_v51 = vrot.slane %v14277_v50, 1  ;;  %v14278_v18 = vld [vmem:[#allocation104_spill] sm:$0xff] }
 0x324   : > { %v2967_v19 = vpop.f32.mrf.mxu2  ;;  %v514_v50 = vld [vmem:[%s9534_s29 + $0x1f0] sm:$0xff] }
 0x325   : > { %v2968_v37 = vadd.f32 %v2967_v19, %v14275_v61  ;;  %v10859_v19 = vsel %vm1763_vm4, %v1848_v24, %v1849_v51  ;;  %v678_v60 = vrot.slane %v514_v50, 7 }
 0x326   : > { %v3136_v23 = vpop.f32.mrf.mxu3  ;;  %v3297_v27 = vpop.f32.mrf.mxu0  ;;  %14279 = vst [vmem:[#allocation90_spill] sm:$0xff] %v10859_v19 }
 0x327   : > { %v3137_v3 = vadd.f32 %v3136_v23, %v2968_v37  ;;  %v3298_v62 = vadd.f32 %v3297_v27, %v3129_v20  ;;  %v14281_v27 = vld [vmem:[#allocation94_spill] sm:$0xff] }
 0x328   : > { %v3466_v15 = vpop.f32.mrf.mxu1 }
 0x329   : > { %v10853_v30 = vadd.f32 %v3466_v15, %v3298_v62  ;;  %v14282_v62 = vld [vmem:[#allocation101_spill] sm:$0xff] }
 0x32b   : > { %14276 = vst [vmem:[#allocation86_spill] sm:$0xff] %v10853_v30  ;;  %v515_v30 = vld [vmem:[%s9534_s29 + $0x1f8] sm:$0xff] }
 0x32c   : > { %v2969_v59 = vpop.f32.mrf.mxu2 }
 0x32d   : > { %v2970_v53 = vadd.f32 %v2969_v59, %v14278_v18  ;;  %v14283_v59 = vld [vmem:[#allocation108_spill] sm:$0xff] }
 0x32e   : > { %v3138_v17 = vpop.f32.mrf.mxu3  ;;  %v3300_v40 = vpop.f32.mrf.mxu0 }
 0x32f   : > { %v3139_v61 = vadd.f32 %v3138_v17, %v2970_v53  ;;  %v3301_v20 = vadd.f32 %v3300_v40, %v3132_v48  ;;  %v1851_v40 = vrot.slane %v14282_v62, 1 }
 0x330   : > { %v3469_v37 = vpop.f32.mrf.mxu1 }
 0x331   : > { %v10861_v23 = vadd.f32 %v3469_v37, %v3301_v20  ;;  %3011 = vmatmul.bf16.gmra.mxu2 %v10859_v19  ;;  %3339 = vmatmul.bf16.gmra.mxu0 %v14281_v27  ;;  %v14285_v20 = vld [vmem:[#allocation105_spill] sm:$0xff]  ;;  %v14286_v27 = vld [vmem:[#allocation111_spill] sm:$0xff] }
 0x332   : > { %v1852_v37 = vrot.slane %v14285_v20, 1 }
 0x333   : > { %14280 = vst [vmem:[#allocation87_spill] sm:$0xff] %v10861_v23  ;;  %3180 = vmatmul.bf16.gmra.mxu3 %v14282_v62  ;;  %3508 = vmatmul.bf16.gmra.mxu1 %v10844_v16 }
 0x334   : > { %v2972_v18 = vpop.f32.mrf.mxu2 }
 0x335   : > { %v2973_v15 = vadd.f32 %v2972_v18, %v14283_v59  ;;  %v10876_v18 = vsel %vm1763_vm4, %v1851_v40, %v1852_v37 }
 0x336   : > { %v3141_v51 = vpop.f32.mrf.mxu3  ;;  %v3302_v22 = vpop.f32.mrf.mxu0  ;;  %14287 = vst [vmem:[#allocation100_spill] sm:$0xff] %v10876_v18 }
 0x337   : > { %v3142_v53 = vadd.f32 %v3141_v51, %v2973_v15  ;;  %v3303_v17 = vadd.f32 %v3302_v22, %v3134_v5  ;;  %v679_v51 = vrot.slane %v515_v30, 7  ;;  %v811_v22 = vsel %vm582_vm0, 0.0, %v678_v60 }
 0x338   : > { %v3471_v48 = vpop.f32.mrf.mxu1 }
 0x339   : > { %v10868_v24 = vadd.f32 %v3471_v48, %v3303_v17  ;;  %v14289_v48 = vld [vmem:[#allocation102_spill] sm:$0xff] }
 0x33b   : > { %14284 = vst [vmem:[#allocation96_spill] sm:$0xff] %v10868_v24 }
 0x33c   : > { %v2974_v23 = vpop.f32.mrf.mxu2 }
 0x33d   : > { %v2975_v16 = vadd.f32 %v2974_v23, %v14286_v27  ;;  %v680_v23 = vsel %vm582_vm0, %v678_v60, %v679_v51 }
 0x33e   : > { %v3143_v44 = vpop.f32.mrf.mxu3  ;;  %v3305_v49 = vpop.f32.mrf.mxu0  ;;  %v1078_v40 = vpack.c.bf16 %v680_v23, %v680_v23 }
 0x33f   : > { %v3144_v59 = vadd.f32 %v3143_v44, %v2975_v16  ;;  %v3306_v5 = vadd.f32 %v3305_v49, %v3137_v3  ;;  %v978_v49 = vsel %vm849_vm1, %v10631_v41, %v811_v22  ;;  %v14290_v16 = vld [vmem:[#allocation114_spill] sm:$0xff] }
 0x340   : > { %v3474_v15 = vpop.f32.mrf.mxu1  ;;  %v1077_v50 = vpack.c.bf16 %v978_v49, %v978_v49  ;;  %v1895_v24 = vunpack.c.l.b16 %v1078_v40 }
 0x341   : > { %v10879_v17 = vadd.f32 %v3474_v15, %v3306_v5  ;;  %3016 = vmatmul.bf16.gmra.mxu2 %v10876_v18  ;;  %3344 = vmatmul.bf16.gmra.mxu0 %v14289_v48  ;;  %v1854_v15 = vrot.slane %v10275_v36, 1 }
 0x343   : > { %14288 = vst [vmem:[#allocation97_spill] sm:$0xff] %v10879_v17  ;;  %3185 = vmatmul.bf16.gmra.mxu3 %v10275_v36  ;;  %3513 = vmatmul.bf16.gmra.mxu1 %v10859_v19  ;;  %v14292_v17 = vld [vmem:[#allocation113_spill] sm:$0xff]  ;;  %v1894_v19 = vunpack.c.l.b16 %v1077_v50 }
 0x344   : > { %v2977_v44 = vpop.f32.mrf.mxu2  ;;  %v1855_v60 = vrot.slane %v14292_v17, 1  ;;  %v14296_v17 = vld [vmem:[#allocation112_spill] sm:$0xff] }
 0x345   : > { %v2978_v3 = vadd.f32 %v2977_v44, %v14290_v16  ;;  %v10900_v23 = vpack.c.b16 %v1895_v24, %v1894_v19 }
 0x346   : > { %v3146_v30 = vpop.f32.mrf.mxu3  ;;  %v3307_v27 = vpop.f32.mrf.mxu0  ;;  %v10898_v16 = vsel %vm1763_vm4, %v1854_v15, %v1855_v60 }
 0x347   : > { %v3147_v20 = vadd.f32 %v3146_v30, %v2978_v3  ;;  %v10890_v37 = vadd.f32 %v3307_v27, %v3139_v61  ;;  %14293 = vst [vmem:[#allocation108_spill] sm:$0xff] %v10898_v16  ;;  %v844_v27 = vsel %vm582_vm0, %v679_v51, 0.0 }
 0x348   : > { %v10892_v5 = vpop.f32.mrf.mxu1  ;;  %14294 = vst [vmem:[#allocation105_spill] sm:$0xff] %v10900_v23  ;;  %v980_v15 = vsel %vm860_vm2, %v10631_v41, %v844_v27  ;;  %v1921_v41 = vshll.u32 %v10900_v23, 16 }
 0x349   : > { %14291 = vst [vmem:[#allocation104_spill] sm:$0xff] %v10892_v5  ;;  %v1079_v60 = vpack.c.bf16 %v980_v15, %v980_v15 }
 0x34b   : > { %v1903_v51 = vunpack.c.l.b16 %v1079_v60 }
 0x34c   : > { %v2979_v4 = vpop.f32.mrf.mxu2 }
 0x34d   : > { %v2980_v22 = vadd.f32 %v2979_v4, %v10327_v0  ;;  %v1905_v6 = vpack.c.b16 %v1903_v51, %v1903_v51  ;;  %v1935_v51 = vrot.slane %v10900_v23, 1 }
 0x34e   : > { %v3148_v62 = vpop.f32.mrf.mxu3  ;;  %v3310_v44 = vpop.f32.mrf.mxu0 }
 0x34f   : > { %v3149_v61 = vadd.f32 %v3148_v62, %v2980_v22  ;;  %v3311_v49 = vadd.f32 %v3310_v44, %v3142_v53  ;;  %v14299_v22 = vld [vmem:[#allocation117_spill] sm:$0xff] }
 0x350   : > { %v3479_v3 = vpop.f32.mrf.mxu1 }
 0x351   : > { %v10902_v30 = vadd.f32 %v3479_v3, %v3311_v49  ;;  %3021 = vmatmul.bf16.gmra.mxu2 %v10898_v16  ;;  %3349 = vmatmul.bf16.gmra.mxu0 %v14296_v17 }
 0x353   : > { %14295 = vst [vmem:[#allocation111_spill] sm:$0xff] %v10902_v30  ;;  %3190 = vmatmul.bf16.gmra.mxu3 %v10900_v23  ;;  %3518 = vmatmul.bf16.gmra.mxu1 %v10876_v18 }
 0x354   : > { %v2982_v0 = vpop.f32.mrf.mxu2 }
 0x355   : > { %v2983_v50 = vadd.f32 %v2982_v0, %v10343_v28 }
 0x356   : > { %v3151_v19 = vpop.f32.mrf.mxu3  ;;  %v3312_v24 = vpop.f32.mrf.mxu0 }
 0x357   : > { %v3152_v62 = vadd.f32 %v3151_v19, %v2983_v50  ;;  %v10910_v53 = vadd.f32 %v3312_v24, %v3144_v59  ;;  %v14301_v59 = vld [vmem:[#allocation115_spill] sm:$0xff]  ;;  %v14303_v19 = vld [vmem:[#allocation36_spill] sm:$0xff]  ;;  %v14304_v24 = vld [vmem:[#allocation118_spill] sm:$0xff] }
 0x358   : > { %v10912_v40 = vpop.f32.mrf.mxu1  ;;  %v14302_v50 = vld [vmem:[#allocation31_spill] sm:$0xff] }
 0x359   : > { %14297 = vst [vmem:[#allocation102_spill] sm:$0xff] %v10910_v53 }
 0x35a   : > { %14298 = vst [vmem:[#allocation114_spill] sm:$0xff] %v10912_v40 }
 0x35c   : > { %v2984_v4 = vpop.f32.mrf.mxu2 }
 0x35d   : > { %v2985_v44 = vadd.f32 %v2984_v4, %v14299_v22  ;;  %v1923_v22 = vrot.slane %v1921_v41, 1 }
 0x35e   : > { %v3153_v49 = vpop.f32.mrf.mxu3  ;;  %v3315_v3 = vpop.f32.mrf.mxu0 }
 0x35f   : > { %v3154_v30 = vadd.f32 %v3153_v49, %v2985_v44  ;;  %v3316_v28 = vadd.f32 %v3315_v3, %v3147_v20  ;;  %v1919_v20 = vshrl.u32 %v10900_v23, 16  ;;  %v1926_v44 = vshll.u32 %v1905_v6, 16 }
 0x360   : > { %v3484_v0 = vpop.f32.mrf.mxu1 }
 0x361   : > { %v10918_v18 = vadd.f32 %v3484_v0, %v3316_v28  ;;  %3354 = vmatmul.bf16.gmra.mxu0 %v14301_v59  ;;  %3542 = vmatmul.bf16.vlgmr.msra.gmra.mxu2 %v14302_v50  ;;  %v8766_v0 = vld [vmem:[#allocation9 + $0x8] sm:$0xff]  ;;  %v1924_v50 = vor.u32 %v1923_v22, %v1919_v20  ;;  %v14312_v22 = vld [vmem:[#allocation41_spill] sm:$0xff] }
 0x362   : > { %6038 = vmatpush.bf16.msra.mxu1 %v8766_v0 }
 0x363   : > { %14300 = vst [vmem:[#allocation113_spill] sm:$0xff] %v10918_v18  ;;  %3711 = vmatmul.bf16.vlgmr.msra.gmra.mxu3 %v14303_v19  ;;  %3523 = vmatmul.bf16.gmra.mxu1 %v10898_v16  ;;  %v1928_v19 = vrot.slane %v1926_v44, 1  ;;  %v1936_v18 = vrot.slane %v1905_v6, 1  ;;  %v14311_v6 = vld [vmem:[#allocation35_spill] sm:$0xff]  ;;  %v14313_v44 = vld [vmem:[#allocation120_spill] sm:$0xff] }
 0x364   : > { %v2987_v27 = vpop.f32.mrf.mxu2 }
 0x365   : > { %v2988_v15 = vadd.f32 %v2987_v27, %v14304_v24  ;;  %v14307_v27 = vld [vmem:[#allocation119_spill] sm:$0xff]  ;;  %v10934_v41 = vsel %vm1359_vm3, %v1924_v50, %v1928_v19 }
 0x366   : > { %v3156_v60 = vpop.f32.mrf.mxu3  ;;  %v3317_v4 = vpop.f32.mrf.mxu0  ;;  %14308 = vst [vmem:[#allocation115_spill] sm:$0xff] %v10934_v41 }
 0x367   : > { %v3157_v49 = vadd.f32 %v3156_v60, %v2988_v15  ;;  %v10927_v3 = vadd.f32 %v3317_v4, %v3149_v61  ;;  %v10937_v4 = vsel %vm1763_vm4, %v1935_v51, %v1936_v18  ;;  %v14316_v51 = vld [vmem:[#allocation122_spill] sm:$0xff] }
 0x368   : > { %v10929_v28 = vpop.f32.mrf.mxu1  ;;  %14309 = vst [vmem:[#allocation31_spill] sm:$0xff] %v10937_v4 }
 0x369   : > { %14305 = vst [vmem:[#allocation112_spill] sm:$0xff] %v10927_v3 }
 0x36a   : > { %14306 = vst [vmem:[#allocation117_spill] sm:$0xff] %v10929_v28 }
 0x36c   : > { %v2989_v16 = vpop.f32.mrf.mxu2 }
 0x36d   : > { %v2990_v24 = vadd.f32 %v2989_v16, %v14307_v27 }
 0x36e   : > { %v3158_v40 = vpop.f32.mrf.mxu3  ;;  %v3320_v53 = vpop.f32.mrf.mxu0 }
 0x36f   : > { %v3159_v15 = vadd.f32 %v3158_v40, %v2990_v24  ;;  %v3321_v61 = vadd.f32 %v3320_v53, %v3152_v62 }
 0x370   : > { %v3489_v60 = vpop.f32.mrf.mxu1 }
 0x371   : > { %v10939_v20 = vadd.f32 %v3489_v60, %v3321_v61  ;;  %3359 = vmatmul.bf16.gmra.mxu0 %v10934_v41  ;;  %3547 = vmatmul.bf16.gmra.mxu2 %v14311_v6 }
 0x373   : > { %14310 = vst [vmem:[#allocation36_spill] sm:$0xff] %v10939_v20  ;;  %3716 = vmatmul.bf16.gmra.mxu3 %v14312_v22  ;;  %3528 = vmatmul.bf16.gmra.mxu1 %v10937_v4  ;;  %v14318_v4 = vld [vmem:[#allocation39_spill] sm:$0xff] }
 0x374   : > { %v2992_v16 = vpop.f32.mrf.mxu2 }
 0x375   : > { %v2993_v0 = vadd.f32 %v2992_v16, %v14313_v44  ;;  %v14319_v16 = vld [vmem:[#allocation121_spill] sm:$0xff] }
 0x376   : > { %v3161_v50 = vpop.f32.mrf.mxu3  ;;  %v3322_v40 = vpop.f32.mrf.mxu0  ;;  %v14320_v44 = vld [vmem:[#allocation45_spill] sm:$0xff] }
 0x377   : > { %v3162_v62 = vadd.f32 %v3161_v50, %v2993_v0  ;;  %v10946_v53 = vadd.f32 %v3322_v40, %v3154_v30  ;;  %v14321_v0 = vld [vmem:[#allocation123_spill] sm:$0xff] }
 0x378   : > { %v10948_v18 = vpop.f32.mrf.mxu1 }
 0x379   : > { %14314 = vst [vmem:[#allocation118_spill] sm:$0xff] %v10946_v53 }
 0x37a   : > { %14315 = vst [vmem:[#allocation119_spill] sm:$0xff] %v10948_v18 }
 0x37c   : > { %v2994_v19 = vpop.f32.mrf.mxu2 }
 0x37d   : > { %v2995_v27 = vadd.f32 %v2994_v19, %v14316_v51 }
 0x37e   : > { %v3163_v24 = vpop.f32.mrf.mxu3  ;;  %v3325_v61 = vpop.f32.mrf.mxu0 }
 0x37f   : > { %v3164_v60 = vadd.f32 %v3163_v24, %v2995_v27  ;;  %v3326_v6 = vadd.f32 %v3325_v61, %v3157_v49  ;;  %v14324_v27 = vld [vmem:[#allocation125_spill] sm:$0xff] }
 0x380   : > { %v3494_v22 = vpop.f32.mrf.mxu1 }
 0x381   : > { %v10951_v20 = vadd.f32 %v3494_v22, %v3326_v6  ;;  %3552 = vmatmul.bf16.gmra.mxu2 %v14318_v4  ;;  %3880 = vmatmul.bf16.vlgmr.msra.gmra.mxu0 %v14319_v16 }
 0x383   : > { %14317 = vst [vmem:[#allocation35_spill] sm:$0xff] %v10951_v20  ;;  %3721 = vmatmul.bf16.gmra.mxu3 %v14320_v44  ;;  %v14326_v44 = vld [vmem:[#allocation46_spill] sm:$0xff] }
 0x384   : > { %v2997_v30 = vpop.f32.mrf.mxu2 }
 0x385   : > { %v2998_v50 = vadd.f32 %v2997_v30, %v14321_v0  ;;  %v14327_v30 = vld [vmem:[#allocation124_spill] sm:$0xff]  ;;  %v14328_v0 = vld [vmem:[#allocation51_spill] sm:$0xff] }
 0x386   : > { %v3166_v40 = vpop.f32.mrf.mxu3  ;;  %v3327_v18 = vpop.f32.mrf.mxu0 }
 0x387   : > { %v3167_v53 = vadd.f32 %v3166_v40, %v2998_v50  ;;  %v10957_v19 = vadd.f32 %v3327_v18, %v3159_v15  ;;  %v14329_v18 = vld [vmem:[#allocation126_spill] sm:$0xff] }
 0x388   : > { %v10959_v51 = vpop.f32.mrf.mxu1 }
 0x389   : > { %14322 = vst [vmem:[#allocation41_spill] sm:$0xff] %v10957_v19 }
 0x38a   : > { %14323 = vst [vmem:[#allocation120_spill] sm:$0xff] %v10959_v51 }
 0x38c   : > { %v2999_v49 = vpop.f32.mrf.mxu2 }
 0x38d   : > { %v3000_v24 = vadd.f32 %v2999_v49, %v14324_v27 }
 0x38e   : > { %v3168_v61 = vpop.f32.mrf.mxu3  ;;  %v3330_v6 = vpop.f32.mrf.mxu0 }
 0x38f   : > { %v3169_v4 = vadd.f32 %v3168_v61, %v3000_v24  ;;  %v3331_v22 = vadd.f32 %v3330_v6, %v3162_v62  ;;  %v14332_v24 = vld [vmem:[#allocation128_spill] sm:$0xff] }
 0x390   : > { %v3499_v16 = vpop.f32.mrf.mxu1 }
 0x391   : > { %v10962_v20 = vadd.f32 %v3499_v16, %v3331_v22  ;;  %3557 = vmatmul.bf16.gmra.mxu2 %v14326_v44  ;;  %3885 = vmatmul.bf16.gmra.mxu0 %v14327_v30 }
 0x393   : > { %14325 = vst [vmem:[#allocation122_spill] sm:$0xff] %v10962_v20  ;;  %3726 = vmatmul.bf16.gmra.mxu3 %v14328_v0  ;;  %v14334_v0 = vld [vmem:[#allocation49_spill] sm:$0xff] }
 0x394   : > { %v3002_v15 = vpop.f32.mrf.mxu2 }
 0x395   : > { %v3003_v50 = vadd.f32 %v3002_v15, %v14329_v18  ;;  %v14335_v15 = vld [vmem:[#allocation127_spill] sm:$0xff]  ;;  %v14336_v18 = vld [vmem:[#allocation56_spill] sm:$0xff] }
 0x396   : > { %v3171_v40 = vpop.f32.mrf.mxu3  ;;  %v3332_v51 = vpop.f32.mrf.mxu0 }
 0x397   : > { %v3172_v19 = vadd.f32 %v3171_v40, %v3003_v50  ;;  %v10968_v49 = vadd.f32 %v3332_v51, %v3164_v60  ;;  %v14337_v51 = vld [vmem:[#allocation129_spill] sm:$0xff] }
 0x398   : > { %v10970_v27 = vpop.f32.mrf.mxu1 }
 0x399   : > { %14330 = vst [vmem:[#allocation39_spill] sm:$0xff] %v10968_v49 }
 0x39a   : > { %14331 = vst [vmem:[#allocation121_spill] sm:$0xff] %v10970_v27 }
 0x39c   : > { %v3004_v62 = vpop.f32.mrf.mxu2 }
 0x39d   : > { %v3005_v61 = vadd.f32 %v3004_v62, %v14332_v24 }
 0x39e   : > { %v3173_v6 = vpop.f32.mrf.mxu3  ;;  %v3335_v22 = vpop.f32.mrf.mxu0 }
 0x39f   : > { %v3174_v16 = vadd.f32 %v3173_v6, %v3005_v61  ;;  %v3336_v44 = vadd.f32 %v3335_v22, %v3167_v53  ;;  %v8765_v53 = vld [vmem:[#allocation9] sm:$0xff]  ;;  %v14340_v6 = vld [vmem:[#allocation131_spill] sm:$0xff] }
 0x3a0   : > { %v3504_v30 = vpop.f32.mrf.mxu1  ;;  %6039 = vmatpush.bf16.msra.mxu1 %v8765_v53 }
 0x3a1   : > { %v10973_v20 = vadd.f32 %v3504_v30, %v3336_v44  ;;  %3562 = vmatmul.bf16.gmra.mxu2 %v14334_v0  ;;  %3890 = vmatmul.bf16.gmra.mxu0 %v14335_v15 }
 0x3a3   : > { %14333 = vst [vmem:[#allocation45_spill] sm:$0xff] %v10973_v20  ;;  %3731 = vmatmul.bf16.gmra.mxu3 %v14336_v18 }
 0x3a4   : > { %v3007_v60 = vpop.f32.mrf.mxu2 }
 0x3a5   : > { %v3008_v50 = vadd.f32 %v3007_v60, %v14337_v51  ;;  %v14342_v60 = vld [vmem:[#allocation54_spill] sm:$0xff] }
 0x3a6   : > { %v3176_v40 = vpop.f32.mrf.mxu3  ;;  %v3337_v27 = vpop.f32.mrf.mxu0  ;;  %v14343_v51 = vld [vmem:[#allocation130_spill] sm:$0xff] }
 0x3a7   : > { %v3177_v49 = vadd.f32 %v3176_v40, %v3008_v50  ;;  %v10979_v62 = vadd.f32 %v3337_v27, %v3169_v4  ;;  %v14344_v4 = vld [vmem:[#allocation59_spill] sm:$0xff]  ;;  %v14345_v50 = vld [vmem:[#allocation132_spill] sm:$0xff] }
 0x3a8   : > { %v10981_v24 = vpop.f32.mrf.mxu1 }
 0x3a9   : > { %14338 = vst [vmem:[#allocation123_spill] sm:$0xff] %v10979_v62 }
 0x3aa   : > { %14339 = vst [vmem:[#allocation125_spill] sm:$0xff] %v10981_v24 }
 0x3ac   : > { %v3009_v61 = vpop.f32.mrf.mxu2 }
 0x3ad   : > { %v3010_v22 = vadd.f32 %v3009_v61, %v14340_v6 }
 0x3ae   : > { %v3178_v44 = vpop.f32.mrf.mxu3  ;;  %v3340_v30 = vpop.f32.mrf.mxu0 }
 0x3af   : > { %v3179_v0 = vadd.f32 %v3178_v44, %v3010_v22  ;;  %v3341_v15 = vadd.f32 %v3340_v30, %v3172_v19  ;;  %v14348_v22 = vld [vmem:[#allocation134_spill] sm:$0xff] }
 0x3b0   : > { %v3509_v18 = vpop.f32.mrf.mxu1 }
 0x3b1   : > { %v10984_v20 = vadd.f32 %v3509_v18, %v3341_v15  ;;  %3567 = vmatmul.bf16.gmra.mxu2 %v14342_v60  ;;  %3895 = vmatmul.bf16.gmra.mxu0 %v14343_v51 }
 0x3b3   : > { %14341 = vst [vmem:[#allocation46_spill] sm:$0xff] %v10984_v20  ;;  %3736 = vmatmul.bf16.gmra.mxu3 %v14344_v4  ;;  %v14350_v4 = vld [vmem:[#allocation61_spill] sm:$0xff] }
 0x3b4   : > { %v3012_v27 = vpop.f32.mrf.mxu2 }
 0x3b5   : > { %v3013_v40 = vadd.f32 %v3012_v27, %v14345_v50  ;;  %v14351_v27 = vld [vmem:[#allocation133_spill] sm:$0xff]  ;;  %v14352_v50 = vld [vmem:[#allocation66_spill] sm:$0xff] }
 0x3b6   : > { %v3181_v53 = vpop.f32.mrf.mxu3  ;;  %v3342_v24 = vpop.f32.mrf.mxu0 }
 0x3b7   : > { %v3182_v62 = vadd.f32 %v3181_v53, %v3013_v40  ;;  %v10990_v61 = vadd.f32 %v3342_v24, %v3174_v16  ;;  %v14353_v24 = vld [vmem:[#allocation135_spill] sm:$0xff] }
 0x3b8   : > { %v10992_v6 = vpop.f32.mrf.mxu1 }
 0x3b9   : > { %14346 = vst [vmem:[#allocation124_spill] sm:$0xff] %v10990_v61 }
 0x3ba   : > { %14347 = vst [vmem:[#allocation51_spill] sm:$0xff] %v10992_v6 }
 0x3bc   : > { %v3014_v19 = vpop.f32.mrf.mxu2 }
 0x3bd   : > { %v3015_v44 = vadd.f32 %v3014_v19, %v14348_v22 }
 0x3be   : > { %v3183_v30 = vpop.f32.mrf.mxu3  ;;  %v3345_v15 = vpop.f32.mrf.mxu0 }
 0x3bf   : > { %v3184_v18 = vadd.f32 %v3183_v30, %v3015_v44  ;;  %v3346_v60 = vadd.f32 %v3345_v15, %v3177_v49  ;;  %v14356_v44 = vld [vmem:[#allocation137_spill] sm:$0xff] }
 0x3c0   : > { %v3514_v51 = vpop.f32.mrf.mxu1 }
 0x3c1   : > { %v10995_v20 = vadd.f32 %v3514_v51, %v3346_v60  ;;  %3572 = vmatmul.bf16.gmra.mxu2 %v14350_v4  ;;  %3900 = vmatmul.bf16.gmra.mxu0 %v14351_v27 }
 0x3c3   : > { %14349 = vst [vmem:[#allocation126_spill] sm:$0xff] %v10995_v20  ;;  %3741 = vmatmul.bf16.gmra.mxu3 %v14352_v50  ;;  %v14358_v50 = vld [vmem:[#allocation65_spill] sm:$0xff] }
 0x3c4   : > { %v3017_v16 = vpop.f32.mrf.mxu2 }
 0x3c5   : > { %v3018_v40 = vadd.f32 %v3017_v16, %v14353_v24  ;;  %v14359_v16 = vld [vmem:[#allocation136_spill] sm:$0xff] }
 0x3c6   : > { %v3186_v53 = vpop.f32.mrf.mxu3  ;;  %v3347_v6 = vpop.f32.mrf.mxu0  ;;  %v14360_v24 = vld [vmem:[#allocation76_spill] sm:$0xff] }
 0x3c7   : > { %v3187_v61 = vadd.f32 %v3186_v53, %v3018_v40  ;;  %v11001_v19 = vadd.f32 %v3347_v6, %v3179_v0  ;;  %v14361_v6 = vld [vmem:[#allocation138_spill] sm:$0xff] }
 0x3c8   : > { %v11003_v22 = vpop.f32.mrf.mxu1 }
 0x3c9   : > { %14354 = vst [vmem:[#allocation128_spill] sm:$0xff] %v11001_v19 }
 0x3ca   : > { %14355 = vst [vmem:[#allocation49_spill] sm:$0xff] %v11003_v22 }
 0x3cc   : > { %v3019_v49 = vpop.f32.mrf.mxu2 }
 0x3cd   : > { %v3020_v30 = vadd.f32 %v3019_v49, %v14356_v44 }
 0x3ce   : > { %v3188_v15 = vpop.f32.mrf.mxu3  ;;  %v3350_v60 = vpop.f32.mrf.mxu0 }
 0x3cf   : > { %v3189_v51 = vadd.f32 %v3188_v15, %v3020_v30  ;;  %v3351_v4 = vadd.f32 %v3350_v60, %v3182_v62  ;;  %v14364_v30 = vld [vmem:[#allocation140_spill] sm:$0xff] }
 0x3d0   : > { %v3519_v27 = vpop.f32.mrf.mxu1 }
 0x3d1   : > { %v11006_v20 = vadd.f32 %v3519_v27, %v3351_v4  ;;  %3577 = vmatmul.bf16.gmra.mxu2 %v14358_v50  ;;  %3905 = vmatmul.bf16.gmra.mxu0 %v14359_v16 }
 0x3d3   : > { %14357 = vst [vmem:[#allocation127_spill] sm:$0xff] %v11006_v20  ;;  %3746 = vmatmul.bf16.gmra.mxu3 %v14360_v24  ;;  %v8780_v20 = vld [vmem:[#allocation9 + $0x78] sm:$0xff]  ;;  %v9337_v24 = vmov 0  }
 0x3d4   : > { %v3022_v0 = vpop.f32.mrf.mxu2  ;;  %v11017_v28 = vrot.slane %v9337_v24, 7  ;;  %6201 = vmatpush.bf16.msrb.mxu2 %v8780_v20  ;;  %v14375_v20 = vld [vmem:[#allocation68_spill] sm:$0xff] }
 0x3d5   : > { %v3023_v40 = vadd.f32 %v3022_v0, %v14361_v6  ;;  %v14370_v6 = vld [vmem:[#allocation139_spill] sm:$0xff] }
 0x3d6   : > { %v3191_v53 = vpop.f32.mrf.mxu3  ;;  %v3352_v22 = vpop.f32.mrf.mxu0  ;;  %14365 = vst [vmem:[#allocation131_spill] sm:$0xff] %v11017_v28 }
 0x3d7   : > { %v3192_v19 = vadd.f32 %v3191_v53, %v3023_v40  ;;  %v11012_v49 = vadd.f32 %v3352_v22, %v3184_v18  ;;  %v14369_v22 = vld [vmem:[#allocation73_spill] sm:$0xff] }
 0x3d8   : > { %v11014_v44 = vpop.f32.mrf.mxu1 }
 0x3d9   : > { %14362 = vst [vmem:[#allocation56_spill] sm:$0xff] %v11012_v49 }
 0x3da   : > { %14363 = vst [vmem:[#allocation129_spill] sm:$0xff] %v11014_v44 }
 0x3dc   : > { %v3024_v62 = vpop.f32.mrf.mxu2 }
 0x3dd   : > { %v3025_v15 = vadd.f32 %v3024_v62, %v14364_v30  ;;  %v8788_v30 = vld [vmem:[#allocation9 + $0xb8] sm:$0xff] }
 0x3de   : > { %v3193_v60 = vpop.f32.mrf.mxu3  ;;  %v3355_v4 = vpop.f32.mrf.mxu0  ;;  %6370 = vmatpush.bf16.msrb.mxu3 %v8788_v30 }
 0x3df   : > { %v3194_v27 = vadd.f32 %v3193_v60, %v3025_v15  ;;  %v3356_v50 = vadd.f32 %v3355_v4, %v3187_v61  ;;  %v11031_v61 = vsel %vm11020_vm6, 0, %v11017_v28 }
 0x3e0   : > { %v3524_v16 = vpop.f32.mrf.mxu1  ;;  %14371 = vst [vmem:[#allocation130_spill] sm:$0xff] %v11031_v61  ;;  %6040 = vmatmul.bf16.vlgmr.msra.gmra.mxu1 %v11031_v61 }
 0x3e1   : > { %v11024_v18 = vadd.f32 %v3524_v16, %v3356_v50  ;;  %3582 = vmatmul.bf16.gmra.mxu2 %v14369_v22  ;;  %3910 = vmatmul.bf16.gmra.mxu0 %v14370_v6  ;;  %v8796_v6 = vld [vmem:[#allocation9 + $0xf8] sm:$0xff] }
 0x3e2   : > { %6539 = vmatpush.bf16.msrb.mxu0 %v8796_v6 }
 0x3e3   : > { %14368 = vst [vmem:[#allocation54_spill] sm:$0xff] %v11024_v18  ;;  %3751 = vmatmul.bf16.gmra.mxu3 %v14185_v47  ;;  %v8804_v18 = vld [vmem:[#allocation9 + $0x138] sm:$0xff] }
 0x3e4   : > { %v3543_v40 = vpop.f32.mrf.mxu2  ;;  %6708 = vmatpush.bf16.msrb.mxu1 %v8804_v18  ;;  %v14379_v18 = vld [vmem:[#allocation69_spill] sm:$0xff] }
 0x3e6   : > { %v3712_v53 = vpop.f32.mrf.mxu3  ;;  %v3357_v62 = vpop.f32.mrf.mxu0 }
 0x3e7   : > { %v11035_v15 = vadd.f32 %v3357_v62, %v3189_v51 }
 0x3e8   : > { %v11037_v60 = vpop.f32.mrf.mxu1 }
 0x3e9   : > { %14372 = vst [vmem:[#allocation59_spill] sm:$0xff] %v11035_v15 }
 0x3ea   : > { %14373 = vst [vmem:[#allocation132_spill] sm:$0xff] %v11037_v60 }
 0x3ec   : > { %v3545_v4 = vpop.f32.mrf.mxu2 }
 0x3ee   : > { %v3714_v50 = vpop.f32.mrf.mxu3  ;;  %v3360_v16 = vpop.f32.mrf.mxu0 }
 0x3ef   : > { %v3361_v24 = vadd.f32 %v3360_v16, %v3192_v19  ;;  %v14377_v19 = vld [vmem:[#allocation71_spill] sm:$0xff] }
 0x3f0   : > { %v3529_v22 = vpop.f32.mrf.mxu1  ;;  %v3544_v16 = vadd.f32 %v3543_v40, %v14377_v19 }
 0x3f1   : > { %v11039_v47 = vadd.f32 %v3529_v22, %v3361_v24  ;;  %3587 = vmatmul.bf16.gmra.mxu2 %v14179_v34  ;;  %3915 = vmatmul.bf16.gmra.mxu0 %v14375_v20  ;;  %v11047_v34 = vstv %s4041_s23  ;;  %v3546_v20 = vadd.f32 %v3545_v4, %v10568_v32  ;;  %s7936_s23 = scalar_lea.sflag [#allocation4], %s9528_s19 }
 0x3f2   : > { %v3713_v44 = vadd.f32 %v3712_v53, %v3544_v16 }
 0x3f3   : > { %14374 = vst [vmem:[#allocation134_spill] sm:$0xff] %v11039_v47  ;;  %3756 = vmatmul.bf16.gmra.mxu3 %v14191_v14  ;;  %v14378_v14 = vld [vmem:[#allocation93_spill] sm:$0xff]  ;;  %v3715_v40 = vadd.f32 %v3714_v50, %v3546_v20 }
 0x3f4   : > { %v3548_v51 = vpop.f32.mrf.mxu2  ;;  %v14381_v20 = vld [vmem:[#allocation81_spill] sm:$0xff] }
 0x3f6   : > { %v3717_v62 = vpop.f32.mrf.mxu3  ;;  %v3362_v30 = vpop.f32.mrf.mxu0 }
 0x3f7   : > { %v11044_v60 = vadd.f32 %v3362_v30, %v3194_v27 }
 0x3f9   : > { %14376 = vst [vmem:[#allocation61_spill] sm:$0xff] %v11044_v60 }
 0x3fc   : > { %v3550_v15 = vpop.f32.mrf.mxu2 }
 0x3fd   : > { %v3551_v5 = vadd.f32 %v3550_v15, %v14381_v20 }
 0x3fe   : > { %v3719_v24 = vpop.f32.mrf.mxu3  ;;  %v3881_v22 = vpop.f32.mrf.mxu0 }
 0x3ff   : > { %v3882_v47 = vadd.f32 %v3881_v22, %v3713_v44  ;;  %v14380_v44 = vld [vmem:[#allocation79_spill] sm:$0xff] }
 0x400   : > { %v3549_v22 = vadd.f32 %v3548_v51, %v14380_v44 }
 0x401   : > { %3592 = vmatmul.bf16.gmra.mxu2 %v14378_v14  ;;  %3920 = vmatmul.bf16.gmra.mxu0 %v14379_v18  ;;  %v4107_v27 = vmul.f32 %v11047_v34, %v3882_v47  ;;  %vm4042_vm7 = vcmp.ge.f32.partialorder %v3882_v47, 0.0 }
 0x402   : > { %v3718_v49 = vadd.f32 %v3717_v62, %v3549_v22 }
 0x403   : > { %3761 = vmatmul.bf16.gmra.mxu3 %v14198_v54  ;;  %v4171_v19 = vsel %vm4042_vm7, %v3882_v47, %v4107_v27  ;;  %v14382_v47 = vld [vmem:[#allocation78_spill] sm:$0xff] }
 0x404   : > { %v3553_v6 = vpop.f32.mrf.mxu2  ;;  %v4235_v4 = vpack.c.bf16 %v4171_v19, %v4171_v19 }
 0x406   : > { %v3722_v30 = vpop.f32.mrf.mxu3  ;;  %v3883_v53 = vpop.f32.mrf.mxu0  ;;  %v4363_v3 = vunpack.c.l.b16 %v4235_v4 }
 0x407   : > { %v3884_v16 = vadd.f32 %v3883_v53, %v3715_v40 }
 0x409   : > { %vm4043_vm8 = vcmp.ge.f32.partialorder %v3884_v16, 0.0  ;;  %v4108_v32 = vmul.f32 %v11047_v34, %v3884_v16 }
 0x40b   : > { %v4172_v14 = vsel %vm4043_vm8, %v3884_v16, %v4108_v32 }
 0x40c   : > { %v4236_v60 = vpack.c.bf16 %v4172_v14, %v4172_v14  ;;  %v3555_v18 = vpop.f32.mrf.mxu2 }
 0x40e   : > { %v3724_v54 = vpop.f32.mrf.mxu3  ;;  %v4364_v28 = vunpack.c.l.b16 %v4236_v60  ;;  %v3886_v41 = vpop.f32.mrf.mxu0  ;;  %v3720_v60 = vadd.f32 %v3719_v24, %v3551_v5 }
 0x40f   : > { %v3887_v23 = vadd.f32 %v3886_v41, %v3718_v49 }
 0x410   : > { %v4427_v50 = vpack.c.b16 %v4364_v28, %v4363_v3 }
 0x411   : > { %3597 = vmatmul.bf16.gmra.mxu2 %v10228_v7  ;;  %3925 = vmatmul.bf16.gmra.mxu0 %v14382_v47  ;;  %v4109_v27 = vmul.f32 %v11047_v34, %v3887_v23  ;;  %vm4044_vm9 = vcmp.ge.f32.partialorder %v3887_v23, 0.0 }
 0x412   : > { %v4467_v51 = vshrl.u32 %v4427_v50, 16  ;;  %v4470_v53 = vshll.u32 %v4427_v50, 16 }
 0x413   : > { %3766 = vmatmul.bf16.gmra.mxu3 %v10287_v13  ;;  %v4173_v28 = vsel %vm4044_vm9, %v3887_v23, %v4109_v27  ;;  %v14383_v13 = vld [vmem:[#allocation88_spill] sm:$0xff] }
 0x414   : > { %v3558_v40 = vpop.f32.mrf.mxu2  ;;  %v11061_v62 = vrot.slane %v4467_v51, 7  ;;  %v3554_v15 = vadd.f32 %v3553_v6, %v14383_v13  ;;  %v4237_v44 = vpack.c.bf16 %v4173_v28, %v4173_v28  ;;  %v14384_v51 = vld [vmem:[#allocation89_spill] sm:$0xff]  ;;  %v14386_v6 = vld [vmem:[#allocation83_spill] sm:$0xff] }
 0x415   : > { %v3556_v27 = vadd.f32 %v3555_v18, %v14384_v51 }
 0x416   : > { %v3727_v19 = vpop.f32.mrf.mxu3  ;;  %v3888_v41 = vpop.f32.mrf.mxu0  ;;  %v4472_v3 = vor.u32 %v4470_v53, %v11061_v62  ;;  %v3723_v32 = vadd.f32 %v3722_v30, %v3554_v15  ;;  %v4365_v14 = vunpack.c.l.b16 %v4237_v44  ;;  %v14385_v53 = vld [vmem:[#allocation110_spill] sm:$0xff]  ;;  %v8787_v44 = vld [vmem:[#allocation9 + $0xb0] sm:$0xff] }
 0x417   : > { %v3889_v49 = vadd.f32 %v3888_v41, %v3720_v60  ;;  %v3725_v13 = vadd.f32 %v3724_v54, %v3556_v27  ;;  %6371 = vmatpush.bf16.msrb.mxu3 %v8787_v44 }
 0x418   : > { %v11066_v7 = vsel %vm11020_vm6, 0, %v4472_v3 }
 0x419   : > { %vm4045_vm10 = vcmp.ge.f32.partialorder %v3889_v49, 0.0  ;;  %v4110_v16 = vmul.f32 %v11047_v34, %v3889_v49  ;;  %6045 = vmatmul.bf16.gmra.mxu1 %v11066_v7 }
 0x41b   : > { %v4174_v22 = vsel %vm4045_vm10, %v3889_v49, %v4110_v16  ;;  %v8779_v49 = vld [vmem:[#allocation9 + $0x70] sm:$0xff] }
 0x41c   : > { %v4238_v5 = vpack.c.bf16 %v4174_v22, %v4174_v22  ;;  %v3560_v24 = vpop.f32.mrf.mxu2  ;;  %6202 = vmatpush.bf16.msrb.mxu2 %v8779_v49  ;;  %v14389_v49 = vld [vmem:[#allocation98_spill] sm:$0xff] }
 0x41e   : > { %v3729_v4 = vpop.f32.mrf.mxu3  ;;  %v4366_v23 = vunpack.c.l.b16 %v4238_v5  ;;  %v3891_v50 = vpop.f32.mrf.mxu0 }
 0x41f   : > { %v3892_v20 = vadd.f32 %v3891_v50, %v3723_v32  ;;  %v14388_v32 = vld [vmem:[#allocation85_spill] sm:$0xff] }
 0x420   : > { %v4428_v47 = vpack.c.b16 %v4366_v23, %v4365_v14  ;;  %v3559_v14 = vadd.f32 %v3558_v40, %v14388_v32  ;;  %v14390_v40 = vld [vmem:[#allocation91_spill] sm:$0xff]  ;;  %v8803_v32 = vld [vmem:[#allocation9 + $0x130] sm:$0xff] }
 0x421   : > { %3602 = vmatmul.bf16.gmra.mxu2 %v14385_v53  ;;  %3930 = vmatmul.bf16.gmra.mxu0 %v14386_v6  ;;  %v4111_v41 = vmul.f32 %v11047_v34, %v3892_v20  ;;  %vm4046_vm11 = vcmp.ge.f32.partialorder %v3892_v20, 0.0 }
 0x422   : > { %v4474_v60 = vshrl.u32 %v4428_v47, 16  ;;  %v4477_v30 = vshll.u32 %v4428_v47, 16  ;;  %v3728_v27 = vadd.f32 %v3727_v19, %v3559_v14  ;;  %6709 = vmatpush.bf16.msrb.mxu1 %v8803_v32 }
 0x423   : > { %3771 = vmatmul.bf16.gmra.mxu3 %v10325_v31  ;;  %v4175_v22 = vsel %vm4046_vm11, %v3892_v20, %v4111_v41 }
 0x424   : > { %v11076_v3 = vrot.slane %v4474_v60, 7  ;;  %v3563_v28 = vpop.f32.mrf.mxu2  ;;  %v4239_v54 = vpack.c.bf16 %v4175_v22, %v4175_v22 }
 0x426   : > { %v3732_v15 = vpop.f32.mrf.mxu3  ;;  %v3893_v16 = vpop.f32.mrf.mxu0  ;;  %v4479_v18 = vor.u32 %v4477_v30, %v11076_v3  ;;  %v4367_v20 = vunpack.c.l.b16 %v4239_v54 }
 0x427   : > { %v3894_v5 = vadd.f32 %v3893_v16, %v3725_v13  ;;  %v3561_v13 = vadd.f32 %v3560_v24, %v14389_v49 }
 0x428   : > { %v11081_v31 = vsel %vm11020_vm6, 0, %v4479_v18 }
 0x429   : > { %14387 = vst [vmem:[#allocation133_spill] sm:$0xff] %v11081_v31  ;;  %vm4047_vm12 = vcmp.ge.f32.partialorder %v3894_v5, 0.0  ;;  %v4112_v23 = vmul.f32 %v11047_v34, %v3894_v5  ;;  %6050 = vmatmul.bf16.gmra.mxu1 %v11081_v31  ;;  %v3730_v14 = vadd.f32 %v3729_v4, %v3561_v13 }
 0x42b   : > { %v4176_v50 = vsel %vm4047_vm12, %v3894_v5, %v4112_v23  ;;  %v8795_v5 = vld [vmem:[#allocation9 + $0xf0] sm:$0xff] }
 0x42c   : > { %v4240_v47 = vpack.c.bf16 %v4176_v50, %v4176_v50  ;;  %v3565_v51 = vpop.f32.mrf.mxu2  ;;  %6540 = vmatpush.bf16.msrb.mxu0 %v8795_v5 }
 0x42d   : > { %v3566_v5 = vadd.f32 %v3565_v51, %v10637_v10 }
 0x42e   : > { %v3734_v53 = vpop.f32.mrf.mxu3  ;;  %v4368_v6 = vunpack.c.l.b16 %v4240_v47  ;;  %v3896_v60 = vpop.f32.mrf.mxu0  ;;  %v14392_v47 = vld [vmem:[#allocation99_spill] sm:$0xff] }
 0x42f   : > { %v3897_v41 = vadd.f32 %v3896_v60, %v3728_v27  ;;  %v3564_v27 = vadd.f32 %v3563_v28, %v14392_v47 }
 0x430   : > { %v4429_v30 = vpack.c.b16 %v4368_v6, %v4367_v20 }
 0x431   : > { %3607 = vmatmul.bf16.gmra.mxu2 %v10330_v55  ;;  %3935 = vmatmul.bf16.gmra.mxu0 %v14390_v40  ;;  %v4113_v18 = vmul.f32 %v11047_v34, %v3897_v41  ;;  %vm4048_vm13 = vcmp.ge.f32.partialorder %v3897_v41, 0.0  ;;  %v3733_v49 = vadd.f32 %v3732_v15, %v3564_v27 }
 0x432   : > { %v4481_v16 = vshrl.u32 %v4429_v30, 16  ;;  %v4484_v19 = vshll.u32 %v4429_v30, 16 }
 0x433   : > { %3776 = vmatmul.bf16.gmra.mxu3 %v10357_v11  ;;  %v4177_v55 = vsel %vm4048_vm13, %v3897_v41, %v4113_v18 }
 0x434   : > { %v11091_v44 = vrot.slane %v4481_v16, 7  ;;  %v3568_v22 = vpop.f32.mrf.mxu2  ;;  %v4241_v4 = vpack.c.bf16 %v4177_v55, %v4177_v55 }
 0x436   : > { %v3737_v23 = vpop.f32.mrf.mxu3  ;;  %v3898_v54 = vpop.f32.mrf.mxu0  ;;  %v4486_v24 = vor.u32 %v4484_v19, %v11091_v44  ;;  %v4369_v40 = vunpack.c.l.b16 %v4241_v4 }
 0x437   : > { %v3899_v50 = vadd.f32 %v3898_v54, %v3730_v14 }
 0x438   : > { %v11096_v11 = vsel %vm11020_vm6, 0, %v4486_v24  ;;  %v3735_v24 = vadd.f32 %v3734_v53, %v3566_v5  ;;  %v14394_v5 = vld [vmem:[#allocation22_spill] sm:$0xff] }
 0x439   : > { %14391 = vst [vmem:[#allocation66_spill] sm:$0xff] %v11096_v11  ;;  %vm4049_vm14 = vcmp.ge.f32.partialorder %v3899_v50, 0.0  ;;  %v4114_v20 = vmul.f32 %v11047_v34, %v3899_v50  ;;  %6055 = vmatmul.bf16.gmra.mxu1 %v11096_v11 }
 0x43b   : > { %v4178_v6 = vsel %vm4049_vm14, %v3899_v50, %v4114_v20 }
 0x43c   : > { %v4242_v60 = vpack.c.bf16 %v4178_v6, %v4178_v6  ;;  %v3570_v30 = vpop.f32.mrf.mxu2 }
 0x43e   : > { %v3739_v13 = vpop.f32.mrf.mxu3  ;;  %v4370_v41 = vunpack.c.l.b16 %v4242_v60  ;;  %v3901_v16 = vpop.f32.mrf.mxu0 }
 0x43f   : > { %v3902_v18 = vadd.f32 %v3901_v16, %v3733_v49 }
 0x440   : > { %v4430_v19 = vpack.c.b16 %v4370_v41, %v4369_v40 }
 0x441   : > { %3612 = vmatmul.bf16.gmra.mxu2 %v10645_v1  ;;  %3940 = vmatmul.bf16.gmra.mxu0 %v10621_v2  ;;  %v4115_v32 = vmul.f32 %v11047_v34, %v3902_v18  ;;  %vm4050_vm15 = vcmp.ge.f32.partialorder %v3902_v18, 0.0  ;;  %v3569_v1 = vadd.f32 %v3568_v22, %v10647_v43  ;;  %v14395_v43 = vld [vmem:[#allocation95_spill] sm:$0xff] }
 0x442   : > { %v4488_v28 = vshrl.u32 %v4430_v19, 16  ;;  %v4491_v15 = vshll.u32 %v4430_v19, 16  ;;  %v3571_v19 = vadd.f32 %v3570_v30, %v10658_v52 }
 0x443   : > { %3781 = vmatmul.bf16.gmra.mxu3 %v10678_v9  ;;  %v4179_v10 = vsel %vm4050_vm15, %v3902_v18, %v4115_v32  ;;  %v3738_v6 = vadd.f32 %v3737_v23, %v3569_v1 }
 0x444   : > { %v11106_v14 = vrot.slane %v4488_v28, 7  ;;  %v3573_v54 = vpop.f32.mrf.mxu2  ;;  %v4243_v27 = vpack.c.bf16 %v4179_v10, %v4179_v10  ;;  %v14396_v28 = vld [vmem:[#allocation26_spill] sm:$0xff] }
 0x446   : > { %v3742_v55 = vpop.f32.mrf.mxu3  ;;  %v3903_v50 = vpop.f32.mrf.mxu0  ;;  %v4493_v47 = vor.u32 %v4491_v15, %v11106_v14  ;;  %v4371_v49 = vunpack.c.l.b16 %v4243_v27 }
 0x447   : > { %v3904_v51 = vadd.f32 %v3903_v50, %v3735_v24  ;;  %v3740_v50 = vadd.f32 %v3739_v13, %v3571_v19 }
 0x448   : > { %v11111_v2 = vsel %vm11020_vm6, 0, %v4493_v47 }
 0x449   : > { %14393 = vst [vmem:[#allocation135_spill] sm:$0xff] %v11111_v2  ;;  %vm4051_vm0 = vcmp.ge.f32.partialorder %v3904_v51, 0.0  ;;  %v4116_v9 = vmul.f32 %v11047_v34, %v3904_v51  ;;  %6060 = vmatmul.bf16.gmra.mxu1 %v11111_v2 }
 0x44b   : > { %v4180_v20 = vsel %vm4051_vm0, %v3904_v51, %v4116_v9  ;;  %v14398_v9 = vld [vmem:[#allocation106_spill] sm:$0xff] }
 0x44c   : > { %v4244_v53 = vpack.c.bf16 %v4180_v20, %v4180_v20  ;;  %v3575_v4 = vpop.f32.mrf.mxu2  ;;  %v3574_v27 = vadd.f32 %v3573_v54, %v14398_v9 }
 0x44e   : > { %v3744_v60 = vpop.f32.mrf.mxu3  ;;  %v4372_v40 = vunpack.c.l.b16 %v4244_v53  ;;  %v3906_v41 = vpop.f32.mrf.mxu0 }
 0x44f   : > { %v3907_v16 = vadd.f32 %v3906_v41, %v3738_v6 }
 0x450   : > { %v4431_v18 = vpack.c.b16 %v4372_v40, %v4371_v49  ;;  %v3743_v40 = vadd.f32 %v3742_v55, %v3574_v27 }
 0x451   : > { %3617 = vmatmul.bf16.gmra.mxu2 %v14394_v5  ;;  %3945 = vmatmul.bf16.gmra.mxu0 %v14395_v43  ;;  %v4117_v32 = vmul.f32 %v11047_v34, %v3907_v16  ;;  %vm4052_vm1 = vcmp.ge.f32.partialorder %v3907_v16, 0.0 }
 0x452   : > { %v4495_v22 = vshrl.u32 %v4431_v18, 16  ;;  %v4498_v23 = vshll.u32 %v4431_v18, 16 }
 0x453   : > { %3786 = vmatmul.bf16.gmra.mxu3 %v14396_v28  ;;  %v4181_v52 = vsel %vm4052_vm1, %v3907_v16, %v4117_v32  ;;  %v3576_v32 = vadd.f32 %v3575_v4, %v10670_v21 }
 0x454   : > { %v11121_v15 = vrot.slane %v4495_v22, 7  ;;  %v3578_v24 = vpop.f32.mrf.mxu2  ;;  %v4245_v53 = vpack.c.bf16 %v4181_v52, %v4181_v52 }
 0x455   : > { %v3745_v52 = vadd.f32 %v3744_v60, %v3576_v32  ;;  %v3579_v27 = vadd.f32 %v3578_v24, %v10683_v38  ;;  %v14400_v38 = vld [vmem:[#allocation116_spill] sm:$0xff] }
 0x456   : > { %v3747_v47 = vpop.f32.mrf.mxu3  ;;  %v3908_v10 = vpop.f32.mrf.mxu0  ;;  %v4500_v51 = vor.u32 %v4498_v23, %v11121_v15  ;;  %v4373_v18 = vunpack.c.l.b16 %v4245_v53 }
 0x457   : > { %v3909_v30 = vadd.f32 %v3908_v10, %v3740_v50 }
 0x458   : > { %v11126_v1 = vsel %vm11020_vm6, 0, %v4500_v51  ;;  %v8778_v51 = vld [vmem:[#allocation9 + $0x68] sm:$0xff] }
 0x459   : > { %14397 = vst [vmem:[#allocation137_spill] sm:$0xff] %v11126_v1  ;;  %vm4053_vm2 = vcmp.ge.f32.partialorder %v3909_v30, 0.0  ;;  %v4118_v20 = vmul.f32 %v11047_v34, %v3909_v30  ;;  %6065 = vmatmul.bf16.gmra.mxu1 %v11126_v1  ;;  %6203 = vmatpush.bf16.msrb.mxu2 %v8778_v51 }
 0x45b   : > { %v4182_v6 = vsel %vm4053_vm2, %v3909_v30, %v4118_v20 }
 0x45c   : > { %v4246_v13 = vpack.c.bf16 %v4182_v6, %v4182_v6  ;;  %v3580_v49 = vpop.f32.mrf.mxu2 }
 0x45e   : > { %v3749_v41 = vpop.f32.mrf.mxu3  ;;  %v4374_v16 = vunpack.c.l.b16 %v4246_v13  ;;  %v3911_v19 = vpop.f32.mrf.mxu0 }
 0x45f   : > { %v3912_v43 = vadd.f32 %v3911_v19, %v3743_v40  ;;  %v3748_v40 = vadd.f32 %v3747_v47, %v3579_v27 }
 0x460   : > { %v4432_v22 = vpack.c.b16 %v4374_v16, %v4373_v18 }
 0x461   : > { %3622 = vmatmul.bf16.gmra.mxu2 %v14205_v12  ;;  %3950 = vmatmul.bf16.gmra.mxu0 %v10681_v57  ;;  %v4119_v23 = vmul.f32 %v11047_v34, %v3912_v43  ;;  %vm4054_vm5 = vcmp.ge.f32.partialorder %v3912_v43, 0.0  ;;  %v8786_v12 = vld [vmem:[#allocation9 + $0xa8] sm:$0xff] }
 0x462   : > { %v4502_v54 = vshrl.u32 %v4432_v22, 16  ;;  %v4505_v55 = vshll.u32 %v4432_v22, 16  ;;  %6372 = vmatpush.bf16.msrb.mxu3 %v8786_v12 }
 0x463   : > { %3791 = vmatmul.bf16.gmra.mxu3 %v14213_v56  ;;  %v4183_v4 = vsel %vm4054_vm5, %v3912_v43, %v4119_v23 }
 0x464   : > { %v11136_v50 = vrot.slane %v4502_v54, 7  ;;  %v3583_v10 = vpop.f32.mrf.mxu2  ;;  %v4247_v60 = vpack.c.bf16 %v4183_v4, %v4183_v4  ;;  %v3581_v54 = vadd.f32 %v3580_v49, %v10689_v63 }
 0x466   : > { %v3752_v30 = vpop.f32.mrf.mxu3  ;;  %v3913_v9 = vpop.f32.mrf.mxu0  ;;  %v4507_v21 = vor.u32 %v4505_v55, %v11136_v50  ;;  %v4375_v16 = vunpack.c.l.b16 %v4247_v60 }
 0x467   : > { %v3914_v57 = vadd.f32 %v3913_v9, %v3745_v52  ;;  %v8794_v52 = vld [vmem:[#allocation9 + $0xe8] sm:$0xff]  ;;  %v11161_v60 = vpop.f32.mrf.mxu1 }
 0x468   : > { %v11141_v56 = vsel %vm11020_vm6, 0, %v4507_v21  ;;  %v8802_v9 = vld [vmem:[#allocation9 + $0x128] sm:$0xff]  ;;  %v3750_v21 = vadd.f32 %v3749_v41, %v3581_v54  ;;  %6541 = vmatpush.bf16.msrb.mxu0 %v8794_v52 }
 0x469   : > { %14399 = vst [vmem:[#allocation65_spill] sm:$0xff] %v11141_v56  ;;  %vm4055_vm7 = vcmp.ge.f32.partialorder %v3914_v57, 0.0  ;;  %v4120_v20 = vmul.f32 %v11047_v34, %v3914_v57  ;;  %6070 = vmatmul.bf16.gmra.mxu1 %v11141_v56 }
 0x46a   : > { %6710 = vmatpush.bf16.msrb.mxu1 %v8802_v9 }
 0x46b   : > { %v4184_v53 = vsel %vm4055_vm7, %v3914_v57, %v4120_v20  ;;  %v3584_v57 = vadd.f32 %v3583_v10, %v10697_v46  ;;  %v14402_v10 = vld [vmem:[#allocation107_spill] sm:$0xff] }
 0x46c   : > { %v4248_v6 = vpack.c.bf16 %v4184_v53, %v4184_v53  ;;  %v3585_v13 = vpop.f32.mrf.mxu2 }
 0x46d   : > { %v3586_v46 = vadd.f32 %v3585_v13, %v10703_v58 }
 0x46e   : > { %v3754_v18 = vpop.f32.mrf.mxu3  ;;  %v4376_v19 = vunpack.c.l.b16 %v4248_v6  ;;  %v3916_v43 = vpop.f32.mrf.mxu0 }
 0x46f   : > { %v3917_v22 = vadd.f32 %v3916_v43, %v3748_v40  ;;  %v3753_v40 = vadd.f32 %v3752_v30, %v3584_v57  ;;  %v11170_v52 = vpop.f32.mrf.mxu1 }
 0x470   : > { %v4433_v32 = vpack.c.b16 %v4376_v19, %v4375_v16 }
 0x471   : > { %3627 = vmatmul.bf16.gmra.mxu2 %v14209_v8  ;;  %3955 = vmatmul.bf16.gmra.mxu0 %v14400_v38  ;;  %v4121_v23 = vmul.f32 %v11047_v34, %v3917_v22  ;;  %vm4056_vm8 = vcmp.ge.f32.partialorder %v3917_v22, 0.0 }
 0x472   : > { %v4509_v24 = vshrl.u32 %v4433_v32, 16  ;;  %v4512_v47 = vshll.u32 %v4433_v32, 16 }
 0x473   : > { %3796 = vmatmul.bf16.gmra.mxu3 %v14219_v25  ;;  %v4185_v8 = vsel %vm4056_vm8, %v3917_v22, %v4121_v23 }
 0x474   : > { %v11151_v55 = vrot.slane %v4509_v24, 7  ;;  %v3588_v51 = vpop.f32.mrf.mxu2  ;;  %v4249_v41 = vpack.c.bf16 %v4185_v8, %v4185_v8 }
 0x476   : > { %v3757_v12 = vpop.f32.mrf.mxu3  ;;  %v3918_v4 = vpop.f32.mrf.mxu0  ;;  %v4514_v63 = vor.u32 %v4512_v47, %v11151_v55  ;;  %v4377_v19 = vunpack.c.l.b16 %v4249_v41 }
 0x477   : > { %v3919_v49 = vadd.f32 %v3918_v4, %v3750_v21  ;;  %v3755_v21 = vadd.f32 %v3754_v18, %v3586_v46 }
 0x478   : > { %v11156_v25 = vsel %vm11020_vm6, 0, %v4514_v63 }
 0x479   : > { %14401 = vst [vmem:[#allocation136_spill] sm:$0xff] %v11156_v25  ;;  %vm4057_vm9 = vcmp.ge.f32.partialorder %v3919_v49, 0.0  ;;  %v4122_v27 = vmul.f32 %v11047_v34, %v3919_v49  ;;  %6075 = vmatmul.bf16.gmra.mxu1 %v11156_v25 }
 0x47b   : > { %v4186_v20 = vsel %vm4057_vm9, %v3919_v49, %v4122_v27 }
 0x47c   : > { %v4250_v53 = vpack.c.bf16 %v4186_v20, %v4186_v20  ;;  %v3590_v6 = vpop.f32.mrf.mxu2 }
 0x47e   : > { %v3759_v16 = vpop.f32.mrf.mxu3  ;;  %v4378_v43 = vunpack.c.l.b16 %v4250_v53  ;;  %v3921_v22 = vpop.f32.mrf.mxu0 }
 0x47f   : > { %v3922_v32 = vadd.f32 %v3921_v22, %v3753_v40  ;;  %v11180_v22 = vpop.f32.mrf.mxu1 }
 0x480   : > { %v4434_v54 = vpack.c.b16 %v4378_v43, %v4377_v19 }
 0x481   : > { %3632 = vmatmul.bf16.gmra.mxu2 %v14214_v29  ;;  %3960 = vmatmul.bf16.gmra.mxu0 %v14402_v10  ;;  %v4123_v23 = vmul.f32 %v11047_v34, %v3922_v32  ;;  %vm4058_vm10 = vcmp.ge.f32.partialorder %v3922_v32, 0.0  ;;  %v14405_v10 = vld [vmem:[#allocation23_spill] sm:$0xff] }
 0x482   : > { %v4516_v24 = vshrl.u32 %v4434_v54, 16  ;;  %v4519_v30 = vshll.u32 %v4434_v54, 16 }
 0x483   : > { %3801 = vmatmul.bf16.gmra.mxu3 %v14225_v42  ;;  %v4187_v29 = vsel %vm4058_vm10, %v3922_v32, %v4123_v23  ;;  %v14404_v42 = vld [vmem:[#allocation103_spill] sm:$0xff]  ;;  %v14407_v23 = vld [vmem:[#allocation109_spill] sm:$0xff] }
 0x484   : > { %v11168_v47 = vrot.slane %v4516_v24, 7  ;;  %v3593_v9 = vpop.f32.mrf.mxu2  ;;  %v3589_v49 = vadd.f32 %v3588_v51, %v14404_v42  ;;  %v4251_v27 = vpack.c.bf16 %v4187_v29, %v4187_v29  ;;  %v3591_v51 = vadd.f32 %v3590_v6, %v14405_v10  ;;  %v14406_v24 = vld [vmem:[#allocation38_spill] sm:$0xff] }
 0x486   : > { %v3762_v4 = vpop.f32.mrf.mxu3  ;;  %v3923_v63 = vpop.f32.mrf.mxu0  ;;  %v4521_v58 = vor.u32 %v4519_v30, %v11168_v47  ;;  %v3758_v53 = vadd.f32 %v3757_v12, %v3589_v49  ;;  %v4379_v19 = vunpack.c.l.b16 %v4251_v27  ;;  %v3760_v29 = vadd.f32 %v3759_v16, %v3591_v51 }
 0x487   : > { %v3924_v13 = vadd.f32 %v3923_v63, %v3755_v21 }
 0x488   : > { %v11175_v8 = vsel %vm11020_vm6, 0, %v4521_v58 }
 0x489   : > { %14403 = vst [vmem:[#allocation76_spill] sm:$0xff] %v11175_v8  ;;  %vm4059_vm11 = vcmp.ge.f32.partialorder %v3924_v13, 0.0  ;;  %v4124_v57 = vmul.f32 %v11047_v34, %v3924_v13  ;;  %6080 = vmatmul.bf16.gmra.mxu1 %v11175_v8 }
 0x48b   : > { %v4188_v41 = vsel %vm4059_vm11, %v3924_v13, %v4124_v57 }
 0x48c   : > { %v4252_v18 = vpack.c.bf16 %v4188_v41, %v4188_v41  ;;  %v3595_v20 = vpop.f32.mrf.mxu2 }
 0x48e   : > { %v3764_v40 = vpop.f32.mrf.mxu3  ;;  %v4380_v43 = vunpack.c.l.b16 %v4252_v18  ;;  %v3926_v32 = vpop.f32.mrf.mxu0 }
 0x48f   : > { %v3927_v54 = vadd.f32 %v3926_v32, %v3758_v53 }
 0x490   : > { %v4435_v46 = vpack.c.b16 %v4380_v43, %v4379_v19 }
 0x491   : > { %3637 = vmatmul.bf16.gmra.mxu2 %v14406_v24  ;;  %3965 = vmatmul.bf16.gmra.mxu0 %v14407_v23  ;;  %v4125_v21 = vmul.f32 %v11047_v34, %v3927_v54  ;;  %vm4060_vm12 = vcmp.ge.f32.partialorder %v3927_v54, 0.0 }
 0x492   : > { %v4523_v30 = vshrl.u32 %v4435_v46, 16  ;;  %v4526_v63 = vshll.u32 %v4435_v46, 16 }
 0x493   : > { %3806 = vmatmul.bf16.gmra.mxu3 %v14231_v39  ;;  %v4189_v57 = vsel %vm4060_vm12, %v3927_v54, %v4125_v21  ;;  %v14409_v39 = vld [vmem:[#allocation25_spill] sm:$0xff] }
 0x494   : > { %v11187_v12 = vrot.slane %v4523_v30, 7  ;;  %v3598_v58 = vpop.f32.mrf.mxu2  ;;  %v3594_v18 = vadd.f32 %v3593_v9, %v14409_v39  ;;  %v4253_v16 = vpack.c.bf16 %v4189_v57, %v4189_v57  ;;  %v8777_v39 = vld [vmem:[#allocation9 + $0x60] sm:$0xff] }
 0x495   : > { %6204 = vmatpush.bf16.msrb.mxu2 %v8777_v39 }
 0x496   : > { %v3767_v13 = vpop.f32.mrf.mxu3  ;;  %v3928_v42 = vpop.f32.mrf.mxu0  ;;  %v4528_v6 = vor.u32 %v4526_v63, %v11187_v12  ;;  %v3763_v46 = vadd.f32 %v3762_v4, %v3594_v18  ;;  %v4381_v51 = vunpack.c.l.b16 %v4253_v16  ;;  %v14410_v63 = vld [vmem:[#allocation28_spill] sm:$0xff] }
 0x497   : > { %v11189_v49 = vpop.f32.mrf.mxu1  ;;  %v3929_v27 = vadd.f32 %v3928_v42, %v3760_v29  ;;  %v3596_v9 = vadd.f32 %v3595_v20, %v14410_v63  ;;  %v14411_v29 = vld [vmem:[#allocation24_spill] sm:$0xff]  ;;  %v8785_v20 = vld [vmem:[#allocation9 + $0xa0] sm:$0xff] }
 0x498   : > { %v11194_v41 = vsel %vm11020_vm6, 0, %v4528_v6  ;;  %6373 = vmatpush.bf16.msrb.mxu3 %v8785_v20  ;;  %v14416_v20 = vld [vmem:[#allocation27_spill] sm:$0xff] }
 0x499   : > { %14408 = vst [vmem:[#allocation138_spill] sm:$0xff] %v11194_v41  ;;  %vm4061_vm13 = vcmp.ge.f32.partialorder %v3929_v27, 0.0  ;;  %v4126_v53 = vmul.f32 %v11047_v34, %v3929_v27  ;;  %6085 = vmatmul.bf16.gmra.mxu1 %v11194_v41  ;;  %v3765_v18 = vadd.f32 %v3764_v40, %v3596_v9 }
 0x49b   : > { %v4190_v19 = vsel %vm4061_vm13, %v3929_v27, %v4126_v53 }
 0x49c   : > { %v4254_v43 = vpack.c.bf16 %v4190_v19, %v4190_v19  ;;  %v3600_v32 = vpop.f32.mrf.mxu2 }
 0x49e   : > { %v3769_v10 = vpop.f32.mrf.mxu3  ;;  %v4382_v54 = vunpack.c.l.b16 %v4254_v43  ;;  %v3931_v24 = vpop.f32.mrf.mxu0 }
 0x49f   : > { %v11199_v23 = vpop.f32.mrf.mxu1  ;;  %v3932_v30 = vadd.f32 %v3931_v24, %v3763_v46 }
 0x4a0   : > { %v4436_v21 = vpack.c.b16 %v4382_v54, %v4381_v51  ;;  %v14413_v51 = vld [vmem:[#allocation29_spill] sm:$0xff] }
 0x4a1   : > { %3642 = vmatmul.bf16.gmra.mxu2 %v14226_v33  ;;  %3970 = vmatmul.bf16.gmra.mxu0 %v14411_v29  ;;  %v4127_v6 = vmul.f32 %v11047_v34, %v3932_v30  ;;  %vm4062_vm14 = vcmp.ge.f32.partialorder %v3932_v30, 0.0  ;;  %v3599_v54 = vadd.f32 %v3598_v58, %v14413_v51 }
 0x4a2   : > { %v4530_v42 = vshrl.u32 %v4436_v21, 16  ;;  %v4533_v57 = vshll.u32 %v4436_v21, 16 }
 0x4a3   : > { %3811 = vmatmul.bf16.gmra.mxu3 %v14237_v45  ;;  %v4191_v43 = vsel %vm4062_vm14, %v3932_v30, %v4127_v6  ;;  %v3768_v29 = vadd.f32 %v3767_v13, %v3599_v54 }
 0x4a4   : > { %v11206_v4 = vrot.slane %v4530_v42, 7  ;;  %v3603_v27 = vpop.f32.mrf.mxu2  ;;  %v4255_v24 = vpack.c.bf16 %v4191_v43, %v4191_v43 }
 0x4a6   : > { %v3772_v53 = vpop.f32.mrf.mxu3  ;;  %v3933_v16 = vpop.f32.mrf.mxu0  ;;  %v4535_v33 = vor.u32 %v4533_v57, %v11206_v4  ;;  %v4383_v30 = vunpack.c.l.b16 %v4255_v24  ;;  %v8801_v24 = vld [vmem:[#allocation9 + $0x120] sm:$0xff] }
 0x4a7   : > { %v11208_v19 = vpop.f32.mrf.mxu1  ;;  %v3934_v46 = vadd.f32 %v3933_v16, %v3765_v18  ;;  %6711 = vmatpush.bf16.msrb.mxu1 %v8801_v24 }
 0x4a8   : > { %v11213_v45 = vsel %vm11020_vm6, 0, %v4535_v33  ;;  %v14415_v33 = vld [vmem:[#allocation32_spill] sm:$0xff] }
 0x4a9   : > { %14412 = vst [vmem:[#allocation140_spill] sm:$0xff] %v11213_v45  ;;  %vm4063_vm15 = vcmp.ge.f32.partialorder %v3934_v46, 0.0  ;;  %v4128_v40 = vmul.f32 %v11047_v34, %v3934_v46  ;;  %6090 = vmatmul.bf16.gmra.mxu1 %v11213_v45  ;;  %v3601_v58 = vadd.f32 %v3600_v32, %v14415_v33 }
 0x4ab   : > { %v4192_v21 = vsel %vm4063_vm15, %v3934_v46, %v4128_v40  ;;  %v8793_v40 = vld [vmem:[#allocation9 + $0xe0] sm:$0xff] }
 0x4ac   : > { %v4256_v63 = vpack.c.bf16 %v4192_v21, %v4192_v21  ;;  %v3605_v9 = vpop.f32.mrf.mxu2  ;;  %v3770_v21 = vadd.f32 %v3769_v10, %v3601_v58  ;;  %6542 = vmatpush.bf16.msrb.mxu0 %v8793_v40 }
 0x4ae   : > { %v3774_v42 = vpop.f32.mrf.mxu3  ;;  %v4384_v6 = vunpack.c.l.b16 %v4256_v63  ;;  %v3936_v57 = vpop.f32.mrf.mxu0 }
 0x4af   : > { %v11218_v39 = vpop.f32.mrf.mxu1  ;;  %v3937_v18 = vadd.f32 %v3936_v57, %v3768_v29  ;;  %v14420_v57 = vld [vmem:[#allocation33_spill] sm:$0xff] }
 0x4b0   : > { %14414 = vst [vmem:[#allocation73_spill] sm:$0xff] %v11218_v39  ;;  %v4437_v16 = vpack.c.b16 %v4384_v6, %v4383_v30  ;;  %v14424_v39 = vld [vmem:[#allocation30_spill] sm:$0xff] }
 0x4b1   : > { %3647 = vmatmul.bf16.gmra.mxu2 %v14232_v35  ;;  %3975 = vmatmul.bf16.gmra.mxu0 %v14416_v20  ;;  %v4129_v43 = vmul.f32 %v11047_v34, %v3937_v18  ;;  %vm4064_vm0 = vcmp.ge.f32.partialorder %v3937_v18, 0.0 }
 0x4b2   : > { %v4537_v51 = vshrl.u32 %v4437_v16, 16  ;;  %v4540_v46 = vshll.u32 %v4437_v16, 16  ;;  %v3604_v16 = vadd.f32 %v3603_v27, %v14420_v57  ;;  %v14423_v57 = vld [vmem:[#allocation53_spill] sm:$0xff] }
 0x4b3   : > { %3816 = vmatmul.bf16.gmra.mxu3 %v14243_v26  ;;  %v4193_v30 = vsel %vm4064_vm0, %v3937_v18, %v4129_v43 }
 0x4b4   : > { %v11225_v13 = vrot.slane %v4537_v51, 7  ;;  %v3608_v54 = vpop.f32.mrf.mxu2  ;;  %v4257_v10 = vpack.c.bf16 %v4193_v30, %v4193_v30  ;;  %v14425_v30 = vld [vmem:[#allocation58_spill] sm:$0xff] }
 0x4b6   : > { %14417 = vst [vmem:[#allocation139_spill] sm:$0xff] %v11225_v13  ;;  %v3777_v63 = vpop.f32.mrf.mxu3  ;;  %v3938_v29 = vpop.f32.mrf.mxu0  ;;  %v4542_v35 = vor.u32 %v4540_v46, %v11225_v13  ;;  %v3773_v46 = vadd.f32 %v3772_v53, %v3604_v16  ;;  %v4385_v24 = vunpack.c.l.b16 %v4257_v10 }
 0x4b7   : > { %v11227_v32 = vpop.f32.mrf.mxu1  ;;  %v3939_v26 = vadd.f32 %v3938_v29, %v3770_v21 }
 0x4b8   : > { %14418 = vst [vmem:[#allocation68_spill] sm:$0xff] %v11227_v32  ;;  %v11232_v6 = vsel %vm11020_vm6, 0, %v4542_v35  ;;  %v14422_v32 = vld [vmem:[#allocation37_spill] sm:$0xff] }
 0x4b9   : > { %14419 = vst [vmem:[#allocation71_spill] sm:$0xff] %v11232_v6  ;;  %vm4065_vm1 = vcmp.ge.f32.partialorder %v3939_v26, 0.0  ;;  %v4130_v33 = vmul.f32 %v11047_v34, %v3939_v26  ;;  %6095 = vmatmul.bf16.gmra.mxu1 %v11232_v6  ;;  %v3606_v27 = vadd.f32 %v3605_v9, %v14422_v32 }
 0x4bb   : > { %v4194_v58 = vsel %vm4065_vm1, %v3939_v26, %v4130_v33  ;;  %v3775_v10 = vadd.f32 %v3774_v42, %v3606_v27 }
 0x4bc   : > { %v4258_v20 = vpack.c.bf16 %v4194_v58, %v4194_v58  ;;  %v3610_v51 = vpop.f32.mrf.mxu2 }
 0x4be   : > { %v3779_v40 = vpop.f32.mrf.mxu3  ;;  %v4386_v18 = vunpack.c.l.b16 %v4258_v20  ;;  %v3941_v43 = vpop.f32.mrf.mxu0 }
 0x4bf   : > { %v11237_v21 = vpop.f32.mrf.mxu1  ;;  %v3942_v29 = vadd.f32 %v3941_v43, %v3773_v46 }
 0x4c0   : > { %14421 = vst [vmem:[#allocation93_spill] sm:$0xff] %v11237_v21  ;;  %v4438_v35 = vpack.c.b16 %v4386_v18, %v4385_v24  ;;  %v14429_v18 = vld [vmem:[#allocation42_spill] sm:$0xff]  ;;  %v14431_v21 = vld [vmem:[#allocation40_spill] sm:$0xff] }
 0x4c1   : > { %3652 = vmatmul.bf16.gmra.mxu2 %v14423_v57  ;;  %3980 = vmatmul.bf16.gmra.mxu0 %v14424_v39  ;;  %v4131_v26 = vmul.f32 %v11047_v34, %v3942_v29  ;;  %vm4066_vm2 = vcmp.ge.f32.partialorder %v3942_v29, 0.0  ;;  %v3609_v43 = vadd.f32 %v3608_v54, %v14429_v18  ;;  %v3611_v54 = vadd.f32 %v3610_v51, %v14431_v21  ;;  %v14432_v18 = vld [vmem:[#allocation60_spill] sm:$0xff] }
 0x4c2   : > { %v4544_v13 = vshrl.u32 %v4438_v35, 16  ;;  %v4547_v16 = vshll.u32 %v4438_v35, 16 }
 0x4c3   : > { %3821 = vmatmul.bf16.gmra.mxu3 %v14425_v30  ;;  %v4195_v32 = vsel %vm4066_vm2, %v3942_v29, %v4131_v26  ;;  %v3778_v30 = vadd.f32 %v3777_v63, %v3609_v43 }
 0x4c4   : > { %v11244_v53 = vrot.slane %v4544_v13, 7  ;;  %v3613_v33 = vpop.f32.mrf.mxu2  ;;  %v4259_v42 = vpack.c.bf16 %v4195_v32, %v4195_v32  ;;  %v14434_v32 = vld [vmem:[#allocation64_spill] sm:$0xff] }
 0x4c6   : > { %14426 = vst [vmem:[#allocation69_spill] sm:$0xff] %v11244_v53  ;;  %v3782_v58 = vpop.f32.mrf.mxu3  ;;  %v3943_v20 = vpop.f32.mrf.mxu0  ;;  %v4549_v9 = vor.u32 %v4547_v16, %v11244_v53  ;;  %v4387_v16 = vunpack.c.l.b16 %v4259_v42  ;;  %v14433_v53 = vld [vmem:[#allocation34_spill] sm:$0xff]  ;;  %v3780_v42 = vadd.f32 %v3779_v40, %v3611_v54 }
 0x4c7   : > { %v11246_v46 = vpop.f32.mrf.mxu1  ;;  %v3944_v24 = vadd.f32 %v3943_v20, %v3775_v10 }
 0x4c8   : > { %14427 = vst [vmem:[#allocation79_spill] sm:$0xff] %v11246_v46  ;;  %v11251_v39 = vsel %vm11020_vm6, 0, %v4549_v9 }
 0x4c9   : > { %14428 = vst [vmem:[#allocation81_spill] sm:$0xff] %v11251_v39  ;;  %vm4067_vm5 = vcmp.ge.f32.partialorder %v3944_v24, 0.0  ;;  %v4132_v13 = vmul.f32 %v11047_v34, %v3944_v24  ;;  %6100 = vmatmul.bf16.gmra.mxu1 %v11251_v39 }
 0x4cb   : > { %v4196_v35 = vsel %vm4067_vm5, %v3944_v24, %v4132_v13 }
 0x4cc   : > { %v4260_v27 = vpack.c.bf16 %v4196_v35, %v4196_v35  ;;  %v3615_v57 = vpop.f32.mrf.mxu2  ;;  %v14436_v35 = vld [vmem:[#allocation52_spill] sm:$0xff] }
 0x4ce   : > { %v3784_v46 = vpop.f32.mrf.mxu3  ;;  %v4388_v29 = vunpack.c.l.b16 %v4260_v27  ;;  %v3946_v26 = vpop.f32.mrf.mxu0 }
 0x4cf   : > { %v11256_v10 = vpop.f32.mrf.mxu1  ;;  %v3947_v20 = vadd.f32 %v3946_v26, %v3778_v30 }
 0x4d0   : > { %14430 = vst [vmem:[#allocation78_spill] sm:$0xff] %v11256_v10  ;;  %v4439_v9 = vpack.c.b16 %v4388_v29, %v4387_v16  ;;  %v8776_v10 = vld [vmem:[#allocation9 + $0x58] sm:$0xff] }
 0x4d1   : > { %3657 = vmatmul.bf16.gmra.mxu2 %v14432_v18  ;;  %3985 = vmatmul.bf16.gmra.mxu0 %v14433_v53  ;;  %v4133_v24 = vmul.f32 %v11047_v34, %v3947_v20  ;;  %vm4068_vm7 = vcmp.ge.f32.partialorder %v3947_v20, 0.0 }
 0x4d2   : > { %v4551_v39 = vshrl.u32 %v4439_v9, 16  ;;  %v4554_v43 = vshll.u32 %v4439_v9, 16  ;;  %6205 = vmatpush.bf16.msrb.mxu2 %v8776_v10 }
 0x4d3   : > { %3826 = vmatmul.bf16.gmra.mxu3 %v14434_v32  ;;  %v4197_v53 = vsel %vm4068_vm7, %v3947_v20, %v4133_v24 }
 0x4d4   : > { %v11263_v63 = vrot.slane %v4551_v39, 7  ;;  %v3618_v13 = vpop.f32.mrf.mxu2  ;;  %v14439_v39 = vld [vmem:[#allocation47_spill] sm:$0xff]  ;;  %v4261_v54 = vpack.c.bf16 %v4197_v53, %v4197_v53 }
 0x4d5   : > { %v3619_v27 = vadd.f32 %v3618_v13, %v14436_v35  ;;  %v3614_v9 = vadd.f32 %v3613_v33, %v14439_v39  ;;  %v14444_v53 = vld [vmem:[#allocation43_spill] sm:$0xff] }
 0x4d6   : > { %14435 = vst [vmem:[#allocation88_spill] sm:$0xff] %v11263_v63  ;;  %v3787_v30 = vpop.f32.mrf.mxu3  ;;  %v3948_v16 = vpop.f32.mrf.mxu0  ;;  %v4556_v21 = vor.u32 %v4554_v43, %v11263_v63  ;;  %v14440_v43 = vld [vmem:[#allocation50_spill] sm:$0xff]  ;;  %v14442_v63 = vld [vmem:[#allocation44_spill] sm:$0xff] }
 0x4d7   : > { %v11266_v51 = vpop.f32.mrf.mxu1  ;;  %v3788_v29 = vadd.f32 %v3787_v30, %v3619_v27  ;;  %v3949_v26 = vadd.f32 %v3948_v16, %v3780_v42  ;;  %v4389_v42 = vunpack.c.l.b16 %v4261_v54  ;;  %v3616_v6 = vadd.f32 %v3615_v57, %v14442_v63  ;;  %v8784_v63 = vld [vmem:[#allocation9 + $0x98] sm:$0xff] }
 0x4d8   : > { %14437 = vst [vmem:[#allocation89_spill] sm:$0xff] %v11266_v51  ;;  %v11271_v18 = vsel %vm11020_vm6, 0, %v4556_v21  ;;  %v3783_v51 = vadd.f32 %v3782_v58, %v3614_v9  ;;  %v14445_v58 = vld [vmem:[#allocation74_spill] sm:$0xff]  ;;  %6374 = vmatpush.bf16.msrb.mxu3 %v8784_v63 }
 0x4d9   : > { %14438 = vst [vmem:[#allocation110_spill] sm:$0xff] %v11271_v18  ;;  %vm4069_vm8 = vcmp.ge.f32.partialorder %v3949_v26, 0.0  ;;  %v4134_v40 = vmul.f32 %v11047_v34, %v3949_v26  ;;  %6105 = vmatmul.bf16.gmra.mxu1 %v11271_v18  ;;  %v14443_v18 = vld [vmem:[#allocation63_spill] sm:$0xff] }
 0x4db   : > { %v4198_v32 = vsel %vm4069_vm8, %v3949_v26, %v4134_v40 }
 0x4dc   : > { %v4262_v13 = vpack.c.bf16 %v4198_v32, %v4198_v32  ;;  %v3620_v35 = vpop.f32.mrf.mxu2 }
 0x4dd   : > { %v3621_v20 = vadd.f32 %v3620_v35, %v14440_v43 }
 0x4de   : > { %v3789_v24 = vpop.f32.mrf.mxu3  ;;  %v4390_v27 = vunpack.c.l.b16 %v4262_v13  ;;  %v3951_v30 = vpop.f32.mrf.mxu0 }
 0x4df   : > { %v11277_v16 = vpop.f32.mrf.mxu1  ;;  %v3790_v21 = vadd.f32 %v3789_v24, %v3621_v20  ;;  %v3952_v33 = vadd.f32 %v3951_v30, %v3783_v51  ;;  %v3785_v51 = vadd.f32 %v3784_v46, %v3616_v6 }
 0x4e0   : > { %14441 = vst [vmem:[#allocation83_spill] sm:$0xff] %v11277_v16  ;;  %v4440_v39 = vpack.c.b16 %v4390_v27, %v4389_v42 }
 0x4e1   : > { %3662 = vmatmul.bf16.gmra.mxu2 %v14443_v18  ;;  %3990 = vmatmul.bf16.gmra.mxu0 %v14444_v53  ;;  %v4135_v9 = vmul.f32 %v11047_v34, %v3952_v33  ;;  %vm4070_vm9 = vcmp.ge.f32.partialorder %v3952_v33, 0.0 }
 0x4e2   : > { %v4558_v26 = vshrl.u32 %v4440_v39, 16  ;;  %v4561_v54 = vshll.u32 %v4440_v39, 16 }
 0x4e3   : > { %3831 = vmatmul.bf16.gmra.mxu3 %v14445_v58  ;;  %v4199_v18 = vsel %vm4070_vm9, %v3952_v33, %v4135_v9 }
 0x4e4   : > { %v11284_v40 = vrot.slane %v4558_v26, 7  ;;  %v3623_v32 = vpop.f32.mrf.mxu2  ;;  %v4263_v6 = vpack.c.bf16 %v4199_v18, %v4199_v18 }
 0x4e6   : > { %14446 = vst [vmem:[#allocation85_spill] sm:$0xff] %v11284_v40  ;;  %v3792_v13 = vpop.f32.mrf.mxu3  ;;  %v3953_v35 = vpop.f32.mrf.mxu0  ;;  %v4563_v57 = vor.u32 %v4561_v54, %v11284_v40  ;;  %v4391_v39 = vunpack.c.l.b16 %v4263_v6  ;;  %v8792_v54 = vld [vmem:[#allocation9 + $0xd8] sm:$0xff] }
 0x4e7   : > { %v11286_v43 = vpop.f32.mrf.mxu1  ;;  %v3954_v20 = vadd.f32 %v3953_v35, %v3785_v51  ;;  %v8800_v51 = vld [vmem:[#allocation9 + $0x118] sm:$0xff]  ;;  %v14450_v35 = vld [vmem:[#allocation72_spill] sm:$0xff]  ;;  %6543 = vmatpush.bf16.msrb.mxu0 %v8792_v54  ;;  %v14456_v54 = vld [vmem:[#allocation55_spill] sm:$0xff] }
 0x4e8   : > { %14447 = vst [vmem:[#allocation98_spill] sm:$0xff] %v11286_v43  ;;  %v11291_v10 = vsel %vm11020_vm6, 0, %v4563_v57  ;;  %v14451_v57 = vld [vmem:[#allocation48_spill] sm:$0xff]  ;;  %6712 = vmatpush.bf16.msrb.mxu1 %v8800_v51  ;;  %v14461_v40 = vld [vmem:[#allocation57_spill] sm:$0xff] }
 0x4e9   : > { %14448 = vst [vmem:[#allocation91_spill] sm:$0xff] %v11291_v10  ;;  %vm4071_vm10 = vcmp.ge.f32.partialorder %v3954_v20, 0.0  ;;  %v4136_v24 = vmul.f32 %v11047_v34, %v3954_v20  ;;  %6110 = vmatmul.bf16.gmra.mxu1 %v11291_v10  ;;  %v14452_v43 = vld [vmem:[#allocation84_spill] sm:$0xff] }
 0x4eb   : > { %v4200_v46 = vsel %vm4071_vm10, %v3954_v20, %v4136_v24 }
 0x4ec   : > { %v4264_v42 = vpack.c.bf16 %v4200_v46, %v4200_v46  ;;  %v3625_v27 = vpop.f32.mrf.mxu2 }
 0x4ee   : > { %v3794_v30 = vpop.f32.mrf.mxu3  ;;  %v4392_v53 = vunpack.c.l.b16 %v4264_v42  ;;  %v3956_v26 = vpop.f32.mrf.mxu0 }
 0x4ef   : > { %v11295_v33 = vpop.f32.mrf.mxu1  ;;  %v3957_v58 = vadd.f32 %v3956_v26, %v3788_v29 }
 0x4f0   : > { %14449 = vst [vmem:[#allocation99_spill] sm:$0xff] %v11295_v33  ;;  %v4441_v9 = vpack.c.b16 %v4392_v53, %v4391_v39 }
 0x4f1   : > { %3667 = vmatmul.bf16.gmra.mxu2 %v14450_v35  ;;  %3995 = vmatmul.bf16.gmra.mxu0 %v14451_v57  ;;  %v4137_v18 = vmul.f32 %v11047_v34, %v3957_v58  ;;  %vm4072_vm11 = vcmp.ge.f32.partialorder %v3957_v58, 0.0  ;;  %v3624_v35 = vadd.f32 %v3623_v32, %v14456_v54  ;;  %v14459_v32 = vld [vmem:[#allocation62_spill] sm:$0xff] }
 0x4f2   : > { %v4565_v63 = vshrl.u32 %v4441_v9, 16  ;;  %v4568_v24 = vshll.u32 %v4441_v9, 16  ;;  %v3626_v54 = vadd.f32 %v3625_v27, %v14459_v32 }
 0x4f3   : > { %3836 = vmatmul.bf16.gmra.mxu3 %v14452_v43  ;;  %v4201_v53 = vsel %vm4072_vm11, %v3957_v58, %v4137_v18 }
 0x4f4   : > { %v11301_v20 = vrot.slane %v4565_v63, 7  ;;  %v3628_v6 = vpop.f32.mrf.mxu2  ;;  %v4265_v9 = vpack.c.bf16 %v4201_v53, %v4201_v53  ;;  %v14462_v53 = vld [vmem:[#allocation94_spill] sm:$0xff] }
 0x4f6   : > { %14453 = vst [vmem:[#allocation22_spill] sm:$0xff] %v11301_v20  ;;  %v3797_v29 = vpop.f32.mrf.mxu3  ;;  %v3958_v46 = vpop.f32.mrf.mxu0  ;;  %v4570_v39 = vor.u32 %v4568_v24, %v11301_v20  ;;  %v4393_v24 = vunpack.c.l.b16 %v4265_v9  ;;  %v14460_v20 = vld [vmem:[#allocation82_spill] sm:$0xff] }
 0x4f7   : > { %v11303_v42 = vpop.f32.mrf.mxu1  ;;  %v3959_v26 = vadd.f32 %v3958_v46, %v3790_v21 }
 0x4f8   : > { %14454 = vst [vmem:[#allocation95_spill] sm:$0xff] %v11303_v42  ;;  %v11308_v43 = vsel %vm11020_vm6, 0, %v4570_v39  ;;  %v3793_v42 = vadd.f32 %v3792_v13, %v3624_v35  ;;  %v3795_v35 = vadd.f32 %v3794_v30, %v3626_v54 }
 0x4f9   : > { %14455 = vst [vmem:[#allocation26_spill] sm:$0xff] %v11308_v43  ;;  %vm4073_vm12 = vcmp.ge.f32.partialorder %v3959_v26, 0.0  ;;  %v4138_v51 = vmul.f32 %v11047_v34, %v3959_v26  ;;  %6115 = vmatmul.bf16.gmra.mxu1 %v11308_v43 }
 0x4fb   : > { %v4202_v57 = vsel %vm4073_vm12, %v3959_v26, %v4138_v51 }
 0x4fc   : > { %v4266_v63 = vpack.c.bf16 %v4202_v57, %v4202_v57  ;;  %v3630_v33 = vpop.f32.mrf.mxu2 }
 0x4fe   : > { %v3799_v16 = vpop.f32.mrf.mxu3  ;;  %v4394_v58 = vunpack.c.l.b16 %v4266_v63  ;;  %v3961_v21 = vpop.f32.mrf.mxu0 }
 0x4ff   : > { %v11313_v18 = vpop.f32.mrf.mxu1  ;;  %v3962_v46 = vadd.f32 %v3961_v21, %v3793_v42 }
 0x500   : > { %14457 = vst [vmem:[#allocation106_spill] sm:$0xff] %v11313_v18  ;;  %v11315_v39 = vpack.c.b16 %v4394_v58, %v4393_v24  ;;  %v14463_v24 = vld [vmem:[#allocation67_spill] sm:$0xff] }
 0x501   : > { %3672 = vmatmul.bf16.gmra.mxu2 %v14460_v20  ;;  %4000 = vmatmul.bf16.gmra.mxu0 %v14461_v40  ;;  %v4139_v26 = vmul.f32 %v11047_v34, %v3962_v46  ;;  %vm4074_vm13 = vcmp.ge.f32.partialorder %v3962_v46, 0.0  ;;  %v3629_v58 = vadd.f32 %v3628_v6, %v14463_v24  ;;  %v14467_v24 = vld [vmem:[#allocation70_spill] sm:$0xff] }
 0x502   : > { %14458 = vst [vmem:[#allocation116_spill] sm:$0xff] %v11315_v39 }
 0x503   : > { %3841 = vmatmul.bf16.gmra.mxu3 %v14462_v53  ;;  %v4203_v42 = vsel %vm4074_vm13, %v3962_v46, %v4139_v26  ;;  %v3798_v53 = vadd.f32 %v3797_v29, %v3629_v58 }
 0x504   : > { %v3633_v13 = vpop.f32.mrf.mxu2  ;;  %v4267_v40 = vpack.c.bf16 %v4203_v42, %v4203_v42 }
 0x506   : > { %v3802_v51 = vpop.f32.mrf.mxu3  ;;  %v3963_v9 = vpop.f32.mrf.mxu0  ;;  %v4395_v30 = vunpack.c.l.b16 %v4267_v40 }
 0x507   : > { %v11322_v57 = vpop.f32.mrf.mxu1  ;;  %v3964_v63 = vadd.f32 %v3963_v9, %v3795_v35  ;;  %v14465_v35 = vld [vmem:[#allocation75_spill] sm:$0xff]  ;;  %v14466_v9 = vld [vmem:[#allocation92_spill] sm:$0xff] }
 0x508   : > { %v3631_v6 = vadd.f32 %v3630_v33, %v14465_v35 }
 0x509   : > { %vm4075_vm14 = vcmp.ge.f32.partialorder %v3964_v63, 0.0  ;;  %v4140_v27 = vmul.f32 %v11047_v34, %v3964_v63  ;;  %6120 = vmatmul.bf16.gmra.mxu1 %v11031_v61 }
 0x50a   : > { %v3800_v40 = vadd.f32 %v3799_v16, %v3631_v6 }
 0x50b   : > { %v4204_v20 = vsel %vm4075_vm14, %v3964_v63, %v4140_v27 }
 0x50c   : > { %v4268_v21 = vpack.c.bf16 %v4204_v20, %v4204_v20  ;;  %v3635_v32 = vpop.f32.mrf.mxu2 }
 0x50e   : > { %v3804_v39 = vpop.f32.mrf.mxu3  ;;  %v4396_v54 = vunpack.c.l.b16 %v4268_v21  ;;  %v3966_v18 = vpop.f32.mrf.mxu0 }
 0x50f   : > { %v11327_v43 = vpop.f32.mrf.mxu1  ;;  %v3967_v46 = vadd.f32 %v3966_v18, %v3798_v53 }
 0x510   : > { %14464 = vst [vmem:[#allocation107_spill] sm:$0xff] %v11327_v43  ;;  %v4443_v26 = vpack.c.b16 %v4396_v54, %v4395_v30  ;;  %v14471_v54 = vld [vmem:[#allocation77_spill] sm:$0xff]  ;;  %v14473_v43 = vld [vmem:[#allocation86_spill] sm:$0xff] }
 0x511   : > { %3677 = vmatmul.bf16.gmra.mxu2 %v14466_v9  ;;  %4005 = vmatmul.bf16.gmra.mxu0 %v14467_v24  ;;  %v4141_v63 = vmul.f32 %v11047_v34, %v3967_v46  ;;  %vm4076_vm15 = vcmp.ge.f32.partialorder %v3967_v46, 0.0  ;;  %v3634_v35 = vadd.f32 %v3633_v13, %v14471_v54  ;;  %v3636_v13 = vadd.f32 %v3635_v32, %v14473_v43  ;;  %v14474_v54 = vld [vmem:[#allocation101_spill] sm:$0xff]  ;;  %v8783_v32 = vld [vmem:[#allocation9 + $0x90] sm:$0xff] }
 0x512   : > { %v4579_v42 = vshrl.u32 %v4443_v26, 16  ;;  %v4582_v27 = vshll.u32 %v4443_v26, 16  ;;  %6375 = vmatpush.bf16.msrb.mxu3 %v8783_v32 }
 0x513   : > { %3846 = vmatmul.bf16.gmra.mxu3 %v14289_v48  ;;  %v4205_v53 = vsel %vm4076_vm15, %v3967_v46, %v4141_v63 }
 0x514   : > { %v3638_v29 = vpop.f32.mrf.mxu2  ;;  %v11334_v58 = vrot.slane %v4579_v42, 7  ;;  %v4269_v16 = vpack.c.bf16 %v4205_v53, %v4205_v53  ;;  %v3803_v42 = vadd.f32 %v3802_v51, %v3634_v35 }
 0x516   : > { %14468 = vst [vmem:[#allocation103_spill] sm:$0xff] %v11334_v58  ;;  %v3807_v20 = vpop.f32.mrf.mxu3  ;;  %v3968_v18 = vpop.f32.mrf.mxu0  ;;  %v4584_v33 = vor.u32 %v4582_v27, %v11334_v58  ;;  %v4397_v27 = vunpack.c.l.b16 %v4269_v16  ;;  %v14475_v58 = vld [vmem:[#allocation80_spill] sm:$0xff]  ;;  %v3805_v16 = vadd.f32 %v3804_v39, %v3636_v13 }
 0x517   : > { %v11336_v21 = vpop.f32.mrf.mxu1  ;;  %v3969_v30 = vadd.f32 %v3968_v18, %v3800_v40 }
 0x518   : > { %14469 = vst [vmem:[#allocation23_spill] sm:$0xff] %v11336_v21  ;;  %v11341_v48 = vsel %vm11020_vm6, 0, %v4584_v33 }
 0x519   : > { %14470 = vst [vmem:[#allocation38_spill] sm:$0xff] %v11341_v48  ;;  %vm4077_vm0 = vcmp.ge.f32.partialorder %v3969_v30, 0.0  ;;  %v4142_v9 = vmul.f32 %v11047_v34, %v3969_v30  ;;  %6125 = vmatmul.bf16.gmra.mxu1 %v11341_v48 }
 0x51b   : > { %v4206_v26 = vsel %vm4077_vm0, %v3969_v30, %v4142_v9  ;;  %v8775_v9 = vld [vmem:[#allocation9 + $0x50] sm:$0xff] }
 0x51c   : > { %v4270_v6 = vpack.c.bf16 %v4206_v26, %v4206_v26  ;;  %v3640_v24 = vpop.f32.mrf.mxu2  ;;  %6206 = vmatpush.bf16.msrb.mxu2 %v8775_v9 }
 0x51e   : > { %v3809_v21 = vpop.f32.mrf.mxu3  ;;  %v4398_v46 = vunpack.c.l.b16 %v4270_v6  ;;  %v3971_v63 = vpop.f32.mrf.mxu0 }
 0x51f   : > { %v11346_v40 = vpop.f32.mrf.mxu1  ;;  %v3972_v18 = vadd.f32 %v3971_v63, %v3803_v42 }
 0x520   : > { %14472 = vst [vmem:[#allocation109_spill] sm:$0xff] %v11346_v40  ;;  %v4444_v33 = vpack.c.b16 %v4398_v46, %v4397_v27 }
 0x521   : > { %3682 = vmatmul.bf16.gmra.mxu2 %v14474_v54  ;;  %4010 = vmatmul.bf16.gmra.mxu0 %v14475_v58  ;;  %v4143_v53 = vmul.f32 %v11047_v34, %v3972_v18  ;;  %vm4078_vm1 = vcmp.ge.f32.partialorder %v3972_v18, 0.0 }
 0x522   : > { %v4586_v48 = vshrl.u32 %v4444_v33, 16  ;;  %v4589_v30 = vshll.u32 %v4444_v33, 16 }
 0x523   : > { %3851 = vmatmul.bf16.gmra.mxu3 %v14296_v17  ;;  %v4207_v58 = vsel %vm4078_vm1, %v3972_v18, %v4143_v53 }
 0x524   : > { %v11353_v51 = vrot.slane %v4586_v48, 7  ;;  %v3643_v35 = vpop.f32.mrf.mxu2  ;;  %v14478_v48 = vld [vmem:[#allocation87_spill] sm:$0xff]  ;;  %v4271_v63 = vpack.c.bf16 %v4207_v58, %v4207_v58 }
 0x525   : > { %v3639_v46 = vadd.f32 %v3638_v29, %v14478_v48  ;;  %v14480_v29 = vld [vmem:[#allocation96_spill] sm:$0xff] }
 0x526   : > { %v3812_v26 = vpop.f32.mrf.mxu3  ;;  %v3973_v6 = vpop.f32.mrf.mxu0  ;;  %v4591_v43 = vor.u32 %v4589_v30, %v11353_v51  ;;  %v4399_v18 = vunpack.c.l.b16 %v4271_v63  ;;  %v3641_v48 = vadd.f32 %v3640_v24, %v14480_v29  ;;  %v8791_v63 = vld [vmem:[#allocation9 + $0xd0] sm:$0xff] }
 0x527   : > { %v11355_v42 = vpop.f32.mrf.mxu1  ;;  %v3974_v27 = vadd.f32 %v3973_v6, %v3805_v16  ;;  %v3808_v30 = vadd.f32 %v3807_v20, %v3639_v46  ;;  %6544 = vmatpush.bf16.msrb.mxu0 %v8791_v63 }
 0x528   : > { %14476 = vst [vmem:[#allocation25_spill] sm:$0xff] %v11355_v42  ;;  %v11360_v17 = vsel %vm11020_vm6, 0, %v4591_v43  ;;  %v14481_v42 = vld [vmem:[#allocation90_spill] sm:$0xff] }
 0x529   : > { %14477 = vst [vmem:[#allocation28_spill] sm:$0xff] %v11360_v17  ;;  %vm4079_vm2 = vcmp.ge.f32.partialorder %v3974_v27, 0.0  ;;  %v4144_v39 = vmul.f32 %v11047_v34, %v3974_v27  ;;  %6130 = vmatmul.bf16.gmra.mxu1 %v11360_v17 }
 0x52b   : > { %v4208_v33 = vsel %vm4079_vm2, %v3974_v27, %v4144_v39 }
 0x52c   : > { %v4272_v13 = vpack.c.bf16 %v4208_v33, %v4208_v33  ;;  %v3645_v54 = vpop.f32.mrf.mxu2  ;;  %v8799_v33 = vld [vmem:[#allocation9 + $0x110] sm:$0xff] }
 0x52d   : > { %6713 = vmatpush.bf16.msrb.mxu1 %v8799_v33  ;;  %v8773_v33 = vld [vmem:[#allocation9 + $0x40] sm:$0xff] }
 0x52e   : > { %v11365_v9 = vpop.f32.mrf.mxu3  ;;  %v4400_v53 = vunpack.c.l.b16 %v4272_v13  ;;  %v3976_v16 = vpop.f32.mrf.mxu0  ;;  %v3810_v13 = vadd.f32 %v3809_v21, %v3641_v48  ;;  %v8774_v21 = vld [vmem:[#allocation9 + $0x48] sm:$0xff] }
 0x52f   : > { %v11367_v6 = vpop.f32.mrf.mxu1  ;;  %v3977_v43 = vadd.f32 %v3976_v16, %v3808_v30  ;;  %v14485_v16 = vld [vmem:[#allocation97_spill] sm:$0xff]  ;;  %v8782_v48 = vld [vmem:[#allocation9 + $0x88] sm:$0xff]  ;;  %6207 = vmatpush.bf16.msrb.mxu2 %v8774_v21 }
 0x530   : > { %14479 = vst [vmem:[#allocation24_spill] sm:$0xff] %v11367_v6  ;;  %v4445_v32 = vpack.c.b16 %v4400_v53, %v4399_v18  ;;  %6376 = vmatpush.bf16.msrb.mxu3 %v8782_v48  ;;  %v14487_v6 = vld [vmem:[#allocation104_spill] sm:$0xff] }
 0x531   : > { %3687 = vmatmul.bf16.gmra.mxu2 %v10275_v36  ;;  %4015 = vmatmul.bf16.gmra.mxu0 %v14481_v42  ;;  %v4145_v20 = vmul.f32 %v11047_v34, %v3977_v43  ;;  %vm4080_vm5 = vcmp.ge.f32.partialorder %v3977_v43, 0.0 }
 0x532   : > { %v4593_v58 = vshrl.u32 %v4445_v32, 16  ;;  %v4596_v46 = vshll.u32 %v4445_v32, 16  ;;  %v3644_v32 = vadd.f32 %v3643_v35, %v14485_v16 }
 0x533   : > { %3856 = vmatmul.bf16.gmra.mxu3 %v14301_v59  ;;  %v4209_v42 = vsel %vm4080_vm5, %v3977_v43, %v4145_v20  ;;  %6208 = vmatpush.bf16.msrb.mxu2 %v8773_v33 }
 0x534   : > { %v11374_v27 = vrot.slane %v4593_v58, 7  ;;  %v3648_v39 = vpop.f32.mrf.mxu2  ;;  %v4273_v58 = vpack.c.bf16 %v4209_v42, %v4209_v42  ;;  %v3813_v20 = vadd.f32 %v3812_v26, %v3644_v32  ;;  %v14490_v32 = vld [vmem:[#allocation115_spill] sm:$0xff] }
 0x536   : > { %14482 = vst [vmem:[#allocation29_spill] sm:$0xff] %v11374_v27  ;;  %v3817_v30 = vpop.f32.mrf.mxu3  ;;  %v3978_v18 = vpop.f32.mrf.mxu0  ;;  %v4598_v36 = vor.u32 %v4596_v46, %v11374_v27  ;;  %v3477_v27 = vadd.f32 %v14487_v6, %v10890_v37 }
 0x537   : > { %v11376_v24 = vpop.f32.mrf.mxu1  ;;  %v3979_v59 = vadd.f32 %v3978_v18, %v3810_v13  ;;  %v8781_v13 = vld [vmem:[#allocation9 + $0x80] sm:$0xff]  ;;  %v4401_v18 = vunpack.c.l.b16 %v4273_v58 }
 0x538   : > { %14483 = vst [vmem:[#allocation32_spill] sm:$0xff] %v11376_v24  ;;  %v11381_v53 = vsel %vm11020_vm6, 0, %v4598_v36  ;;  %6377 = vmatpush.bf16.msrb.mxu3 %v8781_v13 }
 0x539   : > { %14484 = vst [vmem:[#allocation27_spill] sm:$0xff] %v11381_v53  ;;  %vm4081_vm7 = vcmp.ge.f32.partialorder %v3979_v59, 0.0  ;;  %v4146_v29 = vmul.f32 %v11047_v34, %v3979_v59  ;;  %6135 = vmatmul.bf16.gmra.mxu1 %v11381_v53 }
 0x53b   : > { %v4210_v24 = vsel %vm4081_vm7, %v3979_v59, %v4146_v29  ;;  %v3646_v59 = vadd.f32 %v3645_v54, %v3477_v27  ;;  %v14488_v29 = vld [vmem:[#allocation105_spill] sm:$0xff] }
 0x53c   : > { %v4274_v46 = vpack.c.bf16 %v4210_v24, %v4210_v24  ;;  %v3650_v43 = vpop.f32.mrf.mxu2  ;;  %v14489_v24 = vld [vmem:[#allocation100_spill] sm:$0xff] }
 0x53d   : > { %v3815_v37 = vadd.f32 %v11365_v9, %v3646_v59 }
 0x53e   : > { %v3819_v63 = vpop.f32.mrf.mxu3  ;;  %v4402_v36 = vunpack.c.l.b16 %v4274_v46  ;;  %v3981_v35 = vpop.f32.mrf.mxu0 }
 0x53f   : > { %v11386_v16 = vpop.f32.mrf.mxu1  ;;  %v3982_v53 = vadd.f32 %v3981_v35, %v3813_v20 }
 0x540   : > { %14486 = vst [vmem:[#allocation33_spill] sm:$0xff] %v11386_v16  ;;  %v4446_v42 = vpack.c.b16 %v4402_v36, %v4401_v18  ;;  %v14494_v36 = vld [vmem:[#allocation111_spill] sm:$0xff] }
 0x541   : > { %3692 = vmatmul.bf16.gmra.mxu2 %v14488_v29  ;;  %4020 = vmatmul.bf16.gmra.mxu0 %v14489_v24  ;;  %v4147_v21 = vmul.f32 %v11047_v34, %v3982_v53  ;;  %vm4082_vm8 = vcmp.ge.f32.partialorder %v3982_v53, 0.0  ;;  %v3649_v35 = vadd.f32 %v3648_v39, %v14494_v36 }
 0x542   : > { %v4600_v26 = vshrl.u32 %v4446_v42, 16  ;;  %v4603_v58 = vshll.u32 %v4446_v42, 16 }
 0x543   : > { %3861 = vmatmul.bf16.gmra.mxu3 %v14490_v32  ;;  %v4211_v27 = vsel %vm4082_vm8, %v3982_v53, %v4147_v21 }
 0x544   : > { %v11394_v48 = vrot.slane %v4600_v26, 7  ;;  %v3653_v46 = vpop.f32.mrf.mxu2  ;;  %v4275_v9 = vpack.c.bf16 %v4211_v27, %v4211_v27  ;;  %v3818_v26 = vadd.f32 %v3817_v30, %v3649_v35  ;;  %v14498_v27 = vld [vmem:[#allocation108_spill] sm:$0xff]  ;;  %v4828_v30 = vshll.u32 %v11031_v61, 16 }
 0x546   : > { %14491 = vst [vmem:[#allocation37_spill] sm:$0xff] %v11394_v48  ;;  %v3822_v6 = vpop.f32.mrf.mxu3  ;;  %v3983_v20 = vpop.f32.mrf.mxu0  ;;  %v4605_v54 = vor.u32 %v4603_v58, %v11394_v48  ;;  %v4403_v53 = vunpack.c.l.b16 %v4275_v9 }
 0x547   : > { %v11397_v33 = vpop.f32.mrf.mxu1  ;;  %v3984_v13 = vadd.f32 %v3983_v20, %v3815_v37  ;;  %v14496_v20 = vld [vmem:[#allocation102_spill] sm:$0xff] }
 0x548   : > { %14492 = vst [vmem:[#allocation53_spill] sm:$0xff] %v11397_v33  ;;  %v11402_v18 = vsel %vm11020_vm6, 0, %v4605_v54  ;;  %v14497_v54 = vld [vmem:[#allocation114_spill] sm:$0xff] }
 0x549   : > { %14493 = vst [vmem:[#allocation30_spill] sm:$0xff] %v11402_v18  ;;  %vm4083_vm9 = vcmp.ge.f32.partialorder %v3984_v13, 0.0  ;;  %v4148_v42 = vmul.f32 %v11047_v34, %v3984_v13  ;;  %6140 = vmatmul.bf16.gmra.mxu1 %v11402_v18  ;;  %v3482_v39 = vadd.f32 %v14497_v54, %v14496_v20  ;;  %v4830_v20 = vrot.slane %v4828_v30, 1 }
 0x54a   : > { %v5290_v30 = vrot.slane %v11031_v61, 1 }
 0x54b   : > { %v4212_v59 = vsel %vm4083_vm9, %v3984_v13, %v4148_v42  ;;  %v3651_v16 = vadd.f32 %v3650_v43, %v3482_v39  ;;  %v14499_v42 = vld [vmem:[#allocation131_spill] sm:$0xff] }
 0x54c   : > { %v4276_v29 = vpack.c.bf16 %v4212_v59, %v4212_v59  ;;  %v3655_v24 = vpop.f32.mrf.mxu2  ;;  %v4792_v9 = vsel %vm11020_vm6, %v14499_v42, 0 }
 0x54d   : > { %v4833_v54 = vshll.u32 %v4792_v9, 16 }
 0x54e   : > { %v11407_v32 = vpop.f32.mrf.mxu3  ;;  %v4404_v21 = vunpack.c.l.b16 %v4276_v29  ;;  %v3986_v58 = vpop.f32.mrf.mxu0 }
 0x54f   : > { %v11409_v37 = vpop.f32.mrf.mxu1  ;;  %v3987_v36 = vadd.f32 %v3986_v58, %v3818_v26  ;;  %v3820_v26 = vadd.f32 %v3819_v63, %v3651_v16  ;;  %v4826_v58 = vshrl.u32 %v11031_v61, 16  ;;  %v8790_v16 = vld [vmem:[#allocation9 + $0xc8] sm:$0xff] }
 0x550   : > { %14495 = vst [vmem:[#allocation58_spill] sm:$0xff] %v11409_v37  ;;  %v4447_v33 = vpack.c.b16 %v4404_v21, %v4403_v53  ;;  %v4835_v37 = vrot.slane %v4833_v54, 1  ;;  %6545 = vmatpush.bf16.msrb.mxu0 %v8790_v16 }
 0x551   : > { %3697 = vmatmul.bf16.gmra.mxu2 %v14394_v5  ;;  %4025 = vmatmul.bf16.gmra.mxu0 %v14498_v27  ;;  %v4149_v35 = vmul.f32 %v11047_v34, %v3987_v36  ;;  %vm4084_vm10 = vcmp.ge.f32.partialorder %v3987_v36, 0.0 }
 0x552   : > { %v4607_v13 = vshrl.u32 %v4447_v33, 16  ;;  %v4610_v29 = vshll.u32 %v4447_v33, 16  ;;  %v14503_v33 = vld [vmem:[#allocation113_spill] sm:$0xff] }
 0x553   : > { %3866 = vmatmul.bf16.gmra.mxu3 %v14396_v28  ;;  %v4213_v39 = vsel %vm4084_vm10, %v3987_v36, %v4149_v35  ;;  %v3654_v42 = vadd.f32 %v3653_v46, %v14503_v33  ;;  %v5291_v36 = vrot.slane %v4792_v9, 1  ;;  %v8789_v46 = vld [vmem:[#allocation9 + $0xc0] sm:$0xff] }
 0x554   : > { %v11421_v59 = vrot.slane %v4607_v13, 7  ;;  %v3658_v43 = vpop.f32.mrf.mxu2  ;;  %6546 = vmatpush.bf16.msrb.mxu0 %v8789_v46 }
 0x555   : > { %v11447_v9 = vsel %vm1763_vm4, %v5290_v30, %v5291_v36 }
 0x556   : > { %14500 = vst [vmem:[#allocation42_spill] sm:$0xff] %v11421_v59  ;;  %v11423_v5 = vpop.f32.mrf.mxu3  ;;  %v3988_v53 = vpop.f32.mrf.mxu0  ;;  %v4612_v28 = vor.u32 %v4610_v29, %v11421_v59  ;;  %v4831_v29 = vor.u32 %v4830_v20, %v4826_v58  ;;  %v14506_v58 = vld [vmem:[#allocation112_spill] sm:$0xff]  ;;  %v14507_v20 = vld [vmem:[#allocation117_spill] sm:$0xff] }
 0x557   : > { %v11425_v21 = vpop.f32.mrf.mxu1  ;;  %v3989_v27 = vadd.f32 %v3988_v53, %v3820_v26  ;;  %v3823_v53 = vadd.f32 %v3822_v6, %v3654_v42  ;;  %v3487_v54 = vadd.f32 %v14507_v20, %v14506_v58  ;;  %14508 = vst [vmem:[#allocation52_spill] sm:$0xff] %v11447_v9  ;;  %v14509_v42 = vld [vmem:[#allocation31_spill] sm:$0xff] }
 0x558   : > { %14501 = vst [vmem:[#allocation40_spill] sm:$0xff] %v11425_v21  ;;  %v11431_v13 = vsel %vm11020_vm6, 0, %v4612_v28  ;;  %v4277_v21 = vpack.c.bf16 %v4213_v39, %v4213_v39  ;;  %v11442_v39 = vsel %vm1359_vm3, %v4831_v29, %v4835_v37  ;;  %v4840_v29 = vshll.u32 %v11066_v7, 16 }
 0x559   : > { %14502 = vst [vmem:[#allocation60_spill] sm:$0xff] %v11431_v13  ;;  %vm4085_vm11 = vcmp.ge.f32.partialorder %v3989_v27, 0.0  ;;  %v4150_v63 = vmul.f32 %v11047_v34, %v3989_v27  ;;  %6145 = vmatmul.bf16.gmra.mxu1 %v11431_v13 }
 0x55a   : > { %v4405_v33 = vunpack.c.l.b16 %v4277_v21  ;;  %14505 = vst [vmem:[#allocation64_spill] sm:$0xff] %v11442_v39  ;;  %v4842_v20 = vrot.slane %v4840_v29, 1 }
 0x55b   : > { %v4214_v59 = vsel %vm4085_vm11, %v3989_v27, %v4150_v63 }
 0x55c   : > { %v4278_v35 = vpack.c.bf16 %v4214_v59, %v4214_v59  ;;  %v3660_v26 = vpop.f32.mrf.mxu2  ;;  %v3656_v59 = vadd.f32 %v3655_v24, %v3487_v54  ;;  %v14513_v54 = vld [vmem:[#allocation36_spill] sm:$0xff] }
 0x55e   : > { %v11437_v28 = vpop.f32.mrf.mxu3  ;;  %v4406_v48 = vunpack.c.l.b16 %v4278_v35  ;;  %v3991_v18 = vpop.f32.mrf.mxu0  ;;  %v3825_v30 = vadd.f32 %v11407_v32, %v3656_v59  ;;  %v3659_v32 = vadd.f32 %v3658_v43, %v14513_v54  ;;  %v5293_v43 = vrot.slane %v11066_v7, 1 }
 0x55f   : > { %v11439_v40 = vpop.f32.mrf.mxu1  ;;  %v3992_v27 = vadd.f32 %v3991_v18, %v3823_v53 }
 0x560   : > { %14504 = vst [vmem:[#allocation34_spill] sm:$0xff] %v11439_v40  ;;  %v4448_v6 = vpack.c.b16 %v4406_v48, %v4405_v33  ;;  %v4793_v33 = vsel %vm11020_vm6, %v11061_v62, 0  ;;  %v14516_v40 = vld [vmem:[#allocation119_spill] sm:$0xff] }
 0x561   : > { %4030 = vmatmul.bf16.gmra.mxu0 %v14509_v42  ;;  %6209 = vmatmul.bf16.vlgmr.msrb.gmra.mxu2 %v11442_v39  ;;  %v4151_v37 = vmul.f32 %v11047_v34, %v3992_v27  ;;  %vm4086_vm12 = vcmp.ge.f32.partialorder %v3992_v27, 0.0  ;;  %v4845_v42 = vshll.u32 %v4793_v33, 16 }
 0x562   : > { %v4614_v21 = vshrl.u32 %v4448_v6, 16  ;;  %v4617_v16 = vshll.u32 %v4448_v6, 16 }
 0x563   : > { %6378 = vmatmul.bf16.vlgmr.msrb.gmra.mxu3 %v11447_v9  ;;  %v4215_v53 = vsel %vm4086_vm12, %v3992_v27, %v4151_v37  ;;  %v4838_v27 = vshrl.u32 %v11066_v7, 16 }
 0x564   : > { %v11453_v63 = vrot.slane %v4614_v21, 7  ;;  %v3663_v18 = vpop.f32.mrf.mxu2  ;;  %v4279_v59 = vpack.c.bf16 %v4215_v53, %v4215_v53  ;;  %v4847_v53 = vrot.slane %v4845_v42, 1  ;;  %v4852_v42 = vshll.u32 %v11081_v31, 16 }
 0x565   : > { %v4843_v62 = vor.u32 %v4842_v20, %v4838_v27 }
 0x566   : > { %14510 = vst [vmem:[#allocation47_spill] sm:$0xff] %v11453_v63  ;;  %v11457_v48 = vpop.f32.mrf.mxu3  ;;  %v3993_v24 = vpop.f32.mrf.mxu0  ;;  %v4619_v35 = vor.u32 %v4617_v16, %v11453_v63  ;;  %v4407_v29 = vunpack.c.l.b16 %v4279_v59 }
 0x567   : > { %v11459_v36 = vpop.f32.mrf.mxu1  ;;  %v3994_v46 = vadd.f32 %v3993_v24, %v3825_v30  ;;  %v3828_v30 = vadd.f32 %v11423_v5, %v3659_v32  ;;  %v11484_v20 = vsel %vm1359_vm3, %v4843_v62, %v4847_v53  ;;  %v4854_v53 = vrot.slane %v4852_v42, 1 }
 0x568   : > { %14511 = vst [vmem:[#allocation50_spill] sm:$0xff] %v11459_v36  ;;  %v11467_v58 = vsel %vm11020_vm6, 0, %v4619_v35  ;;  %v14515_v36 = vld [vmem:[#allocation118_spill] sm:$0xff]  ;;  %v5296_v42 = vrot.slane %v11081_v31, 1 }
 0x569   : > { %14512 = vst [vmem:[#allocation44_spill] sm:$0xff] %v11467_v58  ;;  %vm4087_vm13 = vcmp.ge.f32.partialorder %v3994_v46, 0.0  ;;  %v4152_v6 = vmul.f32 %v11047_v34, %v3994_v46  ;;  %6150 = vmatmul.bf16.gmra.mxu1 %v11467_v58  ;;  %v3492_v63 = vadd.f32 %v14516_v40, %v14515_v36 }
 0x56b   : > { %v4216_v21 = vsel %vm4087_vm13, %v3994_v46, %v4152_v6  ;;  %v5294_v6 = vrot.slane %v4793_v33, 1  ;;  %v3661_v5 = vadd.f32 %v3660_v26, %v3492_v63  ;;  %v8798_v26 = vld [vmem:[#allocation9 + $0x108] sm:$0xff] }
 0x56c   : > { %v4280_v37 = vpack.c.bf16 %v4216_v21, %v4216_v21  ;;  %v11473_v16 = vpop.f32.mrf.mxu2  ;;  %6714 = vmatpush.bf16.msrb.mxu1 %v8798_v26 }
 0x56d   : > { %v11489_v32 = vsel %vm1763_vm4, %v5293_v43, %v5294_v6 }
 0x56e   : > { %v11476_v24 = vpop.f32.mrf.mxu3  ;;  %v4408_v35 = vunpack.c.l.b16 %v4280_v37  ;;  %v3996_v54 = vpop.f32.mrf.mxu0  ;;  %14517 = vst [vmem:[#allocation43_spill] sm:$0xff] %v11489_v32 }
 0x56f   : > { %v11479_v61 = vpop.f32.mrf.mxu1  ;;  %v3997_v46 = vadd.f32 %v3996_v54, %v3828_v30 }
 0x570   : > { %14514 = vst [vmem:[#allocation63_spill] sm:$0xff] %v11479_v61  ;;  %v4449_v21 = vpack.c.b16 %v4408_v35, %v4407_v29  ;;  %v4794_v35 = vsel %vm11020_vm6, %v11076_v3, 0  ;;  %v14524_v61 = vld [vmem:[#allocation120_spill] sm:$0xff] }
 0x571   : > { %4035 = vmatmul.bf16.gmra.mxu0 %v14400_v38  ;;  %6214 = vmatmul.bf16.gmra.mxu2 %v11484_v20  ;;  %v4153_v27 = vmul.f32 %v11047_v34, %v3997_v46  ;;  %vm4088_vm14 = vcmp.ge.f32.partialorder %v3997_v46, 0.0  ;;  %v3830_v38 = vadd.f32 %v11437_v28, %v3661_v5  ;;  %v14521_v28 = vld [vmem:[#allocation35_spill] sm:$0xff] }
 0x572   : > { %v4621_v59 = vshrl.u32 %v4449_v21, 16  ;;  %v4624_v36 = vshll.u32 %v4449_v21, 16  ;;  %v3664_v6 = vadd.f32 %v3663_v18, %v14521_v28 }
 0x573   : > { %6383 = vmatmul.bf16.gmra.mxu3 %v11489_v32  ;;  %v4217_v43 = vsel %vm4088_vm14, %v3997_v46, %v4153_v27  ;;  %v4850_v46 = vshrl.u32 %v11081_v31, 16 }
 0x574   : > { %v11493_v40 = vrot.slane %v4621_v59, 7  ;;  %v3668_v33 = vpop.f32.mrf.mxu2  ;;  %v4281_v5 = vpack.c.bf16 %v4217_v43, %v4217_v43  ;;  %v4857_v59 = vshll.u32 %v4794_v35, 16  ;;  %v14523_v43 = vld [vmem:[#allocation41_spill] sm:$0xff] }
 0x575   : > { %v4855_v3 = vor.u32 %v4854_v53, %v4850_v46 }
 0x576   : > { %14518 = vst [vmem:[#allocation74_spill] sm:$0xff] %v11493_v40  ;;  %v11497_v63 = vpop.f32.mrf.mxu3  ;;  %v3998_v37 = vpop.f32.mrf.mxu0  ;;  %v4626_v30 = vor.u32 %v4624_v36, %v11493_v40  ;;  %v4409_v18 = vunpack.c.l.b16 %v4281_v5  ;;  %v3497_v40 = vadd.f32 %v14524_v61, %v14523_v43 }
 0x577   : > { %v11499_v62 = vpop.f32.mrf.mxu1  ;;  %v3999_v29 = vadd.f32 %v3998_v37, %v3830_v38  ;;  %v3833_v38 = vadd.f32 %v11457_v48, %v3664_v6 }
 0x578   : > { %14519 = vst [vmem:[#allocation72_spill] sm:$0xff] %v11499_v62  ;;  %v11507_v54 = vsel %vm11020_vm6, 0, %v4626_v30  ;;  %v4859_v62 = vrot.slane %v4857_v59, 1  ;;  %v3666_v48 = vadd.f32 %v11473_v16, %v3497_v40  ;;  %v4864_v59 = vshll.u32 %v11096_v11, 16 }
 0x579   : > { %14520 = vst [vmem:[#allocation48_spill] sm:$0xff] %v11507_v54  ;;  %vm4089_vm15 = vcmp.ge.f32.partialorder %v3999_v29, 0.0  ;;  %v4154_v21 = vmul.f32 %v11047_v34, %v3999_v29  ;;  %6155 = vmatmul.bf16.gmra.mxu1 %v11507_v54 }
 0x57a   : > { %v11522_v53 = vsel %vm1359_vm3, %v4855_v3, %v4859_v62  ;;  %v3835_v16 = vadd.f32 %v11476_v24, %v3666_v48 }
 0x57b   : > { %v4218_v27 = vsel %vm4089_vm15, %v3999_v29, %v4154_v21  ;;  %v5297_v29 = vrot.slane %v4794_v35, 1  ;;  %14525 = vst [vmem:[#allocation55_spill] sm:$0xff] %v11522_v53 }
 0x57c   : > { %v4282_v36 = vpack.c.bf16 %v4218_v27, %v4218_v27  ;;  %v3670_v26 = vpop.f32.mrf.mxu2 }
 0x57d   : > { %v11527_v6 = vsel %vm1763_vm4, %v5296_v42, %v5297_v29  ;;  %v4795_v42 = vsel %vm11020_vm6, %v11091_v44, 0 }
 0x57e   : > { %v11514_v37 = vpop.f32.mrf.mxu3  ;;  %v4410_v30 = vunpack.c.l.b16 %v4282_v36  ;;  %v4001_v28 = vpop.f32.mrf.mxu0  ;;  %14526 = vst [vmem:[#allocation62_spill] sm:$0xff] %v11527_v6 }
 0x57f   : > { %v11517_v32 = vpop.f32.mrf.mxu1  ;;  %v4002_v54 = vadd.f32 %v4001_v28, %v3833_v38  ;;  %v14530_v28 = vld [vmem:[#allocation122_spill] sm:$0xff] }
 0x580   : > { %14522 = vst [vmem:[#allocation84_spill] sm:$0xff] %v11517_v32  ;;  %v4450_v21 = vpack.c.b16 %v4410_v30, %v4409_v18  ;;  %v4866_v30 = vrot.slane %v4864_v59, 1  ;;  %v3669_v24 = vadd.f32 %v3668_v33, %v14530_v28  ;;  %v5299_v59 = vrot.slane %v11096_v11, 1 }
 0x581   : > { %6219 = vmatmul.bf16.gmra.mxu2 %v11522_v53  ;;  %6547 = vmatmul.bf16.vlgmr.msrb.gmra.mxu0 %v11066_v7  ;;  %v4155_v61 = vmul.f32 %v11047_v34, %v4002_v54  ;;  %vm4090_vm0 = vcmp.ge.f32.partialorder %v4002_v54, 0.0 }
 0x582   : > { %v4628_v5 = vshrl.u32 %v4450_v21, 16  ;;  %v4631_v35 = vshll.u32 %v4450_v21, 16  ;;  %v4869_v21 = vshll.u32 %v4795_v42, 16 }
 0x583   : > { %6388 = vmatmul.bf16.gmra.mxu3 %v11527_v6  ;;  %v4219_v3 = vsel %vm4090_vm0, %v4002_v54, %v4155_v61  ;;  %v4862_v54 = vshrl.u32 %v11096_v11, 16 }
 0x584   : > { %v11532_v46 = vrot.slane %v4628_v5, 7  ;;  %v3673_v62 = vpop.f32.mrf.mxu2  ;;  %v4283_v29 = vpack.c.bf16 %v4219_v3, %v4219_v3  ;;  %v4871_v6 = vrot.slane %v4869_v21, 1  ;;  %v14532_v3 = vld [vmem:[#allocation39_spill] sm:$0xff] }
 0x585   : > { %v4867_v44 = vor.u32 %v4866_v30, %v4862_v54 }
 0x586   : > { %14527 = vst [vmem:[#allocation82_spill] sm:$0xff] %v11532_v46  ;;  %v11536_v40 = vpop.f32.mrf.mxu3  ;;  %v4003_v27 = vpop.f32.mrf.mxu0  ;;  %v4633_v7 = vor.u32 %v4631_v35, %v11532_v46  ;;  %v3838_v35 = vadd.f32 %v11497_v63, %v3669_v24  ;;  %v4411_v33 = vunpack.c.l.b16 %v4283_v29 }
 0x587   : > { %v11538_v36 = vpop.f32.mrf.mxu1  ;;  %v4004_v38 = vadd.f32 %v4003_v27, %v3835_v16  ;;  %v11561_v30 = vsel %vm1359_vm3, %v4867_v44, %v4871_v6  ;;  %v4876_v6 = vshll.u32 %v11111_v2, 16 }
 0x588   : > { %14528 = vst [vmem:[#allocation57_spill] sm:$0xff] %v11538_v36  ;;  %v11546_v18 = vsel %vm11020_vm6, 0, %v4633_v7  ;;  %v14533_v36 = vld [vmem:[#allocation121_spill] sm:$0xff] }
 0x589   : > { %14529 = vst [vmem:[#allocation94_spill] sm:$0xff] %v11546_v18  ;;  %vm4091_vm1 = vcmp.ge.f32.partialorder %v4004_v38, 0.0  ;;  %v4156_v43 = vmul.f32 %v11047_v34, %v4004_v38  ;;  %6160 = vmatmul.bf16.gmra.mxu1 %v11546_v18  ;;  %v3502_v32 = vadd.f32 %v14533_v36, %v14532_v3  ;;  %v14539_v3 = vld [vmem:[#allocation45_spill] sm:$0xff] }
 0x58a   : > { %14534 = vst [vmem:[#allocation75_spill] sm:$0xff] %v11561_v30 }
 0x58b   : > { %v4220_v48 = vsel %vm4091_vm1, %v4004_v38, %v4156_v43  ;;  %v5300_v38 = vrot.slane %v4795_v42, 1  ;;  %v3671_v63 = vadd.f32 %v3670_v26, %v3502_v32 }
 0x58c   : > { %v4284_v5 = vpack.c.bf16 %v4220_v48, %v4220_v48  ;;  %v3675_v61 = vpop.f32.mrf.mxu2 }
 0x58d   : > { %v11565_v24 = vsel %vm1763_vm4, %v5299_v59, %v5300_v38  ;;  %v3840_v32 = vadd.f32 %v11514_v37, %v3671_v63  ;;  %v3674_v37 = vadd.f32 %v3673_v62, %v14539_v3 }
 0x58e   : > { %v11553_v16 = vpop.f32.mrf.mxu3  ;;  %v4412_v27 = vunpack.c.l.b16 %v4284_v5  ;;  %v4006_v7 = vpop.f32.mrf.mxu0  ;;  %14535 = vst [vmem:[#allocation92_spill] sm:$0xff] %v11565_v24 }
 0x58f   : > { %v11556_v28 = vpop.f32.mrf.mxu1  ;;  %v4007_v46 = vadd.f32 %v4006_v7, %v3838_v35  ;;  %v4878_v7 = vrot.slane %v4876_v6, 1  ;;  %v5302_v6 = vrot.slane %v11111_v2, 1 }
 0x590   : > { %14531 = vst [vmem:[#allocation67_spill] sm:$0xff] %v11556_v28  ;;  %v4451_v43 = vpack.c.b16 %v4412_v27, %v4411_v33  ;;  %v4796_v33 = vsel %vm11020_vm6, %v11106_v14, 0 }
 0x591   : > { %6224 = vmatmul.bf16.gmra.mxu2 %v11561_v30  ;;  %6552 = vmatmul.bf16.gmra.mxu0 %v11081_v31  ;;  %v4157_v54 = vmul.f32 %v11047_v34, %v4007_v46  ;;  %vm4092_vm2 = vcmp.ge.f32.partialorder %v4007_v46, 0.0  ;;  %v4881_v63 = vshll.u32 %v4796_v33, 16 }
 0x592   : > { %v4635_v29 = vshrl.u32 %v4451_v43, 16  ;;  %v4638_v42 = vshll.u32 %v4451_v43, 16 }
 0x593   : > { %6393 = vmatmul.bf16.gmra.mxu3 %v11565_v24  ;;  %v4221_v35 = vsel %vm4092_vm2, %v4007_v46, %v4157_v54  ;;  %v4874_v46 = vshrl.u32 %v11111_v2, 16  ;;  %v4883_v31 = vrot.slane %v4881_v63, 1 }
 0x594   : > { %v11570_v36 = vrot.slane %v4635_v29, 7  ;;  %v3678_v21 = vpop.f32.mrf.mxu2  ;;  %v4285_v43 = vpack.c.bf16 %v4221_v35, %v4221_v35  ;;  %v14541_v35 = vld [vmem:[#allocation123_spill] sm:$0xff] }
 0x595   : > { %v4879_v14 = vor.u32 %v4878_v7, %v4874_v46 }
 0x596   : > { %14536 = vst [vmem:[#allocation70_spill] sm:$0xff] %v11570_v36  ;;  %v11574_v26 = vpop.f32.mrf.mxu3  ;;  %v4008_v48 = vpop.f32.mrf.mxu0  ;;  %v4640_v44 = vor.u32 %v4638_v42, %v11570_v36  ;;  %v4413_v62 = vunpack.c.l.b16 %v4285_v43 }
 0x597   : > { %v11576_v5 = vpop.f32.mrf.mxu1  ;;  %v4009_v59 = vadd.f32 %v4008_v48, %v3840_v32  ;;  %v3843_v32 = vadd.f32 %v11536_v40, %v3674_v37  ;;  %v11599_v7 = vsel %vm1359_vm3, %v4879_v14, %v4883_v31  ;;  %v4888_v31 = vshll.u32 %v11126_v1, 16 }
 0x598   : > { %14537 = vst [vmem:[#allocation77_spill] sm:$0xff] %v11576_v5  ;;  %v11584_v27 = vsel %vm11020_vm6, 0, %v4640_v44  ;;  %v14542_v5 = vld [vmem:[#allocation125_spill] sm:$0xff] }
 0x599   : > { %14538 = vst [vmem:[#allocation86_spill] sm:$0xff] %v11584_v27  ;;  %vm4093_vm5 = vcmp.ge.f32.partialorder %v4009_v59, 0.0  ;;  %v4158_v38 = vmul.f32 %v11047_v34, %v4009_v59  ;;  %6165 = vmatmul.bf16.gmra.mxu1 %v11584_v27  ;;  %v3507_v28 = vadd.f32 %v14542_v5, %v14541_v35  ;;  %v14547_v35 = vld [vmem:[#allocation46_spill] sm:$0xff] }
 0x59a   : > { %14543 = vst [vmem:[#allocation80_spill] sm:$0xff] %v11599_v7 }
 0x59b   : > { %v4222_v29 = vsel %vm4093_vm5, %v4009_v59, %v4158_v38  ;;  %v5303_v59 = vrot.slane %v4796_v33, 1  ;;  %v3676_v40 = vadd.f32 %v3675_v61, %v3507_v28 }
 0x59c   : > { %v4286_v54 = vpack.c.bf16 %v4222_v29, %v4222_v29  ;;  %v3680_v42 = vpop.f32.mrf.mxu2 }
 0x59d   : > { %v11603_v37 = vsel %vm1763_vm4, %v5302_v6, %v5303_v59  ;;  %v3845_v61 = vadd.f32 %v11553_v16, %v3676_v40  ;;  %v3679_v16 = vadd.f32 %v3678_v21, %v14547_v35  ;;  %v5305_v21 = vrot.slane %v11126_v1, 1 }
 0x59e   : > { %v11591_v48 = vpop.f32.mrf.mxu3  ;;  %v4414_v44 = vunpack.c.l.b16 %v4286_v54  ;;  %v4011_v3 = vpop.f32.mrf.mxu0  ;;  %14544 = vst [vmem:[#allocation87_spill] sm:$0xff] %v11603_v37 }
 0x59f   : > { %v11594_v24 = vpop.f32.mrf.mxu1  ;;  %v4012_v36 = vadd.f32 %v4011_v3, %v3843_v32  ;;  %v4890_v3 = vrot.slane %v4888_v31, 1 }
 0x5a0   : > { %14540 = vst [vmem:[#allocation101_spill] sm:$0xff] %v11594_v24  ;;  %v4452_v38 = vpack.c.b16 %v4414_v44, %v4413_v62  ;;  %v4797_v62 = vsel %vm11020_vm6, %v11121_v15, 0 }
 0x5a1   : > { %6229 = vmatmul.bf16.gmra.mxu2 %v11599_v7  ;;  %6557 = vmatmul.bf16.gmra.mxu0 %v11096_v11  ;;  %v4159_v46 = vmul.f32 %v11047_v34, %v4012_v36  ;;  %vm4094_vm7 = vcmp.ge.f32.partialorder %v4012_v36, 0.0  ;;  %v4893_v40 = vshll.u32 %v4797_v62, 16  ;;  %v14549_v11 = vld [vmem:[#allocation124_spill] sm:$0xff] }
 0x5a2   : > { %v4642_v43 = vshrl.u32 %v4452_v38, 16  ;;  %v4645_v33 = vshll.u32 %v4452_v38, 16 }
 0x5a3   : > { %6398 = vmatmul.bf16.gmra.mxu3 %v11603_v37  ;;  %v4223_v32 = vsel %vm4094_vm7, %v4012_v36, %v4159_v46  ;;  %v4886_v36 = vshrl.u32 %v11126_v1, 16 }
 0x5a4   : > { %v11608_v5 = vrot.slane %v4642_v43, 7  ;;  %v3683_v63 = vpop.f32.mrf.mxu2  ;;  %v4287_v38 = vpack.c.bf16 %v4223_v32, %v4223_v32  ;;  %v4895_v32 = vrot.slane %v4893_v40, 1  ;;  %v4900_v40 = vshll.u32 %v11141_v56, 16 }
 0x5a5   : > { %v4891_v15 = vor.u32 %v4890_v3, %v4886_v36 }
 0x5a6   : > { %v11612_v28 = vpop.f32.mrf.mxu3  ;;  %v4013_v29 = vpop.f32.mrf.mxu0  ;;  %v4647_v14 = vor.u32 %v4645_v33, %v11608_v5  ;;  %v4415_v31 = vunpack.c.l.b16 %v4287_v38 }
 0x5a7   : > { %v11614_v54 = vpop.f32.mrf.mxu1  ;;  %v4014_v6 = vadd.f32 %v4013_v29, %v3845_v61  ;;  %v3848_v61 = vadd.f32 %v11574_v26, %v3679_v16  ;;  %v11639_v3 = vsel %vm1359_vm3, %v4891_v15, %v4895_v32 }
 0x5a8   : > { %14545 = vst [vmem:[#allocation96_spill] sm:$0xff] %v11614_v54  ;;  %v11622_v44 = vsel %vm11020_vm6, 0, %v4647_v14  ;;  %v14550_v54 = vld [vmem:[#allocation51_spill] sm:$0xff] }
 0x5a9   : > { %14546 = vst [vmem:[#allocation90_spill] sm:$0xff] %v11622_v44  ;;  %vm4095_vm8 = vcmp.ge.f32.partialorder %v4014_v6, 0.0  ;;  %v4160_v59 = vmul.f32 %v11047_v34, %v4014_v6  ;;  %6170 = vmatmul.bf16.gmra.mxu1 %v11622_v44  ;;  %v3512_v24 = vadd.f32 %v14550_v54, %v14549_v11 }
 0x5aa   : > { %14551 = vst [vmem:[#allocation104_spill] sm:$0xff] %v11639_v3 }
 0x5ab   : > { %v4224_v43 = vsel %vm4095_vm8, %v4014_v6, %v4160_v59  ;;  %v5306_v59 = vrot.slane %v4797_v62, 1  ;;  %v3681_v26 = vadd.f32 %v3680_v42, %v3512_v24  ;;  %v8797_v24 = vld [vmem:[#allocation9 + $0x100] sm:$0xff] }
 0x5ac   : > { %v4288_v46 = vpack.c.bf16 %v4224_v43, %v4224_v43  ;;  %v11628_v33 = vpop.f32.mrf.mxu2  ;;  %6715 = vmatpush.bf16.msrb.mxu1 %v8797_v24 }
 0x5ad   : > { %v11643_v16 = vsel %vm1763_vm4, %v5305_v21, %v5306_v59  ;;  %v3850_v42 = vadd.f32 %v11591_v48, %v3681_v26  ;;  %v4902_v59 = vrot.slane %v4900_v40, 1  ;;  %v14556_v48 = vld [vmem:[#allocation126_spill] sm:$0xff]  ;;  %v5308_v40 = vrot.slane %v11141_v56, 1 }
 0x5ae   : > { %v11631_v29 = vpop.f32.mrf.mxu3  ;;  %v4416_v14 = vunpack.c.l.b16 %v4288_v46  ;;  %v4016_v35 = vpop.f32.mrf.mxu0  ;;  %14552 = vst [vmem:[#allocation105_spill] sm:$0xff] %v11643_v16 }
 0x5af   : > { %v11634_v37 = vpop.f32.mrf.mxu1  ;;  %v4017_v6 = vadd.f32 %v4016_v35, %v3848_v61  ;;  %v4798_v35 = vsel %vm11020_vm6, %v11136_v50, 0 }
 0x5b0   : > { %14548 = vst [vmem:[#allocation97_spill] sm:$0xff] %v11634_v37  ;;  %v4453_v43 = vpack.c.b16 %v4416_v14, %v4415_v31  ;;  %v14559_v37 = vld [vmem:[#allocation49_spill] sm:$0xff] }
 0x5b1   : > { %6234 = vmatmul.bf16.gmra.mxu2 %v11639_v3  ;;  %6562 = vmatmul.bf16.gmra.mxu0 %v11111_v2  ;;  %v4161_v36 = vmul.f32 %v11047_v34, %v4017_v6  ;;  %vm4096_vm9 = vcmp.ge.f32.partialorder %v4017_v6, 0.0 }
 0x5b2   : > { %v4649_v38 = vshrl.u32 %v4453_v43, 16  ;;  %v4652_v54 = vshll.u32 %v4453_v43, 16  ;;  %v3684_v43 = vadd.f32 %v3683_v63, %v14556_v48 }
 0x5b3   : > { %6403 = vmatmul.bf16.gmra.mxu3 %v11643_v16  ;;  %v4225_v31 = vsel %vm4096_vm9, %v4017_v6, %v4161_v36  ;;  %v4898_v6 = vshrl.u32 %v11141_v56, 16  ;;  %v4905_v36 = vshll.u32 %v4798_v35, 16 }
 0x5b4   : > { %v11648_v11 = vrot.slane %v4649_v38, 7  ;;  %v3688_v62 = vpop.f32.mrf.mxu2  ;;  %v4289_v38 = vpack.c.bf16 %v4225_v31, %v4225_v31  ;;  %v14558_v31 = vld [vmem:[#allocation128_spill] sm:$0xff] }
 0x5b5   : > { %v4903_v50 = vor.u32 %v4902_v59, %v4898_v6  ;;  %v4912_v6 = vshll.u32 %v11156_v25, 16 }
 0x5b6   : > { %14553 = vst [vmem:[#allocation100_spill] sm:$0xff] %v11648_v11  ;;  %v11652_v46 = vpop.f32.mrf.mxu3  ;;  %v4018_v15 = vpop.f32.mrf.mxu0  ;;  %v4654_v21 = vor.u32 %v4652_v54, %v11648_v11  ;;  %v4417_v63 = vunpack.c.l.b16 %v4289_v38  ;;  %v3517_v11 = vadd.f32 %v14559_v37, %v14558_v31  ;;  %v14565_v31 = vld [vmem:[#allocation127_spill] sm:$0xff] }
 0x5b7   : > { %v11654_v61 = vpop.f32.mrf.mxu1  ;;  %v4019_v14 = vadd.f32 %v4018_v15, %v3850_v42  ;;  %v3853_v15 = vadd.f32 %v11612_v28, %v3684_v43 }
 0x5b8   : > { %14554 = vst [vmem:[#allocation115_spill] sm:$0xff] %v11654_v61  ;;  %v11662_v32 = vsel %vm11020_vm6, 0, %v4654_v21  ;;  %v4907_v61 = vrot.slane %v4905_v36, 1  ;;  %v3686_v28 = vadd.f32 %v11628_v33, %v3517_v11 }
 0x5b9   : > { %14555 = vst [vmem:[#allocation111_spill] sm:$0xff] %v11662_v32  ;;  %vm4097_vm10 = vcmp.ge.f32.partialorder %v4019_v14, 0.0  ;;  %v4162_v26 = vmul.f32 %v11047_v34, %v4019_v14  ;;  %6175 = vmatmul.bf16.gmra.mxu1 %v11662_v32 }
 0x5ba   : > { %v11677_v59 = vsel %vm1359_vm3, %v4903_v50, %v4907_v61  ;;  %v3855_v33 = vadd.f32 %v11631_v29, %v3686_v28  ;;  %v3689_v29 = vadd.f32 %v3688_v62, %v14565_v31  ;;  %v5311_v62 = vrot.slane %v11156_v25, 1 }
 0x5bb   : > { %v4226_v54 = vsel %vm4097_vm10, %v4019_v14, %v4162_v26  ;;  %v5309_v14 = vrot.slane %v4798_v35, 1  ;;  %14560 = vst [vmem:[#allocation114_spill] sm:$0xff] %v11677_v59 }
 0x5bc   : > { %v4290_v24 = vpack.c.bf16 %v4226_v54, %v4226_v54  ;;  %v3690_v42 = vpop.f32.mrf.mxu2 }
 0x5bd   : > { %v11682_v43 = vsel %vm1763_vm4, %v5308_v40, %v5309_v14  ;;  %v4799_v40 = vsel %vm11020_vm6, %v11151_v55, 0 }
 0x5be   : > { %v11669_v21 = vpop.f32.mrf.mxu3  ;;  %v4418_v48 = vunpack.c.l.b16 %v4290_v24  ;;  %v4021_v16 = vpop.f32.mrf.mxu0  ;;  %14561 = vst [vmem:[#allocation108_spill] sm:$0xff] %v11682_v43  ;;  %v4917_v28 = vshll.u32 %v4799_v40, 16 }
 0x5bf   : > { %v11672_v2 = vpop.f32.mrf.mxu1  ;;  %v4022_v32 = vadd.f32 %v4021_v16, %v3853_v15 }
 0x5c0   : > { %14557 = vst [vmem:[#allocation102_spill] sm:$0xff] %v11672_v2  ;;  %v4454_v26 = vpack.c.b16 %v4418_v48, %v4417_v63  ;;  %v4914_v48 = vrot.slane %v4912_v6, 1 }
 0x5c1   : > { %6239 = vmatmul.bf16.gmra.mxu2 %v11677_v59  ;;  %6567 = vmatmul.bf16.gmra.mxu0 %v11126_v1  ;;  %v4163_v37 = vmul.f32 %v11047_v34, %v4022_v32  ;;  %vm4098_vm11 = vcmp.ge.f32.partialorder %v4022_v32, 0.0  ;;  %v14567_v1 = vld [vmem:[#allocation56_spill] sm:$0xff] }
 0x5c2   : > { %v4656_v38 = vshrl.u32 %v4454_v26, 16  ;;  %v4659_v35 = vshll.u32 %v4454_v26, 16 }
 0x5c3   : > { %6408 = vmatmul.bf16.gmra.mxu3 %v11682_v43  ;;  %v4227_v50 = vsel %vm4098_vm11, %v4022_v32, %v4163_v37  ;;  %v4910_v32 = vshrl.u32 %v11156_v25, 16 }
 0x5c4   : > { %v11687_v16 = vrot.slane %v4656_v38, 7  ;;  %v3693_v61 = vpop.f32.mrf.mxu2  ;;  %v4291_v26 = vpack.c.bf16 %v4227_v50, %v4227_v50  ;;  %v4919_v50 = vrot.slane %v4917_v28, 1  ;;  %v4924_v28 = vshll.u32 %v11175_v8, 16 }
 0x5c5   : > { %v4915_v55 = vor.u32 %v4914_v48, %v4910_v32 }
 0x5c6   : > { %14562 = vst [vmem:[#allocation131_spill] sm:$0xff] %v11687_v16  ;;  %v11691_v11 = vpop.f32.mrf.mxu3  ;;  %v4023_v36 = vpop.f32.mrf.mxu0  ;;  %v4661_v24 = vor.u32 %v4659_v35, %v11687_v16  ;;  %v4419_v6 = vunpack.c.l.b16 %v4291_v26 }
 0x5c7   : > { %v11693_v54 = vpop.f32.mrf.mxu1  ;;  %v4024_v15 = vadd.f32 %v4023_v36, %v3855_v33  ;;  %v3858_v33 = vadd.f32 %v11652_v46, %v3689_v29  ;;  %v11718_v48 = vsel %vm1359_vm3, %v4915_v55, %v4919_v50 }
 0x5c8   : > { %14563 = vst [vmem:[#allocation113_spill] sm:$0xff] %v11693_v54  ;;  %v11701_v63 = vsel %vm11020_vm6, 0, %v4661_v24  ;;  %v14568_v54 = vld [vmem:[#allocation129_spill] sm:$0xff] }
 0x5c9   : > { %14564 = vst [vmem:[#allocation112_spill] sm:$0xff] %v11701_v63  ;;  %vm4099_vm12 = vcmp.ge.f32.partialorder %v4024_v15, 0.0  ;;  %v4164_v14 = vmul.f32 %v11047_v34, %v4024_v15  ;;  %6180 = vmatmul.bf16.gmra.mxu1 %v11701_v63  ;;  %v3522_v2 = vadd.f32 %v14568_v54, %v14567_v1 }
 0x5ca   : > { %14569 = vst [vmem:[#allocation31_spill] sm:$0xff] %v11718_v48 }
 0x5cb   : > { %v4228_v38 = vsel %vm4099_vm12, %v4024_v15, %v4164_v14  ;;  %v5312_v14 = vrot.slane %v4799_v40, 1  ;;  %v3691_v46 = vadd.f32 %v3690_v42, %v3522_v2  ;;  %v14572_v42 = vld [vmem:[#allocation134_spill] sm:$0xff] }
 0x5cc   : > { %v4292_v37 = vpack.c.bf16 %v4228_v38, %v4228_v38  ;;  %v11707_v35 = vpop.f32.mrf.mxu2 }
 0x5cd   : > { %v11722_v29 = vsel %vm1763_vm4, %v5311_v62, %v5312_v14  ;;  %v3860_v2 = vadd.f32 %v11669_v21, %v3691_v46  ;;  %v4800_v14 = vsel %vm11020_vm6, %v11168_v47, 0  ;;  %v4926_v21 = vrot.slane %v4924_v28, 1  ;;  %v14575_v46 = vld [vmem:[#allocation54_spill] sm:$0xff] }
 0x5ce   : > { %v11710_v36 = vpop.f32.mrf.mxu3  ;;  %v4420_v24 = vunpack.c.l.b16 %v4292_v37  ;;  %v4026_v31 = vpop.f32.mrf.mxu0  ;;  %14570 = vst [vmem:[#allocation36_spill] sm:$0xff] %v11722_v29 }
 0x5cf   : > { %v11713_v43 = vpop.f32.mrf.mxu1  ;;  %v4027_v15 = vadd.f32 %v4026_v31, %v3858_v33 }
 0x5d0   : > { %14566 = vst [vmem:[#allocation117_spill] sm:$0xff] %v11713_v43  ;;  %v4455_v38 = vpack.c.b16 %v4420_v24, %v4419_v6 }
 0x5d1   : > { %6244 = vmatmul.bf16.gmra.mxu2 %v11718_v48  ;;  %6572 = vmatmul.bf16.gmra.mxu0 %v11141_v56  ;;  %v4165_v32 = vmul.f32 %v11047_v34, %v4027_v15  ;;  %vm4100_vm13 = vcmp.ge.f32.partialorder %v4027_v15, 0.0 }
 0x5d2   : > { %v4663_v26 = vshrl.u32 %v4455_v38, 16  ;;  %v4666_v54 = vshll.u32 %v4455_v38, 16 }
 0x5d3   : > { %6413 = vmatmul.bf16.gmra.mxu3 %v11722_v29  ;;  %v4229_v24 = vsel %vm4100_vm13, %v4027_v15, %v4165_v32  ;;  %v4922_v32 = vshrl.u32 %v11175_v8, 16 }
 0x5d4   : > { %v11727_v1 = vrot.slane %v4663_v26, 7  ;;  %v3698_v40 = vpop.f32.mrf.mxu2  ;;  %v3694_v26 = vadd.f32 %v3693_v61, %v14575_v46  ;;  %v4293_v15 = vpack.c.bf16 %v4229_v24, %v4229_v24  ;;  %v5314_v46 = vrot.slane %v11175_v8, 1 }
 0x5d5   : > { %v3699_v37 = vadd.f32 %v3698_v40, %v14572_v42 }
 0x5d6   : > { %14571 = vst [vmem:[#allocation118_spill] sm:$0xff] %v11727_v1  ;;  %v3867_v55 = vpop.f32.mrf.mxu3  ;;  %v4028_v33 = vpop.f32.mrf.mxu0  ;;  %v4668_v6 = vor.u32 %v4666_v54, %v11727_v1  ;;  %v4929_v54 = vshll.u32 %v4800_v14, 16  ;;  %v3863_v28 = vadd.f32 %v11691_v11, %v3694_v26  ;;  %v4421_v29 = vunpack.c.l.b16 %v4293_v15  ;;  %v14577_v1 = vld [vmem:[#allocation59_spill] sm:$0xff]  ;;  %v8812_v15 = vld [vmem:[#allocation9 + $0x178] sm:$0xff] }
 0x5d7   : > { %v11732_v62 = vpop.f32.mrf.mxu1  ;;  %v11735_v31 = vadd.f32 %v3867_v55, %v3699_v37  ;;  %v4029_v50 = vadd.f32 %v4028_v33, %v3860_v2  ;;  %v14576_v2 = vld [vmem:[#allocation61_spill] sm:$0xff]  ;;  %v4927_v33 = vor.u32 %v4926_v21, %v4922_v32  ;;  %v5315_v21 = vrot.slane %v4800_v14, 1  ;;  %6877 = vmatpush.bf16.msra.mxu2 %v8812_v15 }
 0x5d8   : > { %14573 = vst [vmem:[#allocation119_spill] sm:$0xff] %v11732_v62  ;;  %v11742_v38 = vsel %vm11020_vm6, 0, %v4668_v6  ;;  %v3532_v42 = vadd.f32 %v11161_v60, %v14576_v2  ;;  %v4931_v43 = vrot.slane %v4929_v54, 1  ;;  %v11759_v60 = vld [vmem:[%s13667_s5] ss:$0 sm:$0xff]  ;;  %v4934_v15 = vshrl.u32 %v11194_v41, 16 }
 0x5d9   : > { %14574 = vst [vmem:[#allocation35_spill] sm:$0xff] %v11742_v38  ;;  %vm4101_vm14 = vcmp.ge.f32.partialorder %v4029_v50, 0.0  ;;  %v4166_v40 = vmul.f32 %v11047_v34, %v4029_v50  ;;  %6185 = vmatmul.bf16.gmra.mxu1 %v11742_v38  ;;  %v14578_v38 = vld [vmem:[#allocation132_spill] sm:$0xff]  ;;  %v8820_v32 = vld [vmem:[#allocation9 + $0x1b8] sm:$0xff] }
 0x5da   : > { %v3527_v16 = vadd.f32 %v14578_v38, %v14577_v1  ;;  %v11769_v1 = vsel %vm1763_vm4, %v5314_v46, %v5315_v21  ;;  %7046 = vmatpush.bf16.msra.mxu3 %v8820_v32 }
 0x5db   : > { %v4230_v47 = vsel %vm4101_vm14, %v4029_v50, %v4166_v40  ;;  %v11764_v40 = vsel %vm1359_vm3, %v4927_v33, %v4931_v43  ;;  %14580 = vst [vmem:[#allocation120_spill] sm:$0xff] %v11769_v1 }
 0x5dc   : > { %v4294_v37 = vpack.c.bf16 %v4230_v47, %v4230_v47  ;;  %v3700_v55 = vpop.f32.mrf.mxu2  ;;  %14579 = vst [vmem:[#allocation41_spill] sm:$0xff] %v11764_v40  ;;  %v3696_v54 = vadd.f32 %v11707_v35, %v3527_v16 }
 0x5dd   : > { %v3701_v6 = vadd.f32 %v3700_v55, %v3532_v42 }
 0x5de   : > { %v3869_v61 = vpop.f32.mrf.mxu3  ;;  %v4422_v56 = vunpack.c.l.b16 %v4294_v37  ;;  %v4031_v62 = vpop.f32.mrf.mxu0  ;;  %v3865_v14 = vadd.f32 %v11710_v36, %v3696_v54 }
 0x5df   : > { %v11752_v24 = vpop.f32.mrf.mxu1  ;;  %v11761_v50 = vadd.f32 %v3869_v61, %v3701_v6  ;;  %v4032_v11 = vadd.f32 %v4031_v62, %v3863_v28  ;;  %v4936_v62 = vshll.u32 %v11194_v41, 16  ;;  %v4801_v6 = vsel %vm11020_vm6, %v11187_v12, 0  ;;  %v8828_v61 = vld [vmem:[#allocation9 + $0x1f8] sm:$0xff] }
 0x5e0   : > { %v4456_v26 = vpack.c.b16 %v4422_v56, %v4421_v29  ;;  %v6042_v56 = vadd.f32 %v11759_v60, %v11170_v52  ;;  %7215 = vmatpush.bf16.msra.mxu0 %v8828_v61  ;;  %v4941_v32 = vshll.u32 %v4801_v6, 16  ;;  %v6044_v12 = vadd.f32 %v11759_v60, %v11180_v22 }
 0x5e1   : > { %6249 = vmatmul.bf16.gmra.mxu2 %v11764_v40  ;;  %6577 = vmatmul.bf16.gmra.mxu0 %v11156_v25  ;;  %v4167_v43 = vmul.f32 %v11047_v34, %v4032_v11  ;;  %vm4102_vm15 = vcmp.ge.f32.partialorder %v4032_v11, 0.0  ;;  %v4938_v36 = vrot.slane %v4936_v62, 1  ;;  %v5317_v62 = vrot.slane %v11194_v41, 1 }
 0x5e2   : > { %v4670_v38 = vshrl.u32 %v4456_v26, 16  ;;  %v4673_v16 = vshll.u32 %v4456_v26, 16  ;;  %v5318_v22 = vrot.slane %v4801_v6, 1 }
 0x5e3   : > { %6418 = vmatmul.bf16.gmra.mxu3 %v11769_v1  ;;  %v4231_v52 = vsel %vm4102_vm15, %v4032_v11, %v4167_v43  ;;  %v8836_v11 = vld [vmem:[#allocation9 + $0x238] sm:$0xff]  ;;  %v4939_v43 = vor.u32 %v4938_v36, %v4934_v15 }
 0x5e4   : > { %v11776_v29 = vrot.slane %v4670_v38, 7  ;;  %v6210_v35 = vpop.f32.mrf.mxu2  ;;  %v4295_v26 = vpack.c.bf16 %v4231_v52, %v4231_v52  ;;  %7384 = vmatpush.bf16.msra.mxu1 %v8836_v11  ;;  %v11808_v36 = vsel %vm1763_vm4, %v5317_v62, %v5318_v22 }
 0x5e5   : > { %v6211_v2 = vadd.f32 %v6210_v35, %v6042_v56  ;;  %14585 = vst [vmem:[#allocation123_spill] sm:$0xff] %v11808_v36 }
 0x5e6   : > { %v6379_v42 = vpop.f32.mrf.mxu3  ;;  %v4033_v47 = vpop.f32.mrf.mxu0  ;;  %v4675_v55 = vor.u32 %v4673_v16, %v11776_v29 }
 0x5e7   : > { %v11780_v37 = vpop.f32.mrf.mxu1  ;;  %v11783_v33 = vadd.f32 %v6379_v42, %v6211_v2  ;;  %v4034_v28 = vadd.f32 %v4033_v47, %v3865_v14  ;;  %v4423_v14 = vunpack.c.l.b16 %v4295_v26  ;;  %v6047_v26 = vadd.f32 %v11759_v60, %v11189_v49 }
 0x5e8   : > { %14581 = vst [vmem:[#allocation122_spill] sm:$0xff] %v11780_v37  ;;  %v11790_v46 = vsel %vm11020_vm6, 0, %v4675_v55  ;;  %v4943_v55 = vrot.slane %v4941_v32, 1  ;;  %v8817_v37 = vld [vmem:[#allocation9 + $0x1a0] sm:$0xff] }
 0x5e9   : > { %14582 = vst [vmem:[#allocation39_spill] sm:$0xff] %v11790_v46  ;;  %vm4103_vm0 = vcmp.ge.f32.partialorder %v4034_v28, 0.0  ;;  %v4168_v21 = vmul.f32 %v11047_v34, %v4034_v28  ;;  %6190 = vmatmul.bf16.gmra.mxu1 %v11790_v46 }
 0x5eb   : > { %v4232_v54 = vsel %vm4103_vm0, %v4034_v28, %v4168_v21  ;;  %v11804_v21 = vsel %vm1359_vm3, %v4939_v43, %v4943_v55 }
 0x5ec   : > { %v4296_v38 = vpack.c.bf16 %v4232_v54, %v4232_v54  ;;  %v6212_v56 = vpop.f32.mrf.mxu2  ;;  %14584 = vst [vmem:[#allocation45_spill] sm:$0xff] %v11804_v21 }
 0x5ed   : > { %v6213_v16 = vadd.f32 %v6212_v56, %v6044_v12  ;;  %v4948_v12 = vshll.u32 %v11213_v45, 16 }
 0x5ee   : > { %v6381_v35 = vpop.f32.mrf.mxu3  ;;  %v4424_v2 = vunpack.c.l.b16 %v4296_v38  ;;  %v4036_v42 = vpop.f32.mrf.mxu0 }
 0x5ef   : > { %v11798_v47 = vpop.f32.mrf.mxu1  ;;  %v11800_v52 = vadd.f32 %v6381_v35, %v6213_v16  ;;  %v4037_v61 = vadd.f32 %v4036_v42, %v11735_v31  ;;  %v4950_v42 = vrot.slane %v4948_v12, 1  ;;  %v5320_v12 = vrot.slane %v11213_v45, 1 }
 0x5f0   : > { %14583 = vst [vmem:[#allocation121_spill] sm:$0xff] %v11798_v47  ;;  %v4457_v28 = vpack.c.b16 %v4424_v2, %v4423_v14  ;;  %v4802_v14 = vsel %vm11020_vm6, %v11206_v4, 0 }
 0x5f1   : > { %6254 = vmatmul.bf16.gmra.mxu2 %v11804_v21  ;;  %6582 = vmatmul.bf16.gmra.mxu0 %v11175_v8  ;;  %v4169_v31 = vmul.f32 %v11047_v34, %v4037_v61  ;;  %vm4104_vm1 = vcmp.ge.f32.partialorder %v4037_v61, 0.0  ;;  %v5321_v1 = vrot.slane %v4802_v14, 1 }
 0x5f2   : > { %v4677_v11 = vshrl.u32 %v4457_v28, 16  ;;  %v4680_v15 = vshll.u32 %v4457_v28, 16  ;;  %v4953_v28 = vshll.u32 %v4802_v14, 16 }
 0x5f3   : > { %6423 = vmatmul.bf16.gmra.mxu3 %v11808_v36  ;;  %v4233_v35 = vsel %vm4104_vm1, %v4037_v61, %v4169_v31  ;;  %v4946_v61 = vshrl.u32 %v11213_v45, 16 }
 0x5f4   : > { %v11815_v6 = vrot.slane %v4677_v11, 7  ;;  %v6215_v32 = vpop.f32.mrf.mxu2  ;;  %v4297_v22 = vpack.c.bf16 %v4233_v35, %v4233_v35 }
 0x5f5   : > { %v6216_v54 = vadd.f32 %v6215_v32, %v6047_v26  ;;  %v4951_v31 = vor.u32 %v4950_v42, %v4946_v61  ;;  %v11847_v42 = vsel %vm1763_vm4, %v5320_v12, %v5321_v1  ;;  %v14595_v1 = vld [vmem:[#allocation139_spill] sm:$0xff]  ;;  %v14596_v12 = vld [vmem:[#allocation73_spill] sm:$0xff] }
 0x5f6   : > { %14586 = vst [vmem:[#allocation125_spill] sm:$0xff] %v11815_v6  ;;  %v6384_v38 = vpop.f32.mrf.mxu3  ;;  %v4038_v56 = vpop.f32.mrf.mxu0  ;;  %v4682_v16 = vor.u32 %v4680_v15, %v11815_v6 }
 0x5f7   : > { %v11818_v43 = vpop.f32.mrf.mxu1  ;;  %v6385_v62 = vadd.f32 %v6384_v38, %v6216_v54  ;;  %v4039_v49 = vadd.f32 %v4038_v56, %v11761_v50  ;;  %v6049_v50 = vadd.f32 %v11759_v60, %v11199_v23  ;;  %v4425_v54 = vunpack.c.l.b16 %v4297_v22  ;;  %14592 = vst [vmem:[#allocation49_spill] sm:$0xff] %v11847_v42  ;;  %v14593_v22 = vld [vmem:[#allocation71_spill] sm:$0xff] }
 0x5f8   : > { %14587 = vst [vmem:[#allocation46_spill] sm:$0xff] %v11818_v43  ;;  %v11827_v2 = vsel %vm11020_vm6, 0, %v4682_v16  ;;  %v4955_v16 = vrot.slane %v4953_v28, 1  ;;  %v4960_v14 = vshll.u32 %v14593_v22, 16 }
 0x5f9   : > { %14588 = vst [vmem:[#allocation124_spill] sm:$0xff] %v11827_v2  ;;  %vm4105_vm2 = vcmp.ge.f32.partialorder %v4039_v49, 0.0  ;;  %v4170_v55 = vmul.f32 %v11047_v34, %v4039_v49  ;;  %6195 = vmatmul.bf16.gmra.mxu1 %v11827_v2 }
 0x5fb   : > { %v4234_v11 = vsel %vm4105_vm2, %v4039_v49, %v4170_v55  ;;  %v11843_v49 = vsel %vm1359_vm3, %v4951_v31, %v4955_v16  ;;  %v6052_v55 = vadd.f32 %v11759_v60, %v11208_v19  ;;  %v4803_v31 = vsel %vm11020_vm6, %v14595_v1, 0 }
 0x5fc   : > { %v4298_v26 = vpack.c.bf16 %v4234_v11, %v4234_v11  ;;  %v6217_v4 = vpop.f32.mrf.mxu2  ;;  %14591 = vst [vmem:[#allocation128_spill] sm:$0xff] %v11843_v49  ;;  %v4958_v19 = vshrl.u32 %v14593_v22, 16 }
 0x5fd   : > { %v6218_v15 = vadd.f32 %v6217_v4, %v6049_v50 }
 0x5fe   : > { %v6386_v32 = vpop.f32.mrf.mxu3  ;;  %v4426_v38 = vunpack.c.l.b16 %v4298_v26  ;;  %v6548_v56 = vpop.f32.mrf.mxu0 }
 0x5ff   : > { %v11835_v34 = vpop.f32.mrf.mxu1  ;;  %v6387_v35 = vadd.f32 %v6386_v32, %v6218_v15  ;;  %v11838_v36 = vadd.f32 %v6548_v56, %v11783_v33  ;;  %v4962_v15 = vrot.slane %v4960_v14, 1  ;;  %v4965_v32 = vshll.u32 %v4803_v31, 16 }
 0x600   : > { %14589 = vst [vmem:[#allocation51_spill] sm:$0xff] %v11835_v34  ;;  %v11840_v23 = vpack.c.b16 %v4426_v38, %v4425_v54  ;;  %v6054_v54 = vadd.f32 %v11759_v60, %v14596_v12 }
 0x601   : > { %6259 = vmatmul.bf16.gmra.mxu2 %v11843_v49  ;;  %6587 = vmatmul.bf16.gmra.mxu0 %v11194_v41  ;;  %v4963_v56 = vor.u32 %v4962_v15, %v4958_v19  ;;  %v14600_v15 = vld [vmem:[#allocation68_spill] sm:$0xff] }
 0x602   : > { %14590 = vst [vmem:[#allocation126_spill] sm:$0xff] %v11840_v23  ;;  %v6057_v19 = vadd.f32 %v11759_v60, %v14600_v15 }
 0x603   : > { %6428 = vmatmul.bf16.gmra.mxu3 %v11847_v42  ;;  %v14604_v42 = vld [vmem:[#allocation93_spill] sm:$0xff] }
 0x604   : > { %v6220_v33 = vpop.f32.mrf.mxu2 }
 0x605   : > { %v6221_v61 = vadd.f32 %v6220_v33, %v6052_v55 }
 0x606   : > { %v6389_v28 = vpop.f32.mrf.mxu3  ;;  %v6550_v11 = vpop.f32.mrf.mxu0 }
 0x607   : > { %v11854_v50 = vpop.f32.mrf.mxu1  ;;  %v6390_v26 = vadd.f32 %v6389_v28, %v6221_v61  ;;  %v11857_v4 = vadd.f32 %v6550_v11, %v11800_v52  ;;  %v5323_v52 = vrot.slane %v14593_v22, 1  ;;  %v4967_v28 = vrot.slane %v4965_v32, 1 }
 0x608   : > { %14594 = vst [vmem:[#allocation127_spill] sm:$0xff] %v11854_v50 }
 0x609   : > { %6716 = vmatmul.bf16.vlgmr.msrb.gmra.mxu1 %v11484_v20  ;;  %v5324_v20 = vrot.slane %v4803_v31, 1  ;;  %v11872_v1 = vsel %vm1359_vm3, %v4963_v56, %v4967_v28 }
 0x60a   : > { %14598 = vst [vmem:[#allocation129_spill] sm:$0xff] %v11872_v1 }
 0x60b   : > { %v11876_v12 = vsel %vm1763_vm4, %v5323_v52, %v5324_v20  ;;  %v14603_v52 = vld [vmem:[#allocation69_spill] sm:$0xff] }
 0x60c   : > { %v6222_v38 = vpop.f32.mrf.mxu2  ;;  %14599 = vst [vmem:[#allocation134_spill] sm:$0xff] %v11876_v12  ;;  %v4804_v28 = vsel %vm11020_vm6, %v14603_v52, 0 }
 0x60d   : > { %v6223_v16 = vadd.f32 %v6222_v38, %v6054_v54  ;;  %v14601_v54 = vld [vmem:[#allocation81_spill] sm:$0xff]  ;;  %v5327_v25 = vrot.slane %v4804_v28, 1 }
 0x60e   : > { %v6391_v55 = vpop.f32.mrf.mxu3  ;;  %v6553_v61 = vpop.f32.mrf.mxu0  ;;  %v4970_v15 = vshrl.u32 %v14601_v54, 16 }
 0x60f   : > { %v11867_v33 = vpop.f32.mrf.mxu1  ;;  %v6392_v11 = vadd.f32 %v6391_v55, %v6223_v16  ;;  %v11869_v14 = vadd.f32 %v6553_v61, %v6385_v62  ;;  %v4972_v62 = vshll.u32 %v14601_v54, 16 }
 0x610   : > { %14597 = vst [vmem:[#allocation56_spill] sm:$0xff] %v11867_v33 }
 0x611   : > { %6264 = vmatmul.bf16.gmra.mxu2 %v11872_v1  ;;  %6592 = vmatmul.bf16.gmra.mxu0 %v11213_v45  ;;  %v4974_v20 = vrot.slane %v4972_v62, 1 }
 0x613   : > { %6433 = vmatmul.bf16.gmra.mxu3 %v11876_v12  ;;  %v4977_v12 = vshll.u32 %v4804_v28, 16  ;;  %v4975_v45 = vor.u32 %v4974_v20, %v4970_v15 }
 0x614   : > { %v6225_v32 = vpop.f32.mrf.mxu2 }
 0x615   : > { %v6226_v38 = vadd.f32 %v6225_v32, %v6057_v19  ;;  %v6059_v19 = vadd.f32 %v11759_v60, %v14604_v42 }
 0x616   : > { %v6394_v31 = vpop.f32.mrf.mxu3  ;;  %v6555_v56 = vpop.f32.mrf.mxu0 }
 0x617   : > { %v11883_v16 = vpop.f32.mrf.mxu1  ;;  %v6395_v55 = vadd.f32 %v6394_v31, %v6226_v38  ;;  %v11885_v61 = vadd.f32 %v6555_v56, %v6387_v35  ;;  %v5326_v35 = vrot.slane %v14601_v54, 1  ;;  %v4979_v56 = vrot.slane %v4977_v12, 1  ;;  %v14608_v12 = vld [vmem:[#allocation79_spill] sm:$0xff] }
 0x618   : > { %14602 = vst [vmem:[#allocation54_spill] sm:$0xff] %v11883_v16  ;;  %v8819_v16 = vld [vmem:[#allocation9 + $0x1b0] sm:$0xff] }
 0x619   : > { %6721 = vmatmul.bf16.gmra.mxu1 %v11522_v53  ;;  %v8811_v53 = vld [vmem:[#allocation9 + $0x170] sm:$0xff]  ;;  %v11900_v33 = vsel %vm1359_vm3, %v4975_v45, %v4979_v56  ;;  %v11904_v42 = vsel %vm1763_vm4, %v5326_v35, %v5327_v25  ;;  %7047 = vmatpush.bf16.msra.mxu3 %v8819_v16 }
 0x61a   : > { %14606 = vst [vmem:[#allocation59_spill] sm:$0xff] %v11900_v33  ;;  %6878 = vmatpush.bf16.msra.mxu2 %v8811_v53  ;;  %v14611_v35 = vld [vmem:[#allocation88_spill] sm:$0xff] }
 0x61b   : > { %14607 = vst [vmem:[#allocation132_spill] sm:$0xff] %v11904_v42  ;;  %v8827_v53 = vld [vmem:[#allocation9 + $0x1f0] sm:$0xff] }
 0x61c   : > { %v6227_v32 = vpop.f32.mrf.mxu2  ;;  %7216 = vmatpush.bf16.msra.mxu0 %v8827_v53  ;;  %v8835_v16 = vld [vmem:[#allocation9 + $0x230] sm:$0xff] }
 0x61d   : > { %v6228_v41 = vadd.f32 %v6227_v32, %v6059_v19  ;;  %7385 = vmatpush.bf16.msra.mxu1 %v8835_v16 }
 0x61e   : > { %v6396_v8 = vpop.f32.mrf.mxu3  ;;  %v6558_v31 = vpop.f32.mrf.mxu0 }
 0x61f   : > { %v11895_v38 = vpop.f32.mrf.mxu1  ;;  %v6397_v52 = vadd.f32 %v6396_v8, %v6228_v41  ;;  %v11897_v62 = vadd.f32 %v6558_v31, %v6390_v26  ;;  %v6062_v8 = vadd.f32 %v11759_v60, %v14608_v12  ;;  %v14609_v26 = vld [vmem:[#allocation110_spill] sm:$0xff]  ;;  %v4805_v31 = vsel %vm11020_vm6, %v14611_v35, 0 }
 0x620   : > { %14605 = vst [vmem:[#allocation61_spill] sm:$0xff] %v11895_v38  ;;  %v4984_v28 = vshll.u32 %v14609_v26, 16  ;;  %v4982_v12 = vshrl.u32 %v14609_v26, 16  ;;  %v5330_v38 = vrot.slane %v4805_v31, 1 }
 0x621   : > { %6269 = vmatmul.bf16.gmra.mxu2 %v11900_v33  ;;  %6597 = vmatmul.bf16.gmra.mxu0 %v14593_v22  ;;  %v5329_v22 = vrot.slane %v14609_v26, 1 }
 0x622   : > { %v4986_v56 = vrot.slane %v4984_v28, 1 }
 0x623   : > { %6438 = vmatmul.bf16.gmra.mxu3 %v11904_v42  ;;  %v11932_v16 = vsel %vm1763_vm4, %v5329_v22, %v5330_v38  ;;  %v14618_v22 = vld [vmem:[#allocation85_spill] sm:$0xff] }
 0x624   : > { %v6230_v41 = vpop.f32.mrf.mxu2  ;;  %14615 = vst [vmem:[#allocation69_spill] sm:$0xff] %v11932_v16  ;;  %v4806_v38 = vsel %vm11020_vm6, %v14618_v22, 0 }
 0x625   : > { %v6231_v20 = vadd.f32 %v6230_v41, %v6062_v8  ;;  %v4989_v8 = vshll.u32 %v4805_v31, 16  ;;  %v14612_v41 = vld [vmem:[#allocation78_spill] sm:$0xff] }
 0x626   : > { %v6399_v45 = vpop.f32.mrf.mxu3  ;;  %v6560_v19 = vpop.f32.mrf.mxu0  ;;  %v6064_v42 = vadd.f32 %v11759_v60, %v14612_v41 }
 0x627   : > { %v11911_v15 = vpop.f32.mrf.mxu1  ;;  %v6400_v32 = vadd.f32 %v6399_v45, %v6231_v20  ;;  %v11913_v25 = vadd.f32 %v6560_v19, %v6392_v11  ;;  %v4987_v11 = vor.u32 %v4986_v56, %v4982_v12 }
 0x628   : > { %14610 = vst [vmem:[#allocation139_spill] sm:$0xff] %v11911_v15  ;;  %v4991_v15 = vrot.slane %v4989_v8, 1 }
 0x629   : > { %6726 = vmatmul.bf16.gmra.mxu1 %v11561_v30 }
 0x62a   : > { %v11928_v23 = vsel %vm1359_vm3, %v4987_v11, %v4991_v15 }
 0x62b   : > { %14614 = vst [vmem:[#allocation68_spill] sm:$0xff] %v11928_v23 }
 0x62c   : > { %v6232_v20 = vpop.f32.mrf.mxu2 }
 0x62d   : > { %v6233_v45 = vadd.f32 %v6232_v20, %v6064_v42  ;;  %v14616_v42 = vld [vmem:[#allocation89_spill] sm:$0xff] }
 0x62e   : > { %v6401_v19 = vpop.f32.mrf.mxu3  ;;  %v6563_v28 = vpop.f32.mrf.mxu0  ;;  %v6067_v56 = vadd.f32 %v11759_v60, %v14616_v42  ;;  %v14619_v42 = vld [vmem:[#allocation83_spill] sm:$0xff] }
 0x62f   : > { %v11923_v35 = vpop.f32.mrf.mxu1  ;;  %v6402_v30 = vadd.f32 %v6401_v19, %v6233_v45  ;;  %v11925_v53 = vadd.f32 %v6563_v28, %v6395_v55  ;;  %v4996_v55 = vshll.u32 %v11291_v10, 16  ;;  %v4994_v19 = vshrl.u32 %v11291_v10, 16 }
 0x630   : > { %14613 = vst [vmem:[#allocation73_spill] sm:$0xff] %v11923_v35  ;;  %v5001_v28 = vshll.u32 %v4806_v38, 16 }
 0x631   : > { %6274 = vmatmul.bf16.gmra.mxu2 %v11928_v23  ;;  %6602 = vmatmul.bf16.gmra.mxu0 %v14601_v54  ;;  %v4998_v45 = vrot.slane %v4996_v55, 1 }
 0x633   : > { %6443 = vmatmul.bf16.gmra.mxu3 %v11932_v16  ;;  %v4999_v16 = vor.u32 %v4998_v45, %v4994_v19  ;;  %v14623_v45 = vld [vmem:[#allocation98_spill] sm:$0xff] }
 0x634   : > { %v6235_v12 = vpop.f32.mrf.mxu2  ;;  %v6072_v19 = vadd.f32 %v11759_v60, %v14623_v45 }
 0x635   : > { %v6236_v8 = vadd.f32 %v6235_v12, %v6067_v56  ;;  %v6069_v56 = vadd.f32 %v11759_v60, %v14619_v42 }
 0x636   : > { %v6404_v31 = vpop.f32.mrf.mxu3  ;;  %v6565_v15 = vpop.f32.mrf.mxu0 }
 0x637   : > { %v11939_v41 = vpop.f32.mrf.mxu1  ;;  %v6405_v20 = vadd.f32 %v6404_v31, %v6236_v8  ;;  %v11941_v11 = vadd.f32 %v6565_v15, %v6397_v52  ;;  %v5332_v52 = vrot.slane %v11291_v10, 1  ;;  %v5003_v15 = vrot.slane %v5001_v28, 1 }
 0x638   : > { %14617 = vst [vmem:[#allocation93_spill] sm:$0xff] %v11939_v41 }
 0x639   : > { %6731 = vmatmul.bf16.gmra.mxu1 %v11599_v7  ;;  %v5333_v7 = vrot.slane %v4806_v38, 1  ;;  %v11956_v35 = vsel %vm1359_vm3, %v4999_v16, %v5003_v15 }
 0x63a   : > { %14621 = vst [vmem:[#allocation88_spill] sm:$0xff] %v11956_v35 }
 0x63b   : > { %v11960_v42 = vsel %vm1763_vm4, %v5332_v52, %v5333_v7  ;;  %v14626_v7 = vld [vmem:[#allocation22_spill] sm:$0xff] }
 0x63c   : > { %v6237_v12 = vpop.f32.mrf.mxu2  ;;  %14622 = vst [vmem:[#allocation78_spill] sm:$0xff] %v11960_v42  ;;  %v4807_v52 = vsel %vm11020_vm6, %v14626_v7, 0 }
 0x63d   : > { %v6238_v54 = vadd.f32 %v6237_v12, %v6069_v56 }
 0x63e   : > { %v6406_v41 = vpop.f32.mrf.mxu3  ;;  %v6568_v31 = vpop.f32.mrf.mxu0 }
 0x63f   : > { %v11951_v8 = vpop.f32.mrf.mxu1  ;;  %v6407_v22 = vadd.f32 %v6406_v41, %v6238_v54  ;;  %v11953_v55 = vadd.f32 %v6568_v31, %v6400_v32  ;;  %v14624_v54 = vld [vmem:[#allocation26_spill] sm:$0xff] }
 0x640   : > { %14620 = vst [vmem:[#allocation79_spill] sm:$0xff] %v11951_v8  ;;  %v5008_v32 = vshll.u32 %v14624_v54, 16  ;;  %v5006_v45 = vshrl.u32 %v14624_v54, 16 }
 0x641   : > { %6279 = vmatmul.bf16.gmra.mxu2 %v11956_v35  ;;  %6607 = vmatmul.bf16.gmra.mxu0 %v14609_v26  ;;  %v14627_v26 = vld [vmem:[#allocation99_spill] sm:$0xff] }
 0x642   : > { %v5010_v15 = vrot.slane %v5008_v32, 1 }
 0x643   : > { %6448 = vmatmul.bf16.gmra.mxu3 %v11960_v42  ;;  %v5013_v42 = vshll.u32 %v4807_v52, 16 }
 0x644   : > { %v6240_v28 = vpop.f32.mrf.mxu2  ;;  %v5011_v8 = vor.u32 %v5010_v15, %v5006_v45  ;;  %v14631_v15 = vld [vmem:[#allocation95_spill] sm:$0xff] }
 0x645   : > { %v6241_v41 = vadd.f32 %v6240_v28, %v6072_v19  ;;  %v6074_v19 = vadd.f32 %v11759_v60, %v14627_v26  ;;  %v6077_v45 = vadd.f32 %v11759_v60, %v14631_v15 }
 0x646   : > { %v6409_v38 = vpop.f32.mrf.mxu3  ;;  %v6570_v16 = vpop.f32.mrf.mxu0 }
 0x647   : > { %v11967_v56 = vpop.f32.mrf.mxu1  ;;  %v6410_v12 = vadd.f32 %v6409_v38, %v6241_v41  ;;  %v11969_v31 = vadd.f32 %v6570_v16, %v6402_v30  ;;  %v5335_v30 = vrot.slane %v14624_v54, 1  ;;  %v5015_v16 = vrot.slane %v5013_v42, 1 }
 0x648   : > { %14625 = vst [vmem:[#allocation89_spill] sm:$0xff] %v11967_v56 }
 0x649   : > { %6736 = vmatmul.bf16.gmra.mxu1 %v11639_v3  ;;  %v5336_v3 = vrot.slane %v4807_v52, 1  ;;  %v11984_v34 = vsel %vm1359_vm3, %v5011_v8, %v5015_v16 }
 0x64a   : > { %14629 = vst [vmem:[#allocation83_spill] sm:$0xff] %v11984_v34 }
 0x64b   : > { %v11988_v26 = vsel %vm1763_vm4, %v5335_v30, %v5336_v3  ;;  %v14633_v3 = vld [vmem:[#allocation106_spill] sm:$0xff] }
 0x64c   : > { %v6242_v28 = vpop.f32.mrf.mxu2  ;;  %14630 = vst [vmem:[#allocation98_spill] sm:$0xff] %v11988_v26 }
 0x64d   : > { %v6243_v56 = vadd.f32 %v6242_v28, %v6074_v19  ;;  %v6079_v28 = vadd.f32 %v11759_v60, %v14633_v3  ;;  %v14636_v3 = vld [vmem:[#allocation116_spill] sm:$0xff] }
 0x64e   : > { %v6411_v50 = vpop.f32.mrf.mxu3  ;;  %v6573_v38 = vpop.f32.mrf.mxu0 }
 0x64f   : > { %v11979_v41 = vpop.f32.mrf.mxu1  ;;  %v6412_v7 = vadd.f32 %v6411_v50, %v6243_v56  ;;  %v11981_v32 = vadd.f32 %v6573_v38, %v6405_v20 }
 0x650   : > { %14628 = vst [vmem:[#allocation85_spill] sm:$0xff] %v11979_v41 }
 0x651   : > { %6284 = vmatmul.bf16.gmra.mxu2 %v11984_v34  ;;  %6612 = vmatmul.bf16.gmra.mxu0 %v11291_v10 }
 0x653   : > { %6453 = vmatmul.bf16.gmra.mxu3 %v11988_v26 }
 0x654   : > { %v6245_v42 = vpop.f32.mrf.mxu2 }
 0x655   : > { %v6246_v50 = vadd.f32 %v6245_v42, %v6077_v45  ;;  %v8810_v42 = vld [vmem:[#allocation9 + $0x168] sm:$0xff] }
 0x656   : > { %v6414_v20 = vpop.f32.mrf.mxu3  ;;  %v6575_v52 = vpop.f32.mrf.mxu0  ;;  %6879 = vmatpush.bf16.msra.mxu2 %v8810_v42 }
 0x657   : > { %v11994_v56 = vpop.f32.mrf.mxu1  ;;  %v6415_v8 = vadd.f32 %v6414_v20, %v6246_v50  ;;  %v11996_v19 = vadd.f32 %v6575_v52, %v6407_v22  ;;  %v6082_v22 = vadd.f32 %v11759_v60, %v11322_v57  ;;  %v14635_v20 = vld [vmem:[#allocation38_spill] sm:$0xff] }
 0x658   : > { %14632 = vst [vmem:[#allocation22_spill] sm:$0xff] %v11994_v56  ;;  %v8818_v56 = vld [vmem:[#allocation9 + $0x1a8] sm:$0xff]  ;;  %v5020_v52 = vshll.u32 %v14635_v20, 16 }
 0x659   : > { %6741 = vmatmul.bf16.gmra.mxu1 %v11677_v59  ;;  %7048 = vmatpush.bf16.msra.mxu3 %v8818_v56  ;;  %v8834_v59 = vld [vmem:[#allocation9 + $0x228] sm:$0xff] }
 0x65a   : > { %v5022_v57 = vrot.slane %v5020_v52, 1  ;;  %7386 = vmatpush.bf16.msra.mxu1 %v8834_v59 }
 0x65c   : > { %v6247_v30 = vpop.f32.mrf.mxu2 }
 0x65d   : > { %v6248_v38 = vadd.f32 %v6247_v30, %v6079_v28  ;;  %v4572_v28 = vshrl.u32 %v14636_v3, 16  ;;  %7049 = vmatpush.bf16.msra.mxu3 %v8817_v37  ;;  %v8833_v37 = vld [vmem:[#allocation9 + $0x220] sm:$0xff] }
 0x65e   : > { %v6416_v16 = vpop.f32.mrf.mxu3  ;;  %v6578_v15 = vpop.f32.mrf.mxu0  ;;  %7387 = vmatpush.bf16.msra.mxu1 %v8833_v37  ;;  %v14669_v37 = vld [vmem:[#allocation40_spill] sm:$0xff] }
 0x65f   : > { %v12001_v26 = vpop.f32.mrf.mxu1  ;;  %v6417_v10 = vadd.f32 %v6416_v16, %v6248_v38  ;;  %v12003_v45 = vadd.f32 %v6578_v15, %v6410_v12  ;;  %v12019_v56 = vrot.slane %v4572_v28, 7 }
 0x660   : > { %14634 = vst [vmem:[#allocation99_spill] sm:$0xff] %v12001_v26  ;;  %v5338_v26 = vrot.slane %v14635_v20, 1 }
 0x661   : > { %6289 = vmatmul.bf16.gmra.mxu2 %v11442_v39  ;;  %6617 = vmatmul.bf16.gmra.mxu0 %v14624_v54  ;;  %v14638_v54 = vld [vmem:[#allocation103_spill] sm:$0xff] }
 0x662   : > { %v4809_v42 = vsel %vm11020_vm6, %v14638_v54, 0 }
 0x663   : > { %6458 = vmatmul.bf16.gmra.mxu3 %v11447_v9  ;;  %v8826_v9 = vld [vmem:[#allocation9 + $0x1e8] sm:$0xff] }
 0x664   : > { %v6250_v50 = vpop.f32.mrf.mxu2  ;;  %7217 = vmatpush.bf16.msra.mxu0 %v8826_v9 }
 0x665   : > { %v6251_v12 = vadd.f32 %v6250_v50, %v6082_v22  ;;  %v5018_v22 = vshrl.u32 %v14635_v20, 16  ;;  %v5025_v50 = vshll.u32 %v4809_v42, 16 }
 0x666   : > { %v6419_v30 = vpop.f32.mrf.mxu3  ;;  %v6580_v16 = vpop.f32.mrf.mxu0 }
 0x667   : > { %v12012_v38 = vpop.f32.mrf.mxu1  ;;  %v6420_v15 = vadd.f32 %v6419_v30, %v6251_v12  ;;  %v12014_v39 = vadd.f32 %v6580_v16, %v6412_v7  ;;  %v14639_v12 = vld [vmem:[#allocation107_spill] sm:$0xff]  ;;  %v5023_v16 = vor.u32 %v5022_v57, %v5018_v22  ;;  %v5027_v41 = vrot.slane %v5025_v50, 1 }
 0x668   : > { %14637 = vst [vmem:[#allocation95_spill] sm:$0xff] %v12012_v38  ;;  %v4575_v38 = vshll.u32 %v14636_v3, 16  ;;  %v6084_v7 = vadd.f32 %v11759_v60, %v14639_v12  ;;  %v5339_v3 = vrot.slane %v4809_v42, 1  ;;  %v14642_v57 = vld [vmem:[#allocation23_spill] sm:$0xff] }
 0x669   : > { %6746 = vmatmul.bf16.gmra.mxu1 %v11718_v48  ;;  %v12033_v6 = vsel %vm1359_vm3, %v5023_v16, %v5027_v41  ;;  %v5032_v41 = vshll.u32 %v11360_v17, 16 }
 0x66a   : > { %v4577_v54 = vor.u32 %v4575_v38, %v12019_v56  ;;  %v12041_v38 = vsel %vm1763_vm4, %v5338_v26, %v5339_v3  ;;  %v4810_v26 = vsel %vm11020_vm6, %v11353_v51, 0 }
 0x66b   : > { %14641 = vst [vmem:[#allocation38_spill] sm:$0xff] %v12041_v38 }
 0x66c   : > { %v6252_v30 = vpop.f32.mrf.mxu2  ;;  %v12037_v59 = vsel %vm11020_vm6, 0, %v4577_v54  ;;  %v5034_v54 = vrot.slane %v5032_v41, 1 }
 0x66d   : > { %v6253_v52 = vadd.f32 %v6252_v30, %v6084_v7 }
 0x66e   : > { %v6421_v28 = vpop.f32.mrf.mxu3  ;;  %v6583_v9 = vpop.f32.mrf.mxu0 }
 0x66f   : > { %v12028_v48 = vpop.f32.mrf.mxu1  ;;  %v6422_v43 = vadd.f32 %v6421_v28, %v6253_v52  ;;  %v12030_v47 = vadd.f32 %v6583_v9, %v6415_v8  ;;  %v6087_v8 = vadd.f32 %v11759_v60, %v14642_v57  ;;  %v5030_v52 = vshrl.u32 %v11360_v17, 16  ;;  %v14644_v9 = vld [vmem:[#allocation109_spill] sm:$0xff] }
 0x670   : > { %14640 = vst [vmem:[#allocation106_spill] sm:$0xff] %v12028_v48  ;;  %v5037_v28 = vshll.u32 %v4810_v26, 16  ;;  %v6089_v3 = vadd.f32 %v11759_v60, %v14644_v9 }
 0x671   : > { %6294 = vmatmul.bf16.gmra.mxu2 %v12033_v6  ;;  %6622 = vmatmul.bf16.gmra.mxu0 %v12037_v59 }
 0x673   : > { %6463 = vmatmul.bf16.gmra.mxu3 %v12041_v38 }
 0x674   : > { %v6255_v42 = vpop.f32.mrf.mxu2 }
 0x675   : > { %v6256_v22 = vadd.f32 %v6255_v42, %v6087_v8  ;;  %v5035_v8 = vor.u32 %v5034_v54, %v5030_v52  ;;  %v14648_v54 = vld [vmem:[#allocation25_spill] sm:$0xff] }
 0x676   : > { %v6424_v50 = vpop.f32.mrf.mxu3  ;;  %v6585_v7 = vpop.f32.mrf.mxu0  ;;  %v6092_v52 = vadd.f32 %v11759_v60, %v14648_v54 }
 0x677   : > { %v12048_v12 = vpop.f32.mrf.mxu1  ;;  %v6425_v30 = vadd.f32 %v6424_v50, %v6256_v22  ;;  %v12050_v16 = vadd.f32 %v6585_v7, %v6417_v10  ;;  %v5341_v10 = vrot.slane %v11360_v17, 1  ;;  %v5039_v7 = vrot.slane %v5037_v28, 1 }
 0x678   : > { %14643 = vst [vmem:[#allocation116_spill] sm:$0xff] %v12048_v12 }
 0x679   : > { %6751 = vmatmul.bf16.gmra.mxu1 %v11764_v40  ;;  %v5342_v40 = vrot.slane %v4810_v26, 1  ;;  %v12065_v12 = vsel %vm1359_vm3, %v5035_v8, %v5039_v7 }
 0x67a   : > { %14646 = vst [vmem:[#allocation107_spill] sm:$0xff] %v12065_v12 }
 0x67b   : > { %v12069_v9 = vsel %vm1763_vm4, %v5341_v10, %v5342_v40  ;;  %v14651_v10 = vld [vmem:[#allocation29_spill] sm:$0xff] }
 0x67c   : > { %v6257_v57 = vpop.f32.mrf.mxu2  ;;  %14647 = vst [vmem:[#allocation23_spill] sm:$0xff] %v12069_v9 }
 0x67d   : > { %v6258_v42 = vadd.f32 %v6257_v57, %v6089_v3 }
 0x67e   : > { %v6426_v38 = vpop.f32.mrf.mxu3  ;;  %v6588_v50 = vpop.f32.mrf.mxu0 }
 0x67f   : > { %v12060_v22 = vpop.f32.mrf.mxu1  ;;  %v6427_v51 = vadd.f32 %v6426_v38, %v6258_v42  ;;  %v12062_v41 = vadd.f32 %v6588_v50, %v6420_v15  ;;  %v14649_v38 = vld [vmem:[#allocation27_spill] sm:$0xff] }
 0x680   : > { %14645 = vst [vmem:[#allocation103_spill] sm:$0xff] %v12060_v22  ;;  %v5044_v15 = vshll.u32 %v14649_v38, 16  ;;  %v5042_v54 = vshrl.u32 %v14649_v38, 16 }
 0x681   : > { %6299 = vmatmul.bf16.gmra.mxu2 %v12065_v12  ;;  %6627 = vmatmul.bf16.gmra.mxu0 %v14635_v20  ;;  %v4811_v20 = vsel %vm11020_vm6, %v14651_v10, 0 }
 0x682   : > { %v5046_v7 = vrot.slane %v5044_v15, 1 }
 0x683   : > { %6468 = vmatmul.bf16.gmra.mxu3 %v12069_v9  ;;  %v5049_v9 = vshll.u32 %v4811_v20, 16 }
 0x684   : > { %v6260_v28 = vpop.f32.mrf.mxu2 }
 0x685   : > { %v6261_v3 = vadd.f32 %v6260_v28, %v6092_v52  ;;  %v14652_v52 = vld [vmem:[#allocation24_spill] sm:$0xff] }
 0x686   : > { %v6429_v26 = vpop.f32.mrf.mxu3  ;;  %v6590_v57 = vpop.f32.mrf.mxu0  ;;  %v6094_v28 = vadd.f32 %v11759_v60, %v14652_v52 }
 0x687   : > { %v6717_v8 = vpop.f32.mrf.mxu1  ;;  %v6430_v42 = vadd.f32 %v6429_v26, %v6261_v3  ;;  %v12076_v50 = vadd.f32 %v6590_v57, %v6422_v43  ;;  %v5047_v3 = vor.u32 %v5046_v7, %v5042_v54  ;;  %v14657_v54 = vld [vmem:[#allocation30_spill] sm:$0xff] }
 0x688   : > { %v12079_v40 = vadd.f32 %v6717_v8, %v11838_v36  ;;  %v5344_v36 = vrot.slane %v14649_v38, 1 }
 0x689   : > { %6756 = vmatmul.bf16.gmra.mxu1 %v11804_v21  ;;  %v5345_v21 = vrot.slane %v4811_v20, 1 }
 0x68a   : > { %14650 = vst [vmem:[#allocation109_spill] sm:$0xff] %v12079_v40  ;;  %v5051_v40 = vrot.slane %v5049_v9, 1  ;;  %v14656_v9 = vld [vmem:[#allocation32_spill] sm:$0xff] }
 0x68c   : > { %v6262_v22 = vpop.f32.mrf.mxu2  ;;  %v12095_v2 = vsel %vm1359_vm3, %v5047_v3, %v5051_v40 }
 0x68d   : > { %v6263_v43 = vadd.f32 %v6262_v22, %v6094_v28  ;;  %14654 = vst [vmem:[#allocation29_spill] sm:$0xff] %v12095_v2  ;;  %v12099_v22 = vsel %vm1763_vm4, %v5344_v36, %v5345_v21 }
 0x68e   : > { %v6431_v26 = vpop.f32.mrf.mxu3  ;;  %v6593_v57 = vpop.f32.mrf.mxu0  ;;  %14655 = vst [vmem:[#allocation24_spill] sm:$0xff] %v12099_v22 }
 0x68f   : > { %v6719_v8 = vpop.f32.mrf.mxu1  ;;  %v6432_v48 = vadd.f32 %v6431_v26, %v6263_v43  ;;  %v12089_v10 = vadd.f32 %v6593_v57, %v6425_v30  ;;  %v6097_v30 = vadd.f32 %v11759_v60, %v14656_v9  ;;  %v14659_v26 = vld [vmem:[#allocation37_spill] sm:$0xff] }
 0x690   : > { %v12092_v15 = vadd.f32 %v6719_v8, %v11857_v4  ;;  %v5056_v4 = vshll.u32 %v14657_v54, 16  ;;  %v4812_v36 = vsel %vm11020_vm6, %v14659_v26, 0  ;;  %v5054_v8 = vshrl.u32 %v14657_v54, 16 }
 0x691   : > { %6304 = vmatmul.bf16.gmra.mxu2 %v12095_v2  ;;  %6632 = vmatmul.bf16.gmra.mxu0 %v11360_v17  ;;  %v5061_v9 = vshll.u32 %v4812_v36, 16 }
 0x692   : > { %14653 = vst [vmem:[#allocation25_spill] sm:$0xff] %v12092_v15  ;;  %v5058_v57 = vrot.slane %v5056_v4, 1  ;;  %v8809_v15 = vld [vmem:[#allocation9 + $0x160] sm:$0xff] }
 0x693   : > { %6473 = vmatmul.bf16.gmra.mxu3 %v12099_v22  ;;  %v5063_v17 = vrot.slane %v5061_v9, 1  ;;  %6880 = vmatpush.bf16.msra.mxu2 %v8809_v15 }
 0x694   : > { %v6265_v7 = vpop.f32.mrf.mxu2 }
 0x695   : > { %v6266_v52 = vadd.f32 %v6265_v7, %v6097_v30  ;;  %v14660_v30 = vld [vmem:[#allocation33_spill] sm:$0xff] }
 0x696   : > { %v6434_v20 = vpop.f32.mrf.mxu3  ;;  %v6595_v28 = vpop.f32.mrf.mxu0  ;;  %v6099_v7 = vadd.f32 %v11759_v60, %v14660_v30 }
 0x697   : > { %v6722_v40 = vpop.f32.mrf.mxu1  ;;  %v6435_v3 = vadd.f32 %v6434_v20, %v6266_v52  ;;  %v12106_v43 = vadd.f32 %v6595_v28, %v6427_v51  ;;  %v5059_v52 = vor.u32 %v5058_v57, %v5054_v8  ;;  %v5068_v57 = vshll.u32 %v11431_v13, 16 }
 0x698   : > { %v12109_v21 = vadd.f32 %v6722_v40, %v11869_v14  ;;  %v5347_v14 = vrot.slane %v14657_v54, 1 }
 0x699   : > { %6761 = vmatmul.bf16.gmra.mxu1 %v11843_v49  ;;  %v5348_v49 = vrot.slane %v4812_v36, 1  ;;  %v12125_v30 = vsel %vm1359_vm3, %v5059_v52, %v5063_v17 }
 0x69a   : > { %14658 = vst [vmem:[#allocation32_spill] sm:$0xff] %v12109_v21 }
 0x69b   : > { %14661 = vst [vmem:[#allocation37_spill] sm:$0xff] %v12125_v30 }
 0x69c   : > { %v6267_v22 = vpop.f32.mrf.mxu2 }
 0x69d   : > { %v6268_v51 = vadd.f32 %v6267_v22, %v6099_v7  ;;  %v12129_v22 = vsel %vm1763_vm4, %v5347_v14, %v5348_v49  ;;  %v8825_v14 = vld [vmem:[#allocation9 + $0x1e0] sm:$0xff] }
 0x69e   : > { %v6436_v20 = vpop.f32.mrf.mxu3  ;;  %v6598_v28 = vpop.f32.mrf.mxu0  ;;  %14662 = vst [vmem:[#allocation33_spill] sm:$0xff] %v12129_v22  ;;  %7218 = vmatpush.bf16.msra.mxu0 %v8825_v14 }
 0x69f   : > { %v6724_v40 = vpop.f32.mrf.mxu1  ;;  %v6437_v21 = vadd.f32 %v6436_v20, %v6268_v51  ;;  %v12119_v26 = vadd.f32 %v6598_v28, %v6430_v42  ;;  %v14663_v42 = vld [vmem:[#allocation53_spill] sm:$0xff]  ;;  %v14665_v20 = vld [vmem:[#allocation42_spill] sm:$0xff]  ;;  %v5070_v28 = vrot.slane %v5068_v57, 1 }
 0x6a0   : > { %v12122_v4 = vadd.f32 %v6724_v40, %v11885_v61  ;;  %v6102_v61 = vadd.f32 %v11759_v60, %v14663_v42  ;;  %v4813_v15 = vsel %vm11020_vm6, %v14665_v20, 0  ;;  %v5066_v40 = vshrl.u32 %v11431_v13, 16 }
 0x6a1   : > { %6309 = vmatmul.bf16.gmra.mxu2 %v12125_v30  ;;  %6637 = vmatmul.bf16.gmra.mxu0 %v14649_v38  ;;  %v5073_v42 = vshll.u32 %v4813_v15, 16 }
 0x6a3   : > { %6478 = vmatmul.bf16.gmra.mxu3 %v12129_v22  ;;  %v5075_v57 = vrot.slane %v5073_v42, 1 }
 0x6a4   : > { %v6270_v36 = vpop.f32.mrf.mxu2 }
 0x6a5   : > { %v6271_v8 = vadd.f32 %v6270_v36, %v6102_v61  ;;  %v14666_v61 = vld [vmem:[#allocation58_spill] sm:$0xff] }
 0x6a6   : > { %v6439_v17 = vpop.f32.mrf.mxu3  ;;  %v6600_v9 = vpop.f32.mrf.mxu0 }
 0x6a7   : > { %v6727_v7 = vpop.f32.mrf.mxu1  ;;  %v6440_v52 = vadd.f32 %v6439_v17, %v6271_v8  ;;  %v12136_v51 = vadd.f32 %v6600_v9, %v6432_v48  ;;  %v6104_v48 = vadd.f32 %v11759_v60, %v14666_v61  ;;  %v5350_v9 = vrot.slane %v11431_v13, 1 }
 0x6a8   : > { %v12139_v49 = vadd.f32 %v6727_v7, %v11897_v62  ;;  %v5071_v62 = vor.u32 %v5070_v28, %v5066_v40 }
 0x6a9   : > { %6766 = vmatmul.bf16.gmra.mxu1 %v11872_v1  ;;  %v5351_v1 = vrot.slane %v4813_v15, 1 }
 0x6aa   : > { %14664 = vst [vmem:[#allocation53_spill] sm:$0xff] %v12139_v49  ;;  %v12155_v49 = vsel %vm1359_vm3, %v5071_v62, %v5075_v57  ;;  %v14671_v57 = vld [vmem:[#allocation34_spill] sm:$0xff] }
 0x6ab   : > { %14667 = vst [vmem:[#allocation42_spill] sm:$0xff] %v12155_v49  ;;  %v12159_v28 = vsel %vm1763_vm4, %v5350_v9, %v5351_v1 }
 0x6ac   : > { %v6272_v36 = vpop.f32.mrf.mxu2  ;;  %14668 = vst [vmem:[#allocation58_spill] sm:$0xff] %v12159_v28 }
 0x6ad   : > { %v6273_v8 = vadd.f32 %v6272_v36, %v6104_v48 }
 0x6ae   : > { %v6441_v17 = vpop.f32.mrf.mxu3  ;;  %v6603_v7 = vpop.f32.mrf.mxu0 }
 0x6af   : > { %v6729_v20 = vpop.f32.mrf.mxu1  ;;  %v6442_v22 = vadd.f32 %v6441_v17, %v6273_v8  ;;  %v12149_v38 = vadd.f32 %v6603_v7, %v6435_v3  ;;  %v6107_v3 = vadd.f32 %v11759_v60, %v14669_v37  ;;  %v14670_v8 = vld [vmem:[#allocation47_spill] sm:$0xff]  ;;  %v5078_v7 = vshrl.u32 %v11467_v58, 16 }
 0x6b0   : > { %v12152_v14 = vadd.f32 %v6729_v20, %v11913_v25  ;;  %v5080_v25 = vshll.u32 %v11467_v58, 16  ;;  %v4814_v17 = vsel %vm11020_vm6, %v14670_v8, 0  ;;  %v6109_v37 = vadd.f32 %v11759_v60, %v14671_v57 }
 0x6b1   : > { %6314 = vmatmul.bf16.gmra.mxu2 %v12155_v49  ;;  %6642 = vmatmul.bf16.gmra.mxu0 %v14657_v54  ;;  %v5085_v20 = vshll.u32 %v4814_v17, 16  ;;  %v5354_v54 = vrot.slane %v4814_v17, 1 }
 0x6b2   : > { %v5082_v9 = vrot.slane %v5080_v25, 1 }
 0x6b3   : > { %6483 = vmatmul.bf16.gmra.mxu3 %v12159_v28 }
 0x6b4   : > { %v6275_v40 = vpop.f32.mrf.mxu2 }
 0x6b5   : > { %v6276_v42 = vadd.f32 %v6275_v40, %v6107_v3  ;;  %v5083_v40 = vor.u32 %v5082_v9, %v5078_v7  ;;  %v14676_v7 = vld [vmem:[#allocation48_spill] sm:$0xff] }
 0x6b6   : > { %v6444_v15 = vpop.f32.mrf.mxu3  ;;  %v6605_v61 = vpop.f32.mrf.mxu0 }
 0x6b7   : > { %v6732_v48 = vpop.f32.mrf.mxu1  ;;  %v6445_v36 = vadd.f32 %v6444_v15, %v6276_v42  ;;  %v12166_v62 = vadd.f32 %v6605_v61, %v6437_v21 }
 0x6b8   : > { %v12169_v1 = vadd.f32 %v6732_v48, %v11925_v53  ;;  %v5353_v53 = vrot.slane %v11467_v58, 1  ;;  %v5087_v48 = vrot.slane %v5085_v20, 1  ;;  %v5092_v20 = vshll.u32 %v14676_v7, 16 }
 0x6b9   : > { %6771 = vmatmul.bf16.gmra.mxu1 %v11900_v33 }
 0x6ba   : > { %v12185_v33 = vsel %vm1359_vm3, %v5083_v40, %v5087_v48  ;;  %v12189_v60 = vsel %vm1763_vm4, %v5353_v53, %v5354_v54  ;;  %v14678_v53 = vld [vmem:[#allocation74_spill] sm:$0xff]  ;;  %v5090_v48 = vshrl.u32 %v14676_v7, 16 }
 0x6bb   : > { %14673 = vst [vmem:[#allocation47_spill] sm:$0xff] %v12185_v33 }
 0x6bc   : > { %v6277_v3 = vpop.f32.mrf.mxu2  ;;  %14674 = vst [vmem:[#allocation34_spill] sm:$0xff] %v12189_v60 }
 0x6bd   : > { %v6278_v21 = vadd.f32 %v6277_v3, %v6109_v37 }
 0x6be   : > { %v6446_v42 = vpop.f32.mrf.mxu3  ;;  %v6608_v15 = vpop.f32.mrf.mxu0 }
 0x6bf   : > { %v6734_v61 = vpop.f32.mrf.mxu1  ;;  %v6447_v28 = vadd.f32 %v6446_v42, %v6278_v21  ;;  %v12179_v8 = vadd.f32 %v6608_v15, %v6440_v52  ;;  %v12196_v52 = vld [vmem:[%s13667_s5] ss:$0 sm:$0xff]  ;;  %v4815_v15 = vsel %vm11020_vm6, %v14678_v53, 0 }
 0x6c0   : > { %v12182_v25 = vadd.f32 %v6734_v61, %v11941_v11  ;;  %v14675_v11 = vld [vmem:[#allocation50_spill] sm:$0xff]  ;;  %v5094_v61 = vrot.slane %v5092_v20, 1 }
 0x6c1   : > { %6319 = vmatmul.bf16.gmra.mxu2 %v12185_v33  ;;  %6647 = vmatmul.bf16.gmra.mxu0 %v11431_v13  ;;  %v6112_v17 = vadd.f32 %v12196_v52, %v14675_v11  ;;  %v5097_v11 = vshll.u32 %v4815_v15, 16 }
 0x6c2   : > { %14672 = vst [vmem:[#allocation40_spill] sm:$0xff] %v12182_v25 }
 0x6c3   : > { %6488 = vmatmul.bf16.gmra.mxu3 %v12189_v60  ;;  %v5099_v13 = vrot.slane %v5097_v11, 1 }
 0x6c4   : > { %v6280_v9 = vpop.f32.mrf.mxu2 }
 0x6c5   : > { %v6281_v57 = vadd.f32 %v6280_v9, %v6112_v17  ;;  %v14679_v17 = vld [vmem:[#allocation63_spill] sm:$0xff] }
 0x6c6   : > { %v6449_v37 = vpop.f32.mrf.mxu3  ;;  %v6610_v3 = vpop.f32.mrf.mxu0  ;;  %v6114_v9 = vadd.f32 %v12196_v52, %v14679_v17 }
 0x6c7   : > { %v6737_v54 = vpop.f32.mrf.mxu1  ;;  %v6450_v40 = vadd.f32 %v6449_v37, %v6281_v57  ;;  %v12201_v21 = vadd.f32 %v6610_v3, %v6442_v22  ;;  %v5095_v57 = vor.u32 %v5094_v61, %v5090_v48  ;;  %v14683_v61 = vld [vmem:[#allocation72_spill] sm:$0xff] }
 0x6c8   : > { %v12204_v42 = vadd.f32 %v6737_v54, %v11953_v55  ;;  %v5356_v55 = vrot.slane %v14676_v7, 1 }
 0x6c9   : > { %6776 = vmatmul.bf16.gmra.mxu1 %v11928_v23  ;;  %v5357_v23 = vrot.slane %v4815_v15, 1  ;;  %v12220_v25 = vsel %vm1359_vm3, %v5095_v57, %v5099_v13 }
 0x6ca   : > { %14677 = vst [vmem:[#allocation50_spill] sm:$0xff] %v12204_v42 }
 0x6cb   : > { %14681 = vst [vmem:[#allocation63_spill] sm:$0xff] %v12220_v25 }
 0x6cc   : > { %v6282_v60 = vpop.f32.mrf.mxu2 }
 0x6cd   : > { %v6283_v22 = vadd.f32 %v6282_v60, %v6114_v9  ;;  %v12224_v60 = vsel %vm1763_vm4, %v5356_v55, %v5357_v23 }
 0x6ce   : > { %v6451_v37 = vpop.f32.mrf.mxu3  ;;  %v6613_v3 = vpop.f32.mrf.mxu0  ;;  %14682 = vst [vmem:[#allocation141_spill] sm:$0xff] %v12224_v60 }
 0x6cf   : > { %v6739_v54 = vpop.f32.mrf.mxu1  ;;  %v6452_v42 = vadd.f32 %v6451_v37, %v6283_v22  ;;  %v12214_v53 = vadd.f32 %v6613_v3, %v6445_v36  ;;  %v6117_v36 = vadd.f32 %v12196_v52, %v14683_v61  ;;  %v14685_v22 = vld [vmem:[#allocation82_spill] sm:$0xff]  ;;  %v5102_v3 = vshrl.u32 %v11546_v18, 16  ;;  %v14686_v61 = vld [vmem:[#allocation84_spill] sm:$0xff] }
 0x6d0   : > { %v12217_v20 = vadd.f32 %v6739_v54, %v11969_v31  ;;  %v5104_v31 = vshll.u32 %v11546_v18, 16  ;;  %v4816_v37 = vsel %vm11020_vm6, %v14685_v22, 0 }
 0x6d1   : > { %6324 = vmatmul.bf16.gmra.mxu2 %v12220_v25  ;;  %6652 = vmatmul.bf16.gmra.mxu0 %v11467_v58  ;;  %v5109_v54 = vshll.u32 %v4816_v37, 16 }
 0x6d2   : > { %14680 = vst [vmem:[#allocation74_spill] sm:$0xff] %v12217_v20  ;;  %v5106_v55 = vrot.slane %v5104_v31, 1  ;;  %v8816_v20 = vld [vmem:[#allocation9 + $0x198] sm:$0xff] }
 0x6d3   : > { %6493 = vmatmul.bf16.gmra.mxu3 %v12224_v60  ;;  %v5111_v60 = vrot.slane %v5109_v54, 1 }
 0x6d4   : > { %v6285_v48 = vpop.f32.mrf.mxu2  ;;  %7050 = vmatpush.bf16.msra.mxu3 %v8816_v20 }
 0x6d5   : > { %v6286_v11 = vadd.f32 %v6285_v48, %v6117_v36  ;;  %v6119_v36 = vadd.f32 %v12196_v52, %v14686_v61 }
 0x6d6   : > { %v6454_v15 = vpop.f32.mrf.mxu3  ;;  %v6615_v17 = vpop.f32.mrf.mxu0 }
 0x6d7   : > { %v6742_v13 = vpop.f32.mrf.mxu1  ;;  %v6455_v9 = vadd.f32 %v6454_v15, %v6286_v11  ;;  %v12231_v57 = vadd.f32 %v6615_v17, %v6447_v28  ;;  %v5107_v11 = vor.u32 %v5106_v55, %v5102_v3  ;;  %v5116_v3 = vshll.u32 %v11584_v27, 16 }
 0x6d8   : > { %v12234_v23 = vadd.f32 %v6742_v13, %v11981_v32  ;;  %v5359_v32 = vrot.slane %v11546_v18, 1 }
 0x6d9   : > { %6781 = vmatmul.bf16.gmra.mxu1 %v11956_v35  ;;  %v5360_v35 = vrot.slane %v4816_v37, 1  ;;  %v12252_v61 = vsel %vm1359_vm3, %v5107_v11, %v5111_v60  ;;  %v5118_v20 = vrot.slane %v5116_v3, 1 }
 0x6da   : > { %14684 = vst [vmem:[#allocation72_spill] sm:$0xff] %v12234_v23  ;;  %v8808_v23 = vld [vmem:[#allocation9 + $0x158] sm:$0xff] }
 0x6db   : > { %14687 = vst [vmem:[#allocation82_spill] sm:$0xff] %v12252_v61  ;;  %v12256_v55 = vsel %vm1763_vm4, %v5359_v32, %v5360_v35  ;;  %6881 = vmatpush.bf16.msra.mxu2 %v8808_v23  ;;  %v8824_v32 = vld [vmem:[#allocation9 + $0x1d8] sm:$0xff] }
 0x6dc   : > { %v6287_v48 = vpop.f32.mrf.mxu2  ;;  %14688 = vst [vmem:[#allocation84_spill] sm:$0xff] %v12256_v55  ;;  %7219 = vmatpush.bf16.msra.mxu0 %v8824_v32  ;;  %v12282_v32 = vsel %vm11020_vm6, %v12019_v56, 0  ;;  %v5415_v56 = vshrl.u32 %v12037_v59, 16 }
 0x6dd   : > { %v6288_v28 = vadd.f32 %v6287_v48, %v6119_v36 }
 0x6de   : > { %v6456_v15 = vpop.f32.mrf.mxu3  ;;  %v6618_v17 = vpop.f32.mrf.mxu0 }
 0x6df   : > { %v6744_v13 = vpop.f32.mrf.mxu1  ;;  %v12244_v58 = vadd.f32 %v6456_v15, %v6288_v28  ;;  %v12246_v31 = vadd.f32 %v6618_v17, %v6450_v40  ;;  %v14689_v40 = vld [vmem:[#allocation57_spill] sm:$0xff]  ;;  %v14690_v15 = vld [vmem:[#allocation70_spill] sm:$0xff] }
 0x6e0   : > { %v12249_v22 = vadd.f32 %v6744_v13, %v11996_v19  ;;  %v6122_v19 = vadd.f32 %v12196_v52, %v14689_v40  ;;  %v4817_v23 = vsel %vm11020_vm6, %v14690_v15, 0  ;;  %v8832_v17 = vld [vmem:[#allocation9 + $0x218] sm:$0xff]  ;;  %v5114_v13 = vshrl.u32 %v11584_v27, 16 }
 0x6e1   : > { %6329 = vmatmul.bf16.gmra.mxu2 %v12252_v61  ;;  %6657 = vmatmul.bf16.gmra.mxu0 %v14676_v7  ;;  %v5121_v40 = vshll.u32 %v4817_v23, 16 }
 0x6e2   : > { %7388 = vmatpush.bf16.msra.mxu1 %v8832_v17 }
 0x6e3   : > { %6498 = vmatmul.bf16.gmra.mxu3 %v12256_v55  ;;  %v5123_v55 = vrot.slane %v5121_v40, 1 }
 0x6e4   : > { %v6290_v37 = vpop.f32.mrf.mxu2 }
 0x6e5   : > { %v6291_v54 = vadd.f32 %v6290_v37, %v6122_v19  ;;  %v14691_v19 = vld [vmem:[#allocation67_spill] sm:$0xff] }
 0x6e6   : > { %v6459_v60 = vpop.f32.mrf.mxu3  ;;  %v6620_v36 = vpop.f32.mrf.mxu0 }
 0x6e7   : > { %v6747_v48 = vpop.f32.mrf.mxu1  ;;  %v12263_v11 = vadd.f32 %v6459_v60, %v6291_v54  ;;  %v12265_v35 = vadd.f32 %v6620_v36, %v6452_v42  ;;  %v6124_v42 = vadd.f32 %v12196_v52, %v14691_v19  ;;  %v5417_v54 = vshll.u32 %v12037_v59, 16 }
 0x6e8   : > { %v12268_v28 = vadd.f32 %v6747_v48, %v12003_v45  ;;  %v5119_v45 = vor.u32 %v5118_v20, %v5114_v13  ;;  %v5362_v48 = vrot.slane %v11584_v27, 1  ;;  %v5363_v20 = vrot.slane %v4817_v23, 1 }
 0x6e9   : > { %6786 = vmatmul.bf16.gmra.mxu1 %v11984_v34  ;;  %v5419_v19 = vrot.slane %v5417_v54, 1 }
 0x6ea   : > { %v12290_v13 = vsel %vm1359_vm3, %v5119_v45, %v5123_v55  ;;  %v12294_v40 = vsel %vm1763_vm4, %v5362_v48, %v5363_v20 }
 0x6eb   : > { %14692 = vst [vmem:[#allocation57_spill] sm:$0xff] %v12290_v13  ;;  %v5420_v55 = vor.u32 %v5419_v19, %v5415_v56 }
 0x6ec   : > { %v6292_v37 = vpop.f32.mrf.mxu2  ;;  %14693 = vst [vmem:[#allocation70_spill] sm:$0xff] %v12294_v40 }
 0x6ed   : > { %v6293_v60 = vadd.f32 %v6292_v37, %v6124_v42  ;;  %v5128_v37 = vshll.u32 %v11622_v44, 16 }
 0x6ee   : > { %v6461_v36 = vpop.f32.mrf.mxu3  ;;  %v6623_v3 = vpop.f32.mrf.mxu0 }
 0x6ef   : > { %v6749_v15 = vpop.f32.mrf.mxu1  ;;  %v6462_v7 = vadd.f32 %v6461_v36, %v6293_v60  ;;  %v12284_v34 = vadd.f32 %v6623_v3, %v6455_v9  ;;  %v5422_v9 = vshll.u32 %v12282_v32, 16  ;;  %v5130_v56 = vrot.slane %v5128_v37, 1 }
 0x6f0   : > { %v12287_v17 = vadd.f32 %v6749_v15, %v12014_v39  ;;  %v14694_v39 = vld [vmem:[#allocation77_spill] sm:$0xff] }
 0x6f1   : > { %6334 = vmatmul.bf16.gmra.mxu2 %v12290_v13  ;;  %6662 = vmatmul.bf16.gmra.mxu0 %v11546_v18  ;;  %v6127_v23 = vadd.f32 %v12196_v52, %v14694_v39  ;;  %v5424_v48 = vrot.slane %v5422_v9, 1  ;;  %v4818_v39 = vsel %vm11020_vm6, %v11608_v5, 0 }
 0x6f2   : > { %v5133_v9 = vshll.u32 %v4818_v39, 16 }
 0x6f3   : > { %6503 = vmatmul.bf16.gmra.mxu3 %v12294_v40  ;;  %v12313_v19 = vsel %vm1359_vm3, %v5420_v55, %v5424_v48 }
 0x6f4   : > { %v6295_v42 = vpop.f32.mrf.mxu2  ;;  %14696 = vst [vmem:[#allocation77_spill] sm:$0xff] %v12313_v19  ;;  %v5135_v18 = vrot.slane %v5133_v9, 1  ;;  %v14702_v9 = vld [vmem:[#allocation111_spill] sm:$0xff] }
 0x6f5   : > { %v6296_v45 = vadd.f32 %v6295_v42, %v6127_v23  ;;  %v5126_v23 = vshrl.u32 %v11622_v44, 16  ;;  %v14697_v42 = vld [vmem:[#allocation101_spill] sm:$0xff] }
 0x6f6   : > { %v6464_v54 = vpop.f32.mrf.mxu3  ;;  %v6625_v60 = vpop.f32.mrf.mxu0 }
 0x6f7   : > { %v6752_v36 = vpop.f32.mrf.mxu1  ;;  %v6465_v3 = vadd.f32 %v6464_v54, %v6296_v45  ;;  %v12304_v15 = vadd.f32 %v6625_v60, %v12244_v58  ;;  %v6129_v58 = vadd.f32 %v12196_v52, %v14697_v42  ;;  %v5131_v54 = vor.u32 %v5130_v56, %v5126_v23  ;;  %v14701_v23 = vld [vmem:[#allocation96_spill] sm:$0xff] }
 0x6f8   : > { %v12307_v20 = vadd.f32 %v6752_v36, %v12030_v47  ;;  %v5365_v36 = vrot.slane %v11622_v44, 1 }
 0x6f9   : > { %6791 = vmatmul.bf16.gmra.mxu1 %v12313_v19  ;;  %v5366_v19 = vrot.slane %v4818_v39, 1 }
 0x6fa   : > { %14695 = vst [vmem:[#allocation67_spill] sm:$0xff] %v12307_v20  ;;  %v12327_v20 = vsel %vm1359_vm3, %v5131_v54, %v5135_v18 }
 0x6fb   : > { %14699 = vst [vmem:[#allocation142_spill] sm:$0xff] %v12327_v20  ;;  %v12331_v56 = vsel %vm1763_vm4, %v5365_v36, %v5366_v19 }
 0x6fc   : > { %v6297_v45 = vpop.f32.mrf.mxu2  ;;  %14700 = vst [vmem:[#allocation143_spill] sm:$0xff] %v12331_v56 }
 0x6fd   : > { %v6298_v47 = vadd.f32 %v6297_v45, %v6129_v58 }
 0x6fe   : > { %v6466_v60 = vpop.f32.mrf.mxu3  ;;  %v6628_v40 = vpop.f32.mrf.mxu0 }
 0x6ff   : > { %v6754_v5 = vpop.f32.mrf.mxu1  ;;  %v6467_v55 = vadd.f32 %v6466_v60, %v6298_v47  ;;  %v12321_v37 = vadd.f32 %v6628_v40, %v12263_v11  ;;  %v6132_v11 = vadd.f32 %v12196_v52, %v14701_v23  ;;  %v14704_v47 = vld [vmem:[#allocation100_spill] sm:$0xff] }
 0x700   : > { %v12324_v48 = vadd.f32 %v6754_v5, %v12050_v16  ;;  %v5140_v16 = vshll.u32 %v14702_v9, 16  ;;  %v4819_v60 = vsel %vm11020_vm6, %v14704_v47, 0  ;;  %v5138_v5 = vshrl.u32 %v14702_v9, 16 }
 0x701   : > { %6339 = vmatmul.bf16.gmra.mxu2 %v12327_v20  ;;  %6667 = vmatmul.bf16.gmra.mxu0 %v11584_v27  ;;  %v5145_v23 = vshll.u32 %v4819_v60, 16 }
 0x702   : > { %14698 = vst [vmem:[#allocation101_spill] sm:$0xff] %v12324_v48  ;;  %v5142_v36 = vrot.slane %v5140_v16, 1  ;;  %v5369_v16 = vrot.slane %v4819_v60, 1 }
 0x703   : > { %6508 = vmatmul.bf16.gmra.mxu3 %v12331_v56  ;;  %v5147_v27 = vrot.slane %v5145_v23, 1 }
 0x704   : > { %v6300_v40 = vpop.f32.mrf.mxu2 }
 0x705   : > { %v6301_v42 = vadd.f32 %v6300_v40, %v6132_v11  ;;  %v14705_v11 = vld [vmem:[#allocation97_spill] sm:$0xff] }
 0x706   : > { %v6469_v39 = vpop.f32.mrf.mxu3  ;;  %v6630_v58 = vpop.f32.mrf.mxu0  ;;  %v6134_v40 = vadd.f32 %v12196_v52, %v14705_v11 }
 0x707   : > { %v6757_v18 = vpop.f32.mrf.mxu1  ;;  %v6470_v45 = vadd.f32 %v6469_v39, %v6301_v42  ;;  %v12338_v54 = vadd.f32 %v6630_v58, %v6462_v7  ;;  %v5143_v42 = vor.u32 %v5142_v36, %v5138_v5  ;;  %v14709_v36 = vld [vmem:[#allocation115_spill] sm:$0xff] }
 0x708   : > { %v12341_v19 = vadd.f32 %v6757_v18, %v12062_v41  ;;  %v5368_v41 = vrot.slane %v14702_v9, 1 }
 0x709   : > { %6796 = vmatmul.bf16.gmra.mxu1 %v12033_v6  ;;  %v12357_v48 = vsel %vm1359_vm3, %v5143_v42, %v5147_v27 }
 0x70a   : > { %14703 = vst [vmem:[#allocation96_spill] sm:$0xff] %v12341_v19 }
 0x70b   : > { %14707 = vst [vmem:[#allocation97_spill] sm:$0xff] %v12357_v48 }
 0x70c   : > { %v6302_v56 = vpop.f32.mrf.mxu2 }
 0x70d   : > { %v6303_v7 = vadd.f32 %v6302_v56, %v6134_v40  ;;  %v12361_v56 = vsel %vm1763_vm4, %v5368_v41, %v5369_v16 }
 0x70e   : > { %v6471_v39 = vpop.f32.mrf.mxu3  ;;  %v6633_v58 = vpop.f32.mrf.mxu0  ;;  %14708 = vst [vmem:[#allocation144_spill] sm:$0xff] %v12361_v56 }
 0x70f   : > { %v6759_v18 = vpop.f32.mrf.mxu1  ;;  %v6472_v19 = vadd.f32 %v6471_v39, %v6303_v7  ;;  %v12351_v47 = vadd.f32 %v6633_v58, %v6465_v3  ;;  %v6137_v3 = vadd.f32 %v12196_v52, %v14709_v36  ;;  %v14711_v39 = vld [vmem:[#allocation131_spill] sm:$0xff]  ;;  %v14712_v36 = vld [vmem:[#allocation102_spill] sm:$0xff] }
 0x710   : > { %v12354_v6 = vadd.f32 %v6759_v18, %v12076_v50  ;;  %v5152_v50 = vshll.u32 %v11701_v63, 16  ;;  %v4820_v41 = vsel %vm11020_vm6, %v14711_v39, 0  ;;  %v5150_v18 = vshrl.u32 %v11701_v63, 16 }
 0x711   : > { %6344 = vmatmul.bf16.gmra.mxu2 %v12357_v48  ;;  %6672 = vmatmul.bf16.gmra.mxu0 %v11622_v44  ;;  %v5157_v16 = vshll.u32 %v4820_v41, 16 }
 0x712   : > { %14706 = vst [vmem:[#allocation100_spill] sm:$0xff] %v12354_v6  ;;  %v5154_v58 = vrot.slane %v5152_v50, 1  ;;  %v8815_v6 = vld [vmem:[#allocation9 + $0x190] sm:$0xff] }
 0x713   : > { %6513 = vmatmul.bf16.gmra.mxu3 %v12361_v56  ;;  %v5159_v56 = vrot.slane %v5157_v16, 1 }
 0x714   : > { %v6305_v5 = vpop.f32.mrf.mxu2  ;;  %7051 = vmatpush.bf16.msra.mxu3 %v8815_v6  ;;  %v8831_v6 = vld [vmem:[#allocation9 + $0x210] sm:$0xff] }
 0x715   : > { %v6306_v23 = vadd.f32 %v6305_v5, %v6137_v3  ;;  %v6139_v3 = vadd.f32 %v12196_v52, %v14712_v36  ;;  %7389 = vmatpush.bf16.msra.mxu1 %v8831_v6  ;;  %v14723_v6 = vld [vmem:[#allocation119_spill] sm:$0xff] }
 0x716   : > { %v6474_v60 = vpop.f32.mrf.mxu3  ;;  %v6635_v11 = vpop.f32.mrf.mxu0 }
 0x717   : > { %v6762_v27 = vpop.f32.mrf.mxu1  ;;  %v6475_v40 = vadd.f32 %v6474_v60, %v6306_v23  ;;  %v12368_v42 = vadd.f32 %v6635_v11, %v6467_v55  ;;  %v5155_v23 = vor.u32 %v5154_v58, %v5150_v18  ;;  %v14717_v18 = vld [vmem:[#allocation35_spill] sm:$0xff] }
 0x718   : > { %v12371_v7 = vadd.f32 %v6762_v27, %v12089_v10  ;;  %v5371_v10 = vrot.slane %v11701_v63, 1  ;;  %v5164_v16 = vshll.u32 %v14717_v18, 16 }
 0x719   : > { %6801 = vmatmul.bf16.gmra.mxu1 %v12065_v12  ;;  %v5372_v12 = vrot.slane %v4820_v41, 1  ;;  %v12387_v36 = vsel %vm1359_vm3, %v5155_v23, %v5159_v56 }
 0x71a   : > { %14710 = vst [vmem:[#allocation115_spill] sm:$0xff] %v12371_v7  ;;  %v8807_v7 = vld [vmem:[#allocation9 + $0x150] sm:$0xff] }
 0x71b   : > { %14714 = vst [vmem:[#allocation102_spill] sm:$0xff] %v12387_v36  ;;  %v12391_v58 = vsel %vm1763_vm4, %v5371_v10, %v5372_v12  ;;  %6882 = vmatpush.bf16.msra.mxu2 %v8807_v7  ;;  %v14719_v10 = vld [vmem:[#allocation118_spill] sm:$0xff] }
 0x71c   : > { %v6307_v5 = vpop.f32.mrf.mxu2  ;;  %14715 = vst [vmem:[#allocation145_spill] sm:$0xff] %v12391_v58  ;;  %v4821_v7 = vsel %vm11020_vm6, %v14719_v10, 0 }
 0x71d   : > { %v6308_v55 = vadd.f32 %v6307_v5, %v6139_v3 }
 0x71e   : > { %v6476_v60 = vpop.f32.mrf.mxu3  ;;  %v6638_v11 = vpop.f32.mrf.mxu0 }
 0x71f   : > { %v6764_v27 = vpop.f32.mrf.mxu1  ;;  %v6477_v44 = vadd.f32 %v6476_v60, %v6308_v55  ;;  %v12381_v39 = vadd.f32 %v6638_v11, %v6470_v45  ;;  %v14716_v45 = vld [vmem:[#allocation113_spill] sm:$0xff]  ;;  %v8823_v11 = vld [vmem:[#allocation9 + $0x1d0] sm:$0xff] }
 0x720   : > { %v12384_v50 = vadd.f32 %v6764_v27, %v12106_v43  ;;  %v6142_v43 = vadd.f32 %v12196_v52, %v14716_v45  ;;  %v5166_v27 = vrot.slane %v5164_v16, 1  ;;  %7220 = vmatpush.bf16.msra.mxu0 %v8823_v11  ;;  %v5162_v45 = vshrl.u32 %v14717_v18, 16 }
 0x721   : > { %6349 = vmatmul.bf16.gmra.mxu2 %v12387_v36  ;;  %6677 = vmatmul.bf16.gmra.mxu0 %v14702_v9 }
 0x722   : > { %14713 = vst [vmem:[#allocation131_spill] sm:$0xff] %v12384_v50 }
 0x723   : > { %6518 = vmatmul.bf16.gmra.mxu3 %v12391_v58 }
 0x724   : > { %v6310_v41 = vpop.f32.mrf.mxu2 }
 0x725   : > { %v6311_v3 = vadd.f32 %v6310_v41, %v6142_v43  ;;  %v5169_v43 = vshll.u32 %v4821_v7, 16  ;;  %v14720_v41 = vld [vmem:[#allocation117_spill] sm:$0xff] }
 0x726   : > { %v6479_v56 = vpop.f32.mrf.mxu3  ;;  %v6640_v5 = vpop.f32.mrf.mxu0 }
 0x727   : > { %v6767_v23 = vpop.f32.mrf.mxu1  ;;  %v6480_v55 = vadd.f32 %v6479_v56, %v6311_v3  ;;  %v12398_v60 = vadd.f32 %v6640_v5, %v6472_v19  ;;  %v6144_v19 = vadd.f32 %v12196_v52, %v14720_v41  ;;  %v5171_v16 = vrot.slane %v5169_v43, 1 }
 0x728   : > { %v12401_v12 = vadd.f32 %v6767_v23, %v12119_v26  ;;  %v5167_v26 = vor.u32 %v5166_v27, %v5162_v45  ;;  %v5374_v23 = vrot.slane %v14717_v18, 1 }
 0x729   : > { %6806 = vmatmul.bf16.gmra.mxu1 %v12095_v2 }
 0x72a   : > { %14718 = vst [vmem:[#allocation113_spill] sm:$0xff] %v12401_v12  ;;  %v5375_v12 = vrot.slane %v4821_v7, 1  ;;  %v12417_v50 = vsel %vm1359_vm3, %v5167_v26, %v5171_v16  ;;  %v4822_v26 = vsel %vm11020_vm6, %v11776_v29, 0 }
 0x72b   : > { %14721 = vst [vmem:[#allocation118_spill] sm:$0xff] %v12417_v50  ;;  %v5181_v16 = vshll.u32 %v4822_v26, 16 }
 0x72c   : > { %v6312_v3 = vpop.f32.mrf.mxu2  ;;  %v12421_v27 = vsel %vm1763_vm4, %v5374_v23, %v5375_v12  ;;  %v8814_v23 = vld [vmem:[#allocation9 + $0x188] sm:$0xff] }
 0x72d   : > { %v6313_v56 = vadd.f32 %v6312_v3, %v6144_v19  ;;  %14722 = vst [vmem:[#allocation117_spill] sm:$0xff] %v12421_v27  ;;  %7052 = vmatpush.bf16.msra.mxu3 %v8814_v23 }
 0x72e   : > { %v6481_v5 = vpop.f32.mrf.mxu3  ;;  %v6643_v10 = vpop.f32.mrf.mxu0 }
 0x72f   : > { %v6769_v58 = vpop.f32.mrf.mxu1  ;;  %v6482_v9 = vadd.f32 %v6481_v5, %v6313_v56  ;;  %v12411_v2 = vadd.f32 %v6643_v10, %v6475_v40  ;;  %v6147_v40 = vadd.f32 %v12196_v52, %v14723_v6  ;;  %v8806_v5 = vld [vmem:[#allocation9 + $0x148] sm:$0xff]  ;;  %v5174_v10 = vshrl.u32 %v11790_v46, 16 }
 0x730   : > { %v12414_v11 = vadd.f32 %v6769_v58, %v12136_v51  ;;  %v5176_v51 = vshll.u32 %v11790_v46, 16  ;;  %v6149_v6 = vadd.f32 %v12196_v52, %v11752_v24  ;;  %6883 = vmatpush.bf16.msra.mxu2 %v8806_v5  ;;  %v5378_v24 = vrot.slane %v4822_v26, 1 }
 0x731   : > { %6354 = vmatmul.bf16.gmra.mxu2 %v12417_v50  ;;  %6682 = vmatmul.bf16.gmra.mxu0 %v11701_v63 }
 0x732   : > { %v5178_v56 = vrot.slane %v5176_v51, 1 }
 0x733   : > { %6523 = vmatmul.bf16.gmra.mxu3 %v12421_v27 }
 0x734   : > { %v6315_v45 = vpop.f32.mrf.mxu2 }
 0x735   : > { %v6316_v58 = vadd.f32 %v6315_v45, %v6147_v40 }
 0x736   : > { %v6484_v7 = vpop.f32.mrf.mxu3  ;;  %v6645_v43 = vpop.f32.mrf.mxu0 }
 0x737   : > { %v6772_v41 = vpop.f32.mrf.mxu1  ;;  %v6485_v19 = vadd.f32 %v6484_v7, %v6316_v58  ;;  %v12428_v3 = vadd.f32 %v6645_v43, %v6477_v44  ;;  %v5377_v58 = vrot.slane %v11790_v46, 1  ;;  %v5183_v7 = vrot.slane %v5181_v16, 1  ;;  %v8805_v43 = vld [vmem:[#allocation9 + $0x140] sm:$0xff] }
 0x738   : > { %v12431_v12 = vadd.f32 %v6772_v41, %v12149_v38  ;;  %v5179_v38 = vor.u32 %v5178_v56, %v5174_v10  ;;  %v8813_v41 = vld [vmem:[#allocation9 + $0x180] sm:$0xff]  ;;  %6884 = vmatpush.bf16.msra.mxu2 %v8805_v43  ;;  %v14727_v10 = vld [vmem:[#allocation124_spill] sm:$0xff] }
 0x739   : > { %6811 = vmatmul.bf16.gmra.mxu1 %v12125_v30  ;;  %7053 = vmatpush.bf16.msra.mxu3 %v8813_v41  ;;  %v12451_v56 = vsel %vm1763_vm4, %v5377_v58, %v5378_v24  ;;  %v5188_v26 = vshll.u32 %v14727_v10, 16  ;;  %v5186_v43 = vshrl.u32 %v14727_v10, 16  ;;  %v14729_v24 = vld [vmem:[#allocation121_spill] sm:$0xff] }
 0x73a   : > { %v12447_v5 = vsel %vm1359_vm3, %v5179_v38, %v5183_v7  ;;  %14725 = vst [vmem:[#allocation146_spill] sm:$0xff] %v12451_v56 }
 0x73b   : > { %14724 = vst [vmem:[#allocation119_spill] sm:$0xff] %v12447_v5  ;;  %v5190_v7 = vrot.slane %v5188_v26, 1 }
 0x73c   : > { %v6317_v44 = vpop.f32.mrf.mxu2 }
 0x73d   : > { %v6318_v40 = vadd.f32 %v6317_v44, %v6149_v6 }
 0x73e   : > { %v6486_v45 = vpop.f32.mrf.mxu3  ;;  %v6648_v29 = vpop.f32.mrf.mxu0 }
 0x73f   : > { %v6774_v51 = vpop.f32.mrf.mxu1  ;;  %v6487_v27 = vadd.f32 %v6486_v45, %v6318_v40  ;;  %v12441_v63 = vadd.f32 %v6648_v29, %v6480_v55  ;;  %v14726_v55 = vld [vmem:[#allocation122_spill] sm:$0xff]  ;;  %v14728_v29 = vld [vmem:[#allocation125_spill] sm:$0xff] }
 0x740   : > { %v12444_v30 = vadd.f32 %v6774_v51, %v12166_v62  ;;  %v6152_v23 = vadd.f32 %v12196_v52, %v14726_v55  ;;  %v4823_v51 = vsel %vm11020_vm6, %v14728_v29, 0  ;;  %v6154_v55 = vadd.f32 %v12196_v52, %v14729_v24 }
 0x741   : > { %6359 = vmatmul.bf16.gmra.mxu2 %v12447_v5  ;;  %6687 = vmatmul.bf16.gmra.mxu0 %v14717_v18  ;;  %v5193_v41 = vshll.u32 %v4823_v51, 16  ;;  %v5381_v18 = vrot.slane %v4823_v51, 1 }
 0x743   : > { %6528 = vmatmul.bf16.gmra.mxu3 %v12451_v56 }
 0x744   : > { %v6320_v62 = vpop.f32.mrf.mxu2 }
 0x745   : > { %v6321_v16 = vadd.f32 %v6320_v62, %v6152_v23  ;;  %v5191_v62 = vor.u32 %v5190_v7, %v5186_v43  ;;  %v14732_v43 = vld [vmem:[#allocation46_spill] sm:$0xff] }
 0x746   : > { %v6489_v6 = vpop.f32.mrf.mxu3  ;;  %v6650_v44 = vpop.f32.mrf.mxu0 }
 0x747   : > { %v6777_v38 = vpop.f32.mrf.mxu1  ;;  %v6490_v40 = vadd.f32 %v6489_v6, %v6321_v16  ;;  %v12458_v45 = vadd.f32 %v6650_v44, %v6482_v9 }
 0x748   : > { %v12461_v58 = vadd.f32 %v6777_v38, %v12179_v8  ;;  %v5380_v8 = vrot.slane %v14727_v10, 1  ;;  %v5195_v38 = vrot.slane %v5193_v41, 1 }
 0x749   : > { %6816 = vmatmul.bf16.gmra.mxu1 %v12155_v49 }
 0x74a   : > { %v12477_v49 = vsel %vm1359_vm3, %v5191_v62, %v5195_v38  ;;  %v12481_v7 = vsel %vm1763_vm4, %v5380_v8, %v5381_v18  ;;  %v8822_v18 = vld [vmem:[#allocation9 + $0x1c8] sm:$0xff] }
 0x74b   : > { %14730 = vst [vmem:[#allocation122_spill] sm:$0xff] %v12477_v49  ;;  %7221 = vmatpush.bf16.msra.mxu0 %v8822_v18 }
 0x74c   : > { %v6322_v23 = vpop.f32.mrf.mxu2  ;;  %14731 = vst [vmem:[#allocation125_spill] sm:$0xff] %v12481_v7 }
 0x74d   : > { %v6323_v9 = vadd.f32 %v6322_v23, %v6154_v55 }
 0x74e   : > { %v6491_v16 = vpop.f32.mrf.mxu3  ;;  %v6653_v6 = vpop.f32.mrf.mxu0 }
 0x74f   : > { %v6779_v44 = vpop.f32.mrf.mxu1  ;;  %v6492_v56 = vadd.f32 %v6491_v16, %v6323_v9  ;;  %v12471_v29 = vadd.f32 %v6653_v6, %v6485_v19  ;;  %v6157_v19 = vadd.f32 %v12196_v52, %v14732_v43  ;;  %v14733_v16 = vld [vmem:[#allocation51_spill] sm:$0xff] }
 0x750   : > { %v12474_v26 = vadd.f32 %v6779_v44, %v12201_v21  ;;  %v6159_v8 = vadd.f32 %v12196_v52, %v14733_v16  ;;  %v14738_v16 = vld [vmem:[#allocation126_spill] sm:$0xff] }
 0x751   : > { %6364 = vmatmul.bf16.gmra.mxu2 %v12477_v49  ;;  %6692 = vmatmul.bf16.gmra.mxu0 %v11790_v46  ;;  %v14746_v46 = vld [vmem:[#allocation61_spill] sm:$0xff] }
 0x753   : > { %6533 = vmatmul.bf16.gmra.mxu3 %v12481_v7 }
 0x754   : > { %v6325_v41 = vpop.f32.mrf.mxu2 }
 0x755   : > { %v6326_v24 = vadd.f32 %v6325_v41, %v6157_v19  ;;  %v8821_v41 = vld [vmem:[#allocation9 + $0x1c0] sm:$0xff] }
 0x756   : > { %v6494_v21 = vpop.f32.mrf.mxu3  ;;  %v6655_v55 = vpop.f32.mrf.mxu0  ;;  %7222 = vmatpush.bf16.msra.mxu0 %v8821_v41 }
 0x757   : > { %v6782_v51 = vpop.f32.mrf.mxu1  ;;  %v6495_v23 = vadd.f32 %v6494_v21, %v6326_v24  ;;  %v12487_v62 = vadd.f32 %v6655_v55, %v6487_v27  ;;  %v14736_v21 = vld [vmem:[#allocation133_spill] sm:$0xff]  ;;  %v14737_v55 = vld [vmem:[#allocation127_spill] sm:$0xff] }
 0x758   : > { %v12490_v9 = vadd.f32 %v6782_v51, %v12214_v53  ;;  %v14735_v53 = vld [vmem:[#allocation43_spill] sm:$0xff]  ;;  %v6162_v51 = vadd.f32 %v12196_v52, %v14737_v55  ;;  %v14740_v55 = vld [vmem:[#allocation56_spill] sm:$0xff] }
 0x759   : > { %6821 = vmatmul.bf16.gmra.mxu1 %v12185_v33 }
 0x75c   : > { %v6327_v6 = vpop.f32.mrf.mxu2 }
 0x75d   : > { %v6328_v44 = vadd.f32 %v6327_v6, %v6159_v8  ;;  %v4684_v8 = vshrl.u32 %v14738_v16, 16 }
 0x75e   : > { %v6496_v38 = vpop.f32.mrf.mxu3  ;;  %v6658_v43 = vpop.f32.mrf.mxu0 }
 0x75f   : > { %v6784_v19 = vpop.f32.mrf.mxu1  ;;  %v6497_v7 = vadd.f32 %v6496_v38, %v6328_v44  ;;  %v12495_v24 = vadd.f32 %v6658_v43, %v6490_v40  ;;  %v12511_v41 = vrot.slane %v4684_v8, 7 }
 0x760   : > { %v12498_v27 = vadd.f32 %v6784_v19, %v12231_v57 }
 0x761   : > { %6697 = vmatmul.bf16.gmra.mxu0 %v14727_v10  ;;  %6885 = vmatmul.bf16.vlgmr.msra.gmra.mxu2 %v14735_v53  ;;  %v8830_v53 = vld [vmem:[#allocation9 + $0x208] sm:$0xff]  ;;  %v6164_v10 = vadd.f32 %v12196_v52, %v14740_v55  ;;  %v14743_v55 = vld [vmem:[#allocation66_spill] sm:$0xff] }
 0x762   : > { %14734 = vst [vmem:[#allocation121_spill] sm:$0xff] %v12498_v27  ;;  %7390 = vmatpush.bf16.msra.mxu1 %v8830_v53  ;;  %v14742_v53 = vld [vmem:[#allocation62_spill] sm:$0xff] }
 0x763   : > { %7054 = vmatmul.bf16.vlgmr.msra.gmra.mxu3 %v14736_v21  ;;  %v4687_v21 = vshll.u32 %v14738_v16, 16 }
 0x764   : > { %v6330_v18 = vpop.f32.mrf.mxu2 }
 0x765   : > { %v6331_v6 = vadd.f32 %v6330_v18, %v6162_v51  ;;  %v4689_v18 = vor.u32 %v4687_v21, %v12511_v41 }
 0x766   : > { %v6499_v44 = vpop.f32.mrf.mxu3  ;;  %v6660_v40 = vpop.f32.mrf.mxu0 }
 0x767   : > { %v6787_v38 = vpop.f32.mrf.mxu1  ;;  %v6500_v43 = vadd.f32 %v6499_v44, %v6331_v6  ;;  %v12506_v57 = vadd.f32 %v6660_v40, %v6492_v56  ;;  %v12525_v16 = vsel %vm11020_vm6, 0, %v4689_v18 }
 0x768   : > { %v12509_v19 = vadd.f32 %v6787_v38, %v12246_v31 }
 0x769   : > { %6826 = vmatmul.bf16.gmra.mxu1 %v12220_v25  ;;  %v6169_v25 = vadd.f32 %v12196_v52, %v14746_v46 }
 0x76a   : > { %14739 = vst [vmem:[#allocation46_spill] sm:$0xff] %v12509_v19 }
 0x76c   : > { %v6332_v51 = vpop.f32.mrf.mxu2 }
 0x76d   : > { %v6333_v6 = vadd.f32 %v6332_v51, %v6164_v10  ;;  %v14744_v10 = vld [vmem:[#allocation54_spill] sm:$0xff] }
 0x76e   : > { %v6501_v56 = vpop.f32.mrf.mxu3  ;;  %v6663_v44 = vpop.f32.mrf.mxu0  ;;  %v6167_v21 = vadd.f32 %v12196_v52, %v14744_v10 }
 0x76f   : > { %v6789_v40 = vpop.f32.mrf.mxu1  ;;  %v6502_v31 = vadd.f32 %v6501_v56, %v6333_v6  ;;  %v12518_v38 = vadd.f32 %v6663_v44, %v6495_v23 }
 0x770   : > { %v12521_v8 = vadd.f32 %v6789_v40, %v12265_v35 }
 0x771   : > { %6702 = vmatmul.bf16.gmra.mxu0 %v12525_v16  ;;  %6890 = vmatmul.bf16.gmra.mxu2 %v14742_v53 }
 0x772   : > { %14741 = vst [vmem:[#allocation51_spill] sm:$0xff] %v12521_v8 }
 0x773   : > { %7059 = vmatmul.bf16.gmra.mxu3 %v14743_v55 }
 0x774   : > { %v6335_v51 = vpop.f32.mrf.mxu2 }
 0x775   : > { %v6336_v6 = vadd.f32 %v6335_v51, %v6167_v21 }
 0x776   : > { %v6504_v23 = vpop.f32.mrf.mxu3  ;;  %v6665_v56 = vpop.f32.mrf.mxu0 }
 0x777   : > { %v6792_v44 = vpop.f32.mrf.mxu1  ;;  %v6505_v35 = vadd.f32 %v6504_v23, %v6336_v6  ;;  %v12532_v40 = vadd.f32 %v6665_v56, %v6497_v7  ;;  %v14748_v7 = vld [vmem:[#allocation92_spill] sm:$0xff]  ;;  %v14750_v23 = vld [vmem:[#allocation135_spill] sm:$0xff] }
 0x778   : > { %v12535_v18 = vadd.f32 %v6792_v44, %v12284_v34  ;;  %v14749_v34 = vld [vmem:[#allocation55_spill] sm:$0xff] }
 0x779   : > { %6831 = vmatmul.bf16.gmra.mxu1 %v12252_v61  ;;  %v14751_v56 = vld [vmem:[#allocation139_spill] sm:$0xff] }
 0x77a   : > { %14745 = vst [vmem:[#allocation43_spill] sm:$0xff] %v12535_v18  ;;  %v6172_v46 = vadd.f32 %v12196_v52, %v14751_v56 }
 0x77c   : > { %v6337_v55 = vpop.f32.mrf.mxu2 }
 0x77d   : > { %v6338_v8 = vadd.f32 %v6337_v55, %v6169_v25 }
 0x77e   : > { %v6506_v19 = vpop.f32.mrf.mxu3  ;;  %v6668_v10 = vpop.f32.mrf.mxu0 }
 0x77f   : > { %v6794_v33 = vpop.f32.mrf.mxu1  ;;  %v6507_v21 = vadd.f32 %v6506_v19, %v6338_v8  ;;  %v12540_v51 = vadd.f32 %v6668_v10, %v6500_v43 }
 0x780   : > { %v12543_v6 = vadd.f32 %v6794_v33, %v12304_v15  ;;  %v14753_v15 = vld [vmem:[#allocation73_spill] sm:$0xff] }
 0x781   : > { %6895 = vmatmul.bf16.gmra.mxu2 %v14748_v7  ;;  %7223 = vmatmul.bf16.vlgmr.msra.gmra.mxu0 %v14749_v34  ;;  %v6174_v8 = vadd.f32 %v12196_v52, %v14753_v15 }
 0x782   : > { %14747 = vst [vmem:[#allocation133_spill] sm:$0xff] %v12543_v6 }
 0x783   : > { %7064 = vmatmul.bf16.gmra.mxu3 %v14750_v23 }
 0x784   : > { %v6340_v44 = vpop.f32.mrf.mxu2 }
 0x785   : > { %v6341_v25 = vadd.f32 %v6340_v44, %v6172_v46 }
 0x786   : > { %v6509_v55 = vpop.f32.mrf.mxu3  ;;  %v6670_v61 = vpop.f32.mrf.mxu0 }
 0x787   : > { %v6797_v18 = vpop.f32.mrf.mxu1  ;;  %v6510_v19 = vadd.f32 %v6509_v55, %v6341_v25  ;;  %v12550_v43 = vadd.f32 %v6670_v61, %v6502_v31  ;;  %v14755_v61 = vld [vmem:[#allocation87_spill] sm:$0xff]  ;;  %v14757_v31 = vld [vmem:[#allocation137_spill] sm:$0xff] }
 0x788   : > { %v12553_v33 = vadd.f32 %v6797_v18, %v12321_v37  ;;  %v14756_v37 = vld [vmem:[#allocation75_spill] sm:$0xff]  ;;  %v14758_v18 = vld [vmem:[#allocation93_spill] sm:$0xff] }
 0x789   : > { %6836 = vmatmul.bf16.gmra.mxu1 %v12290_v13  ;;  %v6177_v55 = vadd.f32 %v12196_v52, %v14758_v18 }
 0x78a   : > { %14752 = vst [vmem:[#allocation127_spill] sm:$0xff] %v12553_v33 }
 0x78c   : > { %v6342_v10 = vpop.f32.mrf.mxu2 }
 0x78d   : > { %v6343_v34 = vadd.f32 %v6342_v10, %v6174_v8 }
 0x78e   : > { %v6511_v23 = vpop.f32.mrf.mxu3  ;;  %v6673_v56 = vpop.f32.mrf.mxu0 }
 0x78f   : > { %v6799_v6 = vpop.f32.mrf.mxu1  ;;  %v6512_v46 = vadd.f32 %v6511_v23, %v6343_v34  ;;  %v12558_v44 = vadd.f32 %v6673_v56, %v6505_v35 }
 0x790   : > { %v12561_v25 = vadd.f32 %v6799_v6, %v12338_v54  ;;  %v14760_v6 = vld [vmem:[#allocation79_spill] sm:$0xff] }
 0x791   : > { %6900 = vmatmul.bf16.gmra.mxu2 %v14755_v61  ;;  %7228 = vmatmul.bf16.gmra.mxu0 %v14756_v37  ;;  %v6179_v23 = vadd.f32 %v12196_v52, %v14760_v6 }
 0x792   : > { %14754 = vst [vmem:[#allocation126_spill] sm:$0xff] %v12561_v25 }
 0x793   : > { %7069 = vmatmul.bf16.gmra.mxu3 %v14757_v31 }
 0x794   : > { %v6345_v15 = vpop.f32.mrf.mxu2 }
 0x795   : > { %v6346_v8 = vadd.f32 %v6345_v15, %v6177_v55 }
 0x796   : > { %v6514_v10 = vpop.f32.mrf.mxu3  ;;  %v6675_v13 = vpop.f32.mrf.mxu0 }
 0x797   : > { %v6802_v33 = vpop.f32.mrf.mxu1  ;;  %v6515_v34 = vadd.f32 %v6514_v10, %v6346_v8  ;;  %v12568_v35 = vadd.f32 %v6675_v13, %v6507_v21  ;;  %v14762_v13 = vld [vmem:[#allocation105_spill] sm:$0xff] }
 0x798   : > { %v12571_v54 = vadd.f32 %v6802_v33, %v12351_v47  ;;  %v14763_v47 = vld [vmem:[#allocation80_spill] sm:$0xff]  ;;  %v14764_v21 = vld [vmem:[#allocation65_spill] sm:$0xff] }
 0x799   : > { %6841 = vmatmul.bf16.gmra.mxu1 %v12327_v20  ;;  %v14765_v33 = vld [vmem:[#allocation89_spill] sm:$0xff] }
 0x79a   : > { %14759 = vst [vmem:[#allocation56_spill] sm:$0xff] %v12571_v54  ;;  %v6182_v10 = vadd.f32 %v12196_v52, %v14765_v33 }
 0x79c   : > { %v6347_v56 = vpop.f32.mrf.mxu2 }
 0x79d   : > { %v6348_v37 = vadd.f32 %v6347_v56, %v6179_v23 }
 0x79e   : > { %v6516_v31 = vpop.f32.mrf.mxu3  ;;  %v6678_v18 = vpop.f32.mrf.mxu0 }
 0x79f   : > { %v6804_v25 = vpop.f32.mrf.mxu1  ;;  %v6517_v55 = vadd.f32 %v6516_v31, %v6348_v37  ;;  %v12576_v15 = vadd.f32 %v6678_v18, %v6510_v19  ;;  %v14767_v31 = vld [vmem:[#allocation85_spill] sm:$0xff] }
 0x7a0   : > { %v12579_v8 = vadd.f32 %v6804_v25, %v12368_v42  ;;  %v8829_v25 = vld [vmem:[#allocation9 + $0x200] sm:$0xff]  ;;  %v6184_v18 = vadd.f32 %v12196_v52, %v14767_v31 }
 0x7a1   : > { %6905 = vmatmul.bf16.gmra.mxu2 %v14762_v13  ;;  %7233 = vmatmul.bf16.gmra.mxu0 %v14763_v47 }
 0x7a2   : > { %14761 = vst [vmem:[#allocation62_spill] sm:$0xff] %v12579_v8  ;;  %7391 = vmatpush.bf16.msra.mxu1 %v8829_v25 }
 0x7a3   : > { %7074 = vmatmul.bf16.gmra.mxu3 %v14764_v21 }
 0x7a4   : > { %v6350_v6 = vpop.f32.mrf.mxu2 }
 0x7a5   : > { %v6351_v23 = vadd.f32 %v6350_v6, %v6182_v10 }
 0x7a6   : > { %v6519_v56 = vpop.f32.mrf.mxu3  ;;  %v6680_v20 = vpop.f32.mrf.mxu0 }
 0x7a7   : > { %v6807_v54 = vpop.f32.mrf.mxu1  ;;  %v6520_v37 = vadd.f32 %v6519_v56, %v6351_v23  ;;  %v12586_v19 = vadd.f32 %v6680_v20, %v6512_v46  ;;  %v14770_v46 = vld [vmem:[#allocation104_spill] sm:$0xff]  ;;  %v14772_v23 = vld [vmem:[#allocation22_spill] sm:$0xff] }
 0x7a8   : > { %v12589_v42 = vadd.f32 %v6807_v54, %v12381_v39  ;;  %v14769_v39 = vld [vmem:[#allocation108_spill] sm:$0xff]  ;;  %v6187_v56 = vadd.f32 %v12196_v52, %v14772_v23 }
 0x7a9   : > { %6846 = vmatmul.bf16.gmra.mxu1 %v12357_v48  ;;  %v14771_v54 = vld [vmem:[#allocation136_spill] sm:$0xff] }
 0x7aa   : > { %14766 = vst [vmem:[#allocation66_spill] sm:$0xff] %v12589_v42 }
 0x7ac   : > { %v6352_v47 = vpop.f32.mrf.mxu2 }
 0x7ad   : > { %v6353_v21 = vadd.f32 %v6352_v47, %v6184_v18 }
 0x7ae   : > { %v6521_v33 = vpop.f32.mrf.mxu3  ;;  %v6683_v10 = vpop.f32.mrf.mxu0 }
 0x7af   : > { %v6809_v6 = vpop.f32.mrf.mxu1  ;;  %v6522_v8 = vadd.f32 %v6521_v33, %v6353_v21  ;;  %v12594_v27 = vadd.f32 %v6683_v10, %v6515_v34  ;;  %v14774_v33 = vld [vmem:[#allocation99_spill] sm:$0xff] }
 0x7b0   : > { %v12597_v20 = vadd.f32 %v6809_v6, %v12398_v60  ;;  %v6189_v10 = vadd.f32 %v12196_v52, %v14774_v33 }
 0x7b1   : > { %6910 = vmatmul.bf16.gmra.mxu2 %v14769_v39  ;;  %7238 = vmatmul.bf16.gmra.mxu0 %v14770_v46 }
 0x7b2   : > { %14768 = vst [vmem:[#allocation54_spill] sm:$0xff] %v12597_v20 }
 0x7b3   : > { %7079 = vmatmul.bf16.gmra.mxu3 %v14771_v54 }
 0x7b4   : > { %v6355_v25 = vpop.f32.mrf.mxu2 }
 0x7b5   : > { %v6356_v31 = vadd.f32 %v6355_v25, %v6187_v56 }
 0x7b6   : > { %v6524_v18 = vpop.f32.mrf.mxu3  ;;  %v6685_v47 = vpop.f32.mrf.mxu0 }
 0x7b7   : > { %v6812_v48 = vpop.f32.mrf.mxu1  ;;  %v6525_v21 = vadd.f32 %v6524_v18, %v6356_v31  ;;  %v12604_v34 = vadd.f32 %v6685_v47, %v6517_v55  ;;  %v14776_v55 = vld [vmem:[#allocation36_spill] sm:$0xff]  ;;  %v14779_v18 = vld [vmem:[#allocation95_spill] sm:$0xff] }
 0x7b8   : > { %v12607_v60 = vadd.f32 %v6812_v48, %v12411_v2  ;;  %v14777_v2 = vld [vmem:[#allocation114_spill] sm:$0xff]  ;;  %v14778_v48 = vld [vmem:[#allocation76_spill] sm:$0xff]  ;;  %v6192_v47 = vadd.f32 %v12196_v52, %v14779_v18 }
 0x7b9   : > { %6851 = vmatmul.bf16.gmra.mxu1 %v12387_v36 }
 0x7ba   : > { %14773 = vst [vmem:[#allocation61_spill] sm:$0xff] %v12607_v60 }
 0x7bc   : > { %v6357_v6 = vpop.f32.mrf.mxu2 }
 0x7bd   : > { %v6358_v46 = vadd.f32 %v6357_v6, %v6189_v10 }
 0x7be   : > { %v6526_v54 = vpop.f32.mrf.mxu3  ;;  %v6688_v23 = vpop.f32.mrf.mxu0 }
 0x7bf   : > { %v6814_v20 = vpop.f32.mrf.mxu1  ;;  %v6527_v56 = vadd.f32 %v6526_v54, %v6358_v46  ;;  %v12612_v25 = vadd.f32 %v6688_v23, %v6520_v37 }
 0x7c0   : > { %v12615_v31 = vadd.f32 %v6814_v20, %v12428_v3  ;;  %v14781_v20 = vld [vmem:[#allocation106_spill] sm:$0xff] }
 0x7c1   : > { %6915 = vmatmul.bf16.gmra.mxu2 %v14776_v55  ;;  %7243 = vmatmul.bf16.gmra.mxu0 %v14777_v2  ;;  %v6194_v54 = vadd.f32 %v12196_v52, %v14781_v20  ;;  %v8983_v52 = vld [vmem:[%s13667_s5] ss:$0 sm:$0xff] }
 0x7c2   : > { %14775 = vst [vmem:[#allocation92_spill] sm:$0xff] %v12615_v31 }
 0x7c3   : > { %7084 = vmatmul.bf16.gmra.mxu3 %v14778_v48 }
 0x7c4   : > { %v6360_v33 = vpop.f32.mrf.mxu2 }
 0x7c5   : > { %v6361_v10 = vadd.f32 %v6360_v33, %v6192_v47 }
 0x7c6   : > { %v6529_v6 = vpop.f32.mrf.mxu3  ;;  %v6690_v36 = vpop.f32.mrf.mxu0 }
 0x7c7   : > { %v6817_v60 = vpop.f32.mrf.mxu1  ;;  %v6530_v46 = vadd.f32 %v6529_v6, %v6361_v10  ;;  %v12622_v37 = vadd.f32 %v6690_v36, %v6522_v8  ;;  %v14783_v36 = vld [vmem:[#allocation120_spill] sm:$0xff]  ;;  %v14785_v8 = vld [vmem:[#allocation138_spill] sm:$0xff] }
 0x7c8   : > { %v12625_v3 = vadd.f32 %v6817_v60, %v12441_v63  ;;  %v14784_v63 = vld [vmem:[#allocation31_spill] sm:$0xff]  ;;  %v14786_v60 = vld [vmem:[#allocation116_spill] sm:$0xff] }
 0x7c9   : > { %6856 = vmatmul.bf16.gmra.mxu1 %v12417_v50  ;;  %v6197_v6 = vadd.f32 %v8983_v52, %v14786_v60 }
 0x7ca   : > { %14780 = vst [vmem:[#allocation55_spill] sm:$0xff] %v12625_v3 }
 0x7cc   : > { %v6362_v23 = vpop.f32.mrf.mxu2 }
 0x7cd   : > { %v6363_v2 = vadd.f32 %v6362_v23, %v6194_v54 }
 0x7ce   : > { %v6531_v48 = vpop.f32.mrf.mxu3  ;;  %v6693_v18 = vpop.f32.mrf.mxu0 }
 0x7cf   : > { %v6819_v31 = vpop.f32.mrf.mxu1  ;;  %v6532_v47 = vadd.f32 %v6531_v48, %v6363_v2  ;;  %v12630_v33 = vadd.f32 %v6693_v18, %v6525_v21  ;;  %v14787_v18 = vld [vmem:[#allocation103_spill] sm:$0xff] }
 0x7d0   : > { %v12633_v10 = vadd.f32 %v6819_v31, %v12458_v45 }
 0x7d1   : > { %6920 = vmatmul.bf16.gmra.mxu2 %v14783_v36  ;;  %7248 = vmatmul.bf16.gmra.mxu0 %v14784_v63  ;;  %v6199_v63 = vadd.f32 %v8983_v52, %v14787_v18 }
 0x7d2   : > { %14782 = vst [vmem:[#allocation135_spill] sm:$0xff] %v12633_v10 }
 0x7d3   : > { %7089 = vmatmul.bf16.gmra.mxu3 %v14785_v8 }
 0x7d4   : > { %v6365_v20 = vpop.f32.mrf.mxu2 }
 0x7d5   : > { %v6366_v54 = vadd.f32 %v6365_v20, %v6197_v6 }
 0x7d6   : > { %v6534_v23 = vpop.f32.mrf.mxu3  ;;  %v6695_v21 = vpop.f32.mrf.mxu0 }
 0x7d7   : > { %v6822_v2 = vpop.f32.mrf.mxu1  ;;  %v6535_v48 = vadd.f32 %v6534_v23, %v6366_v54  ;;  %v12642_v45 = vadd.f32 %v6695_v21, %v6527_v56  ;;  %v14788_v56 = vld [vmem:[#allocation123_spill] sm:$0xff]  ;;  %v14789_v54 = vld [vmem:[#allocation41_spill] sm:$0xff] }
 0x7d8   : > { %v12645_v31 = vadd.f32 %v6822_v2, %v12471_v29  ;;  %v14790_v29 = vld [vmem:[#allocation140_spill] sm:$0xff]  ;;  %v14791_v21 = vld [vmem:[#allocation109_spill] sm:$0xff] }
 0x7d9   : > { %6861 = vmatmul.bf16.gmra.mxu1 %v12447_v5 }
 0x7dc   : > { %v6367_v8 = vpop.f32.mrf.mxu2 }
 0x7dd   : > { %v6368_v3 = vadd.f32 %v6367_v8, %v6199_v63 }
 0x7de   : > { %v6536_v50 = vpop.f32.mrf.mxu3  ;;  %v6698_v10 = vpop.f32.mrf.mxu0 }
 0x7df   : > { %v6824_v60 = vpop.f32.mrf.mxu1  ;;  %v6537_v42 = vadd.f32 %v6536_v50, %v6368_v3  ;;  %v12649_v6 = vadd.f32 %v6698_v10, %v6530_v46  ;;  %v5429_v46 = vshll.u32 %v12525_v16, 16  ;;  %v14792_v3 = vld [vmem:[#allocation25_spill] sm:$0xff] }
 0x7e0   : > { %v12652_v20 = vadd.f32 %v6824_v60, %v12487_v62 }
 0x7e1   : > { %6925 = vmatmul.bf16.gmra.mxu2 %v14788_v56  ;;  %7253 = vmatmul.bf16.gmra.mxu0 %v14789_v54 }
 0x7e3   : > { %7094 = vmatmul.bf16.gmra.mxu3 %v14790_v29 }
 0x7e4   : > { %v6886_v23 = vpop.f32.mrf.mxu2 }
 0x7e5   : > { %v6887_v52 = vadd.f32 %v6886_v23, %v14791_v21 }
 0x7e6   : > { %v7055_v2 = vpop.f32.mrf.mxu3  ;;  %v6700_v18 = vpop.f32.mrf.mxu0 }
 0x7e7   : > { %v6827_v63 = vpop.f32.mrf.mxu1  ;;  %v7056_v8 = vadd.f32 %v7055_v2, %v6887_v52  ;;  %v12658_v5 = vadd.f32 %v6700_v18, %v6532_v47  ;;  %v5431_v47 = vrot.slane %v5429_v46, 1  ;;  %v14795_v2 = vld [vmem:[#allocation49_spill] sm:$0xff] }
 0x7e8   : > { %v12661_v50 = vadd.f32 %v6827_v63, %v12495_v24  ;;  %v12674_v24 = vsel %vm11020_vm6, %v12511_v41, 0  ;;  %v14796_v18 = vld [vmem:[#allocation45_spill] sm:$0xff]  ;;  %v14797_v63 = vld [vmem:[#allocation71_spill] sm:$0xff] }
 0x7e9   : > { %6866 = vmatmul.bf16.gmra.mxu1 %v12477_v49  ;;  %14794 = vst [vmem:[#allocation73_spill] sm:$0xff] %v12674_v24 }
 0x7ec   : > { %v6888_v62 = vpop.f32.mrf.mxu2 }
 0x7ed   : > { %v6889_v10 = vadd.f32 %v6888_v62, %v14792_v3  ;;  %v5427_v62 = vshrl.u32 %v12525_v16, 16 }
 0x7ee   : > { %v7057_v60 = vpop.f32.mrf.mxu3  ;;  %v6703_v54 = vpop.f32.mrf.mxu0 }
 0x7ef   : > { %v6829_v29 = vpop.f32.mrf.mxu1  ;;  %v7058_v23 = vadd.f32 %v7057_v60, %v6889_v10  ;;  %v12666_v21 = vadd.f32 %v6703_v54, %v6535_v48  ;;  %v5434_v48 = vshll.u32 %v12674_v24, 16  ;;  %v5432_v10 = vor.u32 %v5431_v47, %v5427_v62 }
 0x7f0   : > { %v12669_v52 = vadd.f32 %v6829_v29, %v12506_v57  ;;  %v14798_v57 = vld [vmem:[#allocation32_spill] sm:$0xff] }
 0x7f1   : > { %6930 = vmatmul.bf16.gmra.mxu2 %v14795_v2  ;;  %7258 = vmatmul.bf16.gmra.mxu0 %v14796_v18  ;;  %v5436_v41 = vrot.slane %v5434_v48, 1 }
 0x7f2   : > { %14793 = vst [vmem:[#allocation139_spill] sm:$0xff] %v12669_v52 }
 0x7f3   : > { %7099 = vmatmul.bf16.gmra.mxu3 %v14797_v63  ;;  %v12688_v18 = vsel %vm1359_vm3, %v5432_v10, %v5436_v41  ;;  %v14802_v10 = vld [vmem:[#allocation81_spill] sm:$0xff] }
 0x7f4   : > { %v6891_v3 = vpop.f32.mrf.mxu2  ;;  %14799 = vst [vmem:[#allocation87_spill] sm:$0xff] %v12688_v18 }
 0x7f5   : > { %v6892_v60 = vadd.f32 %v6891_v3, %v14798_v57 }
 0x7f6   : > { %v7060_v54 = vpop.f32.mrf.mxu3  ;;  %v6705_v29 = vpop.f32.mrf.mxu0 }
 0x7f7   : > { %v6832_v0 = vpop.f32.mrf.mxu1  ;;  %v7061_v49 = vadd.f32 %v7060_v54, %v6892_v60  ;;  %v12682_v46 = vadd.f32 %v6705_v29, %v6537_v42  ;;  %v14800_v60 = vld [vmem:[#allocation134_spill] sm:$0xff]  ;;  %v14803_v29 = vld [vmem:[#allocation53_spill] sm:$0xff] }
 0x7f8   : > { %v12685_v52 = vadd.f32 %v6832_v0, %v12518_v38  ;;  %v14801_v38 = vld [vmem:[#allocation128_spill] sm:$0xff] }
 0x7f9   : > { %6871 = vmatmul.bf16.gmra.mxu1 %v12688_v18 }
 0x7fc   : > { %v6893_v63 = vpop.f32.mrf.mxu2 }
 0x7fd   : > { %v6894_v47 = vadd.f32 %v6893_v63, %v12122_v4 }
 0x7fe   : > { %v7062_v62 = vpop.f32.mrf.mxu3  ;;  %v7224_v57 = vpop.f32.mrf.mxu0 }
 0x7ff   : > { %v6834_v3 = vpop.f32.mrf.mxu1  ;;  %v7063_v24 = vadd.f32 %v7062_v62, %v6894_v47  ;;  %v12695_v42 = vadd.f32 %v7224_v57, %v7056_v8 }
 0x800   : > { %v12693_v48 = vadd.f32 %v6834_v3, %v12532_v40 }
 0x801   : > { %6935 = vmatmul.bf16.gmra.mxu2 %v14800_v60  ;;  %7263 = vmatmul.bf16.gmra.mxu0 %v14801_v38 }
 0x803   : > { %7104 = vmatmul.bf16.gmra.mxu3 %v14802_v10 }
 0x804   : > { %v6896_v54 = vpop.f32.mrf.mxu2 }
 0x805   : > { %v6897_v0 = vadd.f32 %v6896_v54, %v14803_v29 }
 0x806   : > { %v7065_v41 = vpop.f32.mrf.mxu3  ;;  %v7226_v63 = vpop.f32.mrf.mxu0 }
 0x807   : > { %v6837_v4 = vpop.f32.mrf.mxu1  ;;  %v7066_v18 = vadd.f32 %v7065_v41, %v6897_v0  ;;  %v12704_v40 = vadd.f32 %v7226_v63, %v7058_v23  ;;  %v14805_v0 = vld [vmem:[#allocation132_spill] sm:$0xff]  ;;  %v14807_v23 = vld [vmem:[#allocation110_spill] sm:$0xff] }
 0x808   : > { %v12702_v47 = vadd.f32 %v6837_v4, %v12540_v51  ;;  %v14806_v51 = vld [vmem:[#allocation129_spill] sm:$0xff] }
 0x809   : > { %7392 = vmatmul.bf16.vlgmr.msra.gmra.mxu1 %v14742_v53 }
 0x80c   : > { %v6898_v8 = vpop.f32.mrf.mxu2 }
 0x80d   : > { %v6899_v62 = vadd.f32 %v6898_v8, %v12152_v14 }
 0x80e   : > { %v7067_v3 = vpop.f32.mrf.mxu3  ;;  %v7229_v38 = vpop.f32.mrf.mxu0 }
 0x80f   : > { %v6839_v57 = vpop.f32.mrf.mxu1  ;;  %v7068_v10 = vadd.f32 %v7067_v3, %v6899_v62  ;;  %v12711_v29 = vadd.f32 %v7229_v38, %v7061_v49  ;;  %v14809_v3 = vld [vmem:[#allocation40_spill] sm:$0xff] }
 0x810   : > { %v12709_v54 = vadd.f32 %v6839_v57, %v12550_v43 }
 0x811   : > { %6940 = vmatmul.bf16.gmra.mxu2 %v14805_v0  ;;  %7268 = vmatmul.bf16.gmra.mxu0 %v14806_v51 }
 0x812   : > { %14804 = vst [vmem:[#allocation75_spill] sm:$0xff] %v12709_v54 }
 0x813   : > { %7109 = vmatmul.bf16.gmra.mxu3 %v14807_v23 }
 0x814   : > { %v6901_v41 = vpop.f32.mrf.mxu2 }
 0x815   : > { %v6902_v53 = vadd.f32 %v6901_v41, %v12169_v1 }
 0x816   : > { %v7070_v4 = vpop.f32.mrf.mxu3  ;;  %v7231_v63 = vpop.f32.mrf.mxu0 }
 0x817   : > { %v6842_v14 = vpop.f32.mrf.mxu1  ;;  %v7071_v8 = vadd.f32 %v7070_v4, %v6902_v53  ;;  %v12720_v43 = vadd.f32 %v7231_v63, %v7063_v24  ;;  %v14811_v53 = vld [vmem:[#allocation69_spill] sm:$0xff]  ;;  %v14813_v24 = vld [vmem:[#allocation91_spill] sm:$0xff] }
 0x818   : > { %v12718_v62 = vadd.f32 %v6842_v14, %v12558_v44  ;;  %v14812_v44 = vld [vmem:[#allocation59_spill] sm:$0xff] }
 0x819   : > { %7397 = vmatmul.bf16.gmra.mxu1 %v14748_v7  ;;  %v14814_v7 = vld [vmem:[#allocation50_spill] sm:$0xff] }
 0x81a   : > { %14808 = vst [vmem:[#allocation137_spill] sm:$0xff] %v12718_v62 }
 0x81c   : > { %v6903_v49 = vpop.f32.mrf.mxu2 }
 0x81d   : > { %v6904_v57 = vadd.f32 %v6903_v49, %v14809_v3 }
 0x81e   : > { %v7072_v38 = vpop.f32.mrf.mxu3  ;;  %v7234_v23 = vpop.f32.mrf.mxu0 }
 0x81f   : > { %v6844_v51 = vpop.f32.mrf.mxu1  ;;  %v7073_v54 = vadd.f32 %v7072_v38, %v6904_v57  ;;  %v12727_v41 = vadd.f32 %v7234_v23, %v7066_v18  ;;  %v14816_v38 = vld [vmem:[#allocation74_spill] sm:$0xff] }
 0x820   : > { %v12725_v1 = vadd.f32 %v6844_v51, %v12568_v35 }
 0x821   : > { %6945 = vmatmul.bf16.gmra.mxu2 %v14811_v53  ;;  %7273 = vmatmul.bf16.gmra.mxu0 %v14812_v44 }
 0x822   : > { %14810 = vst [vmem:[#allocation93_spill] sm:$0xff] %v12725_v1 }
 0x823   : > { %7114 = vmatmul.bf16.gmra.mxu3 %v14813_v24 }
 0x824   : > { %v6906_v4 = vpop.f32.mrf.mxu2 }
 0x825   : > { %v6907_v14 = vadd.f32 %v6906_v4, %v14814_v7 }
 0x826   : > { %v7075_v63 = vpop.f32.mrf.mxu3  ;;  %v7236_v3 = vpop.f32.mrf.mxu0 }
 0x827   : > { %v6847_v49 = vpop.f32.mrf.mxu1  ;;  %v7076_v62 = vadd.f32 %v7075_v63, %v6907_v14  ;;  %v12736_v35 = vadd.f32 %v7236_v3, %v7068_v10  ;;  %v14818_v14 = vld [vmem:[#allocation78_spill] sm:$0xff] }
 0x828   : > { %v12734_v57 = vadd.f32 %v6847_v49, %v12576_v15  ;;  %v14819_v15 = vld [vmem:[#allocation68_spill] sm:$0xff]  ;;  %v14820_v10 = vld [vmem:[#allocation26_spill] sm:$0xff] }
 0x829   : > { %7402 = vmatmul.bf16.gmra.mxu1 %v14755_v61  ;;  %v14821_v61 = vld [vmem:[#allocation72_spill] sm:$0xff] }
 0x82a   : > { %14815 = vst [vmem:[#allocation79_spill] sm:$0xff] %v12734_v57 }
 0x82c   : > { %v6908_v18 = vpop.f32.mrf.mxu2 }
 0x82d   : > { %v6909_v51 = vadd.f32 %v6908_v18, %v14816_v38 }
 0x82e   : > { %v7077_v23 = vpop.f32.mrf.mxu3  ;;  %v7239_v24 = vpop.f32.mrf.mxu0 }
 0x82f   : > { %v6849_v44 = vpop.f32.mrf.mxu1  ;;  %v7078_v1 = vadd.f32 %v7077_v23, %v6909_v51  ;;  %v12743_v7 = vadd.f32 %v7239_v24, %v7071_v8 }
 0x830   : > { %v12741_v4 = vadd.f32 %v6849_v44, %v12586_v19 }
 0x831   : > { %6950 = vmatmul.bf16.gmra.mxu2 %v14818_v14  ;;  %7278 = vmatmul.bf16.gmra.mxu0 %v14819_v15 }
 0x832   : > { %14817 = vst [vmem:[#allocation105_spill] sm:$0xff] %v12741_v4 }
 0x833   : > { %7119 = vmatmul.bf16.gmra.mxu3 %v14820_v10 }
 0x834   : > { %v6911_v63 = vpop.f32.mrf.mxu2 }
 0x835   : > { %v6912_v49 = vadd.f32 %v6911_v63, %v14821_v61 }
 0x836   : > { %v7080_v3 = vpop.f32.mrf.mxu3  ;;  %v7241_v38 = vpop.f32.mrf.mxu0 }
 0x837   : > { %v6852_v18 = vpop.f32.mrf.mxu1  ;;  %v7081_v57 = vadd.f32 %v7080_v3, %v6912_v49  ;;  %v12752_v19 = vadd.f32 %v7241_v38, %v7073_v54  ;;  %v14824_v49 = vld [vmem:[#allocation98_spill] sm:$0xff] }
 0x838   : > { %v12750_v51 = vadd.f32 %v6852_v18, %v12594_v27  ;;  %v14825_v27 = vld [vmem:[#allocation88_spill] sm:$0xff] }
 0x839   : > { %7407 = vmatmul.bf16.gmra.mxu1 %v14762_v13 }
 0x83a   : > { %14822 = vst [vmem:[#allocation80_spill] sm:$0xff] %v12750_v51 }
 0x83c   : > { %v6913_v8 = vpop.f32.mrf.mxu2 }
 0x83d   : > { %v6914_v23 = vadd.f32 %v6913_v8, %v12249_v22 }
 0x83e   : > { %v7082_v44 = vpop.f32.mrf.mxu3  ;;  %v7244_v15 = vpop.f32.mrf.mxu0 }
 0x83f   : > { %v6854_v24 = vpop.f32.mrf.mxu1  ;;  %v7083_v10 = vadd.f32 %v7082_v44, %v6914_v23  ;;  %v12759_v61 = vadd.f32 %v7244_v15, %v7076_v62  ;;  %v5444_v23 = vrot.slane %v12037_v59, 1 }
 0x840   : > { %v12757_v63 = vadd.f32 %v6854_v24, %v12604_v34 }
 0x841   : > { %6955 = vmatmul.bf16.gmra.mxu2 %v14824_v49  ;;  %7283 = vmatmul.bf16.gmra.mxu0 %v14825_v27 }
 0x842   : > { %14823 = vst [vmem:[#allocation65_spill] sm:$0xff] %v12757_v63 }
 0x843   : > { %7124 = vmatmul.bf16.gmra.mxu3 %v12037_v59  ;;  %v14829_v59 = vld [vmem:[#allocation130_spill] sm:$0xff] }
 0x844   : > { %v6916_v54 = vpop.f32.mrf.mxu2 }
 0x845   : > { %v6917_v13 = vadd.f32 %v6916_v54, %v12268_v28  ;;  %v5445_v28 = vrot.slane %v12282_v32, 1 }
 0x846   : > { %v7085_v3 = vpop.f32.mrf.mxu3  ;;  %v7246_v18 = vpop.f32.mrf.mxu0 }
 0x847   : > { %v6857_v22 = vpop.f32.mrf.mxu1  ;;  %v7086_v38 = vadd.f32 %v7085_v3, %v6917_v13  ;;  %v12768_v34 = vadd.f32 %v7246_v18, %v7078_v1  ;;  %v12780_v1 = vsel %vm1763_vm4, %v5444_v23, %v5445_v28  ;;  %v14830_v3 = vld [vmem:[#allocation67_spill] sm:$0xff] }
 0x848   : > { %v12766_v8 = vadd.f32 %v6857_v22, %v12612_v25 }
 0x849   : > { %7412 = vmatmul.bf16.gmra.mxu1 %v14769_v39  ;;  %v14828_v39 = vld [vmem:[#allocation83_spill] sm:$0xff] }
 0x84a   : > { %14826 = vst [vmem:[#allocation89_spill] sm:$0xff] %v12766_v8 }
 0x84c   : > { %v6918_v62 = vpop.f32.mrf.mxu2 }
 0x84d   : > { %v6919_v44 = vadd.f32 %v6918_v62, %v12287_v17 }
 0x84e   : > { %v7087_v24 = vpop.f32.mrf.mxu3  ;;  %v7249_v27 = vpop.f32.mrf.mxu0 }
 0x84f   : > { %v6859_v15 = vpop.f32.mrf.mxu1  ;;  %v7088_v54 = vadd.f32 %v7087_v24, %v6919_v44  ;;  %v12777_v25 = vadd.f32 %v7249_v27, %v7081_v57  ;;  %v14832_v24 = vld [vmem:[#allocation101_spill] sm:$0xff] }
 0x850   : > { %v12775_v13 = vadd.f32 %v6859_v15, %v12622_v37 }
 0x851   : > { %6960 = vmatmul.bf16.gmra.mxu2 %v12780_v1  ;;  %7288 = vmatmul.bf16.gmra.mxu0 %v14828_v39 }
 0x852   : > { %14827 = vst [vmem:[#allocation85_spill] sm:$0xff] %v12775_v13 }
 0x853   : > { %7129 = vmatmul.bf16.gmra.mxu3 %v14829_v59 }
 0x854   : > { %v6921_v17 = vpop.f32.mrf.mxu2 }
 0x855   : > { %v6922_v22 = vadd.f32 %v6921_v17, %v14830_v3 }
 0x856   : > { %v7090_v18 = vpop.f32.mrf.mxu3  ;;  %v7251_v62 = vpop.f32.mrf.mxu0 }
 0x857   : > { %v6862_v32 = vpop.f32.mrf.mxu1  ;;  %v7091_v44 = vadd.f32 %v7090_v18, %v6922_v22  ;;  %v12789_v57 = vadd.f32 %v7251_v62, %v7083_v10  ;;  %v14834_v22 = vld [vmem:[#allocation38_spill] sm:$0xff]  ;;  %v14836_v10 = vld [vmem:[#allocation28_spill] sm:$0xff] }
 0x858   : > { %v12787_v37 = vadd.f32 %v6862_v32, %v12630_v33  ;;  %v14835_v33 = vld [vmem:[#allocation77_spill] sm:$0xff] }
 0x859   : > { %7417 = vmatmul.bf16.gmra.mxu1 %v14776_v55  ;;  %v14837_v55 = vld [vmem:[#allocation96_spill] sm:$0xff] }
 0x85a   : > { %14831 = vst [vmem:[#allocation108_spill] sm:$0xff] %v12787_v37 }
 0x85c   : > { %v6923_v23 = vpop.f32.mrf.mxu2 }
 0x85d   : > { %v6924_v15 = vadd.f32 %v6923_v23, %v14832_v24 }
 0x85e   : > { %v7092_v27 = vpop.f32.mrf.mxu3  ;;  %v7254_v39 = vpop.f32.mrf.mxu0 }
 0x85f   : > { %v6864_v28 = vpop.f32.mrf.mxu1  ;;  %v7093_v13 = vadd.f32 %v7092_v27, %v6924_v15  ;;  %v12796_v3 = vadd.f32 %v7254_v39, %v7086_v38  ;;  %v14839_v27 = vld [vmem:[#allocation100_spill] sm:$0xff] }
 0x860   : > { %v12794_v17 = vadd.f32 %v6864_v28, %v12642_v45 }
 0x861   : > { %6965 = vmatmul.bf16.gmra.mxu2 %v14834_v22  ;;  %7293 = vmatmul.bf16.gmra.mxu0 %v14835_v33 }
 0x862   : > { %14833 = vst [vmem:[#allocation104_spill] sm:$0xff] %v12794_v17 }
 0x863   : > { %7134 = vmatmul.bf16.gmra.mxu3 %v14836_v10 }
 0x864   : > { %v6926_v18 = vpop.f32.mrf.mxu2 }
 0x865   : > { %v6927_v32 = vadd.f32 %v6926_v18, %v14837_v55 }
 0x866   : > { %v7095_v62 = vpop.f32.mrf.mxu3  ;;  %v7256_v24 = vpop.f32.mrf.mxu0 }
 0x867   : > { %v6867_v23 = vpop.f32.mrf.mxu1  ;;  %v7096_v37 = vadd.f32 %v7095_v62, %v6927_v32  ;;  %v12805_v45 = vadd.f32 %v7256_v24, %v7088_v54  ;;  %v14841_v32 = vld [vmem:[#allocation23_spill] sm:$0xff]  ;;  %v7651_v62 = vld [vmem:[#allocation11 + $0x78] sm:$0xff] }
 0x868   : > { %v12803_v15 = vadd.f32 %v6867_v23, %v12649_v6  ;;  %v14842_v6 = vld [vmem:[#allocation64_spill] sm:$0xff]  ;;  %v14843_v54 = vld [vmem:[#allocation27_spill] sm:$0xff]  ;;  %7657 = vmatpush.msrb.mxu2 %v7651_v62 }
 0x869   : > { %7422 = vmatmul.bf16.gmra.mxu1 %v14783_v36  ;;  %v14844_v23 = vld [vmem:[#allocation115_spill] sm:$0xff] }
 0x86a   : > { %14838 = vst [vmem:[#allocation136_spill] sm:$0xff] %v12803_v15 }
 0x86c   : > { %v6928_v38 = vpop.f32.mrf.mxu2 }
 0x86d   : > { %v6929_v28 = vadd.f32 %v6928_v38, %v14839_v27 }
 0x86e   : > { %v7097_v39 = vpop.f32.mrf.mxu3  ;;  %v7259_v33 = vpop.f32.mrf.mxu0 }
 0x86f   : > { %v6869_v22 = vpop.f32.mrf.mxu1  ;;  %v7098_v10 = vadd.f32 %v7097_v39, %v6929_v28  ;;  %v12812_v55 = vadd.f32 %v7259_v33, %v7091_v44 }
 0x870   : > { %v12810_v18 = vadd.f32 %v6869_v22, %v12658_v5  ;;  %v14846_v22 = vld [vmem:[#allocation131_spill] sm:$0xff] }
 0x871   : > { %6970 = vmatmul.bf16.gmra.mxu2 %v14841_v32  ;;  %7298 = vmatmul.bf16.gmra.mxu0 %v14842_v6 }
 0x872   : > { %14840 = vst [vmem:[#allocation22_spill] sm:$0xff] %v12810_v18 }
 0x873   : > { %7139 = vmatmul.bf16.gmra.mxu3 %v14843_v54 }
 0x874   : > { %v6931_v36 = vpop.f32.mrf.mxu2 }
 0x875   : > { %v6932_v24 = vadd.f32 %v6931_v36, %v14844_v23 }
 0x876   : > { %v7100_v38 = vpop.f32.mrf.mxu3  ;;  %v7261_v15 = vpop.f32.mrf.mxu0 }
 0x877   : > { %v6872_v27 = vpop.f32.mrf.mxu1  ;;  %v7101_v28 = vadd.f32 %v7100_v38, %v6932_v24  ;;  %v12821_v44 = vadd.f32 %v7261_v15, %v7093_v13  ;;  %v14848_v24 = vld [vmem:[#allocation24_spill] sm:$0xff]  ;;  %v14850_v13 = vld [vmem:[#allocation30_spill] sm:$0xff] }
 0x878   : > { %v12819_v5 = vadd.f32 %v6872_v27, %v12666_v21  ;;  %v14849_v21 = vld [vmem:[#allocation107_spill] sm:$0xff] }
 0x879   : > { %7427 = vmatmul.bf16.gmra.mxu1 %v14788_v56  ;;  %v14851_v56 = vld [vmem:[#allocation113_spill] sm:$0xff] }
 0x87a   : > { %14845 = vst [vmem:[#allocation99_spill] sm:$0xff] %v12819_v5 }
 0x87c   : > { %v6933_v39 = vpop.f32.mrf.mxu2 }
 0x87d   : > { %v6934_v33 = vadd.f32 %v6933_v39, %v14846_v22 }
 0x87e   : > { %v7102_v54 = vpop.f32.mrf.mxu3  ;;  %v7264_v62 = vpop.f32.mrf.mxu0 }
 0x87f   : > { %v6874_v18 = vpop.f32.mrf.mxu1  ;;  %v7103_v17 = vadd.f32 %v7102_v54, %v6934_v33  ;;  %v12828_v23 = vadd.f32 %v7264_v62, %v7096_v37 }
 0x880   : > { %v12826_v36 = vadd.f32 %v6874_v18, %v12682_v46 }
 0x881   : > { %6975 = vmatmul.bf16.gmra.mxu2 %v14848_v24  ;;  %7303 = vmatmul.bf16.gmra.mxu0 %v14849_v21 }
 0x882   : > { %14847 = vst [vmem:[#allocation36_spill] sm:$0xff] %v12826_v36 }
 0x883   : > { %7144 = vmatmul.bf16.gmra.mxu3 %v14850_v13 }
 0x884   : > { %v6936_v15 = vpop.f32.mrf.mxu2 }
 0x885   : > { %v6937_v38 = vadd.f32 %v6936_v15, %v14851_v56  ;;  %v14854_v56 = vld [vmem:[#allocation33_spill] sm:$0xff] }
 0x886   : > { %v7105_v27 = vpop.f32.mrf.mxu3  ;;  %v7266_v39 = vpop.f32.mrf.mxu0 }
 0x887   : > { %v7393_v22 = vpop.f32.mrf.mxu1  ;;  %v7106_v5 = vadd.f32 %v7105_v27, %v6937_v38  ;;  %v12834_v8 = vadd.f32 %v7266_v39, %v7098_v10  ;;  %v14855_v10 = vld [vmem:[#allocation29_spill] sm:$0xff]  ;;  %v7650_v38 = vld [vmem:[#allocation11 + $0x70] sm:$0xff] }
 0x888   : > { %v12837_v46 = vadd.f32 %v7393_v22, %v12695_v42  ;;  %v14856_v42 = vld [vmem:[#allocation60_spill] sm:$0xff]  ;;  %7658 = vmatpush.msrb.mxu2 %v7650_v38 }
 0x889   : > { %7432 = vmatmul.bf16.gmra.mxu1 %v14795_v2 }
 0x88a   : > { %14852 = vst [vmem:[#allocation114_spill] sm:$0xff] %v12837_v46 }
 0x88c   : > { %v6938_v37 = vpop.f32.mrf.mxu2 }
 0x88d   : > { %v6939_v18 = vadd.f32 %v6938_v37, %v12414_v11 }
 0x88e   : > { %v7107_v33 = vpop.f32.mrf.mxu3  ;;  %v7269_v54 = vpop.f32.mrf.mxu0 }
 0x88f   : > { %v7395_v62 = vpop.f32.mrf.mxu1  ;;  %v7108_v21 = vadd.f32 %v7107_v33, %v6939_v18  ;;  %v12841_v13 = vadd.f32 %v7269_v54, %v7101_v28 }
 0x890   : > { %v12844_v15 = vadd.f32 %v7395_v62, %v12704_v40 }
 0x891   : > { %6980 = vmatmul.bf16.gmra.mxu2 %v14854_v56  ;;  %7308 = vmatmul.bf16.gmra.mxu0 %v14855_v10 }
 0x892   : > { %14853 = vst [vmem:[#allocation76_spill] sm:$0xff] %v12844_v15 }
 0x893   : > { %7149 = vmatmul.bf16.gmra.mxu3 %v14856_v42 }
 0x894   : > { %v6941_v2 = vpop.f32.mrf.mxu2 }
 0x895   : > { %v6942_v11 = vadd.f32 %v6941_v2, %v12431_v12  ;;  %v14859_v2 = vld [vmem:[#allocation58_spill] sm:$0xff] }
 0x896   : > { %v7110_v27 = vpop.f32.mrf.mxu3  ;;  %v7271_v39 = vpop.f32.mrf.mxu0 }
 0x897   : > { %v7398_v22 = vpop.f32.mrf.mxu1  ;;  %v7111_v37 = vadd.f32 %v7110_v27, %v6942_v11  ;;  %v12850_v28 = vadd.f32 %v7271_v39, %v7103_v17  ;;  %v14860_v17 = vld [vmem:[#allocation37_spill] sm:$0xff] }
 0x898   : > { %v12853_v40 = vadd.f32 %v7398_v22, %v12711_v29  ;;  %v14861_v29 = vld [vmem:[#allocation44_spill] sm:$0xff] }
 0x899   : > { %7437 = vmatmul.bf16.gmra.mxu1 %v14800_v60 }
 0x89a   : > { %14857 = vst [vmem:[#allocation95_spill] sm:$0xff] %v12853_v40 }
 0x89c   : > { %v6943_v18 = vpop.f32.mrf.mxu2 }
 0x89d   : > { %v6944_v33 = vadd.f32 %v6943_v18, %v12444_v30 }
 0x89e   : > { %v7112_v54 = vpop.f32.mrf.mxu3  ;;  %v7274_v62 = vpop.f32.mrf.mxu0 }
 0x89f   : > { %v7400_v10 = vpop.f32.mrf.mxu1  ;;  %v7113_v42 = vadd.f32 %v7112_v54, %v6944_v33  ;;  %v12857_v38 = vadd.f32 %v7274_v62, %v7106_v5 }
 0x8a0   : > { %v12860_v12 = vadd.f32 %v7400_v10, %v12720_v43 }
 0x8a1   : > { %6985 = vmatmul.bf16.gmra.mxu2 %v14859_v2  ;;  %7313 = vmatmul.bf16.gmra.mxu0 %v14860_v17 }
 0x8a2   : > { %14858 = vst [vmem:[#allocation106_spill] sm:$0xff] %v12860_v12 }
 0x8a3   : > { %7154 = vmatmul.bf16.gmra.mxu3 %v14861_v29 }
 0x8a4   : > { %v6946_v11 = vpop.f32.mrf.mxu2 }
 0x8a5   : > { %v6947_v60 = vadd.f32 %v6946_v11, %v12461_v58  ;;  %v14864_v11 = vld [vmem:[#allocation34_spill] sm:$0xff] }
 0x8a6   : > { %v7115_v27 = vpop.f32.mrf.mxu3  ;;  %v7276_v30 = vpop.f32.mrf.mxu0 }
 0x8a7   : > { %v7403_v39 = vpop.f32.mrf.mxu1  ;;  %v7116_v22 = vadd.f32 %v7115_v27, %v6947_v60  ;;  %v12866_v18 = vadd.f32 %v7276_v30, %v7108_v21  ;;  %v14865_v21 = vld [vmem:[#allocation42_spill] sm:$0xff]  ;;  %v7649_v60 = vld [vmem:[#allocation11 + $0x68] sm:$0xff] }
 0x8a8   : > { %v12869_v5 = vadd.f32 %v7403_v39, %v12727_v41  ;;  %v14866_v41 = vld [vmem:[#allocation48_spill] sm:$0xff]  ;;  %7659 = vmatpush.msrb.mxu2 %v7649_v60 }
 0x8a9   : > { %7442 = vmatmul.bf16.gmra.mxu1 %v14805_v0 }
 0x8aa   : > { %14862 = vst [vmem:[#allocation120_spill] sm:$0xff] %v12869_v5 }
 0x8ac   : > { %v6948_v43 = vpop.f32.mrf.mxu2 }
 0x8ad   : > { %v6949_v33 = vadd.f32 %v6948_v43, %v12474_v26 }
 0x8ae   : > { %v7117_v54 = vpop.f32.mrf.mxu3  ;;  %v7279_v62 = vpop.f32.mrf.mxu0 }
 0x8af   : > { %v7405_v10 = vpop.f32.mrf.mxu1  ;;  %v7118_v17 = vadd.f32 %v7117_v54, %v6949_v33  ;;  %v12873_v29 = vadd.f32 %v7279_v62, %v7111_v37  ;;  %v14868_v54 = vld [vmem:[#allocation121_spill] sm:$0xff] }
 0x8b0   : > { %v12876_v58 = vadd.f32 %v7405_v10, %v12736_v35 }
 0x8b1   : > { %6990 = vmatmul.bf16.gmra.mxu2 %v14864_v11  ;;  %7318 = vmatmul.bf16.gmra.mxu0 %v14865_v21 }
 0x8b2   : > { %14863 = vst [vmem:[#allocation31_spill] sm:$0xff] %v12876_v58 }
 0x8b3   : > { %7159 = vmatmul.bf16.gmra.mxu3 %v14866_v41 }
 0x8b4   : > { %v6951_v0 = vpop.f32.mrf.mxu2 }
 0x8b5   : > { %v6952_v26 = vadd.f32 %v6951_v0, %v12490_v9  ;;  %v14870_v0 = vld [vmem:[#allocation141_spill] sm:$0xff] }
 0x8b6   : > { %v7120_v27 = vpop.f32.mrf.mxu3  ;;  %v7281_v30 = vpop.f32.mrf.mxu0 }
 0x8b7   : > { %v7408_v39 = vpop.f32.mrf.mxu1  ;;  %v7121_v43 = vadd.f32 %v7120_v27, %v6952_v26  ;;  %v12882_v37 = vadd.f32 %v7281_v30, %v7113_v42  ;;  %v14871_v42 = vld [vmem:[#allocation47_spill] sm:$0xff] }
 0x8b8   : > { %v12885_v35 = vadd.f32 %v7408_v39, %v12743_v7  ;;  %v14872_v7 = vld [vmem:[#allocation94_spill] sm:$0xff] }
 0x8b9   : > { %7447 = vmatmul.bf16.gmra.mxu1 %v14811_v53  ;;  %v14873_v53 = vld [vmem:[#allocation46_spill] sm:$0xff] }
 0x8ba   : > { %14867 = vst [vmem:[#allocation138_spill] sm:$0xff] %v12885_v35 }
 0x8bc   : > { %v6953_v33 = vpop.f32.mrf.mxu2 }
 0x8bd   : > { %v6954_v62 = vadd.f32 %v6953_v33, %v14868_v54 }
 0x8be   : > { %v7122_v10 = vpop.f32.mrf.mxu3  ;;  %v7284_v21 = vpop.f32.mrf.mxu0 }
 0x8bf   : > { %v7410_v41 = vpop.f32.mrf.mxu1  ;;  %v7123_v60 = vadd.f32 %v7122_v10, %v6954_v62  ;;  %v12889_v36 = vadd.f32 %v7284_v21, %v7116_v22  ;;  %v14875_v62 = vld [vmem:[#allocation51_spill] sm:$0xff] }
 0x8c0   : > { %v12892_v9 = vadd.f32 %v7410_v41, %v12752_v19 }
 0x8c1   : > { %6995 = vmatmul.bf16.gmra.mxu2 %v14870_v0  ;;  %7323 = vmatmul.bf16.gmra.mxu0 %v14871_v42 }
 0x8c2   : > { %14869 = vst [vmem:[#allocation116_spill] sm:$0xff] %v12892_v9 }
 0x8c3   : > { %7164 = vmatmul.bf16.gmra.mxu3 %v14872_v7 }
 0x8c4   : > { %v6956_v26 = vpop.f32.mrf.mxu2 }
 0x8c5   : > { %v6957_v27 = vadd.f32 %v6956_v26, %v14873_v53  ;;  %v14877_v53 = vld [vmem:[#allocation84_spill] sm:$0xff] }
 0x8c6   : > { %v7125_v30 = vpop.f32.mrf.mxu3  ;;  %v7286_v39 = vpop.f32.mrf.mxu0 }
 0x8c7   : > { %v7413_v33 = vpop.f32.mrf.mxu1  ;;  %v7126_v54 = vadd.f32 %v7125_v30, %v6957_v27  ;;  %v12898_v63 = vadd.f32 %v7286_v39, %v7118_v17  ;;  %v14878_v17 = vld [vmem:[#allocation63_spill] sm:$0xff]  ;;  %v7648_v27 = vld [vmem:[#allocation11 + $0x60] sm:$0xff] }
 0x8c8   : > { %v12901_v22 = vadd.f32 %v7413_v33, %v12759_v61  ;;  %v14879_v61 = vld [vmem:[#allocation86_spill] sm:$0xff]  ;;  %7660 = vmatpush.msrb.mxu2 %v7648_v27  ;;  %v14880_v30 = vld [vmem:[#allocation43_spill] sm:$0xff] }
 0x8c9   : > { %7452 = vmatmul.bf16.gmra.mxu1 %v14818_v14 }
 0x8ca   : > { %14874 = vst [vmem:[#allocation103_spill] sm:$0xff] %v12901_v22 }
 0x8cc   : > { %v6958_v19 = vpop.f32.mrf.mxu2 }
 0x8cd   : > { %v6959_v10 = vadd.f32 %v6958_v19, %v14875_v62 }
 0x8ce   : > { %v7127_v21 = vpop.f32.mrf.mxu3  ;;  %v7289_v41 = vpop.f32.mrf.mxu0 }
 0x8cf   : > { %v7415_v42 = vpop.f32.mrf.mxu1  ;;  %v7128_v7 = vadd.f32 %v7127_v21, %v6959_v10  ;;  %v12905_v51 = vadd.f32 %v7289_v41, %v7121_v43  ;;  %v14882_v41 = vld [vmem:[#allocation133_spill] sm:$0xff] }
 0x8d0   : > { %v12908_v26 = vadd.f32 %v7415_v42, %v12768_v34 }
 0x8d1   : > { %7000 = vmatmul.bf16.gmra.mxu2 %v14877_v53  ;;  %7328 = vmatmul.bf16.gmra.mxu0 %v14878_v17 }
 0x8d2   : > { %14876 = vst [vmem:[#allocation123_spill] sm:$0xff] %v12908_v26 }
 0x8d3   : > { %7169 = vmatmul.bf16.gmra.mxu3 %v14879_v61 }
 0x8d4   : > { %v6961_v14 = vpop.f32.mrf.mxu2 }
 0x8d5   : > { %v6962_v39 = vadd.f32 %v6961_v14, %v14880_v30  ;;  %v14884_v30 = vld [vmem:[#allocation70_spill] sm:$0xff] }
 0x8d6   : > { %v7130_v33 = vpop.f32.mrf.mxu3  ;;  %v7291_v19 = vpop.f32.mrf.mxu0 }
 0x8d7   : > { %v7418_v62 = vpop.f32.mrf.mxu1  ;;  %v7131_v10 = vadd.f32 %v7130_v33, %v6962_v39  ;;  %v12914_v43 = vadd.f32 %v7291_v19, %v7123_v60  ;;  %v14885_v60 = vld [vmem:[#allocation82_spill] sm:$0xff] }
 0x8d8   : > { %v12917_v34 = vadd.f32 %v7418_v62, %v12777_v25  ;;  %v14886_v25 = vld [vmem:[#allocation90_spill] sm:$0xff] }
 0x8d9   : > { %7457 = vmatmul.bf16.gmra.mxu1 %v14824_v49  ;;  %v14887_v49 = vld [vmem:[#allocation127_spill] sm:$0xff] }
 0x8da   : > { %14881 = vst [vmem:[#allocation41_spill] sm:$0xff] %v12917_v34 }
 0x8dc   : > { %v6963_v21 = vpop.f32.mrf.mxu2 }
 0x8dd   : > { %v6964_v42 = vadd.f32 %v6963_v21, %v14882_v41 }
 0x8de   : > { %v7132_v17 = vpop.f32.mrf.mxu3  ;;  %v7294_v61 = vpop.f32.mrf.mxu0 }
 0x8df   : > { %v7420_v27 = vpop.f32.mrf.mxu1  ;;  %v7133_v4 = vadd.f32 %v7132_v17, %v6964_v42  ;;  %v12921_v26 = vadd.f32 %v7294_v61, %v7126_v54  ;;  %v14889_v42 = vld [vmem:[#allocation126_spill] sm:$0xff] }
 0x8e0   : > { %v12924_v14 = vadd.f32 %v7420_v27, %v12789_v57 }
 0x8e1   : > { %7005 = vmatmul.bf16.gmra.mxu2 %v14884_v30  ;;  %7333 = vmatmul.bf16.gmra.mxu0 %v14885_v60 }
 0x8e2   : > { %14883 = vst [vmem:[#allocation140_spill] sm:$0xff] %v12924_v14 }
 0x8e3   : > { %7174 = vmatmul.bf16.gmra.mxu3 %v14886_v25 }
 0x8e4   : > { %v6966_v39 = vpop.f32.mrf.mxu2 }
 0x8e5   : > { %v6967_v33 = vadd.f32 %v6966_v39, %v14887_v49  ;;  %v14891_v49 = vld [vmem:[#allocation143_spill] sm:$0xff] }
 0x8e6   : > { %v7135_v19 = vpop.f32.mrf.mxu3  ;;  %v7296_v62 = vpop.f32.mrf.mxu0 }
 0x8e7   : > { %v7423_v21 = vpop.f32.mrf.mxu1  ;;  %v7136_v41 = vadd.f32 %v7135_v19, %v6967_v33  ;;  %v12930_v34 = vadd.f32 %v7296_v62, %v7128_v7  ;;  %v14892_v7 = vld [vmem:[#allocation57_spill] sm:$0xff]  ;;  %v14894_v19 = vld [vmem:[#allocation56_spill] sm:$0xff] }
 0x8e8   : > { %v12933_v54 = vadd.f32 %v7423_v21, %v12796_v3  ;;  %v14893_v3 = vld [vmem:[#allocation111_spill] sm:$0xff]  ;;  %v7647_v33 = vld [vmem:[#allocation11 + $0x58] sm:$0xff] }
 0x8e9   : > { %7462 = vmatmul.bf16.gmra.mxu1 %v12780_v1  ;;  %7661 = vmatpush.msrb.mxu2 %v7647_v33 }
 0x8ea   : > { %14888 = vst [vmem:[#allocation109_spill] sm:$0xff] %v12933_v54 }
 0x8ec   : > { %v6968_v57 = vpop.f32.mrf.mxu2 }
 0x8ed   : > { %v6969_v17 = vadd.f32 %v6968_v57, %v14889_v42 }
 0x8ee   : > { %v7137_v61 = vpop.f32.mrf.mxu3  ;;  %v7299_v27 = vpop.f32.mrf.mxu0 }
 0x8ef   : > { %v7425_v60 = vpop.f32.mrf.mxu1  ;;  %v7138_v25 = vadd.f32 %v7137_v61, %v6969_v17  ;;  %v12937_v14 = vadd.f32 %v7299_v27, %v7131_v10  ;;  %v14896_v61 = vld [vmem:[#allocation52_spill] sm:$0xff]  ;;  %v7697_v27 = vld [vmem:[#allocation12 + $0x78] sm:$0xff] }
 0x8f0   : > { %v12940_v39 = vadd.f32 %v7425_v60, %v12805_v45  ;;  %7698 = vmatpush.msrb.mxu3 %v7697_v27 }
 0x8f1   : > { %7010 = vmatmul.bf16.gmra.mxu2 %v14891_v49  ;;  %7338 = vmatmul.bf16.gmra.mxu0 %v14892_v7  ;;  %v14897_v7 = vld [vmem:[#allocation62_spill] sm:$0xff] }
 0x8f2   : > { %14890 = vst [vmem:[#allocation25_spill] sm:$0xff] %v12940_v39 }
 0x8f3   : > { %7179 = vmatmul.bf16.gmra.mxu3 %v14893_v3 }
 0x8f4   : > { %v6971_v1 = vpop.f32.mrf.mxu2 }
 0x8f5   : > { %v6972_v62 = vadd.f32 %v6971_v1, %v14894_v19 }
 0x8f6   : > { %v7140_v21 = vpop.f32.mrf.mxu3  ;;  %v7301_v57 = vpop.f32.mrf.mxu0 }
 0x8f7   : > { %v7428_v42 = vpop.f32.mrf.mxu1  ;;  %v7141_v17 = vadd.f32 %v7140_v21, %v6972_v62  ;;  %v12946_v10 = vadd.f32 %v7301_v57, %v7133_v4  ;;  %v14899_v4 = vld [vmem:[#allocation144_spill] sm:$0xff] }
 0x8f8   : > { %v12949_v45 = vadd.f32 %v7428_v42, %v12812_v55  ;;  %v14900_v55 = vld [vmem:[#allocation142_spill] sm:$0xff]  ;;  %v14901_v21 = vld [vmem:[#allocation112_spill] sm:$0xff] }
 0x8f9   : > { %7467 = vmatmul.bf16.gmra.mxu1 %v14896_v61  ;;  %v14902_v42 = vld [vmem:[#allocation66_spill] sm:$0xff] }
 0x8fa   : > { %14895 = vst [vmem:[#allocation49_spill] sm:$0xff] %v12949_v45 }
 0x8fc   : > { %v6973_v60 = vpop.f32.mrf.mxu2 }
 0x8fd   : > { %v6974_v3 = vadd.f32 %v6973_v60, %v14897_v7 }
 0x8fe   : > { %v7142_v33 = vpop.f32.mrf.mxu3  ;;  %v7304_v39 = vpop.f32.mrf.mxu0 }
 0x8ff   : > { %v7430_v54 = vpop.f32.mrf.mxu1  ;;  %v7143_v1 = vadd.f32 %v7142_v33, %v6974_v3  ;;  %v12953_v19 = vadd.f32 %v7304_v39, %v7136_v41 }
 0x900   : > { %v12956_v62 = vadd.f32 %v7430_v54, %v12821_v44  ;;  %v14904_v54 = vld [vmem:[#allocation54_spill] sm:$0xff] }
 0x901   : > { %7015 = vmatmul.bf16.gmra.mxu2 %v14899_v4  ;;  %7343 = vmatmul.bf16.gmra.mxu0 %v14900_v55 }
 0x902   : > { %14898 = vst [vmem:[#allocation45_spill] sm:$0xff] %v12956_v62 }
 0x903   : > { %7184 = vmatmul.bf16.gmra.mxu3 %v14901_v21 }
 0x904   : > { %v6976_v57 = vpop.f32.mrf.mxu2 }
 0x905   : > { %v6977_v27 = vadd.f32 %v6976_v57, %v14902_v42  ;;  %v7646_v42 = vld [vmem:[#allocation11 + $0x50] sm:$0xff] }
 0x906   : > { %v7145_v45 = vpop.f32.mrf.mxu3  ;;  %v7306_v60 = vpop.f32.mrf.mxu0  ;;  %7662 = vmatpush.msrb.mxu2 %v7646_v42 }
 0x907   : > { %v7433_v7 = vpop.f32.mrf.mxu1  ;;  %v7146_v22 = vadd.f32 %v7145_v45, %v6977_v27  ;;  %v12962_v9 = vadd.f32 %v7306_v60, %v7138_v25  ;;  %v14906_v45 = vld [vmem:[#allocation145_spill] sm:$0xff] }
 0x908   : > { %v12965_v41 = vadd.f32 %v7433_v7, %v12828_v23  ;;  %v14907_v25 = vld [vmem:[#allocation97_spill] sm:$0xff]  ;;  %v14908_v23 = vld [vmem:[#allocation35_spill] sm:$0xff] }
 0x909   : > { %7472 = vmatmul.bf16.gmra.mxu1 %v14841_v32  ;;  %v14909_v27 = vld [vmem:[#allocation61_spill] sm:$0xff] }
 0x90a   : > { %14903 = vst [vmem:[#allocation71_spill] sm:$0xff] %v12965_v41 }
 0x90c   : > { %v6978_v44 = vpop.f32.mrf.mxu2 }
 0x90d   : > { %v6979_v39 = vadd.f32 %v6978_v44, %v14904_v54 }
 0x90e   : > { %v7147_v3 = vpop.f32.mrf.mxu3  ;;  %v7309_v33 = vpop.f32.mrf.mxu0 }
 0x90f   : > { %v7435_v55 = vpop.f32.mrf.mxu1  ;;  %v7148_v21 = vadd.f32 %v7147_v3, %v6979_v39  ;;  %v12969_v62 = vadd.f32 %v7309_v33, %v7141_v17  ;;  %v7696_v3 = vld [vmem:[#allocation12 + $0x70] sm:$0xff] }
 0x910   : > { %v12972_v57 = vadd.f32 %v7435_v55, %v12834_v8  ;;  %7699 = vmatpush.msrb.mxu3 %v7696_v3  ;;  %v14911_v55 = vld [vmem:[#allocation92_spill] sm:$0xff] }
 0x911   : > { %7020 = vmatmul.bf16.gmra.mxu2 %v14906_v45  ;;  %7348 = vmatmul.bf16.gmra.mxu0 %v14907_v25 }
 0x912   : > { %14905 = vst [vmem:[#allocation32_spill] sm:$0xff] %v12972_v57 }
 0x913   : > { %7189 = vmatmul.bf16.gmra.mxu3 %v14908_v23 }
 0x914   : > { %v6981_v32 = vpop.f32.mrf.mxu2 }
 0x915   : > { %v6982_v60 = vadd.f32 %v6981_v32, %v14909_v27 }
 0x916   : > { %v7150_v7 = vpop.f32.mrf.mxu3  ;;  %v7311_v44 = vpop.f32.mrf.mxu0 }
 0x917   : > { %v7438_v54 = vpop.f32.mrf.mxu1  ;;  %v7151_v39 = vadd.f32 %v7150_v7, %v6982_v60  ;;  %v12978_v17 = vadd.f32 %v7311_v44, %v7143_v1  ;;  %v14913_v1 = vld [vmem:[#allocation117_spill] sm:$0xff]  ;;  %v14915_v7 = vld [vmem:[#allocation39_spill] sm:$0xff] }
 0x918   : > { %v12981_v8 = vadd.f32 %v7438_v54, %v12841_v13  ;;  %v14914_v13 = vld [vmem:[#allocation102_spill] sm:$0xff] }
 0x919   : > { %7477 = vmatmul.bf16.gmra.mxu1 %v14848_v24 }
 0x91a   : > { %14910 = vst [vmem:[#allocation134_spill] sm:$0xff] %v12981_v8  ;;  %v14919_v8 = vld [vmem:[#allocation146_spill] sm:$0xff] }
 0x91c   : > { %v6983_v33 = vpop.f32.mrf.mxu2 }
 0x91d   : > { %v6984_v25 = vadd.f32 %v6983_v33, %v14911_v55 }
 0x91e   : > { %v7152_v23 = vpop.f32.mrf.mxu3  ;;  %v7314_v42 = vpop.f32.mrf.mxu0 }
 0x91f   : > { %v7440_v57 = vpop.f32.mrf.mxu1  ;;  %v7153_v32 = vadd.f32 %v7152_v23, %v6984_v25  ;;  %v12985_v27 = vadd.f32 %v7314_v42, %v7146_v22 }
 0x920   : > { %v12988_v60 = vadd.f32 %v7440_v57, %v12850_v28  ;;  %v14917_v28 = vld [vmem:[#allocation135_spill] sm:$0xff] }
 0x921   : > { %7025 = vmatmul.bf16.gmra.mxu2 %v14913_v1  ;;  %7353 = vmatmul.bf16.gmra.mxu0 %v14914_v13 }
 0x922   : > { %14912 = vst [vmem:[#allocation128_spill] sm:$0xff] %v12988_v60 }
 0x923   : > { %7194 = vmatmul.bf16.gmra.mxu3 %v14915_v7 }
 0x924   : > { %v6986_v24 = vpop.f32.mrf.mxu2 }
 0x926   : > { %v7155_v44 = vpop.f32.mrf.mxu3  ;;  %v7316_v54 = vpop.f32.mrf.mxu0 }
 0x927   : > { %v7443_v3 = vpop.f32.mrf.mxu1  ;;  %v12993_v33 = vadd.f32 %v7316_v54, %v7148_v21  ;;  %v14920_v21 = vld [vmem:[#allocation118_spill] sm:$0xff]  ;;  %v14921_v54 = vld [vmem:[#allocation124_spill] sm:$0xff] }
 0x928   : > { %v12996_v55 = vadd.f32 %v7443_v3, %v12857_v38  ;;  %v7645_v38 = vld [vmem:[#allocation11 + $0x48] sm:$0xff] }
 0x929   : > { %7482 = vmatmul.bf16.gmra.mxu1 %v14854_v56  ;;  %7663 = vmatpush.msrb.mxu2 %v7645_v38 }
 0x92a   : > { %14916 = vst [vmem:[#allocation81_spill] sm:$0xff] %v12996_v55 }
 0x92c   : > { %v6988_v22 = vpop.f32.mrf.mxu2 }
 0x92d   : > { %v6989_v57 = vadd.f32 %v6988_v22, %v14917_v28 }
 0x92e   : > { %v7157_v25 = vpop.f32.mrf.mxu3  ;;  %v7319_v23 = vpop.f32.mrf.mxu0 }
 0x92f   : > { %v7445_v42 = vpop.f32.mrf.mxu1  ;;  %v7158_v13 = vadd.f32 %v7157_v25, %v6989_v57  ;;  %v13000_v60 = vadd.f32 %v7319_v23, %v7151_v39  ;;  %v14923_v25 = vld [vmem:[#allocation55_spill] sm:$0xff] }
 0x930   : > { %v13003_v7 = vadd.f32 %v7445_v42, %v12866_v18  ;;  %v6987_v23 = vadd.f32 %v6986_v24, %v14923_v25  ;;  %v7695_v42 = vld [vmem:[#allocation12 + $0x68] sm:$0xff] }
 0x931   : > { %7030 = vmatmul.bf16.gmra.mxu2 %v14919_v8  ;;  %7358 = vmatmul.bf16.gmra.mxu0 %v14920_v21  ;;  %v14925_v24 = vld [vmem:[#allocation119_spill] sm:$0xff] }
 0x932   : > { %14918 = vst [vmem:[#allocation53_spill] sm:$0xff] %v13003_v7  ;;  %7700 = vmatpush.msrb.mxu3 %v7695_v42  ;;  %v7156_v38 = vadd.f32 %v7155_v44, %v6987_v23  ;;  %v14926_v42 = vld [vmem:[#allocation139_spill] sm:$0xff] }
 0x933   : > { %7199 = vmatmul.bf16.gmra.mxu3 %v14921_v54 }
 0x934   : > { %v6991_v56 = vpop.f32.mrf.mxu2 }
 0x935   : > { %v6992_v3 = vadd.f32 %v6991_v56, %v12645_v31 }
 0x936   : > { %v7160_v22 = vpop.f32.mrf.mxu3  ;;  %v7321_v28 = vpop.f32.mrf.mxu0 }
 0x937   : > { %v7448_v55 = vpop.f32.mrf.mxu1  ;;  %v7161_v57 = vadd.f32 %v7160_v22, %v6992_v3  ;;  %v13009_v39 = vadd.f32 %v7321_v28, %v7153_v32 }
 0x938   : > { %v13012_v18 = vadd.f32 %v7448_v55, %v12873_v29  ;;  %v14924_v29 = vld [vmem:[#allocation125_spill] sm:$0xff] }
 0x939   : > { %7487 = vmatmul.bf16.gmra.mxu1 %v14859_v2 }
 0x93a   : > { %14922 = vst [vmem:[#allocation132_spill] sm:$0xff] %v13012_v18 }
 0x93c   : > { %v6993_v21 = vpop.f32.mrf.mxu2 }
 0x93d   : > { %v6994_v54 = vadd.f32 %v6993_v21, %v12652_v20 }
 0x93e   : > { %v7162_v31 = vpop.f32.mrf.mxu3  ;;  %v7324_v56 = vpop.f32.mrf.mxu0 }
 0x93f   : > { %v7450_v7 = vpop.f32.mrf.mxu1  ;;  %v7163_v41 = vadd.f32 %v7162_v31, %v6994_v54  ;;  %v13017_v3 = vadd.f32 %v7324_v56, %v7156_v38 }
 0x940   : > { %v13020_v32 = vadd.f32 %v7450_v7, %v12882_v37  ;;  %v5447_v7 = vrot.slane %v12525_v16, 1 }
 0x941   : > { %7035 = vmatmul.bf16.gmra.mxu2 %v14924_v29  ;;  %7363 = vmatmul.bf16.gmra.mxu0 %v14925_v24 }
 0x943   : > { %7204 = vmatmul.bf16.gmra.mxu3 %v12525_v16  ;;  %v7644_v16 = vld [vmem:[#allocation11 + $0x40] sm:$0xff] }
 0x944   : > { %v6996_v2 = vpop.f32.mrf.mxu2  ;;  %7664 = vmatpush.msrb.mxu2 %v7644_v16 }
 0x945   : > { %v6997_v44 = vadd.f32 %v6996_v2, %v12661_v50  ;;  %v14927_v50 = vld [vmem:[#allocation73_spill] sm:$0xff] }
 0x946   : > { %v7165_v55 = vpop.f32.mrf.mxu3  ;;  %v7326_v20 = vpop.f32.mrf.mxu0  ;;  %v5448_v56 = vrot.slane %v14927_v50, 1 }
 0x947   : > { %v7453_v22 = vpop.f32.mrf.mxu1  ;;  %v7166_v28 = vadd.f32 %v7165_v55, %v6997_v44  ;;  %v13026_v25 = vadd.f32 %v7326_v20, %v7158_v13 }
 0x948   : > { %v13029_v23 = vadd.f32 %v7453_v22, %v12889_v36  ;;  %v13041_v36 = vsel %vm1763_vm4, %v5447_v7, %v5448_v56  ;;  %vm7654_vm4 = vcmask 1041409  }
 0x949   : > { %7492 = vmatmul.bf16.gmra.mxu1 %v14864_v11  ;;  %v14928_v11 = vld [vmem:[#allocation122_spill] sm:$0xff] }
 0x94c   : > { %v6998_v37 = vpop.f32.mrf.mxu2 }
 0x94d   : > { %v6999_v21 = vadd.f32 %v6998_v37, %v14926_v42  ;;  %v7694_v42 = vld [vmem:[#allocation12 + $0x60] sm:$0xff] }
 0x94e   : > { %v7167_v38 = vpop.f32.mrf.mxu3  ;;  %v7329_v54 = vpop.f32.mrf.mxu0  ;;  %7701 = vmatpush.msrb.mxu3 %v7694_v42 }
 0x94f   : > { %v7455_v31 = vpop.f32.mrf.mxu1  ;;  %v7168_v24 = vadd.f32 %v7167_v38, %v6999_v21  ;;  %v13035_v2 = vadd.f32 %v7329_v54, %v7161_v57 }
 0x950   : > { %v13038_v13 = vadd.f32 %v7455_v31, %v12898_v63 }
 0x951   : > { %7040 = vmatmul.bf16.gmra.mxu2 %v13041_v36  ;;  %7368 = vmatmul.bf16.gmra.mxu0 %v14928_v11 }
 0x953   : > { %7209 = vmatmul.bf16.gmra.mxu3 %v14829_v59 }
 0x954   : > { %v7001_v44 = vpop.f32.mrf.mxu2 }
 0x955   : > { %v7002_v55 = vadd.f32 %v7001_v44, %v12685_v52 }
 0x956   : > { %v7170_v20 = vpop.f32.mrf.mxu3  ;;  %v7331_v57 = vpop.f32.mrf.mxu0 }
 0x957   : > { %v7458_v22 = vpop.f32.mrf.mxu1  ;;  %v7171_v37 = vadd.f32 %v7170_v20, %v7002_v55  ;;  %v13047_v63 = vadd.f32 %v7331_v57, %v7163_v41  ;;  %v14929_v41 = vld [vmem:[#allocation87_spill] sm:$0xff] }
 0x958   : > { %v13050_v7 = vadd.f32 %v7458_v22, %v12905_v51  ;;  %v14930_v57 = vld [vmem:[#allocation75_spill] sm:$0xff] }
 0x959   : > { %7497 = vmatmul.bf16.gmra.mxu1 %v14870_v0 }
 0x95c   : > { %v7003_v21 = vpop.f32.mrf.mxu2 }
 0x95d   : > { %v7004_v59 = vadd.f32 %v7003_v21, %v12693_v48 }
 0x95e   : > { %v7172_v38 = vpop.f32.mrf.mxu3  ;;  %v7334_v54 = vpop.f32.mrf.mxu0 }
 0x95f   : > { %v7460_v31 = vpop.f32.mrf.mxu1  ;;  %v7173_v52 = vadd.f32 %v7172_v38, %v7004_v59  ;;  %v13054_v50 = vadd.f32 %v7334_v54, %v7166_v28  ;;  %v14931_v54 = vld [vmem:[#allocation137_spill] sm:$0xff] }
 0x960   : > { %v13057_v56 = vadd.f32 %v7460_v31, %v12914_v43 }
 0x961   : > { %7373 = vmatmul.bf16.gmra.mxu0 %v14929_v41 }
 0x964   : > { %v7006_v51 = vpop.f32.mrf.mxu2 }
 0x965   : > { %v7007_v11 = vadd.f32 %v7006_v51, %v12702_v47 }
 0x966   : > { %v7175_v0 = vpop.f32.mrf.mxu3  ;;  %v7336_v16 = vpop.f32.mrf.mxu0 }
 0x967   : > { %v7463_v44 = vpop.f32.mrf.mxu1  ;;  %v7176_v55 = vadd.f32 %v7175_v0, %v7007_v11  ;;  %v13061_v20 = vadd.f32 %v7336_v16, %v7168_v24  ;;  %v7643_v24 = vld [vmem:[#allocation11 + $0x38] sm:$0xff] }
 0x968   : > { %v13064_v48 = vadd.f32 %v7463_v44, %v12921_v26  ;;  %7665 = vmatpush.msrb.mxu2 %v7643_v24  ;;  %v14935_v24 = vld [vmem:[#allocation79_spill] sm:$0xff] }
 0x969   : > { %7502 = vmatmul.bf16.gmra.mxu1 %v14877_v53 }
 0x96c   : > { %v7008_v28 = vpop.f32.mrf.mxu2 }
 0x96d   : > { %v7009_v43 = vadd.f32 %v7008_v28, %v14930_v57 }
 0x96e   : > { %v7177_v22 = vpop.f32.mrf.mxu3  ;;  %v7339_v42 = vpop.f32.mrf.mxu0 }
 0x96f   : > { %v7465_v21 = vpop.f32.mrf.mxu1  ;;  %v7178_v59 = vadd.f32 %v7177_v22, %v7009_v43  ;;  %v13068_v38 = vadd.f32 %v7339_v42, %v7171_v37 }
 0x970   : > { %v13071_v47 = vadd.f32 %v7465_v21, %v12930_v34  ;;  %v7693_v34 = vld [vmem:[#allocation12 + $0x58] sm:$0xff] }
 0x971   : > { %7378 = vmatmul.bf16.gmra.mxu0 %v14842_v6  ;;  %7702 = vmatpush.msrb.mxu3 %v7693_v34  ;;  %v14933_v6 = vld [vmem:[#allocation93_spill] sm:$0xff] }
 0x974   : > { %v7011_v26 = vpop.f32.mrf.mxu2 }
 0x975   : > { %v7012_v31 = vadd.f32 %v7011_v26, %v14931_v54 }
 0x976   : > { %v7180_v53 = vpop.f32.mrf.mxu3  ;;  %v7341_v41 = vpop.f32.mrf.mxu0 }
 0x977   : > { %v7468_v51 = vpop.f32.mrf.mxu1  ;;  %v7181_v11 = vadd.f32 %v7180_v53, %v7012_v31  ;;  %v13075_v0 = vadd.f32 %v7341_v41, %v7173_v52 }
 0x978   : > { %v13078_v16 = vadd.f32 %v7468_v51, %v12937_v14 }
 0x979   : > { %7507 = vmatmul.bf16.gmra.mxu1 %v14884_v30 }
 0x97a   : > { %14932 = vst [vmem:[#allocation129_spill] sm:$0xff] %v13078_v16 }
 0x97c   : > { %v7013_v37 = vpop.f32.mrf.mxu2 }
 0x97d   : > { %v7014_v44 = vadd.f32 %v7013_v37, %v14933_v6  ;;  %v7642_v37 = vld [vmem:[#allocation11 + $0x30] sm:$0xff] }
 0x97e   : > { %v7182_v28 = vpop.f32.mrf.mxu3  ;;  %v7344_v57 = vpop.f32.mrf.mxu0  ;;  %7666 = vmatpush.msrb.mxu2 %v7642_v37 }
 0x97f   : > { %v7470_v43 = vpop.f32.mrf.mxu1  ;;  %v7183_v22 = vadd.f32 %v7182_v28, %v7014_v44  ;;  %v13082_v42 = vadd.f32 %v7344_v57, %v7176_v55 }
 0x980   : > { %v13085_v21 = vadd.f32 %v7470_v43, %v12946_v10 }
 0x982   : > { %14934 = vst [vmem:[#allocation110_spill] sm:$0xff] %v13085_v21 }
 0x984   : > { %v7016_v52 = vpop.f32.mrf.mxu2 }
 0x985   : > { %v7017_v14 = vadd.f32 %v7016_v52, %v14935_v24 }
 0x986   : > { %v7185_v26 = vpop.f32.mrf.mxu3  ;;  %v7346_v54 = vpop.f32.mrf.mxu0 }
 0x987   : > { %v7473_v30 = vpop.f32.mrf.mxu1  ;;  %v7186_v31 = vadd.f32 %v7185_v26, %v7017_v14  ;;  %v13088_v53 = vadd.f32 %v7346_v54, %v7178_v59 }
 0x988   : > { %v13091_v41 = vadd.f32 %v7473_v30, %v12953_v19  ;;  %v7692_v19 = vld [vmem:[#allocation12 + $0x50] sm:$0xff] }
 0x989   : > { %7512 = vmatmul.bf16.gmra.mxu1 %v14891_v49  ;;  %7703 = vmatpush.msrb.mxu3 %v7692_v19 }
 0x98a   : > { %14936 = vst [vmem:[#allocation40_spill] sm:$0xff] %v13091_v41 }
 0x98e   : > { %v7349_v51 = vpop.f32.mrf.mxu0 }
 0x98f   : > { %v7475_v55 = vpop.f32.mrf.mxu1  ;;  %v13094_v34 = vadd.f32 %v7349_v51, %v7181_v11 }
 0x990   : > { %v13097_v10 = vadd.f32 %v7475_v55, %v12962_v9 }
 0x992   : > { %14937 = vst [vmem:[#allocation69_spill] sm:$0xff] %v13097_v10 }
 0x996   : > { %v7351_v6 = vpop.f32.mrf.mxu0 }
 0x997   : > { %v7478_v44 = vpop.f32.mrf.mxu1  ;;  %v13099_v28 = vadd.f32 %v7351_v6, %v7183_v22 }
 0x998   : > { %v13102_v59 = vadd.f32 %v7478_v44, %v12969_v62 }
 0x999   : > { %7517 = vmatmul.bf16.gmra.mxu1 %v14899_v4  ;;  %v7641_v4 = vld [vmem:[#allocation11 + $0x28] sm:$0xff] }
 0x99a   : > { %14938 = vst [vmem:[#allocation59_spill] sm:$0xff] %v13102_v59  ;;  %7667 = vmatpush.msrb.mxu2 %v7641_v4  ;;  %v7688_v4 = vld [vmem:[#allocation12 + $0x30] sm:$0xff] }
 0x99e   : > { %v7354_v49 = vpop.f32.mrf.mxu0 }
 0x99f   : > { %v7480_v57 = vpop.f32.mrf.mxu1  ;;  %v13105_v11 = vadd.f32 %v7354_v49, %v7186_v31 }
 0x9a0   : > { %v13108_v9 = vadd.f32 %v7480_v57, %v12978_v17  ;;  %v7691_v17 = vld [vmem:[#allocation12 + $0x48] sm:$0xff]  ;;  %v13158_v57 = vpop.f32.mrf.mxu2 }
 0x9a1   : > { %7704 = vmatpush.msrb.mxu3 %v7691_v17 }
 0x9a2   : > { %14939 = vst [vmem:[#allocation91_spill] sm:$0xff] %v13108_v9 }
 0x9a7   : > { %v7483_v43 = vpop.f32.mrf.mxu1 }
 0x9a8   : > { %v13111_v52 = vadd.f32 %v7483_v43, %v12985_v27  ;;  %v13160_v43 = vpop.f32.mrf.mxu3 }
 0x9a9   : > { %7522 = vmatmul.bf16.gmra.mxu1 %v14906_v45 }
 0x9aa   : > { %14940 = vst [vmem:[#allocation50_spill] sm:$0xff] %v13111_v52 }
 0x9af   : > { %v7485_v22 = vpop.f32.mrf.mxu1 }
 0x9b0   : > { %v13115_v62 = vadd.f32 %v7485_v22, %v12993_v33  ;;  %v13169_v17 = vpop.f32.mrf.mxu3 }
 0x9b2   : > { %14941 = vst [vmem:[#allocation74_spill] sm:$0xff] %v13115_v62 }
 0x9b7   : > { %v7488_v24 = vpop.f32.mrf.mxu1 }
 0x9b8   : > { %v13118_v14 = vadd.f32 %v7488_v24, %v13000_v60  ;;  %v7640_v60 = vld [vmem:[#allocation11 + $0x20] sm:$0xff]  ;;  %v13167_v24 = vpop.f32.mrf.mxu2 }
 0x9b9   : > { %7527 = vmatmul.bf16.gmra.mxu1 %v14913_v1  ;;  %7668 = vmatpush.msrb.mxu2 %v7640_v60 }
 0x9ba   : > { %14942 = vst [vmem:[#allocation78_spill] sm:$0xff] %v13118_v14 }
 0x9bf   : > { %v7490_v26 = vpop.f32.mrf.mxu1 }
 0x9c0   : > { %v13122_v27 = vadd.f32 %v7490_v26, %v13009_v39  ;;  %v7690_v39 = vld [vmem:[#allocation12 + $0x40] sm:$0xff] }
 0x9c1   : > { %7705 = vmatpush.msrb.mxu3 %v7690_v39 }
 0x9c2   : > { %14943 = vst [vmem:[#allocation68_spill] sm:$0xff] %v13122_v27 }
 0x9c7   : > { %v7493_v54 = vpop.f32.mrf.mxu1 }
 0x9c8   : > { %v13125_v45 = vadd.f32 %v7493_v54, %v13017_v3  ;;  %v13176_v54 = vpop.f32.mrf.mxu2 }
 0x9c9   : > { %7532 = vmatmul.bf16.gmra.mxu1 %v14919_v8 }
 0x9ca   : > { %14944 = vst [vmem:[#allocation26_spill] sm:$0xff] %v13125_v45 }
 0x9cf   : > { %v7495_v33 = vpop.f32.mrf.mxu1 }
 0x9d0   : > { %v13129_v30 = vadd.f32 %v7495_v33, %v13026_v25  ;;  %v13185_v39 = vpop.f32.mrf.mxu2 }
 0x9d2   : > { %14945 = vst [vmem:[#allocation72_spill] sm:$0xff] %v13129_v30 }
 0x9d7   : > { %v7498_v31 = vpop.f32.mrf.mxu1 }
 0x9d8   : > { %v13132_v1 = vadd.f32 %v7498_v31, %v13035_v2  ;;  %v7639_v2 = vld [vmem:[#allocation11 + $0x18] sm:$0xff] }
 0x9d9   : > { %7537 = vmatmul.bf16.gmra.mxu1 %v14924_v29  ;;  %7669 = vmatpush.msrb.mxu2 %v7639_v2  ;;  %v7553_v2 = vadd.f32 %v12844_v15, %v12837_v46  ;;  %v14952_v15 = vld [vmem:[#allocation103_spill] sm:$0xff] }
 0x9da   : > { %14946 = vst [vmem:[#allocation98_spill] sm:$0xff] %v13132_v1 }
 0x9df   : > { %v7500_v51 = vpop.f32.mrf.mxu1 }
 0x9e0   : > { %v13136_v3 = vadd.f32 %v7500_v51, %v13047_v63  ;;  %v7689_v63 = vld [vmem:[#allocation12 + $0x38] sm:$0xff] }
 0x9e1   : > { %7706 = vmatpush.msrb.mxu3 %v7689_v63  ;;  %v13198_v63 = vpop.f32.mrf.mxu2 }
 0x9e2   : > { %14947 = vst [vmem:[#allocation88_spill] sm:$0xff] %v13136_v3 }
 0x9e3   : > { %7707 = vmatpush.msrb.mxu3 %v7688_v4 }
 0x9e7   : > { %v7503_v55 = vpop.f32.mrf.mxu1 }
 0x9e8   : > { %v13139_v8 = vadd.f32 %v7503_v55, %v13054_v50  ;;  %v7637_v55 = vld [vmem:[#allocation11 + $0x8] sm:$0xff] }
 0x9e9   : > { %7542 = vmatmul.bf16.gmra.mxu1 %v13041_v36 }
 0x9ea   : > { %14948 = vst [vmem:[#allocation83_spill] sm:$0xff] %v13139_v8 }
 0x9ef   : > { %v7505_v25 = vpop.f32.mrf.mxu1 }
 0x9f0   : > { %v13143_v37 = vadd.f32 %v7505_v25, %v13061_v20 }
 0x9f2   : > { %14949 = vst [vmem:[#allocation130_spill] sm:$0xff] %v13143_v37 }
 0x9f7   : > { %v7508_v6 = vpop.f32.mrf.mxu1 }
 0x9f8   : > { %v13146_v29 = vadd.f32 %v7508_v6, %v13068_v38  ;;  %v7638_v38 = vld [vmem:[#allocation11 + $0x10] sm:$0xff] }
 0x9f9   : > { %7547 = vmatmul.bf16.gmra.mxu1 %v14896_v61  ;;  %7670 = vmatpush.msrb.mxu2 %v7638_v38  ;;  %v13162_v61 = vpop.f32.mrf.mxu0 }
 0x9fa   : > { %14950 = vst [vmem:[#allocation67_spill] sm:$0xff] %v13146_v29 }
 0x9fb   : > { %7671 = vmatpush.msrb.mxu2 %v7637_v55  ;;  %v14951_v55 = vld [vmem:[#allocation116_spill] sm:$0xff] }
 0x9ff   : > { %v7510_v44 = vpop.f32.mrf.mxu1 }
 0xa00   : > { %v13150_v50 = vadd.f32 %v7510_v44, %v13075_v0  ;;  %v7687_v44 = vld [vmem:[#allocation12 + $0x28] sm:$0xff] }
 0xa01   : > { %v13174_v26 = vpop.f32.mrf.mxu0  ;;  %7708 = vmatpush.msrb.mxu3 %v7687_v44  ;;  %v14953_v44 = vld [vmem:[#allocation123_spill] sm:$0xff] }
 0xa07   : > { %v7513_v19 = vpop.f32.mrf.mxu1 }
 0xa08   : > { %v13153_v36 = vadd.f32 %v7513_v19, %v13082_v42 }
 0xa09   : > { %v13183_v31 = vpop.f32.mrf.mxu0 }
 0xa0f   : > { %v7515_v20 = vpop.f32.mrf.mxu1 }
 0xa10   : > { %v13156_v49 = vadd.f32 %v7515_v20, %v13088_v53 }
 0xa11   : > { %v13191_v25 = vpop.f32.mrf.mxu0 }
 0xa17   : > { %v7518_v22 = vpop.f32.mrf.mxu1 }
 0xa18   : > { %v13165_v0 = vadd.f32 %v7518_v22, %v13094_v34  ;;  %v13181_v34 = vpop.f32.mrf.mxu3 }
 0xa19   : > { %v13205_v4 = vpop.f32.mrf.mxu0 }
 0xa1f   : > { %v7520_v42 = vpop.f32.mrf.mxu1 }
 0xa20   : > { %v13172_v53 = vadd.f32 %v7520_v42, %v13099_v28  ;;  %v13189_v28 = vpop.f32.mrf.mxu3 }
 0xa27   : > { %v7523_v33 = vpop.f32.mrf.mxu1 }
 0xa28   : > { %v13179_v60 = vadd.f32 %v7523_v33, %v13105_v11  ;;  %v7554_v11 = vadd.f32 %v7553_v2, %v12853_v40  ;;  %v13202_v38 = vpop.f32.mrf.mxu3  ;;  %v13211_v40 = vpop.f32.mrf.mxu2 }
 0xa2a   : > { %v7555_v19 = vadd.f32 %v7554_v11, %v12860_v12  ;;  %v7590_v11 = vadd.f32 %v13097_v10, %v13091_v41  ;;  %v14954_v12 = vld [vmem:[#allocation41_spill] sm:$0xff] }
 0xa2c   : > { %v7556_v20 = vadd.f32 %v7555_v19, %v12869_v5 }
 0xa2e   : > { %v7557_v22 = vadd.f32 %v7556_v20, %v12876_v58  ;;  %v7591_v20 = vadd.f32 %v7590_v11, %v13102_v59 }
 0xa2f   : > { %v13187_v51 = vpop.f32.mrf.mxu1 }
 0xa30   : > { %v7558_v33 = vadd.f32 %v7557_v22, %v12885_v35  ;;  %v13220_v58 = vpop.f32.mrf.mxu3  ;;  %v13223_v22 = vpop.f32.mrf.mxu0 }
 0xa31   : > { %14955 = vst [vmem:[#allocation101_spill] sm:$0xff] %v13223_v22  ;;  %v13229_v41 = vpop.f32.mrf.mxu2 }
 0xa32   : > { %v7559_v2 = vadd.f32 %v7558_v33, %v14951_v55  ;;  %v7592_v33 = vadd.f32 %v7591_v20, %v13108_v9  ;;  %v14956_v55 = vld [vmem:[#allocation140_spill] sm:$0xff]  ;;  %v7636_v20 = vld [vmem:[#allocation11] sm:$0xff] }
 0xa33   : > { %7672 = vmatpush.msrb.mxu2 %v7636_v20 }
 0xa34   : > { %v7560_v46 = vadd.f32 %v7559_v2, %v14952_v15  ;;  %v7593_v2 = vadd.f32 %v7592_v33, %v13111_v52  ;;  %v14957_v15 = vld [vmem:[#allocation109_spill] sm:$0xff] }
 0xa35   : > { %v14960_v33 = vld [vmem:[#allocation45_spill] sm:$0xff] }
 0xa36   : > { %v7561_v19 = vadd.f32 %v7560_v46, %v14953_v44  ;;  %v7594_v46 = vadd.f32 %v7593_v2, %v13115_v62  ;;  %v14958_v44 = vld [vmem:[#allocation25_spill] sm:$0xff]  ;;  %v14961_v62 = vld [vmem:[#allocation71_spill] sm:$0xff] }
 0xa37   : > { %v13195_v6 = vpop.f32.mrf.mxu1 }
 0xa38   : > { %v7562_v21 = vadd.f32 %v7561_v19, %v14954_v12  ;;  %v7595_v19 = vadd.f32 %v7594_v46, %v13118_v14  ;;  %v14959_v12 = vld [vmem:[#allocation49_spill] sm:$0xff]  ;;  %v13237_v16 = vpop.f32.mrf.mxu3 }
 0xa39   : > { %v7036_v14 = vpop.f32.mrf.mxu2 }
 0xa3a   : > { %v7563_v35 = vadd.f32 %v7562_v21, %v14956_v55  ;;  %v7596_v21 = vadd.f32 %v7595_v19, %v13122_v27  ;;  %v14963_v19 = vld [vmem:[#allocation134_spill] sm:$0xff] }
 0xa3c   : > { %v7564_v10 = vadd.f32 %v7563_v35, %v14957_v15  ;;  %v13241_v35 = vpop.f32.mrf.mxu0  ;;  %v7597_v2 = vadd.f32 %v7596_v21, %v13125_v45  ;;  %v14964_v15 = vld [vmem:[#allocation128_spill] sm:$0xff] }
 0xa3e   : > { %v7565_v11 = vadd.f32 %v7564_v10, %v14958_v44  ;;  %v7598_v9 = vadd.f32 %v7597_v2, %v13129_v30  ;;  %v14962_v44 = vld [vmem:[#allocation32_spill] sm:$0xff]  ;;  %v14965_v2 = vld [vmem:[#allocation81_spill] sm:$0xff] }
 0xa3f   : > { %v13207_v42 = vpop.f32.mrf.mxu1 }
 0xa40   : > { %v7566_v22 = vadd.f32 %v7565_v11, %v14959_v12  ;;  %v7599_v12 = vadd.f32 %v7598_v9, %v13132_v1  ;;  %v13253_v21 = vpop.f32.mrf.mxu3 }
 0xa42   : > { %v7567_v52 = vadd.f32 %v7566_v22, %v14960_v33  ;;  %v7600_v22 = vadd.f32 %v7599_v12, %v13136_v3  ;;  %v7686_v33 = vld [vmem:[#allocation12 + $0x20] sm:$0xff] }
 0xa43   : > { %7709 = vmatpush.msrb.mxu3 %v7686_v33  ;;  %v14967_v33 = vld [vmem:[#allocation105_spill] sm:$0xff] }
 0xa44   : > { %v7568_v10 = vadd.f32 %v7567_v52, %v14961_v62  ;;  %v7601_v52 = vadd.f32 %v7600_v22, %v13139_v8  ;;  %v7019_v3 = vadd.f32 %v13158_v57, %v14967_v33  ;;  %v14968_v8 = vld [vmem:[#allocation80_spill] sm:$0xff] }
 0xa46   : > { %v7569_v46 = vadd.f32 %v7568_v10, %v14962_v44  ;;  %v13257_v10 = vpop.f32.mrf.mxu0  ;;  %v7602_v45 = vadd.f32 %v7601_v52, %v13143_v37  ;;  %v14966_v44 = vld [vmem:[#allocation53_spill] sm:$0xff] }
 0xa47   : > { %v13217_v5 = vpop.f32.mrf.mxu1  ;;  %v14969_v37 = vld [vmem:[#allocation65_spill] sm:$0xff] }
 0xa48   : > { %v7570_v27 = vadd.f32 %v7569_v46, %v14963_v19  ;;  %v7603_v12 = vadd.f32 %v7602_v45, %v13146_v29  ;;  %v7024_v45 = vadd.f32 %v13176_v54, %v14969_v37  ;;  %v7207_v29 = vpop.f32.mrf.mxu3  ;;  %v14971_v54 = vld [vmem:[#allocation85_spill] sm:$0xff] }
 0xa4a   : > { %v7571_v20 = vadd.f32 %v7570_v27, %v14964_v15  ;;  %v7038_v27 = vpop.f32.mrf.mxu2  ;;  %v7604_v22 = vadd.f32 %v7603_v12, %v13150_v50 }
 0xa4c   : > { %v7572_v30 = vadd.f32 %v7571_v20, %v14965_v2  ;;  %v7022_v2 = vadd.f32 %v13167_v24, %v14968_v8  ;;  %v7605_v52 = vadd.f32 %v7604_v22, %v13153_v36  ;;  %v14970_v24 = vld [vmem:[#allocation89_spill] sm:$0xff] }
 0xa4d   : > { %v7027_v33 = vadd.f32 %v13185_v39, %v14970_v24 }
 0xa4e   : > { %v7573_v9 = vadd.f32 %v7572_v30, %v14966_v44  ;;  %v13278_v12 = vpop.f32.mrf.mxu0  ;;  %v7191_v8 = vadd.f32 %v13169_v17, %v7022_v2  ;;  %v14972_v2 = vld [vmem:[#allocation108_spill] sm:$0xff] }
 0xa4f   : > { %v13233_v59 = vpop.f32.mrf.mxu1 }
 0xa50   : > { %v7574_v46 = vadd.f32 %v7573_v9, %v13012_v18  ;;  %v7188_v9 = vadd.f32 %v13160_v43, %v7019_v3  ;;  %v7606_v18 = vadd.f32 %v7605_v52, %v13156_v49  ;;  %v7193_v43 = vadd.f32 %v13181_v34, %v7024_v45 }
 0xa51   : > { %v7360_v52 = vadd.f32 %v13174_v26, %v7191_v8 }
 0xa52   : > { %v7575_v20 = vadd.f32 %v7574_v46, %v13020_v32  ;;  %v7357_v22 = vadd.f32 %v13162_v61, %v7188_v9  ;;  %v7607_v37 = vadd.f32 %v7606_v18, %v13165_v0  ;;  %v7032_v61 = vadd.f32 %v13211_v40, %v14972_v2  ;;  %v7041_v18 = vpop.f32.mrf.mxu2 }
 0xa53   : > { %v7196_v9 = vadd.f32 %v13189_v28, %v7027_v33  ;;  %v7362_v34 = vadd.f32 %v13183_v31, %v7193_v43 }
 0xa54   : > { %v7576_v30 = vadd.f32 %v7575_v20, %v13029_v23  ;;  %v7029_v20 = vadd.f32 %v13198_v63, %v14971_v54  ;;  %v13294_v17 = vadd.f32 %v13187_v51, %v7357_v22  ;;  %v13303_v63 = vadd.f32 %v13195_v6, %v7360_v52  ;;  %v7210_v6 = vpop.f32.mrf.mxu3  ;;  %v14976_v52 = vld [vmem:[#allocation22_spill] sm:$0xff] }
 0xa55   : > { %v7365_v24 = vadd.f32 %v13191_v25, %v7196_v9  ;;  %v13312_v28 = vadd.f32 %v13207_v42, %v7362_v34  ;;  %v7201_v33 = vadd.f32 %v13220_v58, %v7032_v61  ;;  %v14975_v25 = vld [vmem:[#allocation129_spill] sm:$0xff]  ;;  %v14979_v9 = vld [vmem:[#allocation99_spill] sm:$0xff] }
 0xa56   : > { %v7577_v57 = vadd.f32 %v7576_v30, %v13038_v13  ;;  %v7608_v30 = vadd.f32 %v7607_v37, %v13172_v53  ;;  %v7198_v8 = vadd.f32 %v13202_v38, %v7029_v20  ;;  %v14974_v37 = vld [vmem:[#allocation136_spill] sm:$0xff]  ;;  %v7379_v20 = vpop.f32.mrf.mxu0  ;;  %v7042_v34 = vadd.f32 %v7041_v18, %v14979_v9 }
 0xa57   : > { %v13247_v11 = vpop.f32.mrf.mxu1  ;;  %v13320_v38 = vadd.f32 %v13217_v5, %v7365_v24  ;;  %v9338_v5 = vmov 256.0  }
 0xa58   : > { %v7578_v3 = vadd.f32 %v7577_v57, %v13050_v7  ;;  %v7609_v45 = vadd.f32 %v7608_v30, %v13179_v60  ;;  %v14973_v57 = vld [vmem:[#allocation104_spill] sm:$0xff]  ;;  %v7367_v43 = vadd.f32 %v13205_v4, %v7198_v8  ;;  %v7039_v30 = vadd.f32 %v7038_v27, %v14976_v52  ;;  %v14978_v4 = vld [vmem:[#allocation110_spill] sm:$0xff]  ;;  %v7683_v8 = vld [vmem:[#allocation12 + $0x8] sm:$0xff] }
 0xa59   : > { %v7034_v51 = vadd.f32 %v13229_v41, %v14973_v57  ;;  %8973 = vrcp.f32 %v9338_v5 }
 0xa5a   : > { %v7579_v39 = vadd.f32 %v7578_v3, %v13057_v56  ;;  %v7610_v40 = vadd.f32 %v7609_v45, %v13294_v17  ;;  %v7037_v3 = vadd.f32 %v7036_v14, %v14974_v37  ;;  %v13328_v14 = vadd.f32 %v13233_v59, %v7367_v43  ;;  %v7685_v45 = vld [vmem:[#allocation12 + $0x18] sm:$0xff]  ;;  %v7043_v59 = vpop.f32.mrf.mxu2  ;;  %v7682_v37 = vld [vmem:[#allocation12] sm:$0xff] }
 0xa5b   : > { %v7203_v42 = vadd.f32 %v13237_v16, %v7034_v51  ;;  %7710 = vmatpush.msrb.mxu3 %v7685_v45  ;;  %v7208_v24 = vadd.f32 %v7207_v29, %v7039_v30 }
 0xa5c   : > { %v7580_v26 = vadd.f32 %v7579_v39, %v13064_v48  ;;  %v7611_v41 = vadd.f32 %v7610_v40, %v13303_v63  ;;  %v14977_v39 = vld [vmem:[#allocation101_spill] sm:$0xff]  ;;  %v7206_v16 = vadd.f32 %v13253_v21, %v7037_v3  ;;  %v14980_v3 = vld [vmem:[#allocation36_spill] sm:$0xff] }
 0xa5d   : > { %v7370_v58 = vadd.f32 %v14977_v39, %v7201_v33  ;;  %v7372_v57 = vadd.f32 %v13241_v35, %v7203_v42  ;;  %v7211_v33 = vadd.f32 %v7210_v6, %v7042_v34  ;;  %v7044_v43 = vadd.f32 %v7043_v59, %v14980_v3 }
 0xa5e   : > { %v7581_v31 = vadd.f32 %v7580_v26, %v13071_v47  ;;  %v7612_v2 = vadd.f32 %v7611_v41, %v13312_v28  ;;  %v7684_v26 = vld [vmem:[#allocation12 + $0x10] sm:$0xff]  ;;  %v7375_v40 = vadd.f32 %v13257_v10, %v7206_v16  ;;  %v7381_v6 = vpop.f32.mrf.mxu0 }
 0xa5f   : > { %v13261_v1 = vpop.f32.mrf.mxu1  ;;  %v13336_v51 = vadd.f32 %v13247_v11, %v7370_v58  ;;  %7711 = vmatpush.msrb.mxu3 %v7684_v26  ;;  %v7377_v11 = vadd.f32 %v13278_v12, %v7208_v24  ;;  %v8974_v10 = vpop.eup %8973  ;;  %v7380_v42 = vadd.f32 %v7379_v20, %v7211_v33 }
 0xa60   : > { %v7582_v54 = vadd.f32 %v7581_v31, %v14975_v25  ;;  %v7613_v27 = vadd.f32 %v7612_v2, %v13320_v38  ;;  %v13341_v31 = vadd.f32 %v13261_v1, %v7372_v57  ;;  %v7628_v2 = vmul.f32 256.0, %v8974_v10 }
 0xa61   : > { %7712 = vmatpush.msrb.mxu3 %v7683_v8  ;;  %vm7632_vm3 = vweird.f32 %v8974_v10 }
 0xa62   : > { %v7583_v61 = vadd.f32 %v7582_v54, %v14978_v4  ;;  %v7614_v18 = vadd.f32 %v7613_v27, %v13328_v14  ;;  %v7212_v54 = vpop.f32.mrf.mxu3 }
 0xa63   : > { %7713 = vmatpush.msrb.mxu3 %v7682_v37  ;;  %v7213_v39 = vadd.f32 %v7212_v54, %v7044_v43 }
 0xa64   : > { %v7584_v21 = vrot.slane %v7583_v61, 4  ;;  %v7615_v41 = vadd.f32 %v7614_v18, %v13336_v51 }
 0xa65   : > { %v7382_v9 = vadd.f32 %v7381_v6, %v7213_v39 }
 0xa66   : > { %v7616_v1 = vadd.f32 %v7615_v41, %v13341_v31  ;;  %v7585_v30 = vadd.f32 %v7584_v21, %v7583_v61 }
 0xa67   : > { %v13280_v46 = vpop.f32.mrf.mxu1 }
 0xa68   : > { %v13347_v29 = vadd.f32 %v13280_v46, %v7375_v40  ;;  %v7586_v5 = vrot.slane %v7585_v30, 2 }
 0xa6a   : > { %v7617_v58 = vadd.f32 %v7616_v1, %v13347_v29  ;;  %v7587_v16 = vadd.f32 %v7586_v5, %v7585_v30 }
 0xa6c   : > { %v7588_v59 = vrot.slane %v7587_v16, 1 }
 0xa6e   : > { %v7589_v18 = vadd.f32 %v7588_v59, %v7587_v16 }
 0xa6f   : > { %v7545_v22 = vpop.f32.mrf.mxu1 }
 0xa70   : > { %v13350_v52 = vadd.f32 %v7545_v22, %v7377_v11  ;;  %v7629_v22 = vsub.f32 1.0, %v7628_v2  ;;  %v7679_v11 = vstv %s8683_s15 }
 0xa72   : > { %v7618_v46 = vadd.f32 %v7617_v58, %v13350_v52  ;;  %v7630_v57 = vmul.f32 %v8974_v10, %v7629_v22 }
 0xa74   : > { %v7631_v24 = vadd.f32 %v8974_v10, %v7630_v57 }
 0xa76   : > { %v7633_v33 = vsel %vm7632_vm3, %v8974_v10, %v7631_v24 }
 0xa77   : > { %v7548_v35 = vpop.f32.mrf.mxu1  ;;  %v7634_v37 = vmul.f32 %v7633_v33, %v7589_v18 }
 0xa78   : > { %v13353_v12 = vadd.f32 %v7548_v35, %v7380_v42 }
 0xa7a   : > { %v7619_v20 = vadd.f32 %v7618_v46, %v13353_v12 }
 0xa7f   : > { %v7550_v34 = vpop.f32.mrf.mxu1 }
 0xa80   : > { %v13357_v45 = vadd.f32 %v7550_v34, %v7382_v9 }
 0xa82   : > { %v7620_v26 = vadd.f32 %v7619_v20, %v13357_v45 }
 0xa84   : > { %v7621_v61 = vrot.slane %v7620_v26, 4 }
 0xa86   : > { %v7622_v27 = vadd.f32 %v7621_v61, %v7620_v26  ;;  %v14981_v61 = vld [vmem:[#allocation114_spill] sm:$0xff] }
 0xa88   : > { %v7623_v8 = vrot.slane %v7622_v27, 2 }
 0xa8a   : > { %v7624_v40 = vadd.f32 %v7623_v8, %v7622_v27  ;;  %v14982_v27 = vld [vmem:[#allocation76_spill] sm:$0xff]  ;;  %v14983_v8 = vld [vmem:[#allocation95_spill] sm:$0xff] }
 0xa8c   : > { %v7625_v21 = vrot.slane %v7624_v40, 1 }
 0xa8e   : > { %v7626_v35 = vadd.f32 %v7625_v21, %v7624_v40  ;;  %v14984_v40 = vld [vmem:[#allocation106_spill] sm:$0xff]  ;;  %v14985_v21 = vld [vmem:[#allocation120_spill] sm:$0xff] }
 0xa90   : > { %v7635_v3 = vmul.f32 %v7633_v33, %v7626_v35  ;;  %v14986_v35 = vld [vmem:[#allocation31_spill] sm:$0xff] }
 0xa92   : > { %v7655_v43 = vsel %vm7654_vm4, %v7635_v3, %v7634_v37  ;;  %v14987_v3 = vld [vmem:[#allocation138_spill] sm:$0xff] }
 0xa93   : > { %7673 = vmatmul.f32.vlgmr.msrb.gmra.mxu2 %v7655_v43 }
 0xb16   : > { %v7674_v41 = vpop.f32.mrf.mxu2 }
 0xb17   : > { %vm7678_vm6 = vcmp.ge.f32.partialorder %v7674_v41, 0.0  ;;  %v7680_v54 = vmul.f32 %v7679_v11, %v7674_v41  ;;  %v8984_v11 = vld [vmem:[%s9534_s29] sm:$0xff] }
 0xb19   : > { %v7681_v42 = vsel %vm7678_vm6, %v7674_v41, %v7680_v54  ;;  %v8985_v54 = vld [vmem:[%s9534_s29 + $0x8] sm:$0xff] }
 0xb1a   : > { %7714 = vmatmul.f32.vlgmr.msrb.gmra.mxu3 %v7681_v42 }
 0xb9d   : > { %v7715_v1 = vpop.f32.mrf.mxu3 }
 0xb9e   : > { %v8684_v6 = vmul.f32 -1.442695, %v7715_v1  ;;  %v8986_v1 = vld [vmem:[%s9534_s29 + $0x10] sm:$0xff] }
 0xba0   : > { %8975 = vpow2.f32 %v8684_v6 }
 0xba6   : > { %v8976_v30 = vpop.eup %8975 }
 0xba7   : > { %v7721_v39 = vadd.f32 1.0, %v8976_v30  ;;  %v14988_v30 = vld [vmem:[#allocation116_spill] sm:$0xff] }
 0xba9   : > { %8977 = vrcp.f32 %v7721_v39  ;;  %v7733_v34 = vand.u32 2147483648, %v7721_v39  ;;  %vm7727_vm7 = vweird.f32 %v7721_v39  ;;  %v7731_v5 = vand.u32 2147483647, %v7721_v39 }
 0xbab   : > { %v7734_v22 = vor.u32 1.1754944e-38, %v7733_v34  ;;  %vm7732_vm9 = vcmp.eq.f32.partialorder %v7731_v5, 8.507059e+37  ;;  %v14990_v5 = vld [vmem:[#allocation123_spill] sm:$0xff] }
 0xbaf   : > { %v8978_v10 = vpop.eup %8977 }
 0xbb0   : > { %v7723_v58 = vmul.f32 %v8978_v10, %v7721_v39  ;;  %vm7728_vm5 = vweird.f32 %v8978_v10 }
 0xbb1   : > { %vm7729_vm8 = vmor %vm7727_vm7, %vm7728_vm5 }
 0xbb2   : > { %v7724_v2 = vsub.f32 1.0, %v7723_v58 }
 0xbb4   : > { %v7725_v9 = vmul.f32 %v8978_v10, %v7724_v2  ;;  %v14989_v2 = vld [vmem:[#allocation103_spill] sm:$0xff] }
 0xbb6   : > { %v7726_v46 = vadd.f32 %v8978_v10, %v7725_v9 }
 0xbb8   : > { %v7730_v20 = vsel %vm7729_vm8, %v8978_v10, %v7726_v46  ;;  %v8987_v10 = vld [vmem:[%s9534_s29 + $0x18] sm:$0xff]  ;;  %v8988_v46 = vld [vmem:[%s9534_s29 + $0x20] sm:$0xff] }
 0xbb9   : > { %v13360_v26 = vsel %vm7732_vm9, %v7734_v22, %v7730_v20  ;;  %v8989_v22 = vld [vmem:[%s9534_s29 + $0x28] sm:$0xff] }
 0xbba   : > { %v13363_v16 = vperm.slane %v13360_v26, 0 }
 0xbbc   : > { %v7743_v57 = vmul.f32 %v13363_v16, %v14981_v61  ;;  %v7744_v59 = vmul.f32 %v13363_v16, %v14982_v27  ;;  %v7745_v24 = vmul.f32 %v13363_v16, %v14983_v8  ;;  %v7746_v18 = vmul.f32 %v13363_v16, %v14984_v40  ;;  %v8991_v40 = vld [vmem:[%s9534_s29 + $0x38] sm:$0xff] }
 0xbbd   : > { %v7747_v33 = vmul.f32 %v13363_v16, %v14985_v21  ;;  %v7748_v37 = vmul.f32 %v13363_v16, %v14986_v35  ;;  %v7749_v43 = vmul.f32 %v13363_v16, %v14987_v3  ;;  %v7750_v39 = vmul.f32 %v13363_v16, %v14988_v30  ;;  %v14992_v21 = vld [vmem:[#allocation109_spill] sm:$0xff] }
 0xbbe   : > { %v7807_v41 = vadd.f32 %v8984_v11, %v7743_v57  ;;  %v7808_v42 = vadd.f32 %v8985_v54, %v7744_v59  ;;  %v7809_v6 = vadd.f32 %v8986_v1, %v7745_v24  ;;  %v7810_v58 = vadd.f32 %v8987_v10, %v7746_v18  ;;  %v14991_v57 = vld [vmem:[#allocation41_spill] sm:$0xff]  ;;  %v8990_v59 = vld [vmem:[%s9534_s29 + $0x30] sm:$0xff]  ;;  %v8993_v11 = vld [vmem:[%s9534_s29 + $0x48] sm:$0xff] }
 0xbbf   : > { %v7751_v9 = vmul.f32 %v13363_v16, %v14989_v2  ;;  %v7811_v34 = vadd.f32 %v8988_v46, %v7747_v33  ;;  %v7752_v20 = vmul.f32 %v13363_v16, %v14990_v5  ;;  %v7812_v61 = vadd.f32 %v8989_v22, %v7748_v37  ;;  %v8992_v35 = vld [vmem:[%s9534_s29 + $0x40] sm:$0xff]  ;;  %v14996_v46 = vld [vmem:[#allocation32_spill] sm:$0xff]  ;;  %v8997_v5 = vld [vmem:[%s9534_s29 + $0x68] sm:$0xff] }
 0xbc0   : > { %7871 = vst [vmem:[%s13390_s6] sm:$0xff] %v7807_v41  ;;  %v7753_v27 = vmul.f32 %v13363_v16, %v14991_v57  ;;  %v7813_v8 = vadd.f32 %v8990_v59, %v7749_v43  ;;  %v7754_v24 = vmul.f32 %v13363_v16, %v14956_v55  ;;  %v7814_v18 = vadd.f32 %v8991_v40, %v7750_v39  ;;  %v14993_v3 = vld [vmem:[#allocation25_spill] sm:$0xff] }
 0xbc1   : > { %7872 = vst [vmem:[%s13390_s6 + $0x8] sm:$0xff] %v7808_v42  ;;  %v7755_v33 = vmul.f32 %v13363_v16, %v14992_v21  ;;  %v7815_v37 = vadd.f32 %v8992_v35, %v7751_v9  ;;  %v7756_v43 = vmul.f32 %v13363_v16, %v14993_v3  ;;  %v7816_v41 = vadd.f32 %v8993_v11, %v7752_v20  ;;  %v14994_v55 = vld [vmem:[#allocation49_spill] sm:$0xff]  ;;  %v8994_v42 = vld [vmem:[%s9534_s29 + $0x50] sm:$0xff]  ;;  %v9001_v21 = vld [vmem:[%s9534_s29 + $0x88] sm:$0xff] }
 0xbc2   : > { %7873 = vst [vmem:[%s13390_s6 + $0x10] sm:$0xff] %v7809_v6  ;;  %v7757_v54 = vmul.f32 %v13363_v16, %v14994_v55  ;;  %v7817_v1 = vadd.f32 %v8994_v42, %v7753_v27  ;;  %v14995_v6 = vld [vmem:[#allocation45_spill] sm:$0xff]  ;;  %v7761_v22 = vmul.f32 %v13363_v16, %v14963_v19  ;;  %v7764_v19 = vmul.f32 %v13363_v16, %v14966_v44 }
 0xbc3   : > { %7874 = vst [vmem:[%s13390_s6 + $0x18] sm:$0xff] %v7810_v58  ;;  %v7758_v30 = vmul.f32 %v13363_v16, %v14995_v6  ;;  %v8995_v39 = vld [vmem:[%s9534_s29 + $0x58] sm:$0xff]  ;;  %v7759_v58 = vmul.f32 %v13363_v16, %v14961_v62  ;;  %v8996_v2 = vld [vmem:[%s9534_s29 + $0x60] sm:$0xff]  ;;  %v7820_v20 = vadd.f32 %v8997_v5, %v7756_v43  ;;  %v7762_v62 = vmul.f32 %v13363_v16, %v14964_v15 }
 0xbc4   : > { %7875 = vst [vmem:[%s13390_s6 + $0x20] sm:$0xff] %v7811_v34  ;;  %v7818_v10 = vadd.f32 %v8995_v39, %v7754_v24  ;;  %v7819_v9 = vadd.f32 %v8996_v2, %v7755_v33  ;;  %v7760_v34 = vmul.f32 %v13363_v16, %v14996_v46  ;;  %v8999_v27 = vld [vmem:[%s9534_s29 + $0x78] sm:$0xff]  ;;  %v9000_v40 = vld [vmem:[%s9534_s29 + $0x80] sm:$0xff]  ;;  %v7766_v43 = vmul.f32 %v13363_v16, %v13020_v32  ;;  %v9005_v32 = vld [vmem:[%s9534_s29 + $0xa8] sm:$0xff] }
 0xbc5   : > { %7876 = vst [vmem:[%s13390_s6 + $0x28] sm:$0xff] %v7812_v61  ;;  %v8998_v61 = vld [vmem:[%s9534_s29 + $0x70] sm:$0xff]  ;;  %v7822_v59 = vadd.f32 %v8999_v27, %v7758_v30  ;;  %v9003_v11 = vld [vmem:[%s9534_s29 + $0x98] sm:$0xff]  ;;  %v7738_v44 = vrot.slane %v13360_v26, 1  ;;  %v7767_v55 = vmul.f32 %v13363_v16, %v13029_v23  ;;  %v7828_v6 = vadd.f32 %v9005_v32, %v7764_v19  ;;  %v9012_v27 = vld [vmem:[%s9534_s29 + $0xe0] sm:$0xff] }
 0xbc6   : > { %7877 = vst [vmem:[%s13390_s6 + $0x30] sm:$0xff] %v7813_v8  ;;  %v7821_v57 = vadd.f32 %v8998_v61, %v7757_v54  ;;  %v14997_v8 = vld [vmem:[#allocation81_spill] sm:$0xff]  ;;  %v7824_v33 = vadd.f32 %v9001_v21, %v7760_v34  ;;  %v14998_v15 = vld [vmem:[#allocation132_spill] sm:$0xff]  ;;  %v7769_v30 = vmul.f32 %v13363_v16, %v13050_v7  ;;  %v7770_v23 = vmul.f32 %v13363_v16, %v13057_v56  ;;  %v9009_v56 = vld [vmem:[%s9534_s29 + $0xc8] sm:$0xff] }
 0xbc7   : > { %7878 = vst [vmem:[%s13390_s6 + $0x38] sm:$0xff] %v7814_v18  ;;  %v7763_v24 = vmul.f32 %v13363_v16, %v14997_v8  ;;  %v7823_v18 = vadd.f32 %v9000_v40, %v7759_v58  ;;  %v7765_v35 = vmul.f32 %v13363_v16, %v14998_v15  ;;  %v9004_v54 = vld [vmem:[%s9534_s29 + $0xa0] sm:$0xff]  ;;  %v9006_v26 = vld [vmem:[%s9534_s29 + $0xb0] sm:$0xff]  ;;  %v7771_v2 = vmul.f32 %v13363_v16, %v13064_v48  ;;  %v9011_v61 = vld [vmem:[%s9534_s29 + $0xd8] sm:$0xff] }
 0xbc8   : > { %7879 = vst [vmem:[%s13390_s6 + $0x40] sm:$0xff] %v7815_v37  ;;  %v9002_v37 = vld [vmem:[%s9534_s29 + $0x90] sm:$0xff]  ;;  %v9008_v7 = vld [vmem:[%s9534_s29 + $0xc0] sm:$0xff]  ;;  %v7772_v46 = vmul.f32 %v13363_v16, %v13071_v47  ;;  %v7773_v5 = vmul.f32 %v13363_v16, %v14975_v25  ;;  %v7774_v48 = vmul.f32 %v13363_v16, %v14978_v4  ;;  %v9015_v15 = vld [vmem:[%s9534_s29 + $0xf8] sm:$0xff] }
 0xbc9   : > { %7880 = vst [vmem:[%s13390_s6 + $0x48] sm:$0xff] %v7816_v41  ;;  %v7825_v3 = vadd.f32 %v9002_v37, %v7761_v22  ;;  %v7826_v41 = vadd.f32 %v9003_v11, %v7762_v62  ;;  %v7827_v42 = vadd.f32 %v9004_v54, %v7763_v24  ;;  %v7829_v39 = vadd.f32 %v9006_v26, %v7765_v35  ;;  %v14999_v47 = vld [vmem:[#allocation40_spill] sm:$0xff]  ;;  %v15000_v25 = vld [vmem:[#allocation69_spill] sm:$0xff]  ;;  %v9013_v24 = vld [vmem:[%s9534_s29 + $0xe8] sm:$0xff] }
 0xbca   : > { %7881 = vst [vmem:[%s13390_s6 + $0x50] sm:$0xff] %v7817_v1  ;;  %v7768_v1 = vmul.f32 %v13363_v16, %v13038_v13  ;;  %v13470_v13 = vperm.slane %v7738_v44, 0  ;;  %v7836_v40 = vadd.f32 %v9013_v24, %v7772_v46  ;;  %v15001_v4 = vld [vmem:[#allocation59_spill] sm:$0xff]  ;;  %v7838_v35 = vadd.f32 %v9015_v15, %v7774_v48  ;;  %v15003_v37 = vld [vmem:[#allocation50_spill] sm:$0xff] }
 0xbcb   : > { %7882 = vst [vmem:[%s13390_s6 + $0x58] sm:$0xff] %v7818_v10  ;;  %v9007_v10 = vld [vmem:[%s9534_s29 + $0xb8] sm:$0xff]  ;;  %v15002_v21 = vld [vmem:[#allocation91_spill] sm:$0xff]  ;;  %v15012_v24 = vld [vmem:[#allocation130_spill] sm:$0xff] }
 0xbcc   : > { %7883 = vst [vmem:[%s13390_s6 + $0x60] sm:$0xff] %v7819_v9  ;;  %v7830_v58 = vadd.f32 %v9007_v10, %v7766_v43  ;;  %v7831_v9 = vadd.f32 %v9008_v7, %v7767_v55  ;;  %v7832_v34 = vadd.f32 %v9009_v56, %v7768_v1  ;;  %v7775_v62 = vmul.f32 %v13470_v13, %v14999_v47  ;;  %v9016_v43 = vld [vmem:[%s9534_s29 + $0x100] sm:$0xff]  ;;  %v9017_v55 = vld [vmem:[%s9534_s29 + $0x108] sm:$0xff]  ;;  %v9018_v32 = vld [vmem:[%s9534_s29 + $0x110] sm:$0xff] }
 0xbcd   : > { %7884 = vst [vmem:[%s13390_s6 + $0x68] sm:$0xff] %v7820_v20  ;;  %v9010_v20 = vld [vmem:[%s9534_s29 + $0xd0] sm:$0xff]  ;;  %v7776_v8 = vmul.f32 %v13470_v13, %v15000_v25  ;;  %v7777_v16 = vmul.f32 %v13470_v13, %v15001_v4  ;;  %v15007_v10 = vld [vmem:[#allocation26_spill] sm:$0xff]  ;;  %v9023_v47 = vld [vmem:[%s9534_s29 + $0x138] sm:$0xff]  ;;  %v7790_v15 = vmul.f32 %v13470_v13, %v13150_v50  ;;  %v7793_v50 = vmul.f32 %v13470_v13, %v13165_v0 }
 0xbce   : > { %7885 = vst [vmem:[%s13390_s6 + $0x70] sm:$0xff] %v7821_v57  ;;  %v7833_v22 = vadd.f32 %v9010_v20, %v7769_v30  ;;  %v7834_v57 = vadd.f32 %v9011_v61, %v7770_v23  ;;  %v7839_v11 = vadd.f32 %v9016_v43, %v7775_v62  ;;  %v15006_v30 = vld [vmem:[#allocation68_spill] sm:$0xff]  ;;  %v9021_v56 = vld [vmem:[%s9534_s29 + $0x128] sm:$0xff]  ;;  %v9024_v25 = vld [vmem:[%s9534_s29 + $0x140] sm:$0xff]  ;;  %v7796_v0 = vmul.f32 %v13470_v13, %v13294_v17 }
 0xbcf   : > { %7886 = vst [vmem:[%s13390_s6 + $0x78] sm:$0xff] %v7822_v59  ;;  %v7835_v59 = vadd.f32 %v9012_v27, %v7771_v2  ;;  %v7840_v54 = vadd.f32 %v9017_v55, %v7776_v8  ;;  %v7782_v26 = vmul.f32 %v13470_v13, %v15006_v30  ;;  %v9020_v2 = vld [vmem:[%s9534_s29 + $0x120] sm:$0xff]  ;;  %v15010_v61 = vld [vmem:[#allocation88_spill] sm:$0xff]  ;;  %v15011_v27 = vld [vmem:[#allocation83_spill] sm:$0xff]  ;;  %v7799_v17 = vmul.f32 %v13470_v13, %v13320_v38 }
 0xbd0   : > { %7887 = vst [vmem:[%s13390_s6 + $0x80] sm:$0xff] %v7823_v18  ;;  %v9014_v18 = vld [vmem:[%s9534_s29 + $0xf0] sm:$0xff]  ;;  %v9025_v4 = vld [vmem:[%s9534_s29 + $0x148] sm:$0xff]  ;;  %v9028_v43 = vld [vmem:[%s9534_s29 + $0x160] sm:$0xff]  ;;  %v7802_v38 = vmul.f32 %v13470_v13, %v13341_v31 }
 0xbd1   : > { %7888 = vst [vmem:[%s13390_s6 + $0x88] sm:$0xff] %v7824_v33  ;;  %v7837_v19 = vadd.f32 %v9014_v18, %v7773_v5  ;;  %v7778_v33 = vmul.f32 %v13470_v13, %v15002_v21  ;;  %v15009_v5 = vld [vmem:[#allocation98_spill] sm:$0xff]  ;;  %v7846_v62 = vadd.f32 %v9023_v47, %v7782_v26  ;;  %v15013_v18 = vld [vmem:[#allocation67_spill] sm:$0xff]  ;;  %v7805_v47 = vmul.f32 %v13470_v13, %v13353_v12 }
 0xbd2   : > { %7889 = vst [vmem:[%s13390_s6 + $0x90] sm:$0xff] %v7825_v3  ;;  %v7779_v3 = vmul.f32 %v13470_v13, %v15003_v37  ;;  %v7785_v20 = vmul.f32 %v13470_v13, %v15009_v5  ;;  %v9026_v21 = vld [vmem:[%s9534_s29 + $0x150] sm:$0xff]  ;;  %v9033_v26 = vld [vmem:[%s9534_s29 + $0x188] sm:$0xff] }
 0xbd3   : > { %7890 = vst [vmem:[%s13390_s6 + $0x98] sm:$0xff] %v7826_v41  ;;  %v15004_v41 = vld [vmem:[#allocation74_spill] sm:$0xff] }
 0xbd4   : > { %7891 = vst [vmem:[%s13390_s6 + $0xa0] sm:$0xff] %v7827_v42  ;;  %v7780_v44 = vmul.f32 %v13470_v13, %v15004_v41  ;;  %v15005_v42 = vld [vmem:[#allocation78_spill] sm:$0xff]  ;;  %v7843_v7 = vadd.f32 %v9020_v2, %v7779_v3  ;;  %v7791_v3 = vmul.f32 %v13470_v13, %v13153_v36  ;;  %v7792_v41 = vmul.f32 %v13470_v13, %v13156_v49 }
 0xbd5   : > { %7892 = vst [vmem:[%s13390_s6 + $0xa8] sm:$0xff] %v7828_v6  ;;  %v7781_v1 = vmul.f32 %v13470_v13, %v15005_v42  ;;  %v7841_v6 = vadd.f32 %v9018_v32, %v7777_v16  ;;  %v7794_v36 = vmul.f32 %v13470_v13, %v13172_v53  ;;  %v7795_v49 = vmul.f32 %v13470_v13, %v13179_v60  ;;  %v9041_v31 = vld [vmem:[%s9534_s29 + $0x1c8] sm:$0xff] }
 0xbd6   : > { %7893 = vst [vmem:[%s13390_s6 + $0xb0] sm:$0xff] %v7829_v39  ;;  %v9019_v39 = vld [vmem:[%s9534_s29 + $0x118] sm:$0xff]  ;;  %v7797_v53 = vmul.f32 %v13470_v13, %v13303_v63  ;;  %v7798_v60 = vmul.f32 %v13470_v13, %v13312_v28  ;;  %v7800_v63 = vmul.f32 %v13470_v13, %v13328_v14  ;;  %v7801_v28 = vmul.f32 %v13470_v13, %v13336_v51 }
 0xbd7   : > { %7894 = vst [vmem:[%s13390_s6 + $0xb8] sm:$0xff] %v7830_v58  ;;  %v7842_v23 = vadd.f32 %v9019_v39, %v7778_v33  ;;  %v7783_v58 = vmul.f32 %v13470_v13, %v15007_v10  ;;  %v7849_v33 = vadd.f32 %v9026_v21, %v7785_v20  ;;  %v7856_v39 = vadd.f32 %v9033_v26, %v7792_v41  ;;  %v9039_v20 = vld [vmem:[%s9534_s29 + $0x1b8] sm:$0xff] }
 0xbd8   : > { %7895 = vst [vmem:[%s13390_s6 + $0xc0] sm:$0xff] %v7831_v9  ;;  %v15008_v9 = vld [vmem:[#allocation72_spill] sm:$0xff]  ;;  %v7803_v14 = vmul.f32 %v13470_v13, %v13347_v29 }
 0xbd9   : > { %7896 = vst [vmem:[%s13390_s6 + $0xc8] sm:$0xff] %v7832_v34  ;;  %v7784_v46 = vmul.f32 %v13470_v13, %v15008_v9  ;;  %v7844_v34 = vadd.f32 %v9021_v56, %v7780_v44  ;;  %v7847_v8 = vadd.f32 %v9024_v25, %v7783_v58  ;;  %v9029_v44 = vld [vmem:[%s9534_s29 + $0x168] sm:$0xff]  ;;  %v9035_v58 = vld [vmem:[%s9534_s29 + $0x198] sm:$0xff]  ;;  %v9044_v25 = vld [vmem:[%s9534_s29 + $0x1e0] sm:$0xff] }
 0xbda   : > { %7897 = vst [vmem:[%s13390_s6 + $0xd0] sm:$0xff] %v7833_v22  ;;  %v9022_v22 = vld [vmem:[%s9534_s29 + $0x130] sm:$0xff]  ;;  %v7858_v2 = vadd.f32 %v9035_v58, %v7794_v36  ;;  %v7867_v12 = vadd.f32 %v9044_v25, %v7803_v14 }
 0xbdb   : > { %7898 = vst [vmem:[%s13390_s6 + $0xd8] sm:$0xff] %v7834_v57  ;;  %v7845_v48 = vadd.f32 %v9022_v22, %v7781_v1  ;;  %v7786_v57 = vmul.f32 %v13470_v13, %v15010_v61  ;;  %v7848_v16 = vadd.f32 %v9025_v4, %v7784_v46  ;;  %v9031_v1 = vld [vmem:[%s9534_s29 + $0x178] sm:$0xff]  ;;  %v9037_v46 = vld [vmem:[%s9534_s29 + $0x1a8] sm:$0xff]  ;;  %v7862_v22 = vadd.f32 %v9039_v20, %v7798_v60 }
 0xbdc   : > { %7899 = vst [vmem:[%s13390_s6 + $0xe0] sm:$0xff] %v7835_v59  ;;  %v7787_v59 = vmul.f32 %v13470_v13, %v15011_v27  ;;  %v7854_v32 = vadd.f32 %v9031_v1, %v7790_v15  ;;  %v7860_v56 = vadd.f32 %v9037_v46, %v7796_v0  ;;  %v7804_v61 = vmul.f32 %v13470_v13, %v13350_v52  ;;  %v9043_v27 = vld [vmem:[%s9534_s29 + $0x1d8] sm:$0xff] }
 0xbdd   : > { %7900 = vst [vmem:[%s13390_s6 + $0xe8] sm:$0xff] %v7836_v40  ;;  %v7788_v40 = vmul.f32 %v13470_v13, %v15012_v24  ;;  %v7806_v52 = vmul.f32 %v13470_v13, %v13357_v45  ;;  %v9047_v45 = vld [vmem:[%s9534_s29 + $0x1f8] sm:$0xff] }
 0xbde   : > { %7901 = vst [vmem:[%s13390_s6 + $0xf0] sm:$0xff] %v7837_v19  ;;  %v7789_v19 = vmul.f32 %v13470_v13, %v15013_v18 }
 0xbdf   : > { %7902 = vst [vmem:[%s13390_s6 + $0xf8] sm:$0xff] %v7838_v35  ;;  %v9027_v35 = vld [vmem:[%s9534_s29 + $0x158] sm:$0xff]  ;;  %v7852_v55 = vadd.f32 %v9029_v44, %v7788_v40  ;;  %v9046_v40 = vld [vmem:[%s9534_s29 + $0x1f0] sm:$0xff]  ;;  %v7870_v13 = vadd.f32 %v9047_v45, %v7806_v52 }
 0xbe0   : > { %7903 = vst [vmem:[%s13390_s6 + $0x100] sm:$0xff] %v7839_v11  ;;  %v7850_v37 = vadd.f32 %v9027_v35, %v7786_v57  ;;  %v7851_v11 = vadd.f32 %v9028_v43, %v7787_v59  ;;  %v7864_v57 = vadd.f32 %v9041_v31, %v7800_v63  ;;  %v7866_v59 = vadd.f32 %v9043_v27, %v7802_v38 }
 0xbe1   : > { %7904 = vst [vmem:[%s13390_s6 + $0x108] sm:$0xff] %v7840_v54  ;;  %v9030_v54 = vld [vmem:[%s9534_s29 + $0x170] sm:$0xff]  ;;  %v7869_v4 = vadd.f32 %v9046_v40, %v7805_v47 }
 0xbe2   : > { %7905 = vst [vmem:[%s13390_s6 + $0x110] sm:$0xff] %v7841_v6  ;;  %v7853_v42 = vadd.f32 %v9030_v54, %v7789_v19  ;;  %v9032_v6 = vld [vmem:[%s9534_s29 + $0x180] sm:$0xff] }
 0xbe3   : > { %7906 = vst [vmem:[%s13390_s6 + $0x118] sm:$0xff] %v7842_v23  ;;  %v7855_v30 = vadd.f32 %v9032_v6, %v7791_v3  ;;  %v9034_v23 = vld [vmem:[%s9534_s29 + $0x190] sm:$0xff] }
 0xbe4   : > { %7907 = vst [vmem:[%s13390_s6 + $0x120] sm:$0xff] %v7843_v7  ;;  %v7857_v10 = vadd.f32 %v9034_v23, %v7793_v50  ;;  %v9036_v7 = vld [vmem:[%s9534_s29 + $0x1a0] sm:$0xff] }
 0xbe5   : > { %7908 = vst [vmem:[%s13390_s6 + $0x128] sm:$0xff] %v7844_v34  ;;  %v7859_v9 = vadd.f32 %v9036_v7, %v7795_v49  ;;  %v9038_v34 = vld [vmem:[%s9534_s29 + $0x1b0] sm:$0xff] }
 0xbe6   : > { %7909 = vst [vmem:[%s13390_s6 + $0x130] sm:$0xff] %v7845_v48  ;;  %v7861_v5 = vadd.f32 %v9038_v34, %v7797_v53  ;;  %v9040_v48 = vld [vmem:[%s9534_s29 + $0x1c0] sm:$0xff] }
 0xbe7   : > { %7910 = vst [vmem:[%s13390_s6 + $0x138] sm:$0xff] %v7846_v62  ;;  %v7863_v51 = vadd.f32 %v9040_v48, %v7799_v17  ;;  %v9042_v62 = vld [vmem:[%s9534_s29 + $0x1d0] sm:$0xff] }
 0xbe8   : > { %7911 = vst [vmem:[%s13390_s6 + $0x140] sm:$0xff] %v7847_v8  ;;  %v7865_v29 = vadd.f32 %v9042_v62, %v7801_v28  ;;  %v9045_v8 = vld [vmem:[%s9534_s29 + $0x1e8] sm:$0xff]  ;;  %s9263_s29 = scalar_lea.hbm %s13671_s9, 1024 }
 0xbe9   : > { %7912 = vst [vmem:[%s13390_s6 + $0x148] sm:$0xff] %v7848_v16  ;;  %v7868_v24 = vadd.f32 %v9045_v8, %v7804_v61  ;;  %p9265_p7 = scmp.lt.s32.totalorder %s9263_s29, %s9259_s13 }
 0xbea   : > { %7913 = vst [vmem:[%s13390_s6 + $0x150] sm:$0xff] %v7849_v33 }
 0xbeb   : > { %7914 = vst [vmem:[%s13390_s6 + $0x158] sm:$0xff] %v7850_v37  ;;  %p9266_p8 = por %p9265_p7, %p9264_p12 }
 0xbec   : > { %7915 = vst [vmem:[%s13390_s6 + $0x160] sm:$0xff] %v7851_v11 }
 0xbed   : > { %7916 = vst [vmem:[%s13390_s6 + $0x168] sm:$0xff] %v7852_v55  ;;  %p9267_p9 = pnand %p9266_p8, %p9262_p4 }
 0xbee   : > { %7917 = vst [vmem:[%s13390_s6 + $0x170] sm:$0xff] %v7853_v42 }
 0xbef   : > { %7918 = vst [vmem:[%s13390_s6 + $0x178] sm:$0xff] %v7854_v32 }
 0xbf0   : > { %7919 = vst [vmem:[%s13390_s6 + $0x180] sm:$0xff] %v7855_v30 }
 0xbf1   : > { %7920 = vst [vmem:[%s13390_s6 + $0x188] sm:$0xff] %v7856_v39 }
 0xbf2   : > { %7921 = vst [vmem:[%s13390_s6 + $0x190] sm:$0xff] %v7857_v10 }
 0xbf3   : > { %7922 = vst [vmem:[%s13390_s6 + $0x198] sm:$0xff] %v7858_v2 }
 0xbf4   : > { %7923 = vst [vmem:[%s13390_s6 + $0x1a0] sm:$0xff] %v7859_v9 }
 0xbf5   : > { %7924 = vst [vmem:[%s13390_s6 + $0x1a8] sm:$0xff] %v7860_v56 }
 0xbf6   : > { %7925 = vst [vmem:[%s13390_s6 + $0x1b0] sm:$0xff] %v7861_v5 }
 0xbf7   : > { %7926 = vst [vmem:[%s13390_s6 + $0x1b8] sm:$0xff] %v7862_v22 }
 0xbf8   : > { %7927 = vst [vmem:[%s13390_s6 + $0x1c0] sm:$0xff] %v7863_v51 }
 0xbf9   : > { %7928 = vst [vmem:[%s13390_s6 + $0x1c8] sm:$0xff] %v7864_v57 }
 0xbfa   : > { %7929 = vst [vmem:[%s13390_s6 + $0x1d0] sm:$0xff] %v7865_v29 }
 0xbfb   : > { %7930 = vst [vmem:[%s13390_s6 + $0x1d8] sm:$0xff] %v7866_v59 }
 0xbfc   : > { %7931 = vst [vmem:[%s13390_s6 + $0x1e0] sm:$0xff] %v7867_v12 }
 0xbfd   : > { %7932 = vst [vmem:[%s13390_s6 + $0x1e8] sm:$0xff] %v7868_v24 }
 0xbfe   : > { %7933 = vst [vmem:[%s13390_s6 + $0x1f0] sm:$0xff] %v7869_v4 }
 0xbff   : > { %7934 = vst [vmem:[%s13390_s6 + $0x1f8] sm:$0xff] %v7870_v13 }
 0xc00   : > { %9270 = shalt.err (!%p9267_p9)
}
 0xc01   : > { %s9339_s19 = smov 128   ;;  %s9340_s15 = smov 8  }
 0xc02   : > { %8881 = dma.vmem_to_hbm [thread:$0]  (%p9494_p5), %s7950_s24, 8192, %s7952_s22, %s7936_s23, %s9339_s19, %s9339_s19, %s9340_s15  }
 0xc03 PF: > { %s7966_s6 = sand.u32 1, %s9313_s30   ;;  %p15014_p10 = scmp.ge.s32.totalorder %s9325_s12, 2 }
 0xc04   : > { %s7967_s4 = scalar_lea.sflag [#allocation4], %s7966_s6 }
 0xc05   : > { %p8907_p13 = pnand %p15014_p10, %p9498_p6 }
 0xc07   : > { %p8908_p11 = pneg %p8907_p13 }
 0xc09   : > { %9308 = dma.done.wait (%p8908_p11), %s7967_s4, 8192  }
 0xc0a   : > { %9310 = vsyncadd (%p8908_p11), %s7967_s4, 4294959104  ;;  %p26_p0 = scmp.ge.s32.totalorder %s9468_s21, 4   ;;  %s15015_s30 = smov %s9317_s10 }
 0xc0b   : > { %s15016_s10 = smov %s9321_s11  ;;  %s15017_s11 = smov %s9479_s25 }
 0xc0c   : > { %s15018_s12 = smov %s9468_s21  ;;  %28 = sbr.rel (!%p26_p0) target bundleno = 14 (0xe), region = 126 }
 0xc11   :  { %7973 = vsyncpa [#allocation3], 1 }
 0xc12   :  { %7975 = vsyncpa [#allocation3 + $0x1], 1 }
 0xc13   :  { %7976 = vsyncpa [#allocation7], 1 }
 0xc14   :  { %7977 = vsyncpa [#allocation10], 1 }
 0xc15   :  { %7978 = vsyncpa [#allocation13], 1 }
 0xc16   :  { %7979 = vsyncpa [#allocation4], 1 }
 0xc17   :  { %7981 = vsyncpa [#allocation4 + $0x1], 1 }
 0xc18   :  { %7982 = vsyncpa [#allocation5], 1 }
 0xc19   :  { %7984 = vsyncpa [#allocation5 + $0x1], 1 }

</bundles_post_ra>
